<compile_context>
chip_gen: v6e
topology: v6e:2x2x1
jax: 0.10.0
libtpu: 0.0.40
codegen_flags: <defaults>
</compile_context>

<pallas_src>
import functools

import jax
import jax.numpy as jnp
from jax.experimental import pallas as pl
from jax.experimental.pallas import tpu as pltpu


# ----------------------------------------------------------------------------
# Pallas kernels
# ----------------------------------------------------------------------------
def _vmem_specs(n):
    return [pl.BlockSpec(memory_space=pltpu.MemorySpace.VMEM) for _ in range(n)]


def encode_pdist_kernel(xt_ref, xv_ref, xa_ref, wt_ref, bt_ref, wv_ref, bv_ref,
                        wa_ref, ba_ref, hs_ref, dist_ref):
    """Fused tri-modal projection relu(x @ W + b) + pairwise sq-distance matrix."""
    B, L, _ = xt_ref.shape
    h = wt_ref.shape[1]

    def proj(x_ref, w_ref, b_ref):
        x2 = x_ref[...].reshape(B * L, x_ref.shape[-1])
        y = jnp.dot(x2.astype(jnp.bfloat16), w_ref[...].astype(jnp.bfloat16),
                    preferred_element_type=jnp.float32) + b_ref[...]
        return jnp.maximum(y, 0.0).reshape(B, L, h)

    hs = jnp.concatenate([proj(xt_ref, wt_ref, bt_ref),
                          proj(xv_ref, wv_ref, bv_ref),
                          proj(xa_ref, wa_ref, ba_ref)], axis=1)     # (B, 3L, h)
    hs_ref[...] = hs

    # Pairwise squared distances kept in f32 so KNN neighbour ordering is stable.
    sq = jnp.sum(hs * hs, axis=-1)                                   # (B, 3L)
    g = jax.lax.dot_general(hs, hs, (((2,), (2,)), ((0,), (0,))),
                            preferred_element_type=jnp.float32)      # (B, 3L, 3L)
    d = sq[:, :, None] + sq[:, None, :] - 2.0 * g                    # broadcast, no transpose
    dist_ref[...] = jnp.maximum(d, 0.0)


def gat_readout_kernel(x_ref, adj_ref, w_ref, asrc_ref, adst_ref,
                       row_ref, rob_ref, rou_ref, mask_ref, o_ref,
                       *, num_heads, head_dim, num_layers, num_segments,
                       leaky_alpha=0.2):
    """Fused multi-layer multi-head GAT + residual ReLU + attention readout.

    One grid step handles one "graph config" g (modality / augmentation variant):
    leading block dim of every per-graph array has size 1.
    """
    H, dh = num_heads, head_dim
    x = x_ref[0]                                   # (B, N, h)
    adj = adj_ref[0]                               # (B, N, N)
    mask = mask_ref[...]                           # (B, Lseg, 1) additive mask
    B, N, h = x.shape
    Lseg = N // num_segments

    y = x
    for l in range(num_layers):
        w = w_ref[0, l].astype(jnp.bfloat16)                        # (h, H*dh)
        a_s = asrc_ref[0, l]                                        # (H, dh)
        a_d = adst_ref[0, l]                                        # (H, dh)
        z = jnp.dot(y.reshape(B * N, h).astype(jnp.bfloat16), w,
                    preferred_element_type=jnp.float32)             # (B*N, H*dh)
        z3 = z.reshape(B, N, H * dh)
        # Head-major view built once; all heads processed together (no per-head
        # matvecs, no per-head partial stores).
        zh = jnp.stack([z3[:, :, i * dh:(i + 1) * dh] for i in range(H)], axis=1)  # (B,H,N,dh)
        src = jnp.sum(zh * a_s[None, :, None, :], axis=-1)          # (B, H, N)
        dst = jnp.sum(zh * a_d[None, :, None, :], axis=-1)          # (B, H, N)
        e = src[:, :, :, None] + dst[:, :, None, :]                 # (B, H, N, N)
        e = jnp.where(e > 0, e, leaky_alpha * e)                    # LeakyReLU (f32)
        # NOTE: rows with no neighbours fall back to a uniform softmax over all
        # nodes (same behaviour as the previous / reference -1e9 masking).
        e = jnp.where(adj[:, None, :, :] > 0, e, jnp.float32(-1e9))
        e = e - jnp.max(e, axis=-1, keepdims=True)
        p = jnp.exp(e)
        p = p * pl.reciprocal(jnp.sum(p, axis=-1, keepdims=True), approx=True)
        # Aggregation: single batched matmul over the merged (B*H) axis.
        agg = jax.lax.dot_general(
            p.reshape(B * H, N, N).astype(jnp.bfloat16),
            zh.reshape(B * H, N, dh).astype(jnp.bfloat16),
            (((2,), (1,)), ((0,), (0,))),
            preferred_element_type=jnp.float32).reshape(B, H, N, dh)
        y = jnp.concatenate([agg[:, i] for i in range(H)], axis=-1)  # (B, N, h)
        if l < num_layers - 1:
            y = jnp.where(y > 0, y, jnp.exp(jnp.minimum(y, 0.0)) - 1.0)   # ELU

    hg = jnp.maximum(y + x, 0.0)                   # residual + ReLU

    # Segment-wise attention readout (S=1 unimodal, S=3 multimodal readout_m).
    reps = []
    for s in range(num_segments):
        xs = hg[:, s * Lseg:(s + 1) * Lseg, :]                       # (B, Lseg, h)
        rw = row_ref[0, s].astype(jnp.bfloat16)                      # (h, h)
        rb = rob_ref[0, s]                                           # (1, h)
        ru = rou_ref[0, s].astype(jnp.bfloat16)                      # (h, 1)
        t = jnp.tanh(jnp.dot(xs.reshape(B * Lseg, h).astype(jnp.bfloat16), rw,
                             preferred_element_type=jnp.float32) + rb)
        score = jnp.dot(t.astype(jnp.bfloat16), ru,
                        preferred_element_type=jnp.float32).reshape(B, Lseg, 1)
        score = score + mask
        score = score - jnp.max(score, axis=1, keepdims=True)
        pa = jnp.exp(score)
        pa = pa * pl.reciprocal(jnp.sum(pa, axis=1, keepdims=True), approx=True)
        reps.append(jnp.sum(pa * xs, axis=1))                        # (B, h)

    o_ref[0] = jnp.concatenate(reps, axis=-1)      # single full-width write (B, S*h)


def linear_kernel(x_ref, w_ref, b_ref, o_ref):
    o_ref[...] = jnp.dot(x_ref[...], w_ref[...],
                         preferred_element_type=jnp.float32) + b_ref[...]


# ----------------------------------------------------------------------------
# Pallas wrappers
# ----------------------------------------------------------------------------
def encode_project(xt, xv, xa, pt, pv, pa):
    B, L, _ = xt.shape
    h = pt[0].shape[1]
    return pl.pallas_call(
        encode_pdist_kernel,
        out_shape=(jax.ShapeDtypeStruct((B, 3 * L, h), jnp.float32),
                   jax.ShapeDtypeStruct((B, 3 * L, 3 * L), jnp.float32)),
        in_specs=_vmem_specs(9),
        out_specs=(pl.BlockSpec(memory_space=pltpu.MemorySpace.VMEM),
                   pl.BlockSpec(memory_space=pltpu.MemorySpace.VMEM)),
    )(xt, xv, xa, pt[0], pt[1], pv[0], pv[1], pa[0], pa[1])


def gat_stack_readout(x, adj, w, a_src, a_dst, ro_w, ro_b, ro_u, mask3,
                      *, num_heads, head_dim, num_layers, num_segments):
    """x: (G,B,N,h), adj: (G,B,N,N); returns reps (G, B, num_segments*h)."""
    G, B, N, h = x.shape
    S = num_segments
    Lseg = N // S
    hH = num_heads * head_dim
    kern = functools.partial(gat_readout_kernel, num_heads=num_heads,
                             head_dim=head_dim, num_layers=num_layers,
                             num_segments=num_segments)
    # One graph config per grid step; blocks span full trailing dims, so the
    # (8,128) divisibility rule is satisfied trivially.  For large N/h one
    # would additionally tile N and set vmem_limit_bytes (v7x: 64 MiB budget).
    in_specs = [
        pl.BlockSpec((1, B, N, h), lambda g: (g, 0, 0, 0)),
        pl.BlockSpec((1, B, N, N), lambda g: (g, 0, 0, 0)),
        pl.BlockSpec((1, num_layers, h, hH), lambda g: (g, 0, 0, 0)),
        pl.BlockSpec((1, num_layers, num_heads, head_dim), lambda g: (g, 0, 0, 0)),
        pl.BlockSpec((1, num_layers, num_heads, head_dim), lambda g: (g, 0, 0, 0)),
        pl.BlockSpec((1, S, h, h), lambda g: (g, 0, 0, 0)),
        pl.BlockSpec((1, S, 1, h), lambda g: (g, 0, 0, 0)),
        pl.BlockSpec((1, S, h, 1), lambda g: (g, 0, 0, 0)),
        pl.BlockSpec((B, Lseg, 1), lambda g: (0, 0, 0)),
    ]
    return pl.pallas_call(
        kern,
        out_shape=jax.ShapeDtypeStruct((G, B, S * h), jnp.float32),
        grid=(G,),
        in_specs=in_specs,
        out_specs=pl.BlockSpec((1, B, S * h), lambda g: (g, 0, 0)),
        compiler_params=pltpu.CompilerParams(
            dimension_semantics=("parallel",)),
    )(x, adj, w, a_src, a_dst, ro_w, ro_b, ro_u, mask3)


def linear(x, w, b):
    return pl.pallas_call(
        linear_kernel,
        out_shape=jax.ShapeDtypeStruct((x.shape[0], w.shape[1]), jnp.float32),
        in_specs=_vmem_specs(3),
        out_specs=pl.BlockSpec(memory_space=pltpu.MemorySpace.VMEM),
    )(x, w, b)


# ----------------------------------------------------------------------------
# Plain-JAX glue: bidirectional LSTM with packed-sequence semantics
# ----------------------------------------------------------------------------
# TODO(synk): LSTM recurrence is inherently sequential; kept in lax.scan rather
# than a Pallas kernel (no tiling win at these sizes).
def _lstm_scan(x, lengths, Wi, Wh, bi, bh):
    B, T, _ = x.shape
    H = Wh.shape[1]

    def step(carry, inp):
        h, c = carry
        xt, valid = inp
        gates = xt @ Wi.T + h @ Wh.T + bi + bh      # (B, 4H), gate order i,f,g,o
        i_g, f_g, g_g, o_g = jnp.split(gates, 4, axis=-1)
        i_g = jax.nn.sigmoid(i_g)
        f_g = jax.nn.sigmoid(f_g)
        g_g = jnp.tanh(g_g)
        o_g = jax.nn.sigmoid(o_g)
        c_new = f_g * c + i_g * g_g
        h_new = o_g * jnp.tanh(c_new)
        v = valid[:, None]
        h2 = jnp.where(v, h_new, h)
        c2 = jnp.where(v, c_new, c)
        out = jnp.where(v, h_new, 0.0)
        return (h2, c2), out

    valid = (jnp.arange(T)[None, :] < lengths[:, None])
    xs = (jnp.transpose(x, (1, 0, 2)), valid.T)
    init = (jnp.zeros((B, H), jnp.float32), jnp.zeros((B, H), jnp.float32))
    (_, _), outs = jax.lax.scan(step, init, xs)
    return jnp.transpose(outs, (1, 0, 2))


def bilstm(x, lengths, p):
    B, T, _ = x.shape
    out_f = _lstm_scan(x, lengths, p['Wi_f'], p['Wh_f'], p['bi_f'], p['bh_f'])
    t = jnp.arange(T)
    rev_idx = jnp.clip(lengths[:, None] - 1 - t[None, :], 0, T - 1)   # (B, T)
    valid = (t[None, :] < lengths[:, None])
    x_rev = jnp.take_along_axis(x, rev_idx[:, :, None], axis=1)
    x_rev = jnp.where(valid[:, :, None], x_rev, 0.0)
    out_b_rev = _lstm_scan(x_rev, lengths, p['Wi_b'], p['Wh_b'], p['bi_b'], p['bh_b'])
    out_b = jnp.take_along_axis(out_b_rev, rev_idx[:, :, None], axis=1)
    out_b = jnp.where(valid[:, :, None], out_b, 0.0)
    return jnp.concatenate([out_f, out_b], axis=-1), None


# ----------------------------------------------------------------------------
# On-device KNN graph construction & random edge augmentation
# ----------------------------------------------------------------------------
def knn_graph_to_adj(dist, neighbors):
    """Builds the multimodal KNN adjacency fully on-device from sq-distances."""
    B, N, _ = dist.shape
    step = N // 3
    k = neighbors if (N * 2 // 3) >= neighbors else (N * 2 // 3)
    ii = jnp.arange(step)
    base = jnp.zeros((N, N), jnp.float32)
    base = base.at[ii, ii + step].set(1.0)
    base = base.at[ii + step, ii].set(1.0)
    base = base.at[ii, ii + 2 * step].set(1.0)
    base = base.at[ii + 2 * step, ii].set(1.0)
    base = base.at[ii + step, ii + 2 * step].set(1.0)
    base = base.at[ii + 2 * step, ii + step].set(1.0)
    rows = []
    for m in range(3):
        d_rows = dist[:, m * step:(m + 1) * step, :]                       # (B, step, N)
        other = jnp.concatenate([d_rows[:, :, :m * step],
                                 d_rows[:, :, (m + 1) * step:]], axis=-1)  # (B, step, N-step)
        _, idx = jax.lax.top_k(-other, k)                                  # k nearest
        # NOTE: bug-faithful to the reference KNN_Graph_to_adj — the index into
        # the other-modality concat is used directly (no offset remap).
        hot = jnp.minimum(jax.nn.one_hot(idx, N, dtype=jnp.float32).sum(axis=2), 1.0)
        rows.append(hot)                                                   # (B, step, N)
    knn = jnp.concatenate(rows, axis=1)                                    # (B, N, N)
    return jnp.maximum(base[None, :, :], knn)


def random_edge_drop(adj, ratio, key):
    """Zeroes ceil(num_edges*ratio) randomly chosen existing edges per batch.

    Replaces the host-side random.sample loop with on-device RNG.
    (_add_edge in the reference has the same effect — it also deletes edges —
    so both augmentation steps reuse this op.)
    """
    B = adj.shape[0]
    flat = adj.reshape(B, -1)
    E = flat.shape[1]
    u = jax.random.uniform(key, (B, E))
    is_edge = flat == 1.0
    scores = jnp.where(is_edge, u, -1.0)
    count = jnp.sum(is_edge, axis=1)
    del_num = jnp.ceil(count.astype(jnp.float32) * ratio).astype(jnp.int32)
    sorted_desc = -jnp.sort(-scores, axis=1)
    kth = jnp.take_along_axis(sorted_desc,
                              jnp.clip(del_num - 1, 0, E - 1)[:, None], axis=1)
    drop = is_edge & (scores >= kth) & (del_num[:, None] > 0)
    return jnp.where(drop, 0.0, flat).reshape(adj.shape)


def l2norm(x, eps=1e-12):
    n = jnp.sqrt(jnp.sum(x * x, axis=-1, keepdims=True))
    return x / jnp.maximum(n, eps)


# ----------------------------------------------------------------------------
# Parameters
# ----------------------------------------------------------------------------
def init_params(key, cfg):
    dt, da, dv, h = cfg['t_size'], cfg['a_size'], cfg['v_size'], cfg['hidden_size']
    H = cfg['num_gnn_heads']
    dh = h // H
    L = cfg['num_gnn_layers']
    keys = iter(jax.random.split(key, 128))

    def nrm(shape, s=0.1):
        return jax.random.normal(next(keys), shape, jnp.float32) * s

    def lstm_p(d):
        return dict(Wi_f=nrm((4 * d, d)), Wh_f=nrm((4 * d, d)),
                    bi_f=nrm((4 * d,)), bh_f=nrm((4 * d,)),
                    Wi_b=nrm((4 * d, d)), Wh_b=nrm((4 * d, d)),
                    bi_b=nrm((4 * d,)), bh_b=nrm((4 * d,)))

    def gat_p():
        return [dict(w=nrm((h, H * dh)), a_src=nrm((H, dh)), a_dst=nrm((H, dh)))
                for _ in range(L)]

    def readout_p():
        return dict(w=nrm((h, h)), b=nrm((1, h)), u=nrm((h, 1)))

    return dict(
        bert_emb=nrm((cfg['vocab_size'], dt)),
        proj_t=(nrm((dt, h)), nrm((1, h))),
        proj_v=(nrm((2 * dv, h)), nrm((1, h))),
        proj_a=(nrm((2 * da, h)), nrm((1, h))),
        lstm_v=lstm_p(dv), lstm_a=lstm_p(da),
        gat_t=gat_p(), gat_v=gat_p(), gat_a=gat_p(), gat_m=gat_p(),
        ro_t=readout_p(), ro_v=readout_p(), ro_a=readout_p(),
        fc_mul=(nrm((3 * h, 1)), nrm((1, 1))),
    )


# ----------------------------------------------------------------------------
# Forward pass
# ----------------------------------------------------------------------------
def forward(params, cfg, text_tensor, video_tensor, audio_tensor, lengths,
            adj_matrix, aug_key):
    bsz, max_len, _ = video_tensor.shape
    h = cfg['hidden_size']
    H = cfg['num_gnn_heads']
    dh = h // H
    Lnum = cfg['num_gnn_layers']

    t_ar = jnp.arange(max_len)
    mask3 = jnp.where(t_ar[None, :, None] >= lengths[:, None, None],
                      jnp.float32(-1e9), 0.0)                        # (B, L, 1)

    adj_t = adj_matrix[:, :max_len, :max_len]
    adj_v = adj_matrix[:, max_len:2 * max_len, max_len:2 * max_len]
    adj_a = adj_matrix[:, 2 * max_len:, 2 * max_len:]

    # --- encoders ---
    # TODO(synk): BertModel has no clean Pallas equivalent; replaced by a
    # deterministic token-embedding lookup of hidden size t_size.
    hs_t_raw = params['bert_emb'][text_tensor][:, 1:-1, :]           # (B, L, dt)
    out_v, _ = bilstm(video_tensor, lengths, params['lstm_v'])
    out_a, _ = bilstm(audio_tensor, lengths, params['lstm_a'])

    # --- fused projections + pairwise distances (one Pallas call) ---
    hs, dist = encode_project(hs_t_raw, out_v, out_a,
                              params['proj_t'], params['proj_v'], params['proj_a'])
    hs_t = hs[:, :max_len]
    hs_v = hs[:, max_len:2 * max_len]
    hs_a = hs[:, 2 * max_len:]

    # --- multimodal KNN graph + augmentations (all on-device, no host sync) ---
    adj_mul = knn_graph_to_adj(dist, cfg['knn_neighbors'])
    r = cfg['aug_ratio']
    keys = jax.random.split(aug_key, 8)
    adj_mul_aug1 = random_edge_drop(random_edge_drop(adj_mul, r, keys[0]), r, keys[1])
    adj_t_aug1 = random_edge_drop(random_edge_drop(adj_t, r, keys[2]), r, keys[3])
    adj_v_aug1 = random_edge_drop(random_edge_drop(adj_v, r, keys[4]), r, keys[5])
    adj_a_aug1 = random_edge_drop(random_edge_drop(adj_a, r, keys[6]), r, keys[7])

    # --- stacked GAT / readout parameters ---
    def stack_layers(plist):
        return (jnp.stack([p['w'] for p in plist]),
                jnp.stack([p['a_src'] for p in plist]),
                jnp.stack([p['a_dst'] for p in plist]))

    w_m, as_m, ad_m = stack_layers(params['gat_m'])
    w_t, as_t, ad_t = stack_layers(params['gat_t'])
    w_v, as_v, ad_v = stack_layers(params['gat_v'])
    w_a, as_a, ad_a = stack_layers(params['gat_a'])

    ro_w3 = jnp.stack([params['ro_t']['w'], params['ro_v']['w'], params['ro_a']['w']])
    ro_b3 = jnp.stack([params['ro_t']['b'], params['ro_v']['b'], params['ro_a']['b']])
    ro_u3 = jnp.stack([params['ro_t']['u'], params['ro_v']['u'], params['ro_a']['u']])

    # --- multimodal fused GAT + readout_m (G=2: base, augmented) ---
    mul_reps = gat_stack_readout(
        jnp.stack([hs, hs]),
        jnp.stack([adj_mul, adj_mul_aug1]),
        jnp.stack([w_m, w_m]), jnp.stack([as_m, as_m]), jnp.stack([ad_m, ad_m]),
        jnp.stack([ro_w3, ro_w3]), jnp.stack([ro_b3, ro_b3]), jnp.stack([ro_u3, ro_u3]),
        mask3, num_heads=H, head_dim=dh, num_layers=Lnum, num_segments=3)
    reps_mul = mul_reps[0]                                           # (B, 3h)
    reps_m_aug1 = mul_reps[1]

    # --- unimodal fused GAT + readout (G=6: t, v, a, t_aug, v_aug, a_aug) ---
    w_tva = jnp.stack([w_t, w_v, w_a])
    as_tva = jnp.stack([as_t, as_v, as_a])
    ad_tva = jnp.stack([ad_t, ad_v, ad_a])
    row_tva = ro_w3[:, None]                                         # (3, 1, h, h)
    rob_tva = ro_b3[:, None]
    rou_tva = ro_u3[:, None]
    uni_reps = gat_stack_readout(
        jnp.stack([hs_t, hs_v, hs_a, hs_t, hs_v, hs_a]),
        jnp.stack([adj_t, adj_v, adj_a, adj_t_aug1, adj_v_aug1, adj_a_aug1]),
        jnp.concatenate([w_tva, w_tva], axis=0),
        jnp.concatenate([as_tva, as_tva], axis=0),
        jnp.concatenate([ad_tva, ad_tva], axis=0),
        jnp.concatenate([row_tva, row_tva], axis=0),
        jnp.concatenate([rob_tva, rob_tva], axis=0),
        jnp.concatenate([rou_tva, rou_tva], axis=0),
        mask3, num_heads=H, head_dim=dh, num_layers=Lnum, num_segments=1)
    reps_t, reps_v, reps_a = uni_reps[0], uni_reps[1], uni_reps[2]
    reps_t_aug1, reps_v_aug1, reps_a_aug1 = uni_reps[3], uni_reps[4], uni_reps[5]

    reps_uni = jnp.concatenate([reps_t, reps_v, reps_a], axis=-1)

    # TODO(synk): original forward appends features/labels to text files; omitted (I/O side effect).
    output_mul = linear(reps_mul, *params['fc_mul'])                 # dropout = identity (eval)

    reps_t_aug = jnp.stack([reps_t_aug1, reps_t], axis=1)
    reps_v_aug = jnp.stack([reps_v_aug1, reps_v], axis=1)
    reps_a_aug = jnp.stack([reps_a_aug1, reps_a], axis=1)
    reps_m_aug = jnp.stack([reps_m_aug1, reps_mul], axis=1)

    return (output_mul.reshape(-1),
            l2norm(reps_uni),
            l2norm(reps_mul),
            l2norm(reps_mul[:, None, :]),
            l2norm(reps_t[:, None, :]),
            l2norm(reps_v[:, None, :]),
            l2norm(reps_a[:, None, :]),
            l2norm(reps_m_aug),
            l2norm(reps_t_aug),
            l2norm(reps_v_aug),
            l2norm(reps_a_aug))


# ----------------------------------------------------------------------------
if __name__ == "__main__":
    cfg = dict(t_size=32, a_size=4, v_size=8, hidden_size=32,
               num_gnn_heads=4, num_gnn_layers=2,
               dropout=0.0, dropout_t=0.0, dropout_v=0.0, dropout_a=0.0,
               dropout_gnn=0.0, knn_neighbors=3, aug_ratio=0.1, vocab_size=100)

    key = jax.random.PRNGKey(0)
    kp, kt, kv, ka, kadj, kaug = jax.random.split(key, 6)
    params = init_params(kp, cfg)

    bsz, max_len = 2, 8
    text_tensor = jax.random.randint(kt, (bsz, max_len + 2), 0, cfg['vocab_size'])
    video_tensor = jax.random.normal(kv, (bsz, max_len, cfg['v_size']), jnp.float32)
    audio_tensor = jax.random.normal(ka, (bsz, max_len, cfg['a_size']), jnp.float32)
    lengths = jnp.array([8, 6], jnp.int32)        # sorted descending (packed-seq convention)
    adj_matrix = (jax.random.uniform(kadj, (bsz, 3 * max_len, 3 * max_len)) < 0.3
                  ).astype(jnp.float32)

    fwd = jax.jit(lambda p, t, v, a, ln, adj, k: forward(p, cfg, t, v, a, ln, adj, k))
    outs = fwd(params, text_tensor, video_tensor, audio_tensor, lengths, adj_matrix, kaug)
    jax.block_until_ready(outs)
    print("KERNEL_OK")
</pallas_src>

<mosaic_0001>
module attributes {stable_mosaic.version = 11 : i64} {
  func.func @encode_pdist_kernel(%arg0: memref<2x8x32xf32, #tpu.memory_space<vmem>>, %arg1: memref<2x8x16xf32, #tpu.memory_space<vmem>>, %arg2: memref<2x8x8xf32, #tpu.memory_space<vmem>>, %arg3: memref<32x32xf32, #tpu.memory_space<vmem>>, %arg4: memref<1x32xf32, #tpu.memory_space<vmem>>, %arg5: memref<16x32xf32, #tpu.memory_space<vmem>>, %arg6: memref<1x32xf32, #tpu.memory_space<vmem>>, %arg7: memref<8x32xf32, #tpu.memory_space<vmem>>, %arg8: memref<1x32xf32, #tpu.memory_space<vmem>>, %arg9: memref<2x24x32xf32, #tpu.memory_space<vmem>>, %arg10: memref<2x24x24xf32, #tpu.memory_space<vmem>>) attributes {dimension_semantics = [], scalar_prefetch = 0 : i64, scratch_operands = 0 : i64, tpu.core_type = #tpu.core_type<tc>} {
    %c0 = arith.constant 0 : index
    %c0_0 = arith.constant 0 : index
    %c0_1 = arith.constant 0 : index
    %0 = vector.load %arg0[%c0, %c0_0, %c0_1] : memref<2x8x32xf32, #tpu.memory_space<vmem>>, vector<2x8x32xf32>
    %1 = vector.shape_cast %0 : vector<2x8x32xf32> to vector<16x32xf32>
    %2 = arith.truncf %1 : vector<16x32xf32> to vector<16x32xbf16>
    %c0_2 = arith.constant 0 : index
    %c0_3 = arith.constant 0 : index
    %3 = vector.load %arg3[%c0_2, %c0_3] : memref<32x32xf32, #tpu.memory_space<vmem>>, vector<32x32xf32>
    %4 = arith.truncf %3 : vector<32x32xf32> to vector<32x32xbf16>
    %cst = arith.constant dense<0.000000e+00> : vector<16x32xf32>
    %5 = tpu.matmul %2, %4, %cst {dimension_numbers = #tpu.dot_dimension_numbers<[1], [0], [0], [1], [0, 0, 1, 1], [], []>} : vector<16x32xbf16>, vector<32x32xbf16>, vector<16x32xf32> -> vector<16x32xf32>
    %c0_4 = arith.constant 0 : index
    %c0_5 = arith.constant 0 : index
    %6 = vector.load %arg4[%c0_4, %c0_5] : memref<1x32xf32, #tpu.memory_space<vmem>>, vector<1x32xf32>
    %7 = vector.broadcast %6 : vector<1x32xf32> to vector<16x32xf32>
    %8 = arith.addf %5, %7 : vector<16x32xf32>
    %cst_6 = arith.constant 0.000000e+00 : f32
    %9 = vector.broadcast %cst_6 : f32 to vector<16x32xf32>
    %10 = arith.maximumf %8, %9 : vector<16x32xf32>
    %11 = vector.shape_cast %10 : vector<16x32xf32> to vector<2x8x32xf32>
    %c0_7 = arith.constant 0 : index
    %c0_8 = arith.constant 0 : index
    %c0_9 = arith.constant 0 : index
    %12 = vector.load %arg1[%c0_7, %c0_8, %c0_9] : memref<2x8x16xf32, #tpu.memory_space<vmem>>, vector<2x8x16xf32>
    %13 = vector.shape_cast %12 : vector<2x8x16xf32> to vector<16x16xf32>
    %14 = arith.truncf %13 : vector<16x16xf32> to vector<16x16xbf16>
    %c0_10 = arith.constant 0 : index
    %c0_11 = arith.constant 0 : index
    %15 = vector.load %arg5[%c0_10, %c0_11] : memref<16x32xf32, #tpu.memory_space<vmem>>, vector<16x32xf32>
    %16 = arith.truncf %15 : vector<16x32xf32> to vector<16x32xbf16>
    %cst_12 = arith.constant dense<0.000000e+00> : vector<16x32xf32>
    %17 = tpu.matmul %14, %16, %cst_12 {dimension_numbers = #tpu.dot_dimension_numbers<[1], [0], [0], [1], [0, 0, 1, 1], [], []>} : vector<16x16xbf16>, vector<16x32xbf16>, vector<16x32xf32> -> vector<16x32xf32>
    %c0_13 = arith.constant 0 : index
    %c0_14 = arith.constant 0 : index
    %18 = vector.load %arg6[%c0_13, %c0_14] : memref<1x32xf32, #tpu.memory_space<vmem>>, vector<1x32xf32>
    %19 = vector.broadcast %18 : vector<1x32xf32> to vector<16x32xf32>
    %20 = arith.addf %17, %19 : vector<16x32xf32>
    %cst_15 = arith.constant 0.000000e+00 : f32
    %21 = vector.broadcast %cst_15 : f32 to vector<16x32xf32>
    %22 = arith.maximumf %20, %21 : vector<16x32xf32>
    %23 = vector.shape_cast %22 : vector<16x32xf32> to vector<2x8x32xf32>
    %c0_16 = arith.constant 0 : index
    %c0_17 = arith.constant 0 : index
    %c0_18 = arith.constant 0 : index
    %24 = vector.load %arg2[%c0_16, %c0_17, %c0_18] : memref<2x8x8xf32, #tpu.memory_space<vmem>>, vector<2x8x8xf32>
    %25 = vector.shape_cast %24 : vector<2x8x8xf32> to vector<16x8xf32>
    %26 = arith.truncf %25 : vector<16x8xf32> to vector<16x8xbf16>
    %c0_19 = arith.constant 0 : index
    %c0_20 = arith.constant 0 : index
    %27 = vector.load %arg7[%c0_19, %c0_20] : memref<8x32xf32, #tpu.memory_space<vmem>>, vector<8x32xf32>
    %28 = arith.truncf %27 : vector<8x32xf32> to vector<8x32xbf16>
    %cst_21 = arith.constant dense<0.000000e+00> : vector<16x32xf32>
    %29 = tpu.matmul %26, %28, %cst_21 {dimension_numbers = #tpu.dot_dimension_numbers<[1], [0], [0], [1], [0, 0, 1, 1], [], []>} : vector<16x8xbf16>, vector<8x32xbf16>, vector<16x32xf32> -> vector<16x32xf32>
    %c0_22 = arith.constant 0 : index
    %c0_23 = arith.constant 0 : index
    %30 = vector.load %arg8[%c0_22, %c0_23] : memref<1x32xf32, #tpu.memory_space<vmem>>, vector<1x32xf32>
    %31 = vector.broadcast %30 : vector<1x32xf32> to vector<16x32xf32>
    %32 = arith.addf %29, %31 : vector<16x32xf32>
    %cst_24 = arith.constant 0.000000e+00 : f32
    %33 = vector.broadcast %cst_24 : f32 to vector<16x32xf32>
    %34 = arith.maximumf %32, %33 : vector<16x32xf32>
    %35 = vector.shape_cast %34 : vector<16x32xf32> to vector<2x8x32xf32>
    %36 = tpu.concatenate %11, %23, %35 in 1 : vector<2x8x32xf32>, vector<2x8x32xf32>, vector<2x8x32xf32> -> vector<2x24x32xf32>
    %c0_25 = arith.constant 0 : index
    %c0_26 = arith.constant 0 : index
    %c0_27 = arith.constant 0 : index
    %37 = vector.load %arg9[%c0_25, %c0_26, %c0_27] : memref<2x24x32xf32, #tpu.memory_space<vmem>>, vector<2x24x32xf32>
    tpu.vector_store %arg9[%c0_25, %c0_26, %c0_27], %36 {strides = array<i32>} : memref<2x24x32xf32, #tpu.memory_space<vmem>>, vector<2x24x32xf32>,
    %38 = arith.mulf %36, %36 : vector<2x24x32xf32>
    %cst_28 = arith.constant dense<0.000000e+00> : vector<2x24xf32>
    %39 = vector.multi_reduction <add>, %38, %cst_28 [2] : vector<2x24x32xf32> to vector<2x24xf32>
    %cst_29 = arith.constant dense<0.000000e+00> : vector<2x24x24xf32>
    %40 = tpu.matmul %36, %36, %cst_29 {dimension_numbers = #tpu.dot_dimension_numbers<[2], [2], [1], [1], [0, 0, 0, 1, 1, 1], [0], [0]>} : vector<2x24x32xf32>, vector<2x24x32xf32>, vector<2x24x24xf32> -> vector<2x24x24xf32>
    %41 = vector.shape_cast %39 : vector<2x24xf32> to vector<2x24x1xf32>
    %42 = vector.shape_cast %39 : vector<2x24xf32> to vector<2x1x24xf32>
    %43 = vector.broadcast %41 : vector<2x24x1xf32> to vector<2x24x24xf32>
    %44 = vector.broadcast %42 : vector<2x1x24xf32> to vector<2x24x24xf32>
    %45 = arith.addf %43, %44 : vector<2x24x24xf32>
    %cst_30 = arith.constant 2.000000e+00 : f32
    %46 = vector.broadcast %cst_30 : f32 to vector<2x24x24xf32>
    %47 = arith.mulf %46, %40 : vector<2x24x24xf32>
    %48 = arith.subf %45, %47 : vector<2x24x24xf32>
    %cst_31 = arith.constant 0.000000e+00 : f32
    %49 = vector.broadcast %cst_31 : f32 to vector<2x24x24xf32>
    %50 = arith.maximumf %48, %49 : vector<2x24x24xf32>
    %c0_32 = arith.constant 0 : index
    %c0_33 = arith.constant 0 : index
    %c0_34 = arith.constant 0 : index
    %51 = vector.load %arg10[%c0_32, %c0_33, %c0_34] : memref<2x24x24xf32, #tpu.memory_space<vmem>>, vector<2x24x24xf32>
    tpu.vector_store %arg10[%c0_32, %c0_33, %c0_34], %50 {strides = array<i32>} : memref<2x24x24xf32, #tpu.memory_space<vmem>>, vector<2x24x24xf32>,
    return
  }
}

module attributes {stable_mosaic.version = 11 : i64} {
  func.func @gat_readout_kernel(%arg0: i32, %arg1: memref<1x2x24x32xf32, #tpu.memory_space<vmem>>, %arg2: memref<1x2x24x24xf32, #tpu.memory_space<vmem>>, %arg3: memref<1x2x32x32xf32, #tpu.memory_space<vmem>>, %arg4: memref<1x2x4x8xf32, #tpu.memory_space<vmem>>, %arg5: memref<1x2x4x8xf32, #tpu.memory_space<vmem>>, %arg6: memref<1x3x32x32xf32, #tpu.memory_space<vmem>>, %arg7: memref<1x3x1x32xf32, #tpu.memory_space<vmem>>, %arg8: memref<1x3x32x1xf32, #tpu.memory_space<vmem>>, %arg9: memref<2x8x1xf32, #tpu.memory_space<vmem>>, %arg10: memref<1x2x96xf32, #tpu.memory_space<vmem>>) attributes {dimension_semantics = [#tpu.dimension_semantics<parallel>], iteration_bounds = array<i64: 2>, scalar_prefetch = 0 : i64, scratch_operands = 0 : i64, tpu.core_type = #tpu.core_type<tc>, window_params = [{transform_indices = @transform_0, window_bounds = array<i64: 1, 2, 24, 32>}, {transform_indices = @transform_1, window_bounds = array<i64: 1, 2, 24, 24>}, {transform_indices = @transform_2, window_bounds = array<i64: 1, 2, 32, 32>}, {transform_indices = @transform_3, window_bounds = array<i64: 1, 2, 4, 8>}, {transform_indices = @transform_4, window_bounds = array<i64: 1, 2, 4, 8>}, {transform_indices = @transform_5, window_bounds = array<i64: 1, 3, 32, 32>}, {transform_indices = @transform_6, window_bounds = array<i64: 1, 3, 1, 32>}, {transform_indices = @transform_7, window_bounds = array<i64: 1, 3, 32, 1>}, {pipeline_mode = #tpu.pipeline_mode<synchronous>, transform_indices = @transform_8, window_bounds = array<i64: 2, 8, 1>}, {transform_indices = @transform_9, window_bounds = array<i64: 1, 2, 96>}]} {
    %c0 = arith.constant 0 : index
    %c0_0 = arith.constant 0 : index
    %c0_1 = arith.constant 0 : index
    %c0_2 = arith.constant 0 : index
    %0 = vector.load %arg1[%c0, %c0_0, %c0_1, %c0_2] : memref<1x2x24x32xf32, #tpu.memory_space<vmem>>, vector<1x2x24x32xf32>
    %1 = vector.shape_cast %0 : vector<1x2x24x32xf32> to vector<2x24x32xf32>
    %c0_3 = arith.constant 0 : index
    %c0_4 = arith.constant 0 : index
    %c0_5 = arith.constant 0 : index
    %c0_6 = arith.constant 0 : index
    %2 = vector.load %arg2[%c0_3, %c0_4, %c0_5, %c0_6] : memref<1x2x24x24xf32, #tpu.memory_space<vmem>>, vector<1x2x24x24xf32>
    %3 = vector.shape_cast %2 : vector<1x2x24x24xf32> to vector<2x24x24xf32>
    %c0_7 = arith.constant 0 : index
    %c0_8 = arith.constant 0 : index
    %c0_9 = arith.constant 0 : index
    %4 = vector.load %arg9[%c0_7, %c0_8, %c0_9] : memref<2x8x1xf32, #tpu.memory_space<vmem>>, vector<2x8x1xf32>
    %c0_10 = arith.constant 0 : index
    %c0_11 = arith.constant 0 : index
    %c0_12 = arith.constant 0 : index
    %c0_13 = arith.constant 0 : index
    %5 = vector.load %arg3[%c0_10, %c0_11, %c0_12, %c0_13] : memref<1x2x32x32xf32, #tpu.memory_space<vmem>>, vector<1x1x32x32xf32>
    %6 = vector.shape_cast %5 : vector<1x1x32x32xf32> to vector<32x32xf32>
    %7 = arith.truncf %6 : vector<32x32xf32> to vector<32x32xbf16>
    %c0_14 = arith.constant 0 : index
    %c0_15 = arith.constant 0 : index
    %c0_16 = arith.constant 0 : index
    %c0_17 = arith.constant 0 : index
    %8 = vector.load %arg4[%c0_14, %c0_15, %c0_16, %c0_17] : memref<1x2x4x8xf32, #tpu.memory_space<vmem>>, vector<1x1x4x8xf32>
    %9 = vector.shape_cast %8 : vector<1x1x4x8xf32> to vector<4x8xf32>
    %c0_18 = arith.constant 0 : index
    %c0_19 = arith.constant 0 : index
    %c0_20 = arith.constant 0 : index
    %c0_21 = arith.constant 0 : index
    %10 = vector.load %arg5[%c0_18, %c0_19, %c0_20, %c0_21] : memref<1x2x4x8xf32, #tpu.memory_space<vmem>>, vector<1x1x4x8xf32>
    %11 = vector.shape_cast %10 : vector<1x1x4x8xf32> to vector<4x8xf32>
    %12 = vector.shape_cast %1 : vector<2x24x32xf32> to vector<48x32xf32>
    %13 = arith.truncf %12 : vector<48x32xf32> to vector<48x32xbf16>
    %cst = arith.constant dense<0.000000e+00> : vector<48x32xf32>
    %14 = tpu.matmul %13, %7, %cst {dimension_numbers = #tpu.dot_dimension_numbers<[1], [0], [0], [1], [0, 0, 1, 1], [], []>} : vector<48x32xbf16>, vector<32x32xbf16>, vector<48x32xf32> -> vector<48x32xf32>
    %15 = vector.shape_cast %14 : vector<48x32xf32> to vector<2x24x32xf32>
    %16 = vector.extract_strided_slice %15 {offsets = [0, 0, 0], sizes = [2, 24, 8], strides = [1, 1, 1]} : vector<2x24x32xf32> to vector<2x24x8xf32>
    %17 = vector.extract_strided_slice %15 {offsets = [0, 0, 8], sizes = [2, 24, 8], strides = [1, 1, 1]} : vector<2x24x32xf32> to vector<2x24x8xf32>
    %18 = vector.extract_strided_slice %15 {offsets = [0, 0, 16], sizes = [2, 24, 8], strides = [1, 1, 1]} : vector<2x24x32xf32> to vector<2x24x8xf32>
    %19 = vector.extract_strided_slice %15 {offsets = [0, 0, 24], sizes = [2, 24, 8], strides = [1, 1, 1]} : vector<2x24x32xf32> to vector<2x24x8xf32>
    %20 = vector.shape_cast %16 : vector<2x24x8xf32> to vector<2x1x24x8xf32>
    %21 = vector.shape_cast %17 : vector<2x24x8xf32> to vector<2x1x24x8xf32>
    %22 = vector.shape_cast %18 : vector<2x24x8xf32> to vector<2x1x24x8xf32>
    %23 = vector.shape_cast %19 : vector<2x24x8xf32> to vector<2x1x24x8xf32>
    %24 = tpu.concatenate %20, %21, %22, %23 in 1 : vector<2x1x24x8xf32>, vector<2x1x24x8xf32>, vector<2x1x24x8xf32>, vector<2x1x24x8xf32> -> vector<2x4x24x8xf32>
    %25 = vector.shape_cast %9 : vector<4x8xf32> to vector<1x4x1x8xf32>
    %26 = vector.broadcast %25 : vector<1x4x1x8xf32> to vector<2x4x24x8xf32>
    %27 = arith.mulf %24, %26 : vector<2x4x24x8xf32>
    %cst_22 = arith.constant dense<0.000000e+00> : vector<2x4x24xf32>
    %28 = vector.multi_reduction <add>, %27, %cst_22 [3] : vector<2x4x24x8xf32> to vector<2x4x24xf32>
    %29 = vector.shape_cast %11 : vector<4x8xf32> to vector<1x4x1x8xf32>
    %30 = vector.broadcast %29 : vector<1x4x1x8xf32> to vector<2x4x24x8xf32>
    %31 = arith.mulf %24, %30 : vector<2x4x24x8xf32>
    %cst_23 = arith.constant dense<0.000000e+00> : vector<2x4x24xf32>
    %32 = vector.multi_reduction <add>, %31, %cst_23 [3] : vector<2x4x24x8xf32> to vector<2x4x24xf32>
    %33 = vector.shape_cast %28 : vector<2x4x24xf32> to vector<2x4x24x1xf32>
    %34 = vector.shape_cast %32 : vector<2x4x24xf32> to vector<2x4x1x24xf32>
    %35 = vector.broadcast %33 : vector<2x4x24x1xf32> to vector<2x4x24x24xf32>
    %36 = vector.broadcast %34 : vector<2x4x1x24xf32> to vector<2x4x24x24xf32>
    %37 = arith.addf %35, %36 : vector<2x4x24x24xf32>
    %cst_24 = arith.constant 0.000000e+00 : f32
    %38 = vector.broadcast %cst_24 : f32 to vector<2x4x24x24xf32>
    %39 = arith.cmpf ogt, %37, %38 : vector<2x4x24x24xf32>
    %cst_25 = arith.constant 2.000000e-01 : f32
    %40 = vector.broadcast %cst_25 : f32 to vector<2x4x24x24xf32>
    %41 = arith.mulf %40, %37 : vector<2x4x24x24xf32>
    %42 = arith.select %39, %37, %41 : vector<2x4x24x24xi1>, vector<2x4x24x24xf32>
    %43 = vector.shape_cast %3 : vector<2x24x24xf32> to vector<2x1x24x24xf32>
    %cst_26 = arith.constant 0.000000e+00 : f32
    %44 = vector.broadcast %cst_26 : f32 to vector<2x1x24x24xf32>
    %45 = arith.cmpf ogt, %43, %44 : vector<2x1x24x24xf32>
    %cst_27 = arith.constant -1.000000e+09 : f32
    %46 = vector.shape_cast %45 : vector<2x1x24x24xi1> to vector<2x1x24x24xi1>
    %47 = vector.broadcast %46 : vector<2x1x24x24xi1> to vector<2x4x24x24xi1>
    %48 = vector.broadcast %cst_27 : f32 to vector<2x4x24x24xf32>
    %49 = arith.select %47, %42, %48 : vector<2x4x24x24xi1>, vector<2x4x24x24xf32>
    %cst_28 = arith.constant dense<0xFF800000> : vector<2x4x24xf32>
    %50 = vector.multi_reduction <maximumf>, %49, %cst_28 [3] : vector<2x4x24x24xf32> to vector<2x4x24xf32>
    %51 = vector.shape_cast %50 : vector<2x4x24xf32> to vector<2x4x24x1xf32>
    %52 = vector.broadcast %51 : vector<2x4x24x1xf32> to vector<2x4x24x24xf32>
    %53 = arith.subf %49, %52 : vector<2x4x24x24xf32>
    %54 = math.exp %53 : vector<2x4x24x24xf32>
    %cst_29 = arith.constant dense<0.000000e+00> : vector<2x4x24xf32>
    %55 = vector.multi_reduction <add>, %54, %cst_29 [3] : vector<2x4x24x24xf32> to vector<2x4x24xf32>
    %56 = vector.shape_cast %55 : vector<2x4x24xf32> to vector<2x4x24x1xf32>
    %57 = tpu.reciprocal %56 {approx = true} : vector<2x4x24x1xf32> -> vector<2x4x24x1xf32>
    %58 = vector.broadcast %57 : vector<2x4x24x1xf32> to vector<2x4x24x24xf32>
    %59 = arith.mulf %54, %58 : vector<2x4x24x24xf32>
    %60 = vector.shape_cast %59 : vector<2x4x24x24xf32> to vector<8x24x24xf32>
    %61 = arith.truncf %60 : vector<8x24x24xf32> to vector<8x24x24xbf16>
    %62 = vector.shape_cast %24 : vector<2x4x24x8xf32> to vector<8x24x8xf32>
    %63 = arith.truncf %62 : vector<8x24x8xf32> to vector<8x24x8xbf16>
    %cst_30 = arith.constant dense<0.000000e+00> : vector<8x24x8xf32>
    %64 = tpu.matmul %61, %63, %cst_30 {dimension_numbers = #tpu.dot_dimension_numbers<[2], [1], [1], [2], [0, 0, 0, 1, 1, 2], [0], [0]>} : vector<8x24x24xbf16>, vector<8x24x8xbf16>, vector<8x24x8xf32> -> vector<8x24x8xf32>
    %65 = vector.shape_cast %64 : vector<8x24x8xf32> to vector<2x4x24x8xf32>
    %66 = vector.extract_strided_slice %65 {offsets = [0, 0, 0, 0], sizes = [2, 1, 24, 8], strides = [1, 1, 1, 1]} : vector<2x4x24x8xf32> to vector<2x1x24x8xf32>
    %67 = vector.shape_cast %66 : vector<2x1x24x8xf32> to vector<2x24x8xf32>
    %68 = vector.extract_strided_slice %65 {offsets = [0, 1, 0, 0], sizes = [2, 1, 24, 8], strides = [1, 1, 1, 1]} : vector<2x4x24x8xf32> to vector<2x1x24x8xf32>
    %69 = vector.shape_cast %68 : vector<2x1x24x8xf32> to vector<2x24x8xf32>
    %70 = vector.extract_strided_slice %65 {offsets = [0, 2, 0, 0], sizes = [2, 1, 24, 8], strides = [1, 1, 1, 1]} : vector<2x4x24x8xf32> to vector<2x1x24x8xf32>
    %71 = vector.shape_cast %70 : vector<2x1x24x8xf32> to vector<2x24x8xf32>
    %72 = vector.extract_strided_slice %65 {offsets = [0, 3, 0, 0], sizes = [2, 1, 24, 8], strides = [1, 1, 1, 1]} : vector<2x4x24x8xf32> to vector<2x1x24x8xf32>
    %73 = vector.shape_cast %72 : vector<2x1x24x8xf32> to vector<2x24x8xf32>
    %74 = tpu.concatenate %67, %69, %71, %73 in 2 : vector<2x24x8xf32>, vector<2x24x8xf32>, vector<2x24x8xf32>, vector<2x24x8xf32> -> vector<2x24x32xf32>
    %cst_31 = arith.constant 0.000000e+00 : f32
    %75 = vector.broadcast %cst_31 : f32 to vector<2x24x32xf32>
    %76 = arith.cmpf ogt, %74, %75 : vector<2x24x32xf32>
    %cst_32 = arith.constant 0.000000e+00 : f32
    %77 = vector.broadcast %cst_32 : f32 to vector<2x24x32xf32>
    %78 = arith.minimumf %74, %77 : vector<2x24x32xf32>
    %79 = math.exp %78 : vector<2x24x32xf32>
    %cst_33 = arith.constant 1.000000e+00 : f32
    %80 = vector.broadcast %cst_33 : f32 to vector<2x24x32xf32>
    %81 = arith.subf %79, %80 : vector<2x24x32xf32>
    %82 = arith.select %76, %74, %81 : vector<2x24x32xi1>, vector<2x24x32xf32>
    %c0_34 = arith.constant 0 : index
    %c1 = arith.constant 1 : index
    %c0_35 = arith.constant 0 : index
    %c0_36 = arith.constant 0 : index
    %83 = vector.load %arg3[%c0_34, %c1, %c0_35, %c0_36] : memref<1x2x32x32xf32, #tpu.memory_space<vmem>>, vector<1x1x32x32xf32>
    %84 = vector.shape_cast %83 : vector<1x1x32x32xf32> to vector<32x32xf32>
    %85 = arith.truncf %84 : vector<32x32xf32> to vector<32x32xbf16>
    %c0_37 = arith.constant 0 : index
    %c1_38 = arith.constant 1 : index
    %c0_39 = arith.constant 0 : index
    %c0_40 = arith.constant 0 : index
    %86 = vector.load %arg4[%c0_37, %c1_38, %c0_39, %c0_40] : memref<1x2x4x8xf32, #tpu.memory_space<vmem>>, vector<1x1x4x8xf32>
    %87 = vector.shape_cast %86 : vector<1x1x4x8xf32> to vector<4x8xf32>
    %c0_41 = arith.constant 0 : index
    %c1_42 = arith.constant 1 : index
    %c0_43 = arith.constant 0 : index
    %c0_44 = arith.constant 0 : index
    %88 = vector.load %arg5[%c0_41, %c1_42, %c0_43, %c0_44] : memref<1x2x4x8xf32, #tpu.memory_space<vmem>>, vector<1x1x4x8xf32>
    %89 = vector.shape_cast %88 : vector<1x1x4x8xf32> to vector<4x8xf32>
    %90 = vector.shape_cast %82 : vector<2x24x32xf32> to vector<48x32xf32>
    %91 = arith.truncf %90 : vector<48x32xf32> to vector<48x32xbf16>
    %cst_45 = arith.constant dense<0.000000e+00> : vector<48x32xf32>
    %92 = tpu.matmul %91, %85, %cst_45 {dimension_numbers = #tpu.dot_dimension_numbers<[1], [0], [0], [1], [0, 0, 1, 1], [], []>} : vector<48x32xbf16>, vector<32x32xbf16>, vector<48x32xf32> -> vector<48x32xf32>
    %93 = vector.shape_cast %92 : vector<48x32xf32> to vector<2x24x32xf32>
    %94 = vector.extract_strided_slice %93 {offsets = [0, 0, 0], sizes = [2, 24, 8], strides = [1, 1, 1]} : vector<2x24x32xf32> to vector<2x24x8xf32>
    %95 = vector.extract_strided_slice %93 {offsets = [0, 0, 8], sizes = [2, 24, 8], strides = [1, 1, 1]} : vector<2x24x32xf32> to vector<2x24x8xf32>
    %96 = vector.extract_strided_slice %93 {offsets = [0, 0, 16], sizes = [2, 24, 8], strides = [1, 1, 1]} : vector<2x24x32xf32> to vector<2x24x8xf32>
    %97 = vector.extract_strided_slice %93 {offsets = [0, 0, 24], sizes = [2, 24, 8], strides = [1, 1, 1]} : vector<2x24x32xf32> to vector<2x24x8xf32>
    %98 = vector.shape_cast %94 : vector<2x24x8xf32> to vector<2x1x24x8xf32>
    %99 = vector.shape_cast %95 : vector<2x24x8xf32> to vector<2x1x24x8xf32>
    %100 = vector.shape_cast %96 : vector<2x24x8xf32> to vector<2x1x24x8xf32>
    %101 = vector.shape_cast %97 : vector<2x24x8xf32> to vector<2x1x24x8xf32>
    %102 = tpu.concatenate %98, %99, %100, %101 in 1 : vector<2x1x24x8xf32>, vector<2x1x24x8xf32>, vector<2x1x24x8xf32>, vector<2x1x24x8xf32> -> vector<2x4x24x8xf32>
    %103 = vector.shape_cast %87 : vector<4x8xf32> to vector<1x4x1x8xf32>
    %104 = vector.broadcast %103 : vector<1x4x1x8xf32> to vector<2x4x24x8xf32>
    %105 = arith.mulf %102, %104 : vector<2x4x24x8xf32>
    %cst_46 = arith.constant dense<0.000000e+00> : vector<2x4x24xf32>
    %106 = vector.multi_reduction <add>, %105, %cst_46 [3] : vector<2x4x24x8xf32> to vector<2x4x24xf32>
    %107 = vector.shape_cast %89 : vector<4x8xf32> to vector<1x4x1x8xf32>
    %108 = vector.broadcast %107 : vector<1x4x1x8xf32> to vector<2x4x24x8xf32>
    %109 = arith.mulf %102, %108 : vector<2x4x24x8xf32>
    %cst_47 = arith.constant dense<0.000000e+00> : vector<2x4x24xf32>
    %110 = vector.multi_reduction <add>, %109, %cst_47 [3] : vector<2x4x24x8xf32> to vector<2x4x24xf32>
    %111 = vector.shape_cast %106 : vector<2x4x24xf32> to vector<2x4x24x1xf32>
    %112 = vector.shape_cast %110 : vector<2x4x24xf32> to vector<2x4x1x24xf32>
    %113 = vector.broadcast %111 : vector<2x4x24x1xf32> to vector<2x4x24x24xf32>
    %114 = vector.broadcast %112 : vector<2x4x1x24xf32> to vector<2x4x24x24xf32>
    %115 = arith.addf %113, %114 : vector<2x4x24x24xf32>
    %cst_48 = arith.constant 0.000000e+00 : f32
    %116 = vector.broadcast %cst_48 : f32 to vector<2x4x24x24xf32>
    %117 = arith.cmpf ogt, %115, %116 : vector<2x4x24x24xf32>
    %cst_49 = arith.constant 2.000000e-01 : f32
    %118 = vector.broadcast %cst_49 : f32 to vector<2x4x24x24xf32>
    %119 = arith.mulf %118, %115 : vector<2x4x24x24xf32>
    %120 = arith.select %117, %115, %119 : vector<2x4x24x24xi1>, vector<2x4x24x24xf32>
    %121 = vector.shape_cast %3 : vector<2x24x24xf32> to vector<2x1x24x24xf32>
    %cst_50 = arith.constant 0.000000e+00 : f32
    %122 = vector.broadcast %cst_50 : f32 to vector<2x1x24x24xf32>
    %123 = arith.cmpf ogt, %121, %122 : vector<2x1x24x24xf32>
    %cst_51 = arith.constant -1.000000e+09 : f32
    %124 = vector.shape_cast %123 : vector<2x1x24x24xi1> to vector<2x1x24x24xi1>
    %125 = vector.broadcast %124 : vector<2x1x24x24xi1> to vector<2x4x24x24xi1>
    %126 = vector.broadcast %cst_51 : f32 to vector<2x4x24x24xf32>
    %127 = arith.select %125, %120, %126 : vector<2x4x24x24xi1>, vector<2x4x24x24xf32>
    %cst_52 = arith.constant dense<0xFF800000> : vector<2x4x24xf32>
    %128 = vector.multi_reduction <maximumf>, %127, %cst_52 [3] : vector<2x4x24x24xf32> to vector<2x4x24xf32>
    %129 = vector.shape_cast %128 : vector<2x4x24xf32> to vector<2x4x24x1xf32>
    %130 = vector.broadcast %129 : vector<2x4x24x1xf32> to vector<2x4x24x24xf32>
    %131 = arith.subf %127, %130 : vector<2x4x24x24xf32>
    %132 = math.exp %131 : vector<2x4x24x24xf32>
    %cst_53 = arith.constant dense<0.000000e+00> : vector<2x4x24xf32>
    %133 = vector.multi_reduction <add>, %132, %cst_53 [3] : vector<2x4x24x24xf32> to vector<2x4x24xf32>
    %134 = vector.shape_cast %133 : vector<2x4x24xf32> to vector<2x4x24x1xf32>
    %135 = tpu.reciprocal %134 {approx = true} : vector<2x4x24x1xf32> -> vector<2x4x24x1xf32>
    %136 = vector.broadcast %135 : vector<2x4x24x1xf32> to vector<2x4x24x24xf32>
    %137 = arith.mulf %132, %136 : vector<2x4x24x24xf32>
    %138 = vector.shape_cast %137 : vector<2x4x24x24xf32> to vector<8x24x24xf32>
    %139 = arith.truncf %138 : vector<8x24x24xf32> to vector<8x24x24xbf16>
    %140 = vector.shape_cast %102 : vector<2x4x24x8xf32> to vector<8x24x8xf32>
    %141 = arith.truncf %140 : vector<8x24x8xf32> to vector<8x24x8xbf16>
    %cst_54 = arith.constant dense<0.000000e+00> : vector<8x24x8xf32>
    %142 = tpu.matmul %139, %141, %cst_54 {dimension_numbers = #tpu.dot_dimension_numbers<[2], [1], [1], [2], [0, 0, 0, 1, 1, 2], [0], [0]>} : vector<8x24x24xbf16>, vector<8x24x8xbf16>, vector<8x24x8xf32> -> vector<8x24x8xf32>
    %143 = vector.shape_cast %142 : vector<8x24x8xf32> to vector<2x4x24x8xf32>
    %144 = vector.extract_strided_slice %143 {offsets = [0, 0, 0, 0], sizes = [2, 1, 24, 8], strides = [1, 1, 1, 1]} : vector<2x4x24x8xf32> to vector<2x1x24x8xf32>
    %145 = vector.shape_cast %144 : vector<2x1x24x8xf32> to vector<2x24x8xf32>
    %146 = vector.extract_strided_slice %143 {offsets = [0, 1, 0, 0], sizes = [2, 1, 24, 8], strides = [1, 1, 1, 1]} : vector<2x4x24x8xf32> to vector<2x1x24x8xf32>
    %147 = vector.shape_cast %146 : vector<2x1x24x8xf32> to vector<2x24x8xf32>
    %148 = vector.extract_strided_slice %143 {offsets = [0, 2, 0, 0], sizes = [2, 1, 24, 8], strides = [1, 1, 1, 1]} : vector<2x4x24x8xf32> to vector<2x1x24x8xf32>
    %149 = vector.shape_cast %148 : vector<2x1x24x8xf32> to vector<2x24x8xf32>
    %150 = vector.extract_strided_slice %143 {offsets = [0, 3, 0, 0], sizes = [2, 1, 24, 8], strides = [1, 1, 1, 1]} : vector<2x4x24x8xf32> to vector<2x1x24x8xf32>
    %151 = vector.shape_cast %150 : vector<2x1x24x8xf32> to vector<2x24x8xf32>
    %152 = tpu.concatenate %145, %147, %149, %151 in 2 : vector<2x24x8xf32>, vector<2x24x8xf32>, vector<2x24x8xf32>, vector<2x24x8xf32> -> vector<2x24x32xf32>
    %153 = arith.addf %152, %1 : vector<2x24x32xf32>
    %cst_55 = arith.constant 0.000000e+00 : f32
    %154 = vector.broadcast %cst_55 : f32 to vector<2x24x32xf32>
    %155 = arith.maximumf %153, %154 : vector<2x24x32xf32>
    %156 = vector.extract_strided_slice %155 {offsets = [0, 0, 0], sizes = [2, 8, 32], strides = [1, 1, 1]} : vector<2x24x32xf32> to vector<2x8x32xf32>
    %c0_56 = arith.constant 0 : index
    %c0_57 = arith.constant 0 : index
    %c0_58 = arith.constant 0 : index
    %c0_59 = arith.constant 0 : index
    %157 = vector.load %arg6[%c0_56, %c0_57, %c0_58, %c0_59] : memref<1x3x32x32xf32, #tpu.memory_space<vmem>>, vector<1x1x32x32xf32>
    %158 = vector.shape_cast %157 : vector<1x1x32x32xf32> to vector<32x32xf32>
    %159 = arith.truncf %158 : vector<32x32xf32> to vector<32x32xbf16>
    %c0_60 = arith.constant 0 : index
    %c0_61 = arith.constant 0 : index
    %c0_62 = arith.constant 0 : index
    %c0_63 = arith.constant 0 : index
    %160 = vector.load %arg7[%c0_60, %c0_61, %c0_62, %c0_63] : memref<1x3x1x32xf32, #tpu.memory_space<vmem>>, vector<1x1x1x32xf32>
    %161 = vector.shape_cast %160 : vector<1x1x1x32xf32> to vector<1x32xf32>
    %c0_64 = arith.constant 0 : index
    %c0_65 = arith.constant 0 : index
    %c0_66 = arith.constant 0 : index
    %c0_67 = arith.constant 0 : index
    %162 = vector.load %arg8[%c0_64, %c0_65, %c0_66, %c0_67] : memref<1x3x32x1xf32, #tpu.memory_space<vmem>>, vector<1x1x32x1xf32>
    %163 = vector.shape_cast %162 : vector<1x1x32x1xf32> to vector<32x1xf32>
    %164 = arith.truncf %163 : vector<32x1xf32> to vector<32x1xbf16>
    %165 = vector.shape_cast %156 : vector<2x8x32xf32> to vector<16x32xf32>
    %166 = arith.truncf %165 : vector<16x32xf32> to vector<16x32xbf16>
    %cst_68 = arith.constant dense<0.000000e+00> : vector<16x32xf32>
    %167 = tpu.matmul %166, %159, %cst_68 {dimension_numbers = #tpu.dot_dimension_numbers<[1], [0], [0], [1], [0, 0, 1, 1], [], []>} : vector<16x32xbf16>, vector<32x32xbf16>, vector<16x32xf32> -> vector<16x32xf32>
    %168 = vector.broadcast %161 : vector<1x32xf32> to vector<16x32xf32>
    %169 = arith.addf %167, %168 : vector<16x32xf32>
    %170 = math.tanh %169 : vector<16x32xf32>
    %171 = arith.truncf %170 : vector<16x32xf32> to vector<16x32xbf16>
    %cst_69 = arith.constant dense<0.000000e+00> : vector<16x1xf32>
    %172 = tpu.matmul %171, %164, %cst_69 {dimension_numbers = #tpu.dot_dimension_numbers<[1], [0], [0], [1], [0, 0, 1, 1], [], []>} : vector<16x32xbf16>, vector<32x1xbf16>, vector<16x1xf32> -> vector<16x1xf32>
    %173 = vector.shape_cast %172 : vector<16x1xf32> to vector<2x8x1xf32>
    %174 = arith.addf %173, %4 : vector<2x8x1xf32>
    %cst_70 = arith.constant dense<0xFF800000> : vector<2x1xf32>
    %175 = vector.multi_reduction <maximumf>, %174, %cst_70 [1] : vector<2x8x1xf32> to vector<2x1xf32>
    %176 = vector.shape_cast %175 : vector<2x1xf32> to vector<2x1x1xf32>
    %177 = vector.broadcast %176 : vector<2x1x1xf32> to vector<2x8x1xf32>
    %178 = arith.subf %174, %177 : vector<2x8x1xf32>
    %179 = math.exp %178 : vector<2x8x1xf32>
    %cst_71 = arith.constant dense<0.000000e+00> : vector<2x1xf32>
    %180 = vector.multi_reduction <add>, %179, %cst_71 [1] : vector<2x8x1xf32> to vector<2x1xf32>
    %181 = vector.shape_cast %180 : vector<2x1xf32> to vector<2x1x1xf32>
    %182 = tpu.reciprocal %181 {approx = true} : vector<2x1x1xf32> -> vector<2x1x1xf32>
    %183 = vector.broadcast %182 : vector<2x1x1xf32> to vector<2x8x1xf32>
    %184 = arith.mulf %179, %183 : vector<2x8x1xf32>
    %185 = vector.broadcast %184 : vector<2x8x1xf32> to vector<2x8x32xf32>
    %186 = arith.mulf %185, %156 : vector<2x8x32xf32>
    %cst_72 = arith.constant dense<0.000000e+00> : vector<2x32xf32>
    %187 = vector.multi_reduction <add>, %186, %cst_72 [1] : vector<2x8x32xf32> to vector<2x32xf32>
    %188 = vector.extract_strided_slice %155 {offsets = [0, 8, 0], sizes = [2, 8, 32], strides = [1, 1, 1]} : vector<2x24x32xf32> to vector<2x8x32xf32>
    %c0_73 = arith.constant 0 : index
    %c1_74 = arith.constant 1 : index
    %c0_75 = arith.constant 0 : index
    %c0_76 = arith.constant 0 : index
    %189 = vector.load %arg6[%c0_73, %c1_74, %c0_75, %c0_76] : memref<1x3x32x32xf32, #tpu.memory_space<vmem>>, vector<1x1x32x32xf32>
    %190 = vector.shape_cast %189 : vector<1x1x32x32xf32> to vector<32x32xf32>
    %191 = arith.truncf %190 : vector<32x32xf32> to vector<32x32xbf16>
    %c0_77 = arith.constant 0 : index
    %c1_78 = arith.constant 1 : index
    %c0_79 = arith.constant 0 : index
    %c0_80 = arith.constant 0 : index
    %192 = vector.load %arg7[%c0_77, %c1_78, %c0_79, %c0_80] : memref<1x3x1x32xf32, #tpu.memory_space<vmem>>, vector<1x1x1x32xf32>
    %193 = vector.shape_cast %192 : vector<1x1x1x32xf32> to vector<1x32xf32>
    %c0_81 = arith.constant 0 : index
    %c1_82 = arith.constant 1 : index
    %c0_83 = arith.constant 0 : index
    %c0_84 = arith.constant 0 : index
    %194 = vector.load %arg8[%c0_81, %c1_82, %c0_83, %c0_84] : memref<1x3x32x1xf32, #tpu.memory_space<vmem>>, vector<1x1x32x1xf32>
    %195 = vector.shape_cast %194 : vector<1x1x32x1xf32> to vector<32x1xf32>
    %196 = arith.truncf %195 : vector<32x1xf32> to vector<32x1xbf16>
    %197 = vector.shape_cast %188 : vector<2x8x32xf32> to vector<16x32xf32>
    %198 = arith.truncf %197 : vector<16x32xf32> to vector<16x32xbf16>
    %cst_85 = arith.constant dense<0.000000e+00> : vector<16x32xf32>
    %199 = tpu.matmul %198, %191, %cst_85 {dimension_numbers = #tpu.dot_dimension_numbers<[1], [0], [0], [1], [0, 0, 1, 1], [], []>} : vector<16x32xbf16>, vector<32x32xbf16>, vector<16x32xf32> -> vector<16x32xf32>
    %200 = vector.broadcast %193 : vector<1x32xf32> to vector<16x32xf32>
    %201 = arith.addf %199, %200 : vector<16x32xf32>
    %202 = math.tanh %201 : vector<16x32xf32>
    %203 = arith.truncf %202 : vector<16x32xf32> to vector<16x32xbf16>
    %cst_86 = arith.constant dense<0.000000e+00> : vector<16x1xf32>
    %204 = tpu.matmul %203, %196, %cst_86 {dimension_numbers = #tpu.dot_dimension_numbers<[1], [0], [0], [1], [0, 0, 1, 1], [], []>} : vector<16x32xbf16>, vector<32x1xbf16>, vector<16x1xf32> -> vector<16x1xf32>
    %205 = vector.shape_cast %204 : vector<16x1xf32> to vector<2x8x1xf32>
    %206 = arith.addf %205, %4 : vector<2x8x1xf32>
    %cst_87 = arith.constant dense<0xFF800000> : vector<2x1xf32>
    %207 = vector.multi_reduction <maximumf>, %206, %cst_87 [1] : vector<2x8x1xf32> to vector<2x1xf32>
    %208 = vector.shape_cast %207 : vector<2x1xf32> to vector<2x1x1xf32>
    %209 = vector.broadcast %208 : vector<2x1x1xf32> to vector<2x8x1xf32>
    %210 = arith.subf %206, %209 : vector<2x8x1xf32>
    %211 = math.exp %210 : vector<2x8x1xf32>
    %cst_88 = arith.constant dense<0.000000e+00> : vector<2x1xf32>
    %212 = vector.multi_reduction <add>, %211, %cst_88 [1] : vector<2x8x1xf32> to vector<2x1xf32>
    %213 = vector.shape_cast %212 : vector<2x1xf32> to vector<2x1x1xf32>
    %214 = tpu.reciprocal %213 {approx = true} : vector<2x1x1xf32> -> vector<2x1x1xf32>
    %215 = vector.broadcast %214 : vector<2x1x1xf32> to vector<2x8x1xf32>
    %216 = arith.mulf %211, %215 : vector<2x8x1xf32>
    %217 = vector.broadcast %216 : vector<2x8x1xf32> to vector<2x8x32xf32>
    %218 = arith.mulf %217, %188 : vector<2x8x32xf32>
    %cst_89 = arith.constant dense<0.000000e+00> : vector<2x32xf32>
    %219 = vector.multi_reduction <add>, %218, %cst_89 [1] : vector<2x8x32xf32> to vector<2x32xf32>
    %220 = vector.extract_strided_slice %155 {offsets = [0, 16, 0], sizes = [2, 8, 32], strides = [1, 1, 1]} : vector<2x24x32xf32> to vector<2x8x32xf32>
    %c0_90 = arith.constant 0 : index
    %c2 = arith.constant 2 : index
    %c0_91 = arith.constant 0 : index
    %c0_92 = arith.constant 0 : index
    %221 = vector.load %arg6[%c0_90, %c2, %c0_91, %c0_92] : memref<1x3x32x32xf32, #tpu.memory_space<vmem>>, vector<1x1x32x32xf32>
    %222 = vector.shape_cast %221 : vector<1x1x32x32xf32> to vector<32x32xf32>
    %223 = arith.truncf %222 : vector<32x32xf32> to vector<32x32xbf16>
    %c0_93 = arith.constant 0 : index
    %c2_94 = arith.constant 2 : index
    %c0_95 = arith.constant 0 : index
    %c0_96 = arith.constant 0 : index
    %224 = vector.load %arg7[%c0_93, %c2_94, %c0_95, %c0_96] : memref<1x3x1x32xf32, #tpu.memory_space<vmem>>, vector<1x1x1x32xf32>
    %225 = vector.shape_cast %224 : vector<1x1x1x32xf32> to vector<1x32xf32>
    %c0_97 = arith.constant 0 : index
    %c2_98 = arith.constant 2 : index
    %c0_99 = arith.constant 0 : index
    %c0_100 = arith.constant 0 : index
    %226 = vector.load %arg8[%c0_97, %c2_98, %c0_99, %c0_100] : memref<1x3x32x1xf32, #tpu.memory_space<vmem>>, vector<1x1x32x1xf32>
    %227 = vector.shape_cast %226 : vector<1x1x32x1xf32> to vector<32x1xf32>
    %228 = arith.truncf %227 : vector<32x1xf32> to vector<32x1xbf16>
    %229 = vector.shape_cast %220 : vector<2x8x32xf32> to vector<16x32xf32>
    %230 = arith.truncf %229 : vector<16x32xf32> to vector<16x32xbf16>
    %cst_101 = arith.constant dense<0.000000e+00> : vector<16x32xf32>
    %231 = tpu.matmul %230, %223, %cst_101 {dimension_numbers = #tpu.dot_dimension_numbers<[1], [0], [0], [1], [0, 0, 1, 1], [], []>} : vector<16x32xbf16>, vector<32x32xbf16>, vector<16x32xf32> -> vector<16x32xf32>
    %232 = vector.broadcast %225 : vector<1x32xf32> to vector<16x32xf32>
    %233 = arith.addf %231, %232 : vector<16x32xf32>
    %234 = math.tanh %233 : vector<16x32xf32>
    %235 = arith.truncf %234 : vector<16x32xf32> to vector<16x32xbf16>
    %cst_102 = arith.constant dense<0.000000e+00> : vector<16x1xf32>
    %236 = tpu.matmul %235, %228, %cst_102 {dimension_numbers = #tpu.dot_dimension_numbers<[1], [0], [0], [1], [0, 0, 1, 1], [], []>} : vector<16x32xbf16>, vector<32x1xbf16>, vector<16x1xf32> -> vector<16x1xf32>
    %237 = vector.shape_cast %236 : vector<16x1xf32> to vector<2x8x1xf32>
    %238 = arith.addf %237, %4 : vector<2x8x1xf32>
    %cst_103 = arith.constant dense<0xFF800000> : vector<2x1xf32>
    %239 = vector.multi_reduction <maximumf>, %238, %cst_103 [1] : vector<2x8x1xf32> to vector<2x1xf32>
    %240 = vector.shape_cast %239 : vector<2x1xf32> to vector<2x1x1xf32>
    %241 = vector.broadcast %240 : vector<2x1x1xf32> to vector<2x8x1xf32>
    %242 = arith.subf %238, %241 : vector<2x8x1xf32>
    %243 = math.exp %242 : vector<2x8x1xf32>
    %cst_104 = arith.constant dense<0.000000e+00> : vector<2x1xf32>
    %244 = vector.multi_reduction <add>, %243, %cst_104 [1] : vector<2x8x1xf32> to vector<2x1xf32>
    %245 = vector.shape_cast %244 : vector<2x1xf32> to vector<2x1x1xf32>
    %246 = tpu.reciprocal %245 {approx = true} : vector<2x1x1xf32> -> vector<2x1x1xf32>
    %247 = vector.broadcast %246 : vector<2x1x1xf32> to vector<2x8x1xf32>
    %248 = arith.mulf %243, %247 : vector<2x8x1xf32>
    %249 = vector.broadcast %248 : vector<2x8x1xf32> to vector<2x8x32xf32>
    %250 = arith.mulf %249, %220 : vector<2x8x32xf32>
    %cst_105 = arith.constant dense<0.000000e+00> : vector<2x32xf32>
    %251 = vector.multi_reduction <add>, %250, %cst_105 [1] : vector<2x8x32xf32> to vector<2x32xf32>
    %252 = tpu.concatenate %187, %219, %251 in 1 : vector<2x32xf32>, vector<2x32xf32>, vector<2x32xf32> -> vector<2x96xf32>
    %c0_106 = arith.constant 0 : index
    %c0_107 = arith.constant 0 : index
    %c0_108 = arith.constant 0 : index
    %253 = vector.load %arg10[%c0_106, %c0_107, %c0_108] : memref<1x2x96xf32, #tpu.memory_space<vmem>>, vector<1x2x96xf32>
    %254 = vector.shape_cast %253 : vector<1x2x96xf32> to vector<2x96xf32>
    %255 = vector.shape_cast %252 : vector<2x96xf32> to vector<1x2x96xf32>
    tpu.vector_store %arg10[%c0_106, %c0_107, %c0_108], %255 {strides = array<i32>} : memref<1x2x96xf32, #tpu.memory_space<vmem>>, vector<1x2x96xf32>,
    return
  }
  func.func @transform_0(%arg0: i32) -> (i32, i32, i32, i32) {
    %c0_i32 = arith.constant 0 : i32
    %c0_i32_0 = arith.constant 0 : i32
    %c0_i32_1 = arith.constant 0 : i32
    %c0_i32_2 = arith.constant 0 : i32
    return %arg0, %c0_i32, %c0_i32_0, %c0_i32_1 : i32, i32, i32, i32
  }
  func.func @transform_1(%arg0: i32) -> (i32, i32, i32, i32) {
    %c0_i32 = arith.constant 0 : i32
    %c0_i32_0 = arith.constant 0 : i32
    %c0_i32_1 = arith.constant 0 : i32
    %c0_i32_2 = arith.constant 0 : i32
    return %arg0, %c0_i32, %c0_i32_0, %c0_i32_1 : i32, i32, i32, i32
  }
  func.func @transform_2(%arg0: i32) -> (i32, i32, i32, i32) {
    %c0_i32 = arith.constant 0 : i32
    %c0_i32_0 = arith.constant 0 : i32
    %c0_i32_1 = arith.constant 0 : i32
    %c0_i32_2 = arith.constant 0 : i32
    return %arg0, %c0_i32, %c0_i32_0, %c0_i32_1 : i32, i32, i32, i32
  }
  func.func @transform_3(%arg0: i32) -> (i32, i32, i32, i32) {
    %c0_i32 = arith.constant 0 : i32
    %c0_i32_0 = arith.constant 0 : i32
    %c0_i32_1 = arith.constant 0 : i32
    %c0_i32_2 = arith.constant 0 : i32
    return %arg0, %c0_i32, %c0_i32_0, %c0_i32_1 : i32, i32, i32, i32
  }
  func.func @transform_4(%arg0: i32) -> (i32, i32, i32, i32) {
    %c0_i32 = arith.constant 0 : i32
    %c0_i32_0 = arith.constant 0 : i32
    %c0_i32_1 = arith.constant 0 : i32
    %c0_i32_2 = arith.constant 0 : i32
    return %arg0, %c0_i32, %c0_i32_0, %c0_i32_1 : i32, i32, i32, i32
  }
  func.func @transform_5(%arg0: i32) -> (i32, i32, i32, i32) {
    %c0_i32 = arith.constant 0 : i32
    %c0_i32_0 = arith.constant 0 : i32
    %c0_i32_1 = arith.constant 0 : i32
    %c0_i32_2 = arith.constant 0 : i32
    return %arg0, %c0_i32, %c0_i32_0, %c0_i32_1 : i32, i32, i32, i32
  }
  func.func @transform_6(%arg0: i32) -> (i32, i32, i32, i32) {
    %c0_i32 = arith.constant 0 : i32
    %c0_i32_0 = arith.constant 0 : i32
    %c0_i32_1 = arith.constant 0 : i32
    %c0_i32_2 = arith.constant 0 : i32
    return %arg0, %c0_i32, %c0_i32_0, %c0_i32_1 : i32, i32, i32, i32
  }
  func.func @transform_7(%arg0: i32) -> (i32, i32, i32, i32) {
    %c0_i32 = arith.constant 0 : i32
    %c0_i32_0 = arith.constant 0 : i32
    %c0_i32_1 = arith.constant 0 : i32
    %c0_i32_2 = arith.constant 0 : i32
    return %arg0, %c0_i32, %c0_i32_0, %c0_i32_1 : i32, i32, i32, i32
  }
  func.func @transform_8(%arg0: i32) -> (i32, i32, i32) {
    %c0_i32 = arith.constant 0 : i32
    %c0_i32_0 = arith.constant 0 : i32
    %c0_i32_1 = arith.constant 0 : i32
    %c0_i32_2 = arith.constant 0 : i32
    return %c0_i32, %c0_i32_0, %c0_i32_1 : i32, i32, i32
  }
  func.func @transform_9(%arg0: i32) -> (i32, i32, i32) {
    %c0_i32 = arith.constant 0 : i32
    %c0_i32_0 = arith.constant 0 : i32
    %c0_i32_1 = arith.constant 0 : i32
    return %arg0, %c0_i32, %c0_i32_0 : i32, i32, i32
  }
}

module attributes {stable_mosaic.version = 11 : i64} {
  func.func @linear_kernel(%arg0: memref<2x96xf32, #tpu.memory_space<vmem>>, %arg1: memref<96x1xf32, #tpu.memory_space<vmem>>, %arg2: memref<1x1xf32, #tpu.memory_space<vmem>>, %arg3: memref<2x1xf32, #tpu.memory_space<vmem>>) attributes {dimension_semantics = [], scalar_prefetch = 0 : i64, scratch_operands = 0 : i64, tpu.core_type = #tpu.core_type<tc>} {
    %c0 = arith.constant 0 : index
    %c0_0 = arith.constant 0 : index
    %0 = vector.load %arg0[%c0, %c0_0] : memref<2x96xf32, #tpu.memory_space<vmem>>, vector<2x96xf32>
    %c0_1 = arith.constant 0 : index
    %c0_2 = arith.constant 0 : index
    %1 = vector.load %arg1[%c0_1, %c0_2] : memref<96x1xf32, #tpu.memory_space<vmem>>, vector<96x1xf32>
    %cst = arith.constant dense<0.000000e+00> : vector<2x1xf32>
    %2 = tpu.matmul %0, %1, %cst {dimension_numbers = #tpu.dot_dimension_numbers<[1], [0], [0], [1], [0, 0, 1, 1], [], []>} : vector<2x96xf32>, vector<96x1xf32>, vector<2x1xf32> -> vector<2x1xf32>
    %c0_3 = arith.constant 0 : index
    %c0_4 = arith.constant 0 : index
    %3 = vector.load %arg2[%c0_3, %c0_4] : memref<1x1xf32, #tpu.memory_space<vmem>>, vector<1x1xf32>
    %4 = vector.broadcast %3 : vector<1x1xf32> to vector<2x1xf32>
    %5 = arith.addf %2, %4 : vector<2x1xf32>
    %c0_5 = arith.constant 0 : index
    %c0_6 = arith.constant 0 : index
    %6 = vector.load %arg3[%c0_5, %c0_6] : memref<2x1xf32, #tpu.memory_space<vmem>>, vector<2x1xf32>
    tpu.vector_store %arg3[%c0_5, %c0_6], %5 {strides = array<i32>} : memref<2x1xf32, #tpu.memory_space<vmem>>, vector<2x1xf32>,
    return
  }
}

module attributes {stable_mosaic.version = 11 : i64} {
  func.func @gat_readout_kernel(%arg0: i32, %arg1: memref<1x2x8x32xf32, #tpu.memory_space<vmem>>, %arg2: memref<1x2x8x8xf32, #tpu.memory_space<vmem>>, %arg3: memref<1x2x32x32xf32, #tpu.memory_space<vmem>>, %arg4: memref<1x2x4x8xf32, #tpu.memory_space<vmem>>, %arg5: memref<1x2x4x8xf32, #tpu.memory_space<vmem>>, %arg6: memref<1x1x32x32xf32, #tpu.memory_space<vmem>>, %arg7: memref<1x1x1x32xf32, #tpu.memory_space<vmem>>, %arg8: memref<1x1x32x1xf32, #tpu.memory_space<vmem>>, %arg9: memref<2x8x1xf32, #tpu.memory_space<vmem>>, %arg10: memref<1x2x32xf32, #tpu.memory_space<vmem>>) attributes {dimension_semantics = [#tpu.dimension_semantics<parallel>], iteration_bounds = array<i64: 6>, scalar_prefetch = 0 : i64, scratch_operands = 0 : i64, tpu.core_type = #tpu.core_type<tc>, window_params = [{transform_indices = @transform_0, window_bounds = array<i64: 1, 2, 8, 32>}, {transform_indices = @transform_1, window_bounds = array<i64: 1, 2, 8, 8>}, {transform_indices = @transform_2, window_bounds = array<i64: 1, 2, 32, 32>}, {transform_indices = @transform_3, window_bounds = array<i64: 1, 2, 4, 8>}, {transform_indices = @transform_4, window_bounds = array<i64: 1, 2, 4, 8>}, {transform_indices = @transform_5, window_bounds = array<i64: 1, 1, 32, 32>}, {transform_indices = @transform_6, window_bounds = array<i64: 1, 1, 1, 32>}, {transform_indices = @transform_7, window_bounds = array<i64: 1, 1, 32, 1>}, {pipeline_mode = #tpu.pipeline_mode<synchronous>, transform_indices = @transform_8, window_bounds = array<i64: 2, 8, 1>}, {transform_indices = @transform_9, window_bounds = array<i64: 1, 2, 32>}]} {
    %c0 = arith.constant 0 : index
    %c0_0 = arith.constant 0 : index
    %c0_1 = arith.constant 0 : index
    %c0_2 = arith.constant 0 : index
    %0 = vector.load %arg1[%c0, %c0_0, %c0_1, %c0_2] : memref<1x2x8x32xf32, #tpu.memory_space<vmem>>, vector<1x2x8x32xf32>
    %1 = vector.shape_cast %0 : vector<1x2x8x32xf32> to vector<2x8x32xf32>
    %c0_3 = arith.constant 0 : index
    %c0_4 = arith.constant 0 : index
    %c0_5 = arith.constant 0 : index
    %c0_6 = arith.constant 0 : index
    %2 = vector.load %arg2[%c0_3, %c0_4, %c0_5, %c0_6] : memref<1x2x8x8xf32, #tpu.memory_space<vmem>>, vector<1x2x8x8xf32>
    %3 = vector.shape_cast %2 : vector<1x2x8x8xf32> to vector<2x8x8xf32>
    %c0_7 = arith.constant 0 : index
    %c0_8 = arith.constant 0 : index
    %c0_9 = arith.constant 0 : index
    %4 = vector.load %arg9[%c0_7, %c0_8, %c0_9] : memref<2x8x1xf32, #tpu.memory_space<vmem>>, vector<2x8x1xf32>
    %c0_10 = arith.constant 0 : index
    %c0_11 = arith.constant 0 : index
    %c0_12 = arith.constant 0 : index
    %c0_13 = arith.constant 0 : index
    %5 = vector.load %arg3[%c0_10, %c0_11, %c0_12, %c0_13] : memref<1x2x32x32xf32, #tpu.memory_space<vmem>>, vector<1x1x32x32xf32>
    %6 = vector.shape_cast %5 : vector<1x1x32x32xf32> to vector<32x32xf32>
    %7 = arith.truncf %6 : vector<32x32xf32> to vector<32x32xbf16>
    %c0_14 = arith.constant 0 : index
    %c0_15 = arith.constant 0 : index
    %c0_16 = arith.constant 0 : index
    %c0_17 = arith.constant 0 : index
    %8 = vector.load %arg4[%c0_14, %c0_15, %c0_16, %c0_17] : memref<1x2x4x8xf32, #tpu.memory_space<vmem>>, vector<1x1x4x8xf32>
    %9 = vector.shape_cast %8 : vector<1x1x4x8xf32> to vector<4x8xf32>
    %c0_18 = arith.constant 0 : index
    %c0_19 = arith.constant 0 : index
    %c0_20 = arith.constant 0 : index
    %c0_21 = arith.constant 0 : index
    %10 = vector.load %arg5[%c0_18, %c0_19, %c0_20, %c0_21] : memref<1x2x4x8xf32, #tpu.memory_space<vmem>>, vector<1x1x4x8xf32>
    %11 = vector.shape_cast %10 : vector<1x1x4x8xf32> to vector<4x8xf32>
    %12 = vector.shape_cast %1 : vector<2x8x32xf32> to vector<16x32xf32>
    %13 = arith.truncf %12 : vector<16x32xf32> to vector<16x32xbf16>
    %cst = arith.constant dense<0.000000e+00> : vector<16x32xf32>
    %14 = tpu.matmul %13, %7, %cst {dimension_numbers = #tpu.dot_dimension_numbers<[1], [0], [0], [1], [0, 0, 1, 1], [], []>} : vector<16x32xbf16>, vector<32x32xbf16>, vector<16x32xf32> -> vector<16x32xf32>
    %15 = vector.shape_cast %14 : vector<16x32xf32> to vector<2x8x32xf32>
    %16 = vector.extract_strided_slice %15 {offsets = [0, 0, 0], sizes = [2, 8, 8], strides = [1, 1, 1]} : vector<2x8x32xf32> to vector<2x8x8xf32>
    %17 = vector.extract_strided_slice %15 {offsets = [0, 0, 8], sizes = [2, 8, 8], strides = [1, 1, 1]} : vector<2x8x32xf32> to vector<2x8x8xf32>
    %18 = vector.extract_strided_slice %15 {offsets = [0, 0, 16], sizes = [2, 8, 8], strides = [1, 1, 1]} : vector<2x8x32xf32> to vector<2x8x8xf32>
    %19 = vector.extract_strided_slice %15 {offsets = [0, 0, 24], sizes = [2, 8, 8], strides = [1, 1, 1]} : vector<2x8x32xf32> to vector<2x8x8xf32>
    %20 = vector.shape_cast %16 : vector<2x8x8xf32> to vector<2x1x8x8xf32>
    %21 = vector.shape_cast %17 : vector<2x8x8xf32> to vector<2x1x8x8xf32>
    %22 = vector.shape_cast %18 : vector<2x8x8xf32> to vector<2x1x8x8xf32>
    %23 = vector.shape_cast %19 : vector<2x8x8xf32> to vector<2x1x8x8xf32>
    %24 = tpu.concatenate %20, %21, %22, %23 in 1 : vector<2x1x8x8xf32>, vector<2x1x8x8xf32>, vector<2x1x8x8xf32>, vector<2x1x8x8xf32> -> vector<2x4x8x8xf32>
    %25 = vector.shape_cast %9 : vector<4x8xf32> to vector<1x4x1x8xf32>
    %26 = vector.broadcast %25 : vector<1x4x1x8xf32> to vector<2x4x8x8xf32>
    %27 = arith.mulf %24, %26 : vector<2x4x8x8xf32>
    %cst_22 = arith.constant dense<0.000000e+00> : vector<2x4x8xf32>
    %28 = vector.multi_reduction <add>, %27, %cst_22 [3] : vector<2x4x8x8xf32> to vector<2x4x8xf32>
    %29 = vector.shape_cast %11 : vector<4x8xf32> to vector<1x4x1x8xf32>
    %30 = vector.broadcast %29 : vector<1x4x1x8xf32> to vector<2x4x8x8xf32>
    %31 = arith.mulf %24, %30 : vector<2x4x8x8xf32>
    %cst_23 = arith.constant dense<0.000000e+00> : vector<2x4x8xf32>
    %32 = vector.multi_reduction <add>, %31, %cst_23 [3] : vector<2x4x8x8xf32> to vector<2x4x8xf32>
    %33 = vector.shape_cast %28 : vector<2x4x8xf32> to vector<2x4x8x1xf32>
    %34 = vector.shape_cast %32 : vector<2x4x8xf32> to vector<2x4x1x8xf32>
    %35 = vector.broadcast %33 : vector<2x4x8x1xf32> to vector<2x4x8x8xf32>
    %36 = vector.broadcast %34 : vector<2x4x1x8xf32> to vector<2x4x8x8xf32>
    %37 = arith.addf %35, %36 : vector<2x4x8x8xf32>
    %cst_24 = arith.constant 0.000000e+00 : f32
    %38 = vector.broadcast %cst_24 : f32 to vector<2x4x8x8xf32>
    %39 = arith.cmpf ogt, %37, %38 : vector<2x4x8x8xf32>
    %cst_25 = arith.constant 2.000000e-01 : f32
    %40 = vector.broadcast %cst_25 : f32 to vector<2x4x8x8xf32>
    %41 = arith.mulf %40, %37 : vector<2x4x8x8xf32>
    %42 = arith.select %39, %37, %41 : vector<2x4x8x8xi1>, vector<2x4x8x8xf32>
    %43 = vector.shape_cast %3 : vector<2x8x8xf32> to vector<2x1x8x8xf32>
    %cst_26 = arith.constant 0.000000e+00 : f32
    %44 = vector.broadcast %cst_26 : f32 to vector<2x1x8x8xf32>
    %45 = arith.cmpf ogt, %43, %44 : vector<2x1x8x8xf32>
    %cst_27 = arith.constant -1.000000e+09 : f32
    %46 = vector.shape_cast %45 : vector<2x1x8x8xi1> to vector<2x1x8x8xi1>
    %47 = vector.broadcast %46 : vector<2x1x8x8xi1> to vector<2x4x8x8xi1>
    %48 = vector.broadcast %cst_27 : f32 to vector<2x4x8x8xf32>
    %49 = arith.select %47, %42, %48 : vector<2x4x8x8xi1>, vector<2x4x8x8xf32>
    %cst_28 = arith.constant dense<0xFF800000> : vector<2x4x8xf32>
    %50 = vector.multi_reduction <maximumf>, %49, %cst_28 [3] : vector<2x4x8x8xf32> to vector<2x4x8xf32>
    %51 = vector.shape_cast %50 : vector<2x4x8xf32> to vector<2x4x8x1xf32>
    %52 = vector.broadcast %51 : vector<2x4x8x1xf32> to vector<2x4x8x8xf32>
    %53 = arith.subf %49, %52 : vector<2x4x8x8xf32>
    %54 = math.exp %53 : vector<2x4x8x8xf32>
    %cst_29 = arith.constant dense<0.000000e+00> : vector<2x4x8xf32>
    %55 = vector.multi_reduction <add>, %54, %cst_29 [3] : vector<2x4x8x8xf32> to vector<2x4x8xf32>
    %56 = vector.shape_cast %55 : vector<2x4x8xf32> to vector<2x4x8x1xf32>
    %57 = tpu.reciprocal %56 {approx = true} : vector<2x4x8x1xf32> -> vector<2x4x8x1xf32>
    %58 = vector.broadcast %57 : vector<2x4x8x1xf32> to vector<2x4x8x8xf32>
    %59 = arith.mulf %54, %58 : vector<2x4x8x8xf32>
    %60 = vector.shape_cast %59 : vector<2x4x8x8xf32> to vector<8x8x8xf32>
    %61 = arith.truncf %60 : vector<8x8x8xf32> to vector<8x8x8xbf16>
    %62 = vector.shape_cast %24 : vector<2x4x8x8xf32> to vector<8x8x8xf32>
    %63 = arith.truncf %62 : vector<8x8x8xf32> to vector<8x8x8xbf16>
    %cst_30 = arith.constant dense<0.000000e+00> : vector<8x8x8xf32>
    %64 = tpu.matmul %61, %63, %cst_30 {dimension_numbers = #tpu.dot_dimension_numbers<[2], [1], [1], [2], [0, 0, 0, 1, 1, 2], [0], [0]>} : vector<8x8x8xbf16>, vector<8x8x8xbf16>, vector<8x8x8xf32> -> vector<8x8x8xf32>
    %65 = vector.shape_cast %64 : vector<8x8x8xf32> to vector<2x4x8x8xf32>
    %66 = vector.extract_strided_slice %65 {offsets = [0, 0, 0, 0], sizes = [2, 1, 8, 8], strides = [1, 1, 1, 1]} : vector<2x4x8x8xf32> to vector<2x1x8x8xf32>
    %67 = vector.shape_cast %66 : vector<2x1x8x8xf32> to vector<2x8x8xf32>
    %68 = vector.extract_strided_slice %65 {offsets = [0, 1, 0, 0], sizes = [2, 1, 8, 8], strides = [1, 1, 1, 1]} : vector<2x4x8x8xf32> to vector<2x1x8x8xf32>
    %69 = vector.shape_cast %68 : vector<2x1x8x8xf32> to vector<2x8x8xf32>
    %70 = vector.extract_strided_slice %65 {offsets = [0, 2, 0, 0], sizes = [2, 1, 8, 8], strides = [1, 1, 1, 1]} : vector<2x4x8x8xf32> to vector<2x1x8x8xf32>
    %71 = vector.shape_cast %70 : vector<2x1x8x8xf32> to vector<2x8x8xf32>
    %72 = vector.extract_strided_slice %65 {offsets = [0, 3, 0, 0], sizes = [2, 1, 8, 8], strides = [1, 1, 1, 1]} : vector<2x4x8x8xf32> to vector<2x1x8x8xf32>
    %73 = vector.shape_cast %72 : vector<2x1x8x8xf32> to vector<2x8x8xf32>
    %74 = tpu.concatenate %67, %69, %71, %73 in 2 : vector<2x8x8xf32>, vector<2x8x8xf32>, vector<2x8x8xf32>, vector<2x8x8xf32> -> vector<2x8x32xf32>
    %cst_31 = arith.constant 0.000000e+00 : f32
    %75 = vector.broadcast %cst_31 : f32 to vector<2x8x32xf32>
    %76 = arith.cmpf ogt, %74, %75 : vector<2x8x32xf32>
    %cst_32 = arith.constant 0.000000e+00 : f32
    %77 = vector.broadcast %cst_32 : f32 to vector<2x8x32xf32>
    %78 = arith.minimumf %74, %77 : vector<2x8x32xf32>
    %79 = math.exp %78 : vector<2x8x32xf32>
    %cst_33 = arith.constant 1.000000e+00 : f32
    %80 = vector.broadcast %cst_33 : f32 to vector<2x8x32xf32>
    %81 = arith.subf %79, %80 : vector<2x8x32xf32>
    %82 = arith.select %76, %74, %81 : vector<2x8x32xi1>, vector<2x8x32xf32>
    %c0_34 = arith.constant 0 : index
    %c1 = arith.constant 1 : index
    %c0_35 = arith.constant 0 : index
    %c0_36 = arith.constant 0 : index
    %83 = vector.load %arg3[%c0_34, %c1, %c0_35, %c0_36] : memref<1x2x32x32xf32, #tpu.memory_space<vmem>>, vector<1x1x32x32xf32>
    %84 = vector.shape_cast %83 : vector<1x1x32x32xf32> to vector<32x32xf32>
    %85 = arith.truncf %84 : vector<32x32xf32> to vector<32x32xbf16>
    %c0_37 = arith.constant 0 : index
    %c1_38 = arith.constant 1 : index
    %c0_39 = arith.constant 0 : index
    %c0_40 = arith.constant 0 : index
    %86 = vector.load %arg4[%c0_37, %c1_38, %c0_39, %c0_40] : memref<1x2x4x8xf32, #tpu.memory_space<vmem>>, vector<1x1x4x8xf32>
    %87 = vector.shape_cast %86 : vector<1x1x4x8xf32> to vector<4x8xf32>
    %c0_41 = arith.constant 0 : index
    %c1_42 = arith.constant 1 : index
    %c0_43 = arith.constant 0 : index
    %c0_44 = arith.constant 0 : index
    %88 = vector.load %arg5[%c0_41, %c1_42, %c0_43, %c0_44] : memref<1x2x4x8xf32, #tpu.memory_space<vmem>>, vector<1x1x4x8xf32>
    %89 = vector.shape_cast %88 : vector<1x1x4x8xf32> to vector<4x8xf32>
    %90 = vector.shape_cast %82 : vector<2x8x32xf32> to vector<16x32xf32>
    %91 = arith.truncf %90 : vector<16x32xf32> to vector<16x32xbf16>
    %cst_45 = arith.constant dense<0.000000e+00> : vector<16x32xf32>
    %92 = tpu.matmul %91, %85, %cst_45 {dimension_numbers = #tpu.dot_dimension_numbers<[1], [0], [0], [1], [0, 0, 1, 1], [], []>} : vector<16x32xbf16>, vector<32x32xbf16>, vector<16x32xf32> -> vector<16x32xf32>
    %93 = vector.shape_cast %92 : vector<16x32xf32> to vector<2x8x32xf32>
    %94 = vector.extract_strided_slice %93 {offsets = [0, 0, 0], sizes = [2, 8, 8], strides = [1, 1, 1]} : vector<2x8x32xf32> to vector<2x8x8xf32>
    %95 = vector.extract_strided_slice %93 {offsets = [0, 0, 8], sizes = [2, 8, 8], strides = [1, 1, 1]} : vector<2x8x32xf32> to vector<2x8x8xf32>
    %96 = vector.extract_strided_slice %93 {offsets = [0, 0, 16], sizes = [2, 8, 8], strides = [1, 1, 1]} : vector<2x8x32xf32> to vector<2x8x8xf32>
    %97 = vector.extract_strided_slice %93 {offsets = [0, 0, 24], sizes = [2, 8, 8], strides = [1, 1, 1]} : vector<2x8x32xf32> to vector<2x8x8xf32>
    %98 = vector.shape_cast %94 : vector<2x8x8xf32> to vector<2x1x8x8xf32>
    %99 = vector.shape_cast %95 : vector<2x8x8xf32> to vector<2x1x8x8xf32>
    %100 = vector.shape_cast %96 : vector<2x8x8xf32> to vector<2x1x8x8xf32>
    %101 = vector.shape_cast %97 : vector<2x8x8xf32> to vector<2x1x8x8xf32>
    %102 = tpu.concatenate %98, %99, %100, %101 in 1 : vector<2x1x8x8xf32>, vector<2x1x8x8xf32>, vector<2x1x8x8xf32>, vector<2x1x8x8xf32> -> vector<2x4x8x8xf32>
    %103 = vector.shape_cast %87 : vector<4x8xf32> to vector<1x4x1x8xf32>
    %104 = vector.broadcast %103 : vector<1x4x1x8xf32> to vector<2x4x8x8xf32>
    %105 = arith.mulf %102, %104 : vector<2x4x8x8xf32>
    %cst_46 = arith.constant dense<0.000000e+00> : vector<2x4x8xf32>
    %106 = vector.multi_reduction <add>, %105, %cst_46 [3] : vector<2x4x8x8xf32> to vector<2x4x8xf32>
    %107 = vector.shape_cast %89 : vector<4x8xf32> to vector<1x4x1x8xf32>
    %108 = vector.broadcast %107 : vector<1x4x1x8xf32> to vector<2x4x8x8xf32>
    %109 = arith.mulf %102, %108 : vector<2x4x8x8xf32>
    %cst_47 = arith.constant dense<0.000000e+00> : vector<2x4x8xf32>
    %110 = vector.multi_reduction <add>, %109, %cst_47 [3] : vector<2x4x8x8xf32> to vector<2x4x8xf32>
    %111 = vector.shape_cast %106 : vector<2x4x8xf32> to vector<2x4x8x1xf32>
    %112 = vector.shape_cast %110 : vector<2x4x8xf32> to vector<2x4x1x8xf32>
    %113 = vector.broadcast %111 : vector<2x4x8x1xf32> to vector<2x4x8x8xf32>
    %114 = vector.broadcast %112 : vector<2x4x1x8xf32> to vector<2x4x8x8xf32>
    %115 = arith.addf %113, %114 : vector<2x4x8x8xf32>
    %cst_48 = arith.constant 0.000000e+00 : f32
    %116 = vector.broadcast %cst_48 : f32 to vector<2x4x8x8xf32>
    %117 = arith.cmpf ogt, %115, %116 : vector<2x4x8x8xf32>
    %cst_49 = arith.constant 2.000000e-01 : f32
    %118 = vector.broadcast %cst_49 : f32 to vector<2x4x8x8xf32>
    %119 = arith.mulf %118, %115 : vector<2x4x8x8xf32>
    %120 = arith.select %117, %115, %119 : vector<2x4x8x8xi1>, vector<2x4x8x8xf32>
    %121 = vector.shape_cast %3 : vector<2x8x8xf32> to vector<2x1x8x8xf32>
    %cst_50 = arith.constant 0.000000e+00 : f32
    %122 = vector.broadcast %cst_50 : f32 to vector<2x1x8x8xf32>
    %123 = arith.cmpf ogt, %121, %122 : vector<2x1x8x8xf32>
    %cst_51 = arith.constant -1.000000e+09 : f32
    %124 = vector.shape_cast %123 : vector<2x1x8x8xi1> to vector<2x1x8x8xi1>
    %125 = vector.broadcast %124 : vector<2x1x8x8xi1> to vector<2x4x8x8xi1>
    %126 = vector.broadcast %cst_51 : f32 to vector<2x4x8x8xf32>
    %127 = arith.select %125, %120, %126 : vector<2x4x8x8xi1>, vector<2x4x8x8xf32>
    %cst_52 = arith.constant dense<0xFF800000> : vector<2x4x8xf32>
    %128 = vector.multi_reduction <maximumf>, %127, %cst_52 [3] : vector<2x4x8x8xf32> to vector<2x4x8xf32>
    %129 = vector.shape_cast %128 : vector<2x4x8xf32> to vector<2x4x8x1xf32>
    %130 = vector.broadcast %129 : vector<2x4x8x1xf32> to vector<2x4x8x8xf32>
    %131 = arith.subf %127, %130 : vector<2x4x8x8xf32>
    %132 = math.exp %131 : vector<2x4x8x8xf32>
    %cst_53 = arith.constant dense<0.000000e+00> : vector<2x4x8xf32>
    %133 = vector.multi_reduction <add>, %132, %cst_53 [3] : vector<2x4x8x8xf32> to vector<2x4x8xf32>
    %134 = vector.shape_cast %133 : vector<2x4x8xf32> to vector<2x4x8x1xf32>
    %135 = tpu.reciprocal %134 {approx = true} : vector<2x4x8x1xf32> -> vector<2x4x8x1xf32>
    %136 = vector.broadcast %135 : vector<2x4x8x1xf32> to vector<2x4x8x8xf32>
    %137 = arith.mulf %132, %136 : vector<2x4x8x8xf32>
    %138 = vector.shape_cast %137 : vector<2x4x8x8xf32> to vector<8x8x8xf32>
    %139 = arith.truncf %138 : vector<8x8x8xf32> to vector<8x8x8xbf16>
    %140 = vector.shape_cast %102 : vector<2x4x8x8xf32> to vector<8x8x8xf32>
    %141 = arith.truncf %140 : vector<8x8x8xf32> to vector<8x8x8xbf16>
    %cst_54 = arith.constant dense<0.000000e+00> : vector<8x8x8xf32>
    %142 = tpu.matmul %139, %141, %cst_54 {dimension_numbers = #tpu.dot_dimension_numbers<[2], [1], [1], [2], [0, 0, 0, 1, 1, 2], [0], [0]>} : vector<8x8x8xbf16>, vector<8x8x8xbf16>, vector<8x8x8xf32> -> vector<8x8x8xf32>
    %143 = vector.shape_cast %142 : vector<8x8x8xf32> to vector<2x4x8x8xf32>
    %144 = vector.extract_strided_slice %143 {offsets = [0, 0, 0, 0], sizes = [2, 1, 8, 8], strides = [1, 1, 1, 1]} : vector<2x4x8x8xf32> to vector<2x1x8x8xf32>
    %145 = vector.shape_cast %144 : vector<2x1x8x8xf32> to vector<2x8x8xf32>
    %146 = vector.extract_strided_slice %143 {offsets = [0, 1, 0, 0], sizes = [2, 1, 8, 8], strides = [1, 1, 1, 1]} : vector<2x4x8x8xf32> to vector<2x1x8x8xf32>
    %147 = vector.shape_cast %146 : vector<2x1x8x8xf32> to vector<2x8x8xf32>
    %148 = vector.extract_strided_slice %143 {offsets = [0, 2, 0, 0], sizes = [2, 1, 8, 8], strides = [1, 1, 1, 1]} : vector<2x4x8x8xf32> to vector<2x1x8x8xf32>
    %149 = vector.shape_cast %148 : vector<2x1x8x8xf32> to vector<2x8x8xf32>
    %150 = vector.extract_strided_slice %143 {offsets = [0, 3, 0, 0], sizes = [2, 1, 8, 8], strides = [1, 1, 1, 1]} : vector<2x4x8x8xf32> to vector<2x1x8x8xf32>
    %151 = vector.shape_cast %150 : vector<2x1x8x8xf32> to vector<2x8x8xf32>
    %152 = tpu.concatenate %145, %147, %149, %151 in 2 : vector<2x8x8xf32>, vector<2x8x8xf32>, vector<2x8x8xf32>, vector<2x8x8xf32> -> vector<2x8x32xf32>
    %153 = arith.addf %152, %1 : vector<2x8x32xf32>
    %cst_55 = arith.constant 0.000000e+00 : f32
    %154 = vector.broadcast %cst_55 : f32 to vector<2x8x32xf32>
    %155 = arith.maximumf %153, %154 : vector<2x8x32xf32>
    %c0_56 = arith.constant 0 : index
    %c0_57 = arith.constant 0 : index
    %c0_58 = arith.constant 0 : index
    %c0_59 = arith.constant 0 : index
    %156 = vector.load %arg6[%c0_56, %c0_57, %c0_58, %c0_59] : memref<1x1x32x32xf32, #tpu.memory_space<vmem>>, vector<1x1x32x32xf32>
    %157 = vector.shape_cast %156 : vector<1x1x32x32xf32> to vector<32x32xf32>
    %158 = arith.truncf %157 : vector<32x32xf32> to vector<32x32xbf16>
    %c0_60 = arith.constant 0 : index
    %c0_61 = arith.constant 0 : index
    %c0_62 = arith.constant 0 : index
    %c0_63 = arith.constant 0 : index
    %159 = vector.load %arg7[%c0_60, %c0_61, %c0_62, %c0_63] : memref<1x1x1x32xf32, #tpu.memory_space<vmem>>, vector<1x1x1x32xf32>
    %160 = vector.shape_cast %159 : vector<1x1x1x32xf32> to vector<1x32xf32>
    %c0_64 = arith.constant 0 : index
    %c0_65 = arith.constant 0 : index
    %c0_66 = arith.constant 0 : index
    %c0_67 = arith.constant 0 : index
    %161 = vector.load %arg8[%c0_64, %c0_65, %c0_66, %c0_67] : memref<1x1x32x1xf32, #tpu.memory_space<vmem>>, vector<1x1x32x1xf32>
    %162 = vector.shape_cast %161 : vector<1x1x32x1xf32> to vector<32x1xf32>
    %163 = arith.truncf %162 : vector<32x1xf32> to vector<32x1xbf16>
    %164 = vector.shape_cast %155 : vector<2x8x32xf32> to vector<16x32xf32>
    %165 = arith.truncf %164 : vector<16x32xf32> to vector<16x32xbf16>
    %cst_68 = arith.constant dense<0.000000e+00> : vector<16x32xf32>
    %166 = tpu.matmul %165, %158, %cst_68 {dimension_numbers = #tpu.dot_dimension_numbers<[1], [0], [0], [1], [0, 0, 1, 1], [], []>} : vector<16x32xbf16>, vector<32x32xbf16>, vector<16x32xf32> -> vector<16x32xf32>
    %167 = vector.broadcast %160 : vector<1x32xf32> to vector<16x32xf32>
    %168 = arith.addf %166, %167 : vector<16x32xf32>
    %169 = math.tanh %168 : vector<16x32xf32>
    %170 = arith.truncf %169 : vector<16x32xf32> to vector<16x32xbf16>
    %cst_69 = arith.constant dense<0.000000e+00> : vector<16x1xf32>
    %171 = tpu.matmul %170, %163, %cst_69 {dimension_numbers = #tpu.dot_dimension_numbers<[1], [0], [0], [1], [0, 0, 1, 1], [], []>} : vector<16x32xbf16>, vector<32x1xbf16>, vector<16x1xf32> -> vector<16x1xf32>
    %172 = vector.shape_cast %171 : vector<16x1xf32> to vector<2x8x1xf32>
    %173 = arith.addf %172, %4 : vector<2x8x1xf32>
    %cst_70 = arith.constant dense<0xFF800000> : vector<2x1xf32>
    %174 = vector.multi_reduction <maximumf>, %173, %cst_70 [1] : vector<2x8x1xf32> to vector<2x1xf32>
    %175 = vector.shape_cast %174 : vector<2x1xf32> to vector<2x1x1xf32>
    %176 = vector.broadcast %175 : vector<2x1x1xf32> to vector<2x8x1xf32>
    %177 = arith.subf %173, %176 : vector<2x8x1xf32>
    %178 = math.exp %177 : vector<2x8x1xf32>
    %cst_71 = arith.constant dense<0.000000e+00> : vector<2x1xf32>
    %179 = vector.multi_reduction <add>, %178, %cst_71 [1] : vector<2x8x1xf32> to vector<2x1xf32>
    %180 = vector.shape_cast %179 : vector<2x1xf32> to vector<2x1x1xf32>
    %181 = tpu.reciprocal %180 {approx = true} : vector<2x1x1xf32> -> vector<2x1x1xf32>
    %182 = vector.broadcast %181 : vector<2x1x1xf32> to vector<2x8x1xf32>
    %183 = arith.mulf %178, %182 : vector<2x8x1xf32>
    %184 = vector.broadcast %183 : vector<2x8x1xf32> to vector<2x8x32xf32>
    %185 = arith.mulf %184, %155 : vector<2x8x32xf32>
    %cst_72 = arith.constant dense<0.000000e+00> : vector<2x32xf32>
    %186 = vector.multi_reduction <add>, %185, %cst_72 [1] : vector<2x8x32xf32> to vector<2x32xf32>
    %c0_73 = arith.constant 0 : index
    %c0_74 = arith.constant 0 : index
    %c0_75 = arith.constant 0 : index
    %187 = vector.load %arg10[%c0_73, %c0_74, %c0_75] : memref<1x2x32xf32, #tpu.memory_space<vmem>>, vector<1x2x32xf32>
    %188 = vector.shape_cast %187 : vector<1x2x32xf32> to vector<2x32xf32>
    %189 = vector.shape_cast %186 : vector<2x32xf32> to vector<1x2x32xf32>
    tpu.vector_store %arg10[%c0_73, %c0_74, %c0_75], %189 {strides = array<i32>} : memref<1x2x32xf32, #tpu.memory_space<vmem>>, vector<1x2x32xf32>,
    return
  }
  func.func @transform_0(%arg0: i32) -> (i32, i32, i32, i32) {
    %c0_i32 = arith.constant 0 : i32
    %c0_i32_0 = arith.constant 0 : i32
    %c0_i32_1 = arith.constant 0 : i32
    %c0_i32_2 = arith.constant 0 : i32
    return %arg0, %c0_i32, %c0_i32_0, %c0_i32_1 : i32, i32, i32, i32
  }
  func.func @transform_1(%arg0: i32) -> (i32, i32, i32, i32) {
    %c0_i32 = arith.constant 0 : i32
    %c0_i32_0 = arith.constant 0 : i32
    %c0_i32_1 = arith.constant 0 : i32
    %c0_i32_2 = arith.constant 0 : i32
    return %arg0, %c0_i32, %c0_i32_0, %c0_i32_1 : i32, i32, i32, i32
  }
  func.func @transform_2(%arg0: i32) -> (i32, i32, i32, i32) {
    %c0_i32 = arith.constant 0 : i32
    %c0_i32_0 = arith.constant 0 : i32
    %c0_i32_1 = arith.constant 0 : i32
    %c0_i32_2 = arith.constant 0 : i32
    return %arg0, %c0_i32, %c0_i32_0, %c0_i32_1 : i32, i32, i32, i32
  }
  func.func @transform_3(%arg0: i32) -> (i32, i32, i32, i32) {
    %c0_i32 = arith.constant 0 : i32
    %c0_i32_0 = arith.constant 0 : i32
    %c0_i32_1 = arith.constant 0 : i32
    %c0_i32_2 = arith.constant 0 : i32
    return %arg0, %c0_i32, %c0_i32_0, %c0_i32_1 : i32, i32, i32, i32
  }
  func.func @transform_4(%arg0: i32) -> (i32, i32, i32, i32) {
    %c0_i32 = arith.constant 0 : i32
    %c0_i32_0 = arith.constant 0 : i32
    %c0_i32_1 = arith.constant 0 : i32
    %c0_i32_2 = arith.constant 0 : i32
    return %arg0, %c0_i32, %c0_i32_0, %c0_i32_1 : i32, i32, i32, i32
  }
  func.func @transform_5(%arg0: i32) -> (i32, i32, i32, i32) {
    %c0_i32 = arith.constant 0 : i32
    %c0_i32_0 = arith.constant 0 : i32
    %c0_i32_1 = arith.constant 0 : i32
    %c0_i32_2 = arith.constant 0 : i32
    return %arg0, %c0_i32, %c0_i32_0, %c0_i32_1 : i32, i32, i32, i32
  }
  func.func @transform_6(%arg0: i32) -> (i32, i32, i32, i32) {
    %c0_i32 = arith.constant 0 : i32
    %c0_i32_0 = arith.constant 0 : i32
    %c0_i32_1 = arith.constant 0 : i32
    %c0_i32_2 = arith.constant 0 : i32
    return %arg0, %c0_i32, %c0_i32_0, %c0_i32_1 : i32, i32, i32, i32
  }
  func.func @transform_7(%arg0: i32) -> (i32, i32, i32, i32) {
    %c0_i32 = arith.constant 0 : i32
    %c0_i32_0 = arith.constant 0 : i32
    %c0_i32_1 = arith.constant 0 : i32
    %c0_i32_2 = arith.constant 0 : i32
    return %arg0, %c0_i32, %c0_i32_0, %c0_i32_1 : i32, i32, i32, i32
  }
  func.func @transform_8(%arg0: i32) -> (i32, i32, i32) {
    %c0_i32 = arith.constant 0 : i32
    %c0_i32_0 = arith.constant 0 : i32
    %c0_i32_1 = arith.constant 0 : i32
    %c0_i32_2 = arith.constant 0 : i32
    return %c0_i32, %c0_i32_0, %c0_i32_1 : i32, i32, i32
  }
  func.func @transform_9(%arg0: i32) -> (i32, i32, i32) {
    %c0_i32 = arith.constant 0 : i32
    %c0_i32_0 = arith.constant 0 : i32
    %c0_i32_1 = arith.constant 0 : i32
    return %arg0, %c0_i32, %c0_i32_0 : i32, i32, i32
  }
}

</mosaic_0001>

<bundles_post_ra>
// kernel: custom-call.38
= control target key start
LH: loop header
LB: loop body
LE: loop exit
PB: predicated region body
PF: predicated region fallthrough
CT: control target
= control target key end

     0   :  { %s6_s0 = inlined_call_operand.vmem [shape: bf16[2,8], index: 0, kind: output, shape index: {}]  }

// kernel: custom-call.39
= control target key start
LH: loop header
LB: loop body
LE: loop exit
PB: predicated region body
PF: predicated region fallthrough
CT: control target
= control target key end

     0   :  { %s6_s0 = inlined_call_operand.vmem [shape: f32[2,8], index: 0, kind: output, shape index: {}]  }

// kernel: custom-call.42
= control target key start
LH: loop header
LB: loop body
LE: loop exit
PB: predicated region body
PF: predicated region fallthrough
CT: control target
= control target key end

     0   :  { %s6_s0 = inlined_call_operand.vmem [shape: bf16[2,4], index: 0, kind: output, shape index: {}]  }

// kernel: custom-call.43
= control target key start
LH: loop header
LB: loop body
LE: loop exit
PB: predicated region body
PF: predicated region fallthrough
CT: control target
= control target key end

     0   :  { %s6_s0 = inlined_call_operand.vmem [shape: f32[2,4], index: 0, kind: output, shape index: {}]  }

// kernel: neg.47
= control target key start
LH: loop header
LB: loop body
LE: loop exit
PB: predicated region body
PF: predicated region fallthrough
CT: control target
= control target key end

     0   :  { %s88_s0 = inlined_call_operand.vmem [shape: f32[2,576], index: 0, kind: input, shape index: {}]   ;;  %s89_s1 = inlined_call_operand.vmem [shape: f32[2,576], index: 1, kind: output, shape index: {}]  }
   0x1   :  { %v2_v0 = vld [vmem:[%s88_s0] sm:$0x3]  ;;  %v40_v1 = vld [vmem:[%s88_s0 + $0x2] sm:$0x3]  ;;  %v42_v2 = vld [vmem:[%s88_s0 + $0x4] sm:$0x3] }
   0x2   :  { %v5_v3 = vxor.u32 2147483648, %v2_v0  ;;  %v12_v4 = vxor.u32 2147483648, %v40_v1  ;;  %v20_v5 = vxor.u32 2147483648, %v42_v2  ;;  %v44_v6 = vld [vmem:[%s88_s0 + $0x6] sm:$0x3] }
   0x3   :  { %v28_v7 = vxor.u32 2147483648, %v44_v6  ;;  %v46_v8 = vld [vmem:[%s88_s0 + $0x8] sm:$0x3] }
   0x4   :  { %7 = vst [vmem:[%s89_s1] sm:$0x3] %v5_v3  ;;  %41 = vst [vmem:[%s89_s1 + $0x2] sm:$0x3] %v12_v4  ;;  %v36_v9 = vxor.u32 2147483648, %v46_v8 }
   0x5   :  { %43 = vst [vmem:[%s89_s1 + $0x4] sm:$0x3] %v20_v5  ;;  %45 = vst [vmem:[%s89_s1 + $0x6] sm:$0x3] %v28_v7 }
   0x6   :  { %47 = vst [vmem:[%s89_s1 + $0x8] sm:$0x3] %v36_v9 }

// kernel: _lambda_.4
= control target key start
LH: loop header
LB: loop body
LE: loop exit
PB: predicated region body
PF: predicated region fallthrough
CT: control target
= control target key end

     0   :  { %v617_v0 = vmov 0.0   ;;  %vm618_vm0 = vmmov 0   ;;  %vm174_vm1 = vcmask 1043456   ;;  %vm111_vm2 = vcmask 130048   ;;  %s817_s3 = inlined_call_operand.vmem [shape: f32[32,32], index: 3, kind: input, shape index: {}]   ;;  %s818_s5 = inlined_call_operand.vmem [shape: f32[16,32], index: 5, kind: input, shape index: {}]   ;;  %s819_s1 = inlined_call_operand.vmem [shape: f32[2,8,16], index: 1, kind: input, shape index: {}]   ;;  %s820_s7 = inlined_call_operand.vmem [shape: f32[8,32], index: 7, kind: input, shape index: {}]   ;;  %s821_s0 = inlined_call_operand.vmem [shape: f32[2,8,32], index: 0, kind: input, shape index: {}]   ;;  %s822_s2 = inlined_call_operand.vmem [shape: f32[2,8,8], index: 2, kind: input, shape index: {}]   ;;  %s823_s6 = inlined_call_operand.vmem [shape: f32[1,32], index: 6, kind: input, shape index: {}]   ;;  %s824_s4 = inlined_call_operand.vmem [shape: f32[1,32], index: 4, kind: input, shape index: {}]   ;;  %s825_s9 = inlined_call_operand.vmem [shape: f32[2,24,32], index: 9, kind: output, shape index: {0}]   ;;  %s826_s8 = inlined_call_operand.vmem [shape: f32[1,32], index: 8, kind: input, shape index: {}]   ;;  %s827_s10 = inlined_call_operand.vmem [shape: f32[2,24,24], index: 10, kind: output, shape index: {1}]  }
   0x1   :  { %565 = vmatprep.subr.bf16.mxu0 %v617_v0  ;;  %573 = vmatprep.subr.bf16.mxu1 %v617_v0  ;;  %v40_v1 = vld [vmem:[%s817_s3 + $0x10] sm:$0xff]  ;;  %v41_v2 = vld [vmem:[%s817_s3 + $0x18] sm:$0xff]  ;;  %v101_v3 = vld [vmem:[%s818_s5] sm:$0xff]  ;;  %vm51_vm3 = vcmask 261120   ;;  %vm170_vm4 = vcmask 64512   ;;  %v435_v61 = vlaneseq  ;;  %vm446_vm5 = vcmask 130112  }
   0x2   :  { %v43_v4 = vpack.c.bf16 %v41_v2, %v40_v1  ;;  %v102_v5 = vld [vmem:[%s818_s5 + $0x8] sm:$0xff]  ;;  %575 = vmatprep.mubr.msk.bf16.mxu1 %vm618_vm0, %v617_v0  ;;  %v98_v6 = vld [vmem:[%s819_s1] sm:$0xff]  ;;  %569 = vmatprep.mubr.msk.bf16.mxu0 %vm618_vm0, %v617_v0  ;;  %vm453_vm6 = vcmask 195712   ;;  %vm513_vm7 = vcmask 195584  }
   0x3   :  { %v99_v7 = vld [vmem:[%s819_s1 + $0x8] sm:$0xff]  ;;  %v103_v8 = vpack.c.bf16 %v102_v5, %v101_v3  ;;  %v38_v9 = vld [vmem:[%s817_s3] sm:$0xff]  ;;  %v436_v63 = vand.u32 127, %v435_v61 }
   0x4   :  { %v39_v10 = vld [vmem:[%s817_s3 + $0x8] sm:$0xff]  ;;  %v161_v11 = vld [vmem:[%s820_s7] sm:$0xff]  ;;  %566 = vmatpush3.bf16.msra.mxu0 %v43_v4  ;;  %v100_v12 = vpack.c.bf16 %v99_v7, %v98_v6  ;;  %v438_v4 = vshrl.u32 %v435_v61, 7 }
   0x5   :  { %v42_v13 = vpack.c.bf16 %v39_v10, %v38_v9  ;;  %v162_v14 = vpack.c.bf16 %v161_v11, %v161_v11  ;;  %v35_v15 = vld [vmem:[%s821_s0] sm:$0xff]  ;;  %v36_v16 = vld [vmem:[%s821_s0 + $0x8] sm:$0xff]  ;;  %574 = vmatpush3.bf16.msra.mxu1 %v103_v8  ;;  %567 = vmatprep.subr.bf16.mxu0 %v617_v0  ;;  %v448_v3 = vadd.s32 4294967280, %v436_v63  ;;  %v441_v5 = vadd.s32 4294967288, %v436_v63 }
   0x6   :  { %579 = vmatprep.subr.bf16.mxu1 %v617_v0  ;;  %v37_v18 = vpack.c.bf16 %v36_v16, %v35_v15  ;;  %v158_v19 = vld [vmem:[%s822_s2] sm:$0xff]  ;;  %v159_v20 = vld [vmem:[%s822_s2 + $0x8] sm:$0xff]  ;;  %v439_v6 = vsub.s32 %v436_v63, %v438_v4 }
   0x7   :  { %v176_v17 = vsel %vm174_vm1, %v162_v14, 0  ;;  %v160_v21 = vpack.c.bf16 %v159_v20, %v158_v19  ;;  %v530_v22 = vld [vmem:[%s823_s6] ss:$0 sm:$0xff]  ;;  %v451_v8 = vsub.s32 %v448_v3, %v438_v4  ;;  %v444_v9 = vsub.s32 %v441_v5, %v438_v4 }
   0x8   :  { %576 = vmatmul.mubr.msk.bf16.vlgmr.msra.gmra.mxu1 %vm111_vm2, %v100_v12  ;;  %568 = vmatpush3.bf16.msra.mxu0 %v42_v13  ;;  %v528_v25 = vld [vmem:[%s824_s4] ss:$0 sm:$0xff] }
   0x9   :  { %580 = vmatpush3.bf16.msra.mxu1 %v176_v17  ;;  %581 = vmatprep.mubr.msk.bf16.mxu1 %vm618_vm0, %v617_v0  ;;  %v532_v36 = vld [vmem:[%s826_s8] ss:$0 sm:$0xff] }
   0xa   :  { %585 = vmatprep.subr.mxu0 %v617_v0  ;;  %600 = vmatprep.subr.mxu1 %v617_v0 }
   0xb   :  { %570 = vmatmul.mubr.msk.bf16.vlgmr.msra.gmra.mxu0 %vm51_vm3, %v37_v18 }
   0xc   :  { %591 = vmatprep.mubr.msk.f32.mxu0 %vm618_vm0, %v617_v0 }
  0x10   :  { %582 = vmatmul.mubr.msk.bf16.vlgmr.msra.gmra.mxu1 %vm170_vm4, %v160_v21 }
  0x11   :  { %606 = vmatprep.mubr.msk.f32.mxu1 %vm618_vm0, %v617_v0 }
  0xc8   :  { %v149_v23 = vpop.f32.mrf.mxu1 }
  0xc9   :  { %v150_v24 = vadd.f32 %v530_v22, %v149_v23 }
  0xca   :  { %v577_v26 = vpop.f32.mrf.mxu1 }
  0xcb   :  { %v156_v27 = vmax.f32 %v150_v24, 0.0  ;;  %v89_v28 = vpop.f32.mrf.mxu0 }
  0xcc   :  { %v90_v29 = vadd.f32 %v528_v25, %v89_v28  ;;  %v152_v30 = vpop.f32.mrf.mxu1 }
  0xcd   :  { %222 = vst.msk [vmem:[%s825_s9 + $0x8] sm:$0xff] %vm51_vm3, %v156_v27  ;;  %v153_v31 = vadd.f32 %v530_v22, %v152_v30  ;;  %v571_v32 = vpop.f32.mrf.mxu0  ;;  %v228_v33 = vmul.f32 %v156_v27, %v156_v27 }
  0xce   :  { %v96_v34 = vmax.f32 %v90_v29, 0.0  ;;  %v578_v35 = vpop.f32.mrf.mxu1 }
  0xcf   :  { %v157_v37 = vmax.f32 %v153_v31, 0.0  ;;  %v236_v38 = vsel %vm51_vm3, %v228_v33, 0.0  ;;  %v92_v39 = vpop.f32.mrf.mxu0 }
  0xd0   :  { %221 = vst.msk [vmem:[%s825_s9] sm:$0xff] %vm51_vm3, %v96_v34  ;;  %237 = vadd.xlane.f32.xlu0 %v236_v38  ;;  %v93_v40 = vadd.f32 %v528_v25, %v92_v39  ;;  %v212_v41 = vpop.f32.mrf.mxu1  ;;  %v227_v42 = vmul.f32 %v96_v34, %v96_v34 }
  0xd1   :  { %225 = vst.msk [vmem:[%s825_s9 + $0x20] sm:$0xff] %vm51_vm3, %v157_v37  ;;  %v213_v43 = vadd.f32 %v532_v36, %v212_v41  ;;  %v231_v44 = vmul.f32 %v157_v37, %v157_v37  ;;  %v572_v45 = vpop.f32.mrf.mxu0 }
  0xd2   :  { %v97_v46 = vmax.f32 %v93_v40, 0.0  ;;  %v583_v47 = vpop.f32.mrf.mxu1  ;;  %v233_v48 = vsel %vm51_vm3, %v227_v42, 0.0 }
  0xd3   :  { %v219_v49 = vmax.f32 %v213_v43, 0.0  ;;  %v245_v50 = vsel %vm51_vm3, %v231_v44, 0.0 }
  0xd4   :  { %224 = vst.msk [vmem:[%s825_s9 + $0x18] sm:$0xff] %vm51_vm3, %v97_v46  ;;  %246 = vadd.xlane.f32.xlu1 %v245_v50  ;;  %v215_v51 = vpop.f32.mrf.mxu1  ;;  %234 = vadd.xlane.f32.xlu0 %v233_v48  ;;  %v230_v52 = vmul.f32 %v97_v46, %v97_v46 }
  0xd5   :  { %223 = vst.msk [vmem:[%s825_s9 + $0x10] sm:$0xff] %vm51_vm3, %v219_v49  ;;  %v216_v53 = vadd.f32 %v532_v36, %v215_v51  ;;  %586 = vmatpush3.xpose.msk.msra.mxu0 %vm51_vm3, %v219_v49  ;;  %v229_v54 = vmul.f32 %v219_v49, %v219_v49 }
  0xd6   :  { %v584_v55 = vpop.f32.mrf.mxu1  ;;  %587 = vmatprep.subr.mxu0 %v617_v0  ;;  %v242_v56 = vsel %vm51_vm3, %v230_v52, 0.0 }
  0xd7   :  { %v220_v57 = vmax.f32 %v216_v53, 0.0  ;;  %v239_v58 = vsel %vm51_vm3, %v229_v54, 0.0 }
  0xd8   :  { %240 = vadd.xlane.f32.xlu0 %v239_v58  ;;  %243 = vadd.xlane.f32.xlu1 %v242_v56 }
  0xd9   :  { %226 = vst.msk [vmem:[%s825_s9 + $0x28] sm:$0xff] %vm51_vm3, %v220_v57  ;;  %588 = vmatpush3.xpose.msk.msra.mxu0 %vm51_vm3, %v156_v27  ;;  %601 = vmatpush3.xpose.msk.msra.mxu1 %vm51_vm3, %v220_v57  ;;  %v232_v59 = vmul.f32 %v220_v57, %v220_v57 }
  0xda   :  { %589 = vmatprep.subr.mxu0 %v617_v0  ;;  %602 = vmatprep.subr.mxu1 %v617_v0 }
  0xdb   :  { %v248_v60 = vsel %vm51_vm3, %v232_v59, 0.0 }
  0xdc   :  { %249 = vadd.xlane.f32.xlu1 %v248_v60 }
  0xdd   :  { %590 = vmatpush3.xpose.msk.msra.mxu0 %vm51_vm3, %v96_v34  ;;  %603 = vmatpush3.xpose.msk.msra.mxu1 %vm51_vm3, %v157_v37 }
  0xde   :  { %604 = vmatprep.subr.mxu1 %v617_v0 }
  0xe0   :  { %592 = vmatmul.mubr.msk.f32.vlgmr.msra.gmra.mxu0 %vm51_vm3, %v96_v34 }
  0xe1   :  { %605 = vmatpush3.xpose.msk.msra.mxu1 %vm51_vm3, %v97_v46  ;;  %594 = vmatprep.mubr.msk.f32.mxu0 %vm618_vm0, %v617_v0 }
  0xe4   :  { %595 = vmatmul.mubr.msk.f32.gmra.mxu0 %vm51_vm3, %v156_v27  ;;  %607 = vmatmul.mubr.msk.f32.vlgmr.msra.gmra.mxu1 %vm51_vm3, %v97_v46 }
  0xe5   :  { %597 = vmatprep.mubr.msk.f32.mxu0 %vm618_vm0, %v617_v0  ;;  %609 = vmatprep.mubr.msk.f32.mxu1 %vm618_vm0, %v617_v0 }
  0xe8   :  { %598 = vmatmul.mubr.msk.f32.gmra.mxu0 %vm51_vm3, %v219_v49  ;;  %610 = vmatmul.mubr.msk.f32.gmra.mxu1 %vm51_vm3, %v157_v37 }
  0xe9   :  { %612 = vmatprep.mubr.msk.f32.mxu1 %vm618_vm0, %v617_v0 }
  0xec   :  { %613 = vmatmul.mubr.msk.f32.gmra.mxu1 %vm51_vm3, %v220_v57 }
 0x159   :  { %v238_v62 = vpop.xlane.xlu0 %237 }
 0x15a   :  { %v445_v13 = vrot.slane %v238_v62, %v444_v9 }
 0x15d   :  { %v247_v1 = vpop.xlane.xlu1 %246  ;;  %v235_v2 = vpop.xlane.xlu0 %234 }
 0x15e   :  { %v440_v11 = vrot.slane %v235_v2, %v439_v6  ;;  %v462_v18 = vrot.slane %v247_v1, %v444_v9 }
 0x160   :  { %v447_v14 = vsel %vm446_vm5, %v445_v13, %v440_v11 }
 0x161   :  { %v244_v7 = vpop.xlane.xlu1 %243  ;;  %v241_v10 = vpop.xlane.xlu0 %240 }
 0x162   :  { %v452_v12 = vrot.slane %v241_v10, %v451_v8  ;;  %v458_v15 = vrot.slane %v244_v7, %v439_v6 }
 0x164   :  { %v454_v16 = vsel %vm453_vm6, %v452_v12, %v447_v14  ;;  %v463_v20 = vsel %vm446_vm5, %v462_v18, %v458_v15 }
 0x165   :  { %v250_v0 = vpop.xlane.xlu1 %249  ;;  %v489_v21 = vadd.f32 %v454_v16, %v235_v2  ;;  %v490_v27 = vadd.f32 %v454_v16, %v238_v62  ;;  %v491_v37 = vadd.f32 %v454_v16, %v241_v10 }
 0x166   :  { %v467_v17 = vrot.slane %v250_v0, %v451_v8 }
 0x168   :  { %v468_v23 = vsel %vm453_vm6, %v467_v17, %v463_v20 }
 0x169   :  { %v492_v31 = vadd.f32 %v468_v23, %v244_v7  ;;  %v493_v40 = vadd.f32 %v468_v23, %v247_v1  ;;  %v494_v50 = vadd.f32 %v468_v23, %v250_v0 }
 0x1a0   :  { %v326_v19 = vpop.f32.mrf.mxu0 }
 0x1a1   :  { %v495_v22 = vmul.f32 2.0, %v326_v19 }
 0x1a2   :  { %v593_v24 = vpop.f32.mrf.mxu0 }
 0x1a3   :  { %v501_v25 = vsub.f32 %v489_v21, %v495_v22 }
 0x1a4   :  { %v331_v26 = vpop.f32.mrf.mxu0  ;;  %v415_v28 = vpop.f32.mrf.mxu1 }
 0x1a5   :  { %v507_v29 = vmax.f32 %v501_v25, 0.0  ;;  %v496_v30 = vmul.f32 2.0, %v331_v26  ;;  %v498_v32 = vmul.f32 2.0, %v415_v28 }
 0x1a6   :  { %v596_v33 = vpop.f32.mrf.mxu0  ;;  %v608_v34 = vpop.f32.mrf.mxu1 }
 0x1a7   :  { %514 = vst.msk [vmem:[%s827_s10] sm:$0xff] %vm513_vm7, %v507_v29  ;;  %v502_v35 = vsub.f32 %v490_v27, %v496_v30  ;;  %v504_v36 = vsub.f32 %v492_v31, %v498_v32 }
 0x1a8   :  { %v336_v38 = vpop.f32.mrf.mxu0  ;;  %v420_v39 = vpop.f32.mrf.mxu1 }
 0x1a9   :  { %v508_v41 = vmax.f32 %v502_v35, 0.0  ;;  %v510_v42 = vmax.f32 %v504_v36, 0.0  ;;  %v497_v43 = vmul.f32 2.0, %v336_v38  ;;  %v499_v44 = vmul.f32 2.0, %v420_v39 }
 0x1aa   :  { %v599_v45 = vpop.f32.mrf.mxu0  ;;  %v611_v46 = vpop.f32.mrf.mxu1 }
 0x1ab   :  { %515 = vst.msk [vmem:[%s827_s10 + $0x8] sm:$0xff] %vm513_vm7, %v508_v41  ;;  %517 = vst.msk [vmem:[%s827_s10 + $0x18] sm:$0xff] %vm513_vm7, %v510_v42  ;;  %v503_v47 = vsub.f32 %v491_v37, %v497_v43  ;;  %v505_v48 = vsub.f32 %v493_v40, %v499_v44 }
 0x1ac   :  { %v425_v49 = vpop.f32.mrf.mxu1 }
 0x1ad   :  { %v509_v51 = vmax.f32 %v503_v47, 0.0  ;;  %v511_v52 = vmax.f32 %v505_v48, 0.0  ;;  %v500_v53 = vmul.f32 2.0, %v425_v49 }
 0x1ae   :  { %v614_v54 = vpop.f32.mrf.mxu1 }
 0x1af   :  { %516 = vst.msk [vmem:[%s827_s10 + $0x10] sm:$0xff] %vm513_vm7, %v509_v51  ;;  %518 = vst.msk [vmem:[%s827_s10 + $0x20] sm:$0xff] %vm513_vm7, %v511_v52  ;;  %v506_v55 = vsub.f32 %v494_v50, %v500_v53 }
 0x1b1   :  { %v512_v56 = vmax.f32 %v506_v55, 0.0 }
 0x1b3   :  { %519 = vst.msk [vmem:[%s827_s10 + $0x28] sm:$0xff] %vm513_vm7, %v512_v56 }

// kernel: neg.51
= control target key start
LH: loop header
LB: loop body
LE: loop exit
PB: predicated region body
PF: predicated region fallthrough
CT: control target
= control target key end

     0   :  { %s24_s0 = inlined_call_operand.vmem [shape: f32[2,64], index: 0, kind: input, shape index: {}]   ;;  %s25_s1 = inlined_call_operand.vmem [shape: f32[2,64], index: 1, kind: output, shape index: {}]  }
   0x1   :  { %v2_v0 = vld [vmem:[%s24_s0] sm:$0x3] }
   0x2   :  { %v5_v1 = vxor.u32 2147483648, %v2_v0 }
   0x4   :  { %7 = vst [vmem:[%s25_s1] sm:$0x3] %v5_v1 }

// kernel: _lambda_.6
= control target key start
LH: loop header
LB: loop body
LE: loop exit
PB: predicated region body
PF: predicated region fallthrough
CT: control target
= control target key end

     0   :  { %v160_v0 = vmov 0.0   ;;  %vm161_vm0 = vmmov 0   ;;  %vm36_vm1 = vcmask 785408   ;;  %vm110_vm2 = vcmask 1024   ;;  %s227_s1 = inlined_call_operand.vmem [shape: f32[96,1], index: 1, kind: input, shape index: {}]   ;;  %s228_s2 = inlined_call_operand.<no memory space> [shape: f32[1,1], index: 2, kind: input, shape index: {}]   ;;  %s229_s0 = inlined_call_operand.vmem [shape: f32[2,96], index: 0, kind: input, shape index: {}]   ;;  %s230_s3 = inlined_call_operand.vmem [shape: f32[2,1], index: 3, kind: output, shape index: {}]  }
   0x1   :  { %131 = vmatprep.subr.mxu0 %v160_v0  ;;  %v28_v1 = vld [vmem:[%s227_s1 + $0x58] sm:$0xff]  ;;  %v27_v2 = vld [vmem:[%s227_s1 + $0x50] sm:$0xff]  ;;  %155 = vmatprep.mubr.msk.f32.mxu0 %vm161_vm0, %v160_v0  ;;  %v8_v3 = vstv %s228_s2  ;;  %v26_v4 = vld [vmem:[%s227_s1 + $0x48] sm:$0xff] }
   0x2   :  { %132 = vmatpush3.msra.mxu0 %v28_v1  ;;  %9 = vst [vmem:[#allocation2] sm:$0x1] %v8_v3  ;;  %v25_v5 = vld [vmem:[%s227_s1 + $0x40] sm:$0xff]  ;;  %v24_v6 = vld [vmem:[%s227_s1 + $0x38] sm:$0xff]  ;;  %v23_v7 = vld [vmem:[%s227_s1 + $0x30] sm:$0xff] }
   0x3   :  { %133 = vmatprep.subr.mxu0 %v160_v0  ;;  %v22_v8 = vld [vmem:[%s227_s1 + $0x28] sm:$0xff]  ;;  %v21_v9 = vld [vmem:[%s227_s1 + $0x20] sm:$0xff]  ;;  %v20_v10 = vld [vmem:[%s227_s1 + $0x18] sm:$0xff] }
   0x4   :  { %134 = vmatpush3.msra.mxu0 %v27_v2  ;;  %v19_v11 = vld [vmem:[%s227_s1 + $0x10] sm:$0xff]  ;;  %v18_v12 = vld [vmem:[%s227_s1 + $0x8] sm:$0xff]  ;;  %v17_v13 = vld [vmem:[%s227_s1] sm:$0xff] }
   0x5   :  { %135 = vmatprep.subr.mxu0 %v160_v0  ;;  %v16_v14 = vld [vmem:[%s229_s0] sm:$0x3] }
   0x6   :  { %136 = vmatpush3.msra.mxu0 %v26_v4 }
   0x7   :  { %137 = vmatprep.subr.mxu0 %v160_v0 }
   0x8   :  { %138 = vmatpush3.msra.mxu0 %v25_v5 }
   0x9   :  { %139 = vmatprep.subr.mxu0 %v160_v0  ;;  %v116_v15 = vld [vmem:[#allocation2] ss:$0 sm:$0xff] }
   0xa   :  { %140 = vmatpush3.msra.mxu0 %v24_v6 }
   0xb   :  { %141 = vmatprep.subr.mxu0 %v160_v0 }
   0xc   :  { %142 = vmatpush3.msra.mxu0 %v23_v7 }
   0xd   :  { %143 = vmatprep.subr.mxu0 %v160_v0 }
   0xe   :  { %144 = vmatpush3.msra.mxu0 %v22_v8 }
   0xf   :  { %145 = vmatprep.subr.mxu0 %v160_v0 }
  0x10   :  { %146 = vmatpush3.msra.mxu0 %v21_v9 }
  0x11   :  { %147 = vmatprep.subr.mxu0 %v160_v0 }
  0x12   :  { %148 = vmatpush3.msra.mxu0 %v20_v10 }
  0x13   :  { %149 = vmatprep.subr.mxu0 %v160_v0 }
  0x14   :  { %150 = vmatpush3.msra.mxu0 %v19_v11 }
  0x15   :  { %151 = vmatprep.subr.mxu0 %v160_v0 }
  0x16   :  { %152 = vmatpush3.msra.mxu0 %v18_v12 }
  0x17   :  { %153 = vmatprep.subr.mxu0 %v160_v0 }
  0x18   :  { %154 = vmatpush3.msra.mxu0 %v17_v13 }
  0x19   :  { %156 = vmatmul.mubr.msk.f32.vlgmr.msra.gmra.mxu0 %vm36_vm1, %v16_v14 }
  0xd9   :  { %v106_v16 = vpop.f32.mrf.mxu0 }
  0xda   :  { %v107_v17 = vadd.f32 %v116_v15, %v106_v16 }
  0xdb   :  { %v157_v18 = vpop.f32.mrf.mxu0 }
  0xdc   :  { %111 = vst.msk [vmem:[%s230_s3] sm:$0x3] %vm110_vm2, %v107_v17 }

// kernel: _lambda_.5
= control target key start
LH: loop header
LB: loop body
LE: loop exit
PB: predicated region body
PF: predicated region fallthrough
CT: control target
= control target key end

     0   :  { %s5171_s30 = smov 0   ;;  %s6885_s0 = inlined_call_operand.vmem [shape: f32[2,2,24,32], index: 0, kind: input, shape index: {}]   ;;  %s6886_s1 = inlined_call_operand.vmem [shape: f32[2,2,24,24], index: 1, kind: input, shape index: {}]   ;;  %s6887_s2 = inlined_call_operand.vmem [shape: f32[2,2,32,32], index: 2, kind: input, shape index: {}]   ;;  %s6888_s3 = inlined_call_operand.vmem [shape: f32[2,2,4,8], index: 3, kind: input, shape index: {}]   ;;  %s6889_s4 = inlined_call_operand.vmem [shape: f32[2,2,4,8], index: 4, kind: input, shape index: {}]   ;;  %s6890_s5 = inlined_call_operand.vmem [shape: f32[2,3,32,32], index: 5, kind: input, shape index: {}]   ;;  %s6891_s6 = inlined_call_operand.vmem [shape: f32[2,3,1,32], index: 6, kind: input, shape index: {}]   ;;  %s6892_s7 = inlined_call_operand.vmem [shape: f32[2,3,32,1], index: 7, kind: input, shape index: {}]   ;;  %s6893_s8 = inlined_call_operand.vmem [shape: f32[2,8,1], index: 8, kind: input, shape index: {}]   ;;  %s6894_s9 = inlined_call_operand.vmem [shape: f32[2,2,96], index: 9, kind: output, shape index: {}]  }
   0x1 LB: > { %s4412_s10 = sadd.s32 4294967295, %s5107_s30   ;;  %p4416_p0 = scmp.ge.s32.totalorder %s5107_s30, 1  ;;  %s5107_s30 = sphi %s5171_s30, %s19_s30  }
   0x2   : > { %p356_p1 = scmp.lt.s32.totalorder %s5107_s30, 3 }
   0x4   : > { %p357_p2 = pnand %p4416_p0, %p356_p1 }
   0x6   : > { %360 = sbr.rel (%p357_p2) target bundleno = 3331 (0xd03), region = 56 }
   0xb   : > { %p425_p3 = scmp.lt.s32.totalorder %s4412_s10, 1  ;;  %v6896_v0 = vmov 0.0   ;;  %vm5110_vm0 = vmmov 0   ;;  %vm6895_vm1 = vcmask 261120   ;;  %v633_v16 = vlaneseq  ;;  %s5112_s26 = smov 112  }
   0xc   : > { %4606 = vmatprep.subr.bf16.mxu0 %v6896_v0  ;;  %4610 = vmatprep.mubr.msk.bf16.mxu0 %vm5110_vm0, %v6896_v0  ;;  %v5111_v24 = vmov 1966171168   ;;  %s5113_s27 = smov 120   ;;  %s5114_s28 = smov 104   ;;  %vm1550_vm2 = vcmask 1043456   ;;  %vm690_vm3 = vcmask 64512  }
   0xd   : > { %s6962_s10 = smov (!%p425_p3, %s4412_s10), 1  ;;  %v634_v17 = vshrl.u32 %v633_v16, 7  ;;  %v929_v18 = vand.u32 127, %v633_v16  ;;  %v631_v25 = vunpack.c.l.s4 %v5111_v24  ;;  %vm939_vm4 = vcmask 130112   ;;  %s5116_s14 = smov 24  }
   0xe   : > { %s4511_s11 = sshll.u32 %s6962_s10, 6  ;;  %s4830_s12 = smul.u32 48, %s6962_s10  ;;  %vm946_vm5 = vcmask 195712   ;;  %vm1247_vm8 = vcmask 195584  }
   0xf   : > { %s5189_s15 = scalar_lea.vmem %s6887_s2, %s4511_s11  ;;  %v5216_v19 = vsub.s32 %v929_v18, %v634_v17  ;;  %v934_v20 = vadd.s32 4294967288, %v929_v18  ;;  %v941_v21 = vadd.s32 4294967280, %v929_v18  ;;  %s4512_s19 = sshll.u32 %s6962_s10, 3  ;;  %v632_v26 = vunpack.c.0.s8 %v631_v25 }
  0x10   : > { %v485_v1 = vld [vmem:[%s5189_s15 + $0x10] sm:$0xff]  ;;  %v486_v2 = vld [vmem:[%s5189_s15 + $0x18] sm:$0xff]  ;;  %v483_v3 = vld [vmem:[%s5189_s15] sm:$0xff]  ;;  %s5199_s18 = scalar_lea.vmem %s6885_s0, %s4830_s12  ;;  %s5226_s22 = scalar_lea.vmem %s6889_s4, %s4512_s19  ;;  %v5243_v32 = vsub.s32 0, %v634_v17 }
  0x11   : > { %v488_v4 = vpack.c.bf16 %v486_v2, %v485_v1  ;;  %v484_v5 = vld [vmem:[%s5189_s15 + $0x8] sm:$0xff]  ;;  %v469_v7 = vld [vmem:[%s5199_s18] sm:$0xff]  ;;  %v471_v10 = vld [vmem:[%s5199_s18 + $0x10] sm:$0xff]  ;;  %v5218_v22 = vsub.s32 %v934_v20, %v634_v17  ;;  %v5220_v23 = vsub.s32 %v941_v21, %v634_v17  ;;  %s5231_s25 = scalar_lea.vmem %s6888_s3, %s4512_s19  ;;  %v5236_v28 = vsub.s32 %v632_v26, %v634_v17  ;;  %s5509_s13 = scalar_lea.vmem %s6886_s1, %s4830_s12 }
  0x12   : > { %v487_v6 = vpack.c.bf16 %v484_v5, %v483_v3  ;;  %v470_v8 = vld [vmem:[%s5199_s18 + $0x8] sm:$0xff]  ;;  %v472_v11 = vld [vmem:[%s5199_s18 + $0x18] sm:$0xff]  ;;  %v473_v13 = vld [vmem:[%s5199_s18 + $0x20] sm:$0xff]  ;;  %6915 = vst [vmem:[#allocation3_spill] sm:$0xff] %v5243_v32  ;;  %s5115_s12 = smov 8   ;;  %s5117_s16 = smov 16  }
  0x13   : > { %4607 = vmatpush3.bf16.msra.mxu0 %v488_v4  ;;  %v491_v9 = vpack.c.bf16 %v470_v8, %v469_v7  ;;  %v492_v12 = vpack.c.bf16 %v472_v11, %v471_v10  ;;  %v474_v14 = vld [vmem:[%s5199_s18 + $0x28] sm:$0xff]  ;;  %v5234_v27 = vld.sshfl [vmem:[%s5226_s22] sm:$0x33 pattern:$0x75316420]  ;;  %6914 = vst [vmem:[#allocation2_spill] sm:$0xff] %v5236_v28 }
  0x14   : > { %4608 = vmatprep.subr.bf16.mxu0 %v6896_v0  ;;  %v493_v15 = vpack.c.bf16 %v474_v14, %v473_v13  ;;  %v5239_v30 = vld.sshfl [vmem:[%s5231_s25] sm:$0x33 pattern:$0x75316420]  ;;  %v5247_v33 = vrot.slane %v5234_v27, %v5236_v28  ;;  %v771_v7 = vcombine.high %v5234_v27, %v5234_v27  ;;  %s4832_s23 = smul.u32 3, %s6962_s10 }
  0x15   : > { %v5251_v34 = vrot.slane %v5239_v30, %v5236_v28 }
  0x16   : > { %v5257_v37 = vrot.slane %v5247_v33, %v5243_v32  ;;  %v786_v18 = vcombine.high %v5247_v33, %v5247_v33 }
  0x17   : > { %4609 = vmatpush3.bf16.msra.mxu0 %v487_v6  ;;  %v5261_v38 = vrot.slane %v5251_v34, %v5243_v32  ;;  %v644_v27 = vcombine.high %v5251_v34, %v5251_v34 }
  0x18   : > { %v5345_v26 = vrot.slane %v786_v18, %v5243_v32 }
  0x1a   : > { %4611 = vmatmul.mubr.msk.bf16.vlgmr.msra.gmra.mxu0 %vm6895_vm1, %v491_v9 }
  0x1b   : > { %4614 = vmatprep.mubr.msk.bf16.mxu0 %vm5110_vm0, %v6896_v0 }
  0x22   : > { %4615 = vmatmul.mubr.msk.bf16.gmra.mxu0 %vm6895_vm1, %v492_v12  ;;  %v785_v12 = vrot.slane %v771_v7, %v5236_v28 }
  0x23   : > { %4618 = vmatprep.mubr.msk.bf16.mxu0 %vm5110_vm0, %v6896_v0 }
  0x24   : > { %v5333_v17 = vrot.slane %v785_v12, %v5243_v32 }
  0x2a   : > { %4619 = vmatmul.mubr.msk.bf16.gmra.mxu0 %vm6895_vm1, %v493_v15 }
  0xda   : > { %v538_v29 = vpop.f32.mrf.mxu0 }
  0xdb   : > { %585 = vrot.lane.b32.xlu1 %v538_v29, %s5112_s26  ;;  %567 = vrot.lane.b32.xlu0 %v538_v29, %s5113_s27  ;;  %v808_v52 = vmul.f32 %v5257_v37, %v538_v29  ;;  %v666_v54 = vmul.f32 %v5261_v38, %v538_v29 }
  0xdc   : > { %v4612_v31 = vpop.f32.mrf.mxu0 }
  0xdd   : > { %v832_v53 = vsel %vm690_vm3, %v808_v52, 0.0  ;;  %v691_v56 = vsel %vm690_vm3, %v666_v54, 0.0 }
  0xde   : > { %v541_v35 = vpop.f32.mrf.mxu0 }
  0xdf   : > { %603 = vrot.lane.b32.xlu0 %v538_v29, %s5114_s28  ;;  %605 = vrot.lane.b32.xlu1 %v541_v35, %s5114_s28  ;;  %v1528_v45 = vpack.c.bf16 %v541_v35, %v538_v29  ;;  %v809_v55 = vmul.f32 %v5257_v37, %v541_v35  ;;  %v667_v58 = vmul.f32 %v5261_v38, %v541_v35 }
  0xe0   : > { %v4613_v36 = vpop.f32.mrf.mxu0  ;;  %v629_v29 = vcombine.high %v5239_v30, %v5239_v30 }
  0xe1   : > { %v835_v57 = vsel %vm690_vm3, %v809_v55, 0.0  ;;  %v694_v59 = vsel %vm690_vm3, %v667_v58, 0.0 }
  0xe2   : > { %v546_v39 = vpop.f32.mrf.mxu0 }
  0xe3   : > { %v1529_v40 = vpack.c.bf16 %v546_v39, %v546_v39  ;;  %v810_v41 = vmul.f32 %v5257_v37, %v546_v39  ;;  %v668_v42 = vmul.f32 %v5261_v38, %v546_v39 }
  0xe4   : > { %v4616_v43 = vpop.f32.mrf.mxu0 }
  0xe5   : > { %4814 = vmatprep.subr.msk.bf16.mxu1 %vm1550_vm2, %v1529_v40  ;;  %v1552_v44 = vsel %vm1550_vm2, %v1529_v40, 0  ;;  %v838_v60 = vsel %vm690_vm3, %v810_v41, 0.0  ;;  %v697_v61 = vsel %vm690_vm3, %v668_v42, 0.0  ;;  %v787_v41 = vcombine.high %v785_v12, %v785_v12 }
  0xe6   : > { %4623 = vmatpush3.bf16.msra.mxu1 %v1552_v44  ;;  %v5267_v46 = vpop.f32.mrf.mxu0 }
  0xe7   : > { %4624 = vmatprep.subr.bf16.mxu1 %v1528_v45  ;;  %v820_v62 = vmul.f32 %v5257_v37, %v5267_v46  ;;  %v678_v1 = vmul.f32 %v5261_v38, %v5267_v46  ;;  %v5382_v52 = vrot.slane %v787_v41, %v5243_v32 }
  0xe8   : > { %v4617_v47 = vpop.f32.mrf.mxu0 }
  0xe9   : > { %v868_v63 = vsel %vm690_vm3, %v820_v62, 0.0  ;;  %v727_v2 = vsel %vm690_vm3, %v678_v1, 0.0 }
  0xea   : > { %4625 = vmatpush3.bf16.msra.mxu1 %v1528_v45  ;;  %v5269_v48 = vpop.f32.mrf.mxu0 }
  0xeb   : > { %v821_v3 = vmul.f32 %v5257_v37, %v5269_v48  ;;  %v679_v6 = vmul.f32 %v5261_v38, %v5269_v48 }
  0xec   : > { %v4620_v49 = vpop.f32.mrf.mxu0 }
  0xed   : > { %v871_v5 = vsel %vm690_vm3, %v821_v3, 0.0  ;;  %v730_v10 = vsel %vm690_vm3, %v679_v6, 0.0 }
  0xee   : > { %v5271_v50 = vpop.f32.mrf.mxu0 }
  0xef   : > { %v822_v11 = vmul.f32 %v5257_v37, %v5271_v50  ;;  %v680_v16 = vmul.f32 %v5261_v38, %v5271_v50  ;;  %v5359_v37 = vrot.slane %v644_v27, %v5243_v32  ;;  %v643_v38 = vrot.slane %v629_v29, %v5236_v28 }
  0xf0   : > { %v4621_v51 = vpop.f32.mrf.mxu0 }
  0xf1   : > { %v874_v15 = vsel %vm690_vm3, %v822_v11, 0.0  ;;  %v733_v24 = vsel %vm690_vm3, %v680_v16, 0.0  ;;  %v5370_v43 = vrot.slane %v643_v38, %v5243_v32  ;;  %v645_v45 = vcombine.high %v643_v38, %v643_v38 }
  0xfe   : > { %833 = vadd.xlane.f32.xlu0 %v832_v53 }
 0x102   : > { %692 = vadd.xlane.f32.xlu0 %v691_v56 }
 0x103   : > { %836 = vadd.xlane.f32.xlu1 %v835_v57  ;;  %v5392_v57 = vrot.slane %v645_v45, %v5243_v32 }
 0x107   : > { %695 = vadd.xlane.f32.xlu1 %v694_v59 }
 0x118   : > { %569 = vrot.lane.b32.xlu0 %v541_v35, %s5113_s27  ;;  %571 = vrot.lane.b32.xlu1 %v546_v39, %s5113_s27 }
 0x11c   : > { %587 = vrot.lane.b32.xlu0 %v541_v35, %s5112_s26  ;;  %589 = vrot.lane.b32.xlu1 %v546_v39, %s5112_s26 }
 0x120   : > { %607 = vrot.lane.b32.xlu0 %v546_v39, %s5114_s28  ;;  %573 = vrot.lane.b32.xlu1 %v5267_v46, %s5113_s27 }
 0x124   : > { %609 = vrot.lane.b32.xlu1 %v5267_v46, %s5114_s28 }
 0x13f   : > { %839 = vadd.xlane.f32.xlu0 %v838_v60 }
 0x143   : > { %698 = vadd.xlane.f32.xlu0 %v697_v61 }
 0x148   : > { %869 = vadd.xlane.f32.xlu1 %v868_v63 }
 0x14c   : > { %728 = vadd.xlane.f32.xlu1 %v727_v2 }
 0x14d   : > { %v5312_v4 = vpop.permute.xlu0 %567  ;;  %v5319_v8 = vpop.permute.xlu1 %585 }
 0x14e   : > { %v811_v25 = vmul.f32 %v5333_v17, %v5312_v4  ;;  %v814_v36 = vmul.f32 %v5345_v26, %v5319_v8  ;;  %v672_v40 = vmul.f32 %v5359_v37, %v5319_v8  ;;  %v669_v6 = vmul.f32 %v5370_v43, %v5312_v4 }
 0x150   : > { %v841_v35 = vsel %vm690_vm3, %v811_v25, 0.0  ;;  %v850_v30 = vsel %vm690_vm3, %v814_v36, 0.0  ;;  %v709_v49 = vsel %vm690_vm3, %v672_v40, 0.0  ;;  %v700_v7 = vsel %vm690_vm3, %v669_v6, 0.0 }
 0x151   : > { %v5321_v9 = vpop.permute.xlu0 %603  ;;  %v606_v14 = vpop.permute.xlu1 %605 }
 0x152   : > { %v1534_v54 = vpack.c.bf16 %v606_v14, %v5321_v9  ;;  %v818_v56 = vmul.f32 %v5382_v52, %v606_v14  ;;  %v676_v59 = vmul.f32 %v5392_v57, %v606_v14  ;;  %v675_v12 = vmul.f32 %v5392_v57, %v5321_v9 }
 0x154   : > { %v862_v58 = vsel %vm690_vm3, %v818_v56, 0.0  ;;  %v721_v60 = vsel %vm690_vm3, %v676_v59, 0.0  ;;  %v718_v14 = vsel %vm690_vm3, %v675_v12, 0.0 }
 0x159   : > { %591 = vrot.lane.b32.xlu0 %v5267_v46, %s5112_s26 }
 0x15d   : > { %593 = vrot.lane.b32.xlu1 %v5269_v48, %s5112_s26  ;;  %575 = vrot.lane.b32.xlu0 %v5269_v48, %s5113_s27 }
 0x161   : > { %611 = vrot.lane.b32.xlu0 %v5269_v48, %s5114_s28  ;;  %577 = vrot.lane.b32.xlu1 %v5271_v50, %s5113_s27 }
 0x165   : > { %613 = vrot.lane.b32.xlu1 %v5271_v50, %s5114_s28 }
 0x180   : > { %872 = vadd.xlane.f32.xlu0 %v871_v5 }
 0x184   : > { %731 = vadd.xlane.f32.xlu0 %v730_v10  ;;  %v817_v10 = vmul.f32 %v5382_v52, %v5321_v9 }
 0x186   : > { %v859_v11 = vsel %vm690_vm3, %v817_v10, 0.0 }
 0x187   : > { %v5327_v13 = vpop.xlane.xlu0 %833 }
 0x189   : > { %875 = vadd.xlane.f32.xlu1 %v874_v15 }
 0x18b   : > { %v5337_v20 = vpop.xlane.xlu0 %692 }
 0x18c   : > { %v5339_v21 = vpop.xlane.xlu1 %836 }
 0x18d   : > { %734 = vadd.xlane.f32.xlu1 %v733_v24 }
 0x18f   : > { %v5351_v31 = vpop.permute.xlu0 %569 }
 0x190   : > { %v5353_v33 = vpop.xlane.xlu1 %695  ;;  %v670_v51 = vmul.f32 %v5370_v43, %v5351_v31  ;;  %v812_v15 = vmul.f32 %v5333_v17, %v5351_v31 }
 0x191   : > { %842 = vadd.xlane.f32.xlu1 %v841_v35 }
 0x192   : > { %v703_v55 = vsel %vm690_vm3, %v670_v51, 0.0  ;;  %v844_v16 = vsel %vm690_vm3, %v812_v15, 0.0 }
 0x193   : > { %v5362_v34 = vpop.permute.xlu0 %587 }
 0x194   : > { %v572_v39 = vpop.permute.xlu1 %571  ;;  %v815_v18 = vmul.f32 %v5345_v26, %v5362_v34  ;;  %v673_v9 = vmul.f32 %v5359_v37, %v5362_v34 }
 0x195   : > { %v5367_v42 = vpack.c.bf16 %v572_v39, %v572_v39  ;;  %851 = vadd.xlane.f32.xlu1 %v850_v30  ;;  %v813_v61 = vmul.f32 %v5333_v17, %v572_v39  ;;  %v671_v36 = vmul.f32 %v5370_v43, %v572_v39 }
 0x196   : > { %v853_v27 = vsel %vm690_vm3, %v815_v18, 0.0  ;;  %v712_v35 = vsel %vm690_vm3, %v673_v9, 0.0 }
 0x197   : > { %v5372_v44 = vpop.permute.xlu0 %607  ;;  %4815 = vmatprep.subr.msk.bf16.mxu1 %vm1550_vm2, %v5367_v42  ;;  %v847_v63 = vsel %vm690_vm3, %v813_v61, 0.0  ;;  %v706_v40 = vsel %vm690_vm3, %v671_v36, 0.0  ;;  %v938_v36 = vrot.slane %v5339_v21, %v5218_v22 }
 0x198   : > { %v1535_v47 = vpack.c.bf16 %v5372_v44, %v5372_v44  ;;  %v5398_v62 = vpop.permute.xlu1 %589  ;;  %v819_v41 = vmul.f32 %v5382_v52, %v5372_v44 }
 0x199   : > { %710 = vadd.xlane.f32.xlu1 %v709_v49  ;;  %v816_v1 = vmul.f32 %v5345_v26, %v5398_v62  ;;  %v674_v3 = vmul.f32 %v5359_v37, %v5398_v62 }
 0x19a   : > { %4817 = vmatprep.subr.msk.bf16.mxu0 %vm1550_vm2, %v1535_v47  ;;  %595 = vrot.lane.b32.xlu0 %v5271_v50, %s5112_s26  ;;  %v1723_v53 = vsel %vm1550_vm2, %v1535_v47, 0 }
 0x19b   : > { %4647 = vmatpush3.bf16.msra.mxu0 %v1723_v53  ;;  %v856_v2 = vsel %vm690_vm3, %v816_v1, 0.0  ;;  %v715_v5 = vsel %vm690_vm3, %v674_v3, 0.0  ;;  %v865_v53 = vsel %vm690_vm3, %v819_v41, 0.0  ;;  %v933_v41 = vrot.slane %v5327_v13, %v5216_v19 }
 0x19c   : > { %4648 = vmatprep.subr.bf16.mxu0 %v1534_v54  ;;  %v5421_v24 = vpop.permute.xlu1 %573 }
 0x19d   : > { %704 = vadd.xlane.f32.xlu1 %v703_v55  ;;  %v681_v3 = vmul.f32 %v5370_v43, %v5421_v24 }
 0x19f   : > { %4649 = vmatpush3.bf16.msra.mxu0 %v1534_v54  ;;  %v677_v54 = vmul.f32 %v5392_v57, %v5372_v44 }
 0x1a0   : > { %v5432_v38 = vpop.permute.xlu1 %609 }
 0x1a1   : > { %863 = vadd.xlane.f32.xlu1 %v862_v58  ;;  %v724_v59 = vsel %vm690_vm3, %v677_v54, 0.0  ;;  %v829_v12 = vmul.f32 %v5382_v52, %v5432_v38 }
 0x1a3   : > { %v895_v15 = vsel %vm690_vm3, %v829_v12, 0.0 }
 0x1a5   : > { %722 = vadd.xlane.f32.xlu1 %v721_v60  ;;  %v823_v60 = vmul.f32 %v5333_v17, %v5421_v24 }
 0x1a9   : > { %848 = vadd.xlane.f32.xlu1 %v847_v63 }
 0x1ad   : > { %857 = vadd.xlane.f32.xlu1 %v856_v2  ;;  %v877_v2 = vsel %vm690_vm3, %v823_v60, 0.0 }
 0x1b1   : > { %716 = vadd.xlane.f32.xlu1 %v715_v5 }
 0x1b9   : > { %701 = vadd.xlane.f32.xlu0 %v700_v7 }
 0x1bd   : > { %860 = vadd.xlane.f32.xlu0 %v859_v11  ;;  %v736_v11 = vsel %vm690_vm3, %v681_v3, 0.0 }
 0x1c1   : > { %719 = vadd.xlane.f32.xlu0 %v718_v14 }
 0x1c5   : > { %845 = vadd.xlane.f32.xlu0 %v844_v16  ;;  %v687_v16 = vmul.f32 %v5392_v57, %v5432_v38 }
 0x1c7   : > { %v754_v18 = vsel %vm690_vm3, %v687_v16, 0.0 }
 0x1c8   : > { %v5423_v25 = vpop.xlane.xlu0 %839 }
 0x1c9   : > { %854 = vadd.xlane.f32.xlu0 %v853_v27 }
 0x1cc   : > { %v5428_v29 = vpop.xlane.xlu0 %698 }
 0x1cd   : > { %713 = vadd.xlane.f32.xlu0 %v712_v35 }
 0x1d0   : > { %v5434_v30 = vpop.permute.xlu0 %591 }
 0x1d1   : > { %v5439_v45 = vpop.xlane.xlu1 %869  ;;  %707 = vadd.xlane.f32.xlu0 %v706_v40  ;;  %v826_v47 = vmul.f32 %v5345_v26, %v5434_v30  ;;  %v684_v39 = vmul.f32 %v5359_v37, %v5434_v30  ;;  %v945_v40 = vrot.slane %v5423_v25, %v5220_v23 }
 0x1d3   : > { %v886_v49 = vsel %vm690_vm3, %v826_v47, 0.0  ;;  %v745_v56 = vsel %vm690_vm3, %v684_v39, 0.0  ;;  %v940_v39 = vsel %vm939_vm4, %v938_v36, %v933_v41  ;;  %v5547_v36 = vld [vmem:[%s5509_s13] sm:$0xff] }
 0x1d4   : > { %v5446_v51 = vpop.permute.xlu0 %575  ;;  %887 = vadd.xlane.f32.xlu1 %v886_v49  ;;  %6918 = vst [vmem:[#allocation6_spill] sm:$0xff] %v5547_v36  ;;  %vm1205_vm12 = vcmp.gt.f32.partialorder %v5547_v36, 0.0 }
 0x1d5   : > { %v5451_v55 = vpop.xlane.xlu1 %728  ;;  %866 = vadd.xlane.f32.xlu0 %v865_v53  ;;  %v824_v58 = vmul.f32 %v5333_v17, %v5446_v51  ;;  %v682_v44 = vmul.f32 %v5370_v43, %v5446_v51  ;;  %v947_v53 = vsel %vm946_vm5, %v945_v40, %v940_v39 }
 0x1d6   : > { %v1110_v25 = vadd.f32 %v947_v53, %v5353_v33 }
 0x1d7   : > { %v880_v63 = vsel %vm690_vm3, %v824_v58, 0.0  ;;  %v739_v7 = vsel %vm690_vm3, %v682_v44, 0.0 }
 0x1d8   : > { %746 = vadd.xlane.f32.xlu1 %v745_v56  ;;  %v5464_v1 = vpop.permute.xlu0 %611  ;;  %v1158_v58 = vmul.f32 0.2, %v1110_v25  ;;  %vm1134_vm6 = vcmp.gt.f32.partialorder %v1110_v25, 0.0 }
 0x1d9   : > { %v5459_v61 = vpop.permute.xlu1 %593  ;;  %725 = vadd.xlane.f32.xlu0 %v724_v59  ;;  %6916 = vst [vmem:[#allocation4_spill] sm:$0xff] %v5464_v1  ;;  %v830_v10 = vmul.f32 %v5382_v52, %v5464_v1 }
 0x1da   : > { %v827_v27 = vmul.f32 %v5345_v26, %v5459_v61  ;;  %v685_v35 = vmul.f32 %v5359_v37, %v5459_v61  ;;  %v1182_v60 = vsel %vm1134_vm6, %v1110_v25, %v1158_v58 }
 0x1db   : > { %v898_v14 = vsel %vm690_vm3, %v830_v10, 0.0  ;;  %v1109_v10 = vadd.f32 %v947_v53, %v5337_v20 }
 0x1dc   : > { %881 = vadd.xlane.f32.xlu1 %v880_v63  ;;  %v889_v9 = vsel %vm690_vm3, %v827_v27, 0.0  ;;  %v748_v47 = vsel %vm690_vm3, %v685_v35, 0.0 }
 0x1dd   : > { %878 = vadd.xlane.f32.xlu0 %v877_v2  ;;  %v578_v5 = vpop.permute.xlu1 %577  ;;  %vm1133_vm10 = vcmp.gt.f32.partialorder %v1109_v10, 0.0 }
 0x1de   : > { %v5469_v6 = vpack.c.bf16 %v578_v5, %v578_v5  ;;  %v825_v49 = vmul.f32 %v5333_v17, %v578_v5  ;;  %v683_v21 = vmul.f32 %v5370_v43, %v578_v5  ;;  %v5515_v43 = vld [vmem:[%s5509_s13 + $0x8] sm:$0xff] }
 0x1df   : > { %6917 = vst [vmem:[#allocation5_spill] sm:$0xff] %v5515_v43  ;;  %vm1206_vm7 = vcmp.gt.f32.partialorder %v5515_v43, 0.0 }
 0x1e0   : > { %4819 = vmatprep.subr.msk.bf16.mxu0 %vm1550_vm2, %v5469_v6  ;;  %740 = vadd.xlane.f32.xlu1 %v739_v7  ;;  %v883_v54 = vsel %vm690_vm3, %v825_v49, 0.0  ;;  %v742_v13 = vsel %vm690_vm3, %v683_v21, 0.0  ;;  %v5560_v21 = vld [vmem:[%s5509_s13 + $0x10] sm:$0xff] }
 0x1e1   : > { %737 = vadd.xlane.f32.xlu0 %v736_v11  ;;  %v5501_v56 = vpop.permute.xlu1 %613  ;;  %v993_v11 = vrot.slane %v5439_v45, %v5216_v19  ;;  %v1111_v45 = vadd.f32 %v947_v53, %v5428_v29  ;;  %6919 = vst [vmem:[#allocation7_spill] sm:$0xff] %v5560_v21  ;;  %vm6909_vm14 = vcmp.gt.f32.partialorder %v5560_v21, 0.0 }
 0x1e2   : > { %v831_v17 = vmul.f32 %v5382_v52, %v5501_v56  ;;  %v689_v33 = vmul.f32 %v5392_v57, %v5501_v56  ;;  %v5524_v52 = vsel %vm1206_vm7, %v1182_v60, -1e+09 }
 0x1e3   : > { %v1251_v44 = vsel %vm1247_vm8, %v5524_v52, -inf  ;;  %vm1135_vm13 = vcmp.gt.f32.partialorder %v1111_v45, 0.0 }
 0x1e4   : > { %899 = vadd.xlane.f32.xlu1 %v898_v14  ;;  %v901_v59 = vsel %vm690_vm3, %v831_v17, 0.0  ;;  %v760_v63 = vsel %vm690_vm3, %v689_v33, 0.0 }
 0x1e5   : > { %896 = vadd.xlane.f32.xlu0 %v895_v15 }
 0x1e9   : > { %755 = vadd.xlane.f32.xlu0 %v754_v18 }
 0x1ed   : > { %890 = vadd.xlane.f32.xlu0 %v889_v9  ;;  %v5542_v9 = vld [vmem:[%s5509_s13 + $0x20] sm:$0xff] }
 0x1ee   : > { %vm1209_vm9 = vcmp.gt.f32.partialorder %v5542_v9, 0.0 }
 0x1f1   : > { %749 = vadd.xlane.f32.xlu0 %v748_v47  ;;  %v1159_v47 = vmul.f32 0.2, %v1111_v45 }
 0x1f3   : > { %v1183_v17 = vsel %vm1135_vm13, %v1111_v45, %v1159_v47 }
 0x1f4   : > { %v5577_v60 = vsel %vm6909_vm14, %v1183_v17, -1e+09 }
 0x1f5   : > { %884 = vadd.xlane.f32.xlu0 %v883_v54 }
 0x1f9   : > { %743 = vadd.xlane.f32.xlu0 %v742_v13 }
 0x1fd   : > { %902 = vadd.xlane.f32.xlu0 %v901_v59  ;;  %v5571_v59 = vld [vmem:[%s5509_s13 + $0x18] sm:$0xff] }
 0x1fe   : > { %vm1208_vm6 = vcmp.gt.f32.partialorder %v5571_v59, 0.0 }
 0x201   : > { %761 = vadd.xlane.f32.xlu0 %v760_v63 }
 0x205   : > { %1252 = vmax.xlane.f32.xlu0 %v1251_v44 }
 0x209   : > { %v873_v2 = vpop.xlane.xlu0 %872 }
 0x20a   : > { %v997_v5 = vrot.slane %v873_v2, %v5218_v22  ;;  %v5581_v2 = vld [vmem:[%s5509_s13 + $0x28] sm:$0xff]  ;;  %s5119_s13 = smov 32  }
 0x20c   : > { %v998_v18 = vsel %vm939_vm4, %v997_v5, %v993_v11 }
 0x20d   : > { %v732_v3 = vpop.xlane.xlu0 %731 }
 0x211   : > { %v5529_v7 = vpop.permute.xlu0 %595 }
 0x212   : > { %v876_v12 = vpop.xlane.xlu1 %875  ;;  %v828_v14 = vmul.f32 %v5345_v26, %v5529_v7  ;;  %v686_v27 = vmul.f32 %v5359_v37, %v5529_v7  ;;  %v1157_v26 = vmul.f32 0.2, %v1109_v10  ;;  %v688_v37 = vmul.f32 %v5392_v57, %v5464_v1 }
 0x213   : > { %v1002_v15 = vrot.slane %v876_v12, %v5220_v23 }
 0x214   : > { %v892_v16 = vsel %vm690_vm3, %v828_v14, 0.0  ;;  %v751_v40 = vsel %vm690_vm3, %v686_v27, 0.0  ;;  %v1181_v39 = vsel %vm1133_vm10, %v1109_v10, %v1157_v26  ;;  %v757_v25 = vsel %vm690_vm3, %v688_v37, 0.0 }
 0x215   : > { %893 = vadd.xlane.f32.xlu1 %v892_v16  ;;  %v1003_v20 = vsel %vm946_vm5, %v1002_v15, %v998_v18 }
 0x216   : > { %v1122_v35 = vadd.f32 %v1003_v20, %v732_v3  ;;  %v1121_v29 = vadd.f32 %v1003_v20, %v5451_v55  ;;  %v735_v53 = vpop.xlane.xlu1 %734  ;;  %v5567_v55 = vsel %vm1205_vm12, %v1181_v39, -1e+09  ;;  %v1254_v3 = vsel %vm1247_vm8, %v5577_v60, -inf }
 0x217   : > { %v1123_v13 = vadd.f32 %v1003_v20, %v735_v53  ;;  %v1248_v33 = vsel %vm1247_vm8, %v5567_v55, -inf }
 0x218   : > { %vm1146_vm11 = vcmp.gt.f32.partialorder %v1122_v35, 0.0  ;;  %v1170_v41 = vmul.f32 0.2, %v1122_v35  ;;  %v1169_v58 = vmul.f32 0.2, %v1121_v29  ;;  %vm1145_vm15 = vcmp.gt.f32.partialorder %v1121_v29, 0.0 }
 0x219   : > { %752 = vadd.xlane.f32.xlu1 %v751_v40  ;;  %v1171_v63 = vmul.f32 0.2, %v1123_v13  ;;  %vm1147_vm10 = vcmp.gt.f32.partialorder %v1123_v13, 0.0 }
 0x21a   : > { %v1194_v49 = vsel %vm1146_vm11, %v1122_v35, %v1170_v41  ;;  %v1193_v44 = vsel %vm1145_vm15, %v1121_v29, %v1169_v58  ;;  %v843_v10 = vpop.xlane.xlu1 %842  ;;  %vm6911_vm11 = vcmp.gt.f32.partialorder %v5581_v2, 0.0 }
 0x21b   : > { %v5557_v54 = vsel %vm1209_vm9, %v1194_v49, -1e+09  ;;  %v5587_v5 = vsel %vm1208_vm6, %v1193_v44, -1e+09  ;;  %v1195_v11 = vsel %vm1147_vm10, %v1123_v13, %v1171_v63  ;;  %v951_v47 = vrot.slane %v843_v10, %v5216_v19 }
 0x21c   : > { %v1287_v57 = vsel %vm1247_vm8, %v5557_v54, -inf  ;;  %v1284_v12 = vsel %vm1247_vm8, %v5587_v5, -inf  ;;  %v5594_v14 = vsel %vm6911_vm11, %v1195_v11, -1e+09 }
 0x21d   : > { %1288 = vmax.xlane.f32.xlu0 %v1287_v57  ;;  %758 = vadd.xlane.f32.xlu1 %v757_v25  ;;  %v1290_v16 = vsel %vm1247_vm8, %v5594_v14, -inf }
 0x21e   : > { %v852_v15 = vpop.xlane.xlu1 %851 }
 0x21f   : > { %v965_v13 = vrot.slane %v852_v15, %v5216_v19 }
 0x221   : > { %1249 = vmax.xlane.f32.xlu1 %v1248_v33 }
 0x222   : > { %v711_v18 = vpop.xlane.xlu1 %710 }
 0x225   : > { %1255 = vmax.xlane.f32.xlu1 %v1254_v3 }
 0x226   : > { %v705_v27 = vpop.xlane.xlu1 %704 }
 0x229   : > { %1285 = vmax.xlane.f32.xlu1 %v1284_v12 }
 0x22a   : > { %v864_v20 = vpop.xlane.xlu1 %863 }
 0x22d   : > { %1291 = vmax.xlane.f32.xlu1 %v1290_v16 }
 0x22e   : > { %v5598_v35 = vpop.xlane.xlu1 %722 }
 0x232   : > { %v849_v40 = vpop.xlane.xlu1 %848 }
 0x233   : > { %v960_v49 = vrot.slane %v849_v40, %v5220_v23 }
 0x236   : > { %v858_v39 = vpop.xlane.xlu1 %857 }
 0x237   : > { %v974_v63 = vrot.slane %v858_v39, %v5220_v23 }
 0x23a   : > { %v717_v10 = vpop.xlane.xlu1 %716 }
 0x242   : > { %v702_v45 = vpop.xlane.xlu0 %701 }
 0x246   : > { %v861_v26 = vpop.xlane.xlu0 %860 }
 0x24a   : > { %v720_v41 = vpop.xlane.xlu0 %719 }
 0x24e   : > { %v846_v37 = vpop.xlane.xlu0 %845 }
 0x24f   : > { %v955_v29 = vrot.slane %v846_v37, %v5218_v22 }
 0x251   : > { %v956_v53 = vsel %vm939_vm4, %v955_v29, %v951_v47 }
 0x252   : > { %v855_v57 = vpop.xlane.xlu0 %854  ;;  %v961_v25 = vsel %vm946_vm5, %v960_v49, %v956_v53 }
 0x253   : > { %v969_v17 = vrot.slane %v855_v57, %v5218_v22  ;;  %v1112_v58 = vadd.f32 %v961_v25, %v702_v45  ;;  %v1113_v33 = vadd.f32 %v961_v25, %v705_v27 }
 0x255   : > { %v970_v44 = vsel %vm939_vm4, %v969_v17, %v965_v13  ;;  %vm1137_vm13 = vcmp.gt.f32.partialorder %v1113_v33, 0.0  ;;  %v1161_v3 = vmul.f32 0.2, %v1113_v33  ;;  %vm1136_vm15 = vcmp.gt.f32.partialorder %v1112_v58, 0.0 }
 0x256   : > { %v714_v11 = vpop.xlane.xlu0 %713  ;;  %v975_v12 = vsel %vm946_vm5, %v974_v63, %v970_v44  ;;  %v1160_v16 = vmul.f32 0.2, %v1112_v58 }
 0x257   : > { %v1115_v40 = vadd.f32 %v975_v12, %v711_v18  ;;  %v1116_v37 = vadd.f32 %v975_v12, %v714_v11  ;;  %v1117_v47 = vadd.f32 %v975_v12, %v717_v10  ;;  %v1185_v15 = vsel %vm1137_vm13, %v1113_v33, %v1161_v3 }
 0x258   : > { %v5612_v45 = vsel %vm1206_vm7, %v1185_v15, -1e+09  ;;  %v1184_v27 = vsel %vm1136_vm15, %v1112_v58, %v1160_v16  ;;  %v979_v58 = vrot.slane %v861_v26, %v5216_v19  ;;  %v983_v10 = vrot.slane %v864_v20, %v5218_v22 }
 0x259   : > { %v1260_v29 = vsel %vm1247_vm8, %v5612_v45, -inf  ;;  %v5618_v49 = vsel %vm1205_vm12, %v1184_v27, -1e+09  ;;  %vm1139_vm10 = vcmp.gt.f32.partialorder %v1115_v40, 0.0  ;;  %v1163_v53 = vmul.f32 0.2, %v1115_v40 }
 0x25a   : > { %v708_v39 = vpop.xlane.xlu0 %707  ;;  %1261 = vmax.xlane.f32.xlu1 %v1260_v29  ;;  %v1257_v18 = vsel %vm1247_vm8, %v5618_v49, -inf  ;;  %vm1141_vm13 = vcmp.gt.f32.partialorder %v1117_v47, 0.0  ;;  %v1165_v57 = vmul.f32 0.2, %v1117_v47  ;;  %v1164_v13 = vmul.f32 0.2, %v1116_v37 }
 0x25b   : > { %v1114_v17 = vadd.f32 %v961_v25, %v708_v39  ;;  %1258 = vmax.xlane.f32.xlu0 %v1257_v18  ;;  %v1187_v33 = vsel %vm1139_vm10, %v1115_v40, %v1163_v53  ;;  %vm1140_vm15 = vcmp.gt.f32.partialorder %v1116_v37, 0.0 }
 0x25c   : > { %v1189_v63 = vsel %vm1141_vm13, %v1117_v47, %v1165_v57  ;;  %v5625_v3 = vsel %vm1205_vm12, %v1187_v33, -1e+09  ;;  %v1188_v40 = vsel %vm1140_vm15, %v1116_v37, %v1164_v13  ;;  %v984_v47 = vsel %vm939_vm4, %v983_v10, %v979_v58 }
 0x25d   : > { %v1162_v44 = vmul.f32 0.2, %v1114_v17  ;;  %vm1138_vm1 = vcmp.gt.f32.partialorder %v1114_v17, 0.0  ;;  %v1266_v12 = vsel %vm1247_vm8, %v5625_v3, -inf  ;;  %v5633_v26 = vsel %vm6909_vm14, %v1189_v63, -1e+09 }
 0x25e   : > { %v867_v11 = vpop.xlane.xlu0 %866  ;;  %1267 = vmax.xlane.f32.xlu1 %v1266_v12  ;;  %v1272_v53 = vsel %vm1247_vm8, %v5633_v26, -inf  ;;  %v5648_v37 = vsel %vm1206_vm7, %v1188_v40, -1e+09 }
 0x25f   : > { %v988_v25 = vrot.slane %v867_v11, %v5220_v23  ;;  %v1186_v16 = vsel %vm1138_vm1, %v1114_v17, %v1162_v44 }
 0x260   : > { %v5638_v15 = vsel %vm6909_vm14, %v1186_v16, -1e+09 }
 0x261   : > { %v989_v20 = vsel %vm946_vm5, %v988_v25, %v984_v47  ;;  %v1263_v27 = vsel %vm1247_vm8, %v5638_v15, -inf  ;;  %v888_v47 = vpop.xlane.xlu1 %887 }
 0x262   : > { %v726_v29 = vpop.xlane.xlu0 %725  ;;  %v1118_v39 = vadd.f32 %v989_v20, %v720_v41  ;;  %v1119_v18 = vadd.f32 %v989_v20, %v5598_v35  ;;  %1264 = vmax.xlane.f32.xlu0 %v1263_v27  ;;  %1273 = vmax.xlane.f32.xlu1 %v1272_v53  ;;  %v1269_v41 = vsel %vm1247_vm8, %v5648_v37, -inf }
 0x263   : > { %v1120_v57 = vadd.f32 %v989_v20, %v726_v29 }
 0x264   : > { %vm1143_vm1 = vcmp.gt.f32.partialorder %v1119_v18, 0.0  ;;  %v1167_v13 = vmul.f32 0.2, %v1119_v18  ;;  %vm1142_vm10 = vcmp.gt.f32.partialorder %v1118_v39, 0.0  ;;  %v1166_v17 = vmul.f32 0.2, %v1118_v39 }
 0x265   : > { %v1168_v58 = vmul.f32 0.2, %v1120_v57  ;;  %vm1144_vm13 = vcmp.gt.f32.partialorder %v1120_v57, 0.0 }
 0x266   : > { %v879_v35 = vpop.xlane.xlu0 %878  ;;  %1270 = vmax.xlane.f32.xlu0 %v1269_v41  ;;  %v1191_v33 = vsel %vm1143_vm1, %v1119_v18, %v1167_v13  ;;  %v1190_v63 = vsel %vm1142_vm10, %v1118_v39, %v1166_v17  ;;  %v747_v39 = vpop.xlane.xlu1 %746 }
 0x267   : > { %v5654_v44 = vsel %vm1206_vm7, %v1191_v33, -1e+09  ;;  %v5658_v10 = vsel %vm1205_vm12, %v1190_v63, -1e+09  ;;  %v1192_v11 = vsel %vm1144_vm13, %v1120_v57, %v1168_v58  ;;  %v1007_v17 = vrot.slane %v879_v35, %v5216_v19 }
 0x268   : > { %v1278_v12 = vsel %vm1247_vm8, %v5654_v44, -inf  ;;  %v1275_v25 = vsel %vm1247_vm8, %v5658_v10, -inf  ;;  %v5666_v40 = vsel %vm6909_vm14, %v1192_v11, -1e+09 }
 0x269   : > { %1279 = vmax.xlane.f32.xlu1 %v1278_v12  ;;  %v1281_v20 = vsel %vm1247_vm8, %v5666_v40, -inf }
 0x26a   : > { %v738_v16 = vpop.xlane.xlu0 %737  ;;  %1276 = vmax.xlane.f32.xlu0 %v1275_v25  ;;  %v882_v53 = vpop.xlane.xlu1 %881 }
 0x26b   : > { %v1011_v13 = vrot.slane %v882_v53, %v5218_v22 }
 0x26d   : > { %v1012_v33 = vsel %vm939_vm4, %v1011_v13, %v1007_v17 }
 0x26e   : > { %v897_v27 = vpop.xlane.xlu0 %896  ;;  %1282 = vmax.xlane.f32.xlu0 %v1281_v20  ;;  %v741_v63 = vpop.xlane.xlu1 %740 }
 0x272   : > { %v756_v29 = vpop.xlane.xlu0 %755 }
 0x276   : > { %v891_v18 = vpop.xlane.xlu0 %890 }
 0x27a   : > { %v750_v57 = vpop.xlane.xlu0 %749 }
 0x27e   : > { %v885_v58 = vpop.xlane.xlu0 %884 }
 0x27f   : > { %v1016_v41 = vrot.slane %v885_v58, %v5220_v23 }
 0x281   : > { %v1017_v11 = vsel %vm946_vm5, %v1016_v41, %v1012_v33 }
 0x282   : > { %v744_v12 = vpop.xlane.xlu0 %743  ;;  %v1124_v25 = vadd.f32 %v1017_v11, %v738_v16  ;;  %v1125_v20 = vadd.f32 %v1017_v11, %v741_v63  ;;  %v900_v63 = vpop.xlane.xlu1 %899 }
 0x283   : > { %v1126_v0 = vadd.f32 %v1017_v11, %v744_v12 }
 0x284   : > { %vm1148_vm15 = vcmp.gt.f32.partialorder %v1124_v25, 0.0  ;;  %v1172_v21 = vmul.f32 0.2, %v1124_v25  ;;  %vm1149_vm1 = vcmp.gt.f32.partialorder %v1125_v20, 0.0  ;;  %v1173_v36 = vmul.f32 0.2, %v1125_v20 }
 0x285   : > { %v1174_v43 = vmul.f32 0.2, %v1126_v0  ;;  %vm1150_vm10 = vcmp.gt.f32.partialorder %v1126_v0, 0.0 }
 0x286   : > { %v1196_v53 = vsel %vm1148_vm15, %v1124_v25, %v1172_v21  ;;  %v1197_v35 = vsel %vm1149_vm1, %v1125_v20, %v1173_v36  ;;  %v903_v21 = vpop.xlane.xlu0 %902 }
 0x287   : > { %v5677_v58 = vsel %vm1208_vm6, %v1196_v53, -1e+09  ;;  %v5681_v13 = vsel %vm1209_vm9, %v1197_v35, -1e+09  ;;  %v1198_v17 = vsel %vm1150_vm10, %v1126_v0, %v1174_v43  ;;  %v1039_v0 = vrot.slane %v900_v63, %v5218_v22 }
 0x288   : > { %v1293_v16 = vsel %vm1247_vm8, %v5677_v58, -inf  ;;  %v1296_v41 = vsel %vm1247_vm8, %v5681_v13, -inf  ;;  %v5689_v36 = vsel %vm6911_vm11, %v1198_v17, -1e+09  ;;  %v1035_v43 = vrot.slane %v897_v27, %v5216_v19 }
 0x289   : > { %1294 = vmax.xlane.f32.xlu0 %v1293_v16  ;;  %1297 = vmax.xlane.f32.xlu1 %v1296_v41  ;;  %v1299_v33 = vsel %vm1247_vm8, %v5689_v36, -inf  ;;  %v1044_v12 = vrot.slane %v903_v21, %v5220_v23  ;;  %v1025_v17 = vrot.slane %v891_v18, %v5218_v22  ;;  %v1021_v41 = vrot.slane %v888_v47, %v5216_v19 }
 0x28a   : > { %v762_v11 = vpop.xlane.xlu0 %761  ;;  %v1040_v20 = vsel %vm939_vm4, %v1039_v0, %v1035_v43 }
 0x28b   : > { %v1045_v53 = vsel %vm946_vm5, %v1044_v12, %v1040_v20  ;;  %v1026_v27 = vsel %vm939_vm4, %v1025_v17, %v1021_v41 }
 0x28c   : > { %v1130_v16 = vadd.f32 %v1045_v53, %v756_v29  ;;  %v1132_v1 = vadd.f32 %v1045_v53, %v762_v11 }
 0x28d   : > { %1300 = vmax.xlane.f32.xlu0 %v1299_v33 }
 0x28e   : > { %v1253_v25 = vpop.xlane.xlu0 %1252  ;;  %v1178_v28 = vmul.f32 0.2, %v1130_v16  ;;  %vm1154_vm13 = vcmp.gt.f32.partialorder %v1130_v16, 0.0  ;;  %v1180_v20 = vmul.f32 0.2, %v1132_v1  ;;  %vm1156_vm14 = vcmp.gt.f32.partialorder %v1132_v1, 0.0 }
 0x28f   : > { %v1321_v35 = vsub.f32 %v5524_v52, %v1253_v25 }
 0x290   : > { %v1202_v25 = vsel %vm1154_vm13, %v1130_v16, %v1178_v28 }
 0x291   : > { %v1346_v32 = vmul.f32 1.442695, %v1321_v35 }
 0x293   : > { %4855 = vpow2.f32 %v1346_v32 }
 0x29e   : > { %v894_v33 = vpop.xlane.xlu1 %893 }
 0x29f   : > { %v1030_v63 = vrot.slane %v894_v33, %v5220_v23 }
 0x2a1   : > { %v1031_v21 = vsel %vm946_vm5, %v1030_v63, %v1026_v27  ;;  %v5719_v63 = vsel %vm1208_vm6, %v1202_v25, -1e+09 }
 0x2a2   : > { %v1127_v0 = vadd.f32 %v1031_v21, %v747_v39  ;;  %v1128_v43 = vadd.f32 %v1031_v21, %v750_v57  ;;  %v753_v12 = vpop.xlane.xlu1 %752 }
 0x2a3   : > { %v1129_v52 = vadd.f32 %v1031_v21, %v753_v12 }
 0x2a4   : > { %vm1152_vm15 = vcmp.gt.f32.partialorder %v1128_v43, 0.0  ;;  %v1176_v29 = vmul.f32 0.2, %v1128_v43  ;;  %vm1151_vm1 = vcmp.gt.f32.partialorder %v1127_v0, 0.0  ;;  %v1175_v47 = vmul.f32 0.2, %v1127_v0 }
 0x2a5   : > { %v1177_v18 = vmul.f32 0.2, %v1129_v52  ;;  %vm1153_vm10 = vcmp.gt.f32.partialorder %v1129_v52, 0.0 }
 0x2a6   : > { %v1289_v35 = vpop.xlane.xlu0 %1288  ;;  %v759_v17 = vpop.xlane.xlu1 %758  ;;  %v1200_v41 = vsel %vm1152_vm15, %v1128_v43, %v1176_v29  ;;  %v1199_v33 = vsel %vm1151_vm1, %v1127_v0, %v1175_v47  ;;  %v1204_v43 = vsel %vm1156_vm14, %v1132_v1, %v1180_v20  ;;  %v1311_v47 = vsel %vm1247_vm8, %v5719_v63, -inf }
 0x2a7   : > { %v1333_v39 = vsub.f32 %v5557_v54, %v1289_v35  ;;  %v1131_v57 = vadd.f32 %v1045_v53, %v759_v17  ;;  %v5707_v32 = vsel %vm1209_vm9, %v1200_v41, -1e+09  ;;  %v5711_v11 = vsel %vm1208_vm6, %v1199_v33, -1e+09  ;;  %v5739_v35 = vpop.eup %4855 }
 0x2a8   : > { %v1305_v28 = vsel %vm1247_vm8, %v5707_v32, -inf  ;;  %v1302_v16 = vsel %vm1247_vm8, %v5711_v11, -inf  ;;  %v1201_v54 = vsel %vm1153_vm10, %v1129_v52, %v1177_v18  ;;  %v5732_v25 = vsel %vm6911_vm11, %v1204_v43, -1e+09 }
 0x2a9   : > { %v1370_v53 = vmul.f32 1.442695, %v1333_v39  ;;  %v1179_v27 = vmul.f32 0.2, %v1131_v57  ;;  %1306 = vmax.xlane.f32.xlu0 %v1305_v28  ;;  %1303 = vmax.xlane.f32.xlu1 %v1302_v16  ;;  %v5723_v21 = vsel %vm6911_vm11, %v1201_v54, -1e+09 }
 0x2aa   : > { %v1250_v0 = vpop.xlane.xlu1 %1249  ;;  %vm1155_vm13 = vcmp.gt.f32.partialorder %v1131_v57, 0.0  ;;  %v1308_v52 = vsel %vm1247_vm8, %v5723_v21, -inf  ;;  %v1317_v17 = vsel %vm1247_vm8, %v5732_v25, -inf  ;;  %v1395_v28 = vsel %vm1247_vm8, %v5739_v35, 0.0 }
 0x2ab   : > { %4857 = vpow2.f32 %v1370_v53  ;;  %v1320_v12 = vsub.f32 %v5567_v55, %v1250_v0  ;;  %v1203_v29 = vsel %vm1155_vm13, %v1131_v57, %v1179_v27  ;;  %vm6910_vm14 = vcmask 130048  }
 0x2ac   : > { %v5736_v1 = vsel %vm1209_vm9, %v1203_v29, -1e+09  ;;  %vm6922_vm10 = vcmask 261120  }
 0x2ad   : > { %v1344_v18 = vmul.f32 1.442695, %v1320_v12  ;;  %1312 = vmax.xlane.f32.xlu0 %v1311_v47  ;;  %1309 = vmax.xlane.f32.xlu1 %v1308_v52  ;;  %v1314_v41 = vsel %vm1247_vm8, %v5736_v1, -inf }
 0x2ae   : > { %v1256_v20 = vpop.xlane.xlu1 %1255 }
 0x2af   : > { %4859 = vpow2.f32 %v1344_v18  ;;  %v1322_v55 = vsub.f32 %v5577_v60, %v1256_v20 }
 0x2b1   : > { %v1348_v33 = vmul.f32 1.442695, %v1322_v55  ;;  %1318 = vmax.xlane.f32.xlu0 %v1317_v17  ;;  %1315 = vmax.xlane.f32.xlu1 %v1314_v41 }
 0x2b2   : > { %v1286_v39 = vpop.xlane.xlu1 %1285 }
 0x2b3   : > { %4861 = vpow2.f32 %v1348_v33  ;;  %v1332_v57 = vsub.f32 %v5587_v5, %v1286_v39 }
 0x2b5   : > { %v1368_v16 = vmul.f32 1.442695, %v1332_v57  ;;  %1396 = vadd.xlane.f32.xlu0 %v1395_v28 }
 0x2b6   : > { %v1292_v60 = vpop.xlane.xlu1 %1291 }
 0x2b7   : > { %4863 = vpow2.f32 %v1368_v16  ;;  %v1334_v54 = vsub.f32 %v5594_v14, %v1292_v60 }
 0x2b8   : > { %v5749_v53 = vpop.eup %4857 }
 0x2b9   : > { %v1372_v27 = vmul.f32 1.442695, %v1334_v54  ;;  %v1431_v0 = vsel %vm1247_vm8, %v5749_v53, 0.0 }
 0x2ba   : > { %1432 = vadd.xlane.f32.xlu0 %v1431_v0 }
 0x2bb   : > { %4865 = vpow2.f32 %v1372_v27 }
 0x2bc   : > { %v5753_v43 = vpop.eup %4859 }
 0x2bd   : > { %v1392_v5 = vsel %vm1247_vm8, %v5753_v43, 0.0 }
 0x2be   : > { %1393 = vadd.xlane.f32.xlu1 %v1392_v5 }
 0x2c0   : > { %v5757_v12 = vpop.eup %4861 }
 0x2c1   : > { %v1398_v29 = vsel %vm1247_vm8, %v5757_v12, 0.0 }
 0x2c2   : > { %1399 = vadd.xlane.f32.xlu1 %v1398_v29 }
 0x2c4   : > { %v5761_v14 = vpop.eup %4863 }
 0x2c5   : > { %v1428_v47 = vsel %vm1247_vm8, %v5761_v14, 0.0 }
 0x2c6   : > { %1429 = vadd.xlane.f32.xlu1 %v1428_v47 }
 0x2c8   : > { %v5765_v52 = vpop.eup %4865 }
 0x2c9   : > { %v1434_v18 = vsel %vm1247_vm8, %v5765_v52, 0.0 }
 0x2ca   : > { %1435 = vadd.xlane.f32.xlu1 %v1434_v18 }
 0x2e3   : > { %v1262_v20 = vpop.xlane.xlu1 %1261 }
 0x2e4   : > { %v1259_v55 = vpop.xlane.xlu0 %1258  ;;  %v1324_v17 = vsub.f32 %v5612_v45, %v1262_v20 }
 0x2e5   : > { %v1323_v41 = vsub.f32 %v5618_v49, %v1259_v55 }
 0x2e6   : > { %v1352_v33 = vmul.f32 1.442695, %v1324_v17 }
 0x2e7   : > { %v1350_v39 = vmul.f32 1.442695, %v1323_v41  ;;  %v1268_v57 = vpop.xlane.xlu1 %1267 }
 0x2e8   : > { %4867 = vpow2.f32 %v1352_v33  ;;  %v1326_v28 = vsub.f32 %v5625_v3, %v1268_v57 }
 0x2e9   : > { %4869 = vpow2.f32 %v1350_v39 }
 0x2ea   : > { %v1356_v16 = vmul.f32 1.442695, %v1326_v28 }
 0x2eb   : > { %v1265_v60 = vpop.xlane.xlu0 %1264  ;;  %v1274_v27 = vpop.xlane.xlu1 %1273 }
 0x2ec   : > { %v1325_v54 = vsub.f32 %v5638_v15, %v1265_v60  ;;  %4871 = vpow2.f32 %v1356_v16  ;;  %v1328_v0 = vsub.f32 %v5633_v26, %v1274_v27 }
 0x2ee   : > { %v1354_v5 = vmul.f32 1.442695, %v1325_v54  ;;  %v1360_v29 = vmul.f32 1.442695, %v1328_v0 }
 0x2ef   : > { %v1271_v45 = vpop.xlane.xlu0 %1270 }
 0x2f0   : > { %4873 = vpow2.f32 %v1354_v5  ;;  %v1327_v49 = vsub.f32 %v5648_v37, %v1271_v45 }
 0x2f1   : > { %4875 = vpow2.f32 %v1360_v29 }
 0x2f2   : > { %v1358_v47 = vmul.f32 1.442695, %v1327_v49  ;;  %v1280_v18 = vpop.xlane.xlu1 %1279 }
 0x2f3   : > { %v1330_v20 = vsub.f32 %v5654_v44, %v1280_v18  ;;  %v1277_v3 = vpop.xlane.xlu0 %1276 }
 0x2f4   : > { %4877 = vpow2.f32 %v1358_v47  ;;  %v1329_v55 = vsub.f32 %v5658_v10, %v1277_v3 }
 0x2f5   : > { %v5777_v15 = vpop.eup %4867  ;;  %v1364_v17 = vmul.f32 1.442695, %v1330_v20 }
 0x2f6   : > { %v5779_v41 = vpop.eup %4869  ;;  %v1362_v26 = vmul.f32 1.442695, %v1329_v55  ;;  %v1404_v33 = vsel %vm1247_vm8, %v5777_v15, 0.0 }
 0x2f7   : > { %4879 = vpow2.f32 %v1364_v17  ;;  %v1283_v37 = vpop.xlane.xlu0 %1282  ;;  %v1401_v39 = vsel %vm1247_vm8, %v5779_v41, 0.0  ;;  %1405 = vadd.xlane.f32.xlu1 %v1404_v33 }
 0x2f8   : > { %4881 = vpow2.f32 %v1362_v26  ;;  %v1331_v44 = vsub.f32 %v5666_v40, %v1283_v37  ;;  %1402 = vadd.xlane.f32.xlu0 %v1401_v39 }
 0x2f9   : > { %v5786_v10 = vpop.eup %4871 }
 0x2fa   : > { %v1366_v57 = vmul.f32 1.442695, %v1331_v44  ;;  %v1410_v28 = vsel %vm1247_vm8, %v5786_v10, 0.0 }
 0x2fb   : > { %1411 = vadd.xlane.f32.xlu1 %v1410_v28 }
 0x2fc   : > { %4883 = vpow2.f32 %v1366_v57 }
 0x2fd   : > { %v5790_v16 = vpop.eup %4873 }
 0x2fe   : > { %v5792_v60 = vpop.eup %4875  ;;  %v1407_v54 = vsel %vm1247_vm8, %v5790_v16, 0.0 }
 0x2ff   : > { %1408 = vadd.xlane.f32.xlu0 %v1407_v54  ;;  %v1416_v40 = vsel %vm1247_vm8, %v5792_v60, 0.0 }
 0x300   : > { %1417 = vadd.xlane.f32.xlu1 %v1416_v40 }
 0x301   : > { %v5798_v27 = vpop.eup %4877 }
 0x302   : > { %v1413_v0 = vsel %vm1247_vm8, %v5798_v27, 0.0 }
 0x303   : > { %1414 = vadd.xlane.f32.xlu0 %v1413_v0 }
 0x304   : > { %v5802_v5 = vpop.eup %4879 }
 0x305   : > { %v5804_v29 = vpop.eup %4881  ;;  %v1422_v45 = vsel %vm1247_vm8, %v5802_v5, 0.0 }
 0x306   : > { %1423 = vadd.xlane.f32.xlu1 %v1422_v45  ;;  %v1419_v49 = vsel %vm1247_vm8, %v5804_v29, 0.0 }
 0x307   : > { %1420 = vadd.xlane.f32.xlu0 %v1419_v49 }
 0x309   : > { %v5810_v47 = vpop.eup %4883 }
 0x30a   : > { %v1425_v18 = vsel %vm1247_vm8, %v5810_v47, 0.0 }
 0x30b   : > { %1426 = vadd.xlane.f32.xlu0 %v1425_v18 }
 0x312   : > { %v1295_v20 = vpop.xlane.xlu0 %1294  ;;  %v1298_v3 = vpop.xlane.xlu1 %1297 }
 0x313   : > { %v1335_v55 = vsub.f32 %v5677_v58, %v1295_v20  ;;  %v1336_v17 = vsub.f32 %v5681_v13, %v1298_v3 }
 0x315   : > { %v1374_v26 = vmul.f32 1.442695, %v1335_v55  ;;  %v1376_v33 = vmul.f32 1.442695, %v1336_v17 }
 0x316   : > { %v1301_v37 = vpop.xlane.xlu0 %1300 }
 0x317   : > { %4885 = vpow2.f32 %v1374_v26  ;;  %v1337_v39 = vsub.f32 %v5689_v36, %v1301_v37 }
 0x318   : > { %4887 = vpow2.f32 %v1376_v33 }
 0x319   : > { %v1378_v44 = vmul.f32 1.442695, %v1337_v39 }
 0x31b   : > { %4889 = vpow2.f32 %v1378_v44 }
 0x324   : > { %v5817_v57 = vpop.eup %4885 }
 0x325   : > { %v5819_v28 = vpop.eup %4887  ;;  %v1437_v54 = vsel %vm1247_vm8, %v5817_v57, 0.0 }
 0x326   : > { %1438 = vadd.xlane.f32.xlu0 %v1437_v54  ;;  %v1440_v58 = vsel %vm1247_vm8, %v5819_v28, 0.0 }
 0x327   : > { %1441 = vadd.xlane.f32.xlu1 %v1440_v58 }
 0x328   : > { %v5825_v13 = vpop.eup %4889 }
 0x329   : > { %v1443_v36 = vsel %vm1247_vm8, %v5825_v13, 0.0 }
 0x32a   : > { %1444 = vadd.xlane.f32.xlu0 %v1443_v36 }
 0x332   : > { %v1307_v40 = vpop.xlane.xlu0 %1306  ;;  %v1304_v0 = vpop.xlane.xlu1 %1303 }
 0x333   : > { %v1339_v45 = vsub.f32 %v5707_v32, %v1307_v40  ;;  %v1338_v49 = vsub.f32 %v5711_v11, %v1304_v0 }
 0x335   : > { %v1382_v18 = vmul.f32 1.442695, %v1339_v45  ;;  %v1380_v20 = vmul.f32 1.442695, %v1338_v49 }
 0x336   : > { %v1313_v3 = vpop.xlane.xlu0 %1312  ;;  %v1310_v55 = vpop.xlane.xlu1 %1309 }
 0x337   : > { %4891 = vpow2.f32 %v1382_v18  ;;  %v1341_v17 = vsub.f32 %v5719_v63, %v1313_v3  ;;  %v1340_v26 = vsub.f32 %v5723_v21, %v1310_v55 }
 0x338   : > { %4893 = vpow2.f32 %v1380_v20 }
 0x339   : > { %v1386_v33 = vmul.f32 1.442695, %v1341_v17  ;;  %v1384_v37 = vmul.f32 1.442695, %v1340_v26 }
 0x33a   : > { %v1319_v39 = vpop.xlane.xlu0 %1318  ;;  %v1316_v44 = vpop.xlane.xlu1 %1315 }
 0x33b   : > { %4895 = vpow2.f32 %v1386_v33  ;;  %v1343_v54 = vsub.f32 %v5732_v25, %v1319_v39  ;;  %v1342_v32 = vsub.f32 %v5736_v1, %v1316_v44 }
 0x33c   : > { %4897 = vpow2.f32 %v1384_v37 }
 0x33d   : > { %v1390_v11 = vmul.f32 1.442695, %v1343_v54  ;;  %v1388_v58 = vmul.f32 1.442695, %v1342_v32 }
 0x33e   : > { %v1397_v36 = vpop.xlane.xlu0 %1396 }
 0x33f   : > { %4899 = vpow2.f32 %v1390_v11 }
 0x340   : > { %4901 = vpow2.f32 %v1388_v58 }
 0x341   : > { %4903 = vrcp.f32 %v1397_v36  ;;  %v1609_v36 = vsel %vm1550_vm2, %v5367_v42, 0 }
 0x344   : > { %v5835_v40 = vpop.eup %4891 }
 0x345   : > { %v5837_v63 = vpop.eup %4893  ;;  %v1449_v21 = vsel %vm1247_vm8, %v5835_v40, 0.0 }
 0x346   : > { %1450 = vadd.xlane.f32.xlu0 %v1449_v21  ;;  %v1446_v25 = vsel %vm1247_vm8, %v5837_v63, 0.0  ;;  %v1530_v21 = vpack.c.bf16 %v5351_v31, %v5312_v4 }
 0x347   : > { %1447 = vadd.xlane.f32.xlu1 %v1446_v25  ;;  %v1394_v1 = vpop.xlane.xlu1 %1393 }
 0x348   : > { %v5843_v0 = vpop.eup %4895  ;;  %4905 = vrcp.f32 %v1394_v1 }
 0x349   : > { %v5845_v45 = vpop.eup %4897  ;;  %v1455_v49 = vsel %vm1247_vm8, %v5843_v0, 0.0 }
 0x34a   : > { %1456 = vadd.xlane.f32.xlu0 %v1455_v49  ;;  %v1452_v18 = vsel %vm1247_vm8, %v5845_v45, 0.0 }
 0x34b   : > { %1453 = vadd.xlane.f32.xlu1 %v1452_v18  ;;  %v1400_v20 = vpop.xlane.xlu1 %1399 }
 0x34c   : > { %v5851_v3 = vpop.eup %4899  ;;  %4907 = vrcp.f32 %v1400_v20 }
 0x34d   : > { %v5853_v55 = vpop.eup %4901  ;;  %v1461_v17 = vsel %vm1247_vm8, %v5851_v3, 0.0 }
 0x34e   : > { %1462 = vadd.xlane.f32.xlu0 %v1461_v17  ;;  %v1458_v26 = vsel %vm1247_vm8, %v5853_v55, 0.0  ;;  %v4904_v33 = vpop.eup %4903 }
 0x34f   : > { %1459 = vadd.xlane.f32.xlu1 %v1458_v26  ;;  %v1489_v44 = vmul.f32 %v4904_v33, %v5739_v35  ;;  %v1533_v35 = vpack.c.bf16 %v5398_v62, %v5398_v62 }
 0x355   : > { %v4906_v37 = vpop.eup %4905 }
 0x356   : > { %v1488_v39 = vmul.f32 %v4906_v37, %v5753_v43  ;;  %v1430_v43 = vpop.xlane.xlu1 %1429 }
 0x358   : > { %v1512_v54 = vpack.c.bf16 %v1489_v44, %v1488_v39 }
 0x359   : > { %v4908_v32 = vpop.eup %4907 }
 0x35a   : > { %4626 = vmatprep.mubr.msk.bf16.mxu1 %vm1247_vm8, %v1512_v54  ;;  %v1490_v11 = vmul.f32 %v4908_v32, %v5757_v12  ;;  %v1436_v25 = vpop.xlane.xlu1 %1435  ;;  %v1433_v12 = vpop.xlane.xlu0 %1432 }
 0x35c   : > { %v1513_v58 = vpack.c.bf16 %v1490_v11, %v1490_v11 }
 0x35e   : > { %4627 = vmatmul.mubr.msk.bf16.vlgmr.msra.gmra.mxu1 %vm1247_vm8, %v1513_v58 }
 0x35f   : > { %4631 = vmatpush3.bf16.msra.mxu1 %v1609_v36 }
 0x360   : > { %4632 = vmatprep.subr.bf16.mxu1 %v1530_v21 }
 0x363   : > { %4633 = vmatpush3.bf16.msra.mxu1 %v1530_v21 }
 0x364   : > { %4816 = vmatprep.subr.msk.bf16.mxu1 %vm1550_vm2, %v1533_v35 }
 0x380   : > { %v1406_v1 = vpop.xlane.xlu1 %1405 }
 0x381   : > { %v1403_v49 = vpop.xlane.xlu0 %1402  ;;  %4909 = vrcp.f32 %v1406_v1 }
 0x382   : > { %4911 = vrcp.f32 %v1403_v49 }
 0x384   : > { %v1412_v18 = vpop.xlane.xlu1 %1411 }
 0x388   : > { %v1409_v42 = vpop.xlane.xlu0 %1408 }
 0x389   : > { %4913 = vrcp.f32 %v1409_v42  ;;  %v1418_v20 = vpop.xlane.xlu1 %1417 }
 0x38a   : > { %4915 = vrcp.f32 %v1412_v18 }
 0x38b   : > { %4917 = vrcp.f32 %v1418_v20 }
 0x38c   : > { %v1415_v4 = vpop.xlane.xlu0 %1414 }
 0x38d   : > { %4919 = vrcp.f32 %v1415_v4 }
 0x38e   : > { %v4910_v31 = vpop.eup %4909  ;;  %4921 = vrcp.f32 %v1430_v43 }
 0x38f   : > { %v4912_v62 = vpop.eup %4911  ;;  %4923 = vrcp.f32 %v1433_v12  ;;  %v1424_v17 = vpop.xlane.xlu1 %1423  ;;  %v1492_v26 = vmul.f32 %v4910_v31, %v5777_v15  ;;  %v1666_v15 = vsel %vm1550_vm2, %v1533_v35, 0 }
 0x390   : > { %4925 = vrcp.f32 %v1424_v17  ;;  %v1421_v33 = vpop.xlane.xlu0 %1420  ;;  %v1491_v37 = vmul.f32 %v4912_v62, %v5779_v41  ;;  %v1532_v41 = vpack.c.bf16 %v5362_v34, %v5319_v8  ;;  %v1537_v8 = vpack.c.bf16 %v5271_v50, %v5271_v50 }
 0x391   : > { %4927 = vrcp.f32 %v1421_v33  ;;  %v1541_v17 = vpack.c.bf16 %v5529_v7, %v5529_v7 }
 0x392   : > { %v1514_v39 = vpack.c.bf16 %v1492_v26, %v1491_v37  ;;  %4929 = vrcp.f32 %v1436_v25  ;;  %v1780_v50 = vsel %vm1550_vm2, %v1537_v8, 0  ;;  %v1538_v26 = vpack.c.bf16 %v5446_v51, %v5421_v24 }
 0x393   : > { %v1894_v7 = vsel %vm1550_vm2, %v1541_v17, 0 }
 0x394   : > { %4634 = vmatprep.mubr.msk.bf16.mxu1 %vm1247_vm8, %v1514_v39  ;;  %v1427_v44 = vpop.xlane.xlu0 %1426 }
 0x395   : > { %4931 = vrcp.f32 %v1427_v44 }
 0x396   : > { %v4914_v54 = vpop.eup %4913 }
 0x397   : > { %v1493_v32 = vmul.f32 %v4914_v54, %v5790_v16  ;;  %v4916_v11 = vpop.eup %4915 }
 0x398   : > { %v4918_v58 = vpop.eup %4917  ;;  %v1494_v25 = vmul.f32 %v4916_v11, %v5786_v10 }
 0x399   : > { %v1515_v36 = vpack.c.bf16 %v1493_v32, %v1493_v32  ;;  %v1496_v18 = vmul.f32 %v4918_v58, %v5792_v60  ;;  %v6921_v58 = vld [vmem:[#allocation4_spill] sm:$0xff] }
 0x39a   : > { %v4920_v21 = vpop.eup %4919 }
 0x39b   : > { %v4922_v43 = vpop.eup %4921  ;;  %4635 = vmatmul.mubr.msk.bf16.vlgmr.msra.gmra.mxu1 %vm1247_vm8, %v1515_v36  ;;  %v1495_v12 = vmul.f32 %v4920_v21, %v5798_v27  ;;  %v1517_v35 = vpack.c.bf16 %v1496_v18, %v1496_v18  ;;  %v1542_v36 = vpack.c.bf16 %v6921_v58, %v5432_v38 }
 0x39c   : > { %v4924_v1 = vpop.eup %4923  ;;  %4639 = vmatpush3.bf16.msra.mxu1 %v1666_v15  ;;  %v1500_v4 = vmul.f32 %v4922_v43, %v5761_v14  ;;  %v1536_v14 = vpack.c.bf16 %v5269_v48, %v5267_v46  ;;  %v1543_v48 = vpack.c.bf16 %v5501_v56, %v5501_v56 }
 0x39d   : > { %v4926_v49 = vpop.eup %4925  ;;  %4640 = vmatprep.subr.bf16.mxu1 %v1532_v41  ;;  %v1516_v16 = vpack.c.bf16 %v1495_v12, %v1494_v25  ;;  %v1501_v10 = vmul.f32 %v4924_v1, %v5749_v53 }
 0x39e   : > { %v4928_v42 = vpop.eup %4927  ;;  %v1498_v20 = vmul.f32 %v4926_v49, %v5802_v5  ;;  %v1951_v11 = vsel %vm1550_vm2, %v1543_v48, 0 }
 0x39f   : > { %4642 = vmatprep.mubr.msk.bf16.mxu1 %vm1247_vm8, %v1516_v16  ;;  %v1497_v34 = vmul.f32 %v4928_v42, %v5804_v29  ;;  %v4930_v27 = vpop.eup %4929  ;;  %v1520_v62 = vpack.c.bf16 %v1501_v10, %v1500_v4 }
 0x3a0   : > { %4641 = vmatpush3.bf16.msra.mxu1 %v1532_v41  ;;  %v1502_v29 = vmul.f32 %v4930_v27, %v5765_v52  ;;  %v1540_v52 = vpack.c.bf16 %v5459_v61, %v5434_v30 }
 0x3a1   : > { %4818 = vmatprep.subr.msk.bf16.mxu1 %vm1550_vm2, %v1537_v8  ;;  %v1518_v60 = vpack.c.bf16 %v1498_v20, %v1497_v34 }
 0x3a2   : > { %v4932_v31 = vpop.eup %4931  ;;  %v1521_v46 = vpack.c.bf16 %v1502_v29, %v1502_v29 }
 0x3a3   : > { %v1499_v5 = vmul.f32 %v4932_v31, %v5810_v47  ;;  %4643 = vmatmul.mubr.msk.bf16.vlgmr.msra.gmra.mxu1 %vm1247_vm8, %v1517_v35  ;;  %4650 = vmatprep.mubr.msk.bf16.mxu0 %vm1247_vm8, %v1518_v60  ;;  %v1837_v47 = vsel %vm1550_vm2, %v5469_v6, 0  ;;  %v6920_v6 = vmov 0.0  }
 0x3a4   : > { %4655 = vmatpush3.bf16.msra.mxu1 %v1780_v50  ;;  %4658 = vmatprep.mubr.msk.bf16.mxu1 %vm1247_vm8, %v1520_v62 }
 0x3a5   : > { %v1519_v53 = vpack.c.bf16 %v1499_v5, %v1499_v5  ;;  %4656 = vmatprep.subr.bf16.mxu1 %v1536_v14 }
 0x3a7   : > { %4651 = vmatmul.mubr.msk.bf16.vlgmr.msra.gmra.mxu0 %vm1247_vm8, %v1519_v53 }
 0x3a8   : > { %4657 = vmatpush3.bf16.msra.mxu1 %v1536_v14  ;;  %4663 = vmatpush3.bf16.msra.mxu0 %v1837_v47 }
 0x3a9   : > { %4664 = vmatprep.subr.bf16.mxu0 %v1538_v26  ;;  %4820 = vmatprep.subr.msk.bf16.mxu1 %vm1550_vm2, %v1541_v17 }
 0x3ab   : > { %4659 = vmatmul.mubr.msk.bf16.vlgmr.msra.gmra.mxu1 %vm1247_vm8, %v1521_v46 }
 0x3ac   : > { %4665 = vmatpush3.bf16.msra.mxu0 %v1538_v26  ;;  %4671 = vmatpush3.bf16.msra.mxu1 %v1894_v7  ;;  %v4457_v7 = vld [vmem:[%s5189_s15 + $0x30] sm:$0xff] }
 0x3ad   : > { %4672 = vmatprep.subr.bf16.mxu1 %v1540_v52  ;;  %4821 = vmatprep.subr.msk.bf16.mxu0 %vm1550_vm2, %v1543_v48 }
 0x3af   : > { %v1439_v24 = vpop.xlane.xlu0 %1438 }
 0x3b0   : > { %4933 = vrcp.f32 %v1439_v24  ;;  %4673 = vmatpush3.bf16.msra.mxu1 %v1540_v52  ;;  %v1442_v51 = vpop.xlane.xlu1 %1441  ;;  %v4458_v52 = vld [vmem:[%s5189_s15 + $0x38] sm:$0xff] }
 0x3b1   : > { %4935 = vrcp.f32 %v1442_v51  ;;  %4686 = vmatprep.subr.bf16.mxu1 %v6920_v6  ;;  %v2134_v24 = vpack.c.bf16 %v4458_v52, %v4457_v7  ;;  %v4455_v51 = vld [vmem:[%s5189_s15 + $0x20] sm:$0xff] }
 0x3b3   : > { %v1445_v56 = vpop.xlane.xlu0 %1444 }
 0x3b4   : > { %4937 = vrcp.f32 %v1445_v56  ;;  %v4456_v56 = vld [vmem:[%s5189_s15 + $0x28] sm:$0xff]  ;;  %s4831_s15 = smul.u32 96, %s6962_s10 }
 0x3b6   : > { %s6704_s20 = scalar_lea.vmem %s6890_s5, %s4831_s15 }
 0x3bd   : > { %v4934_v33 = vpop.eup %4933 }
 0x3be   : > { %v4936_v37 = vpop.eup %4935  ;;  %v1503_v39 = vmul.f32 %v4934_v33, %v5817_v57  ;;  %v2133_v33 = vpack.c.bf16 %v4456_v56, %v4455_v51 }
 0x3bf   : > { %v1504_v30 = vmul.f32 %v4936_v37, %v5819_v28 }
 0x3c1   : > { %v4938_v61 = vpop.eup %4937  ;;  %v1522_v44 = vpack.c.bf16 %v1504_v30, %v1503_v39 }
 0x3c2   : > { %v1505_v54 = vmul.f32 %v4938_v61, %v5825_v13 }
 0x3c3   : > { %4666 = vmatprep.mubr.msk.bf16.mxu0 %vm1247_vm8, %v1522_v44 }
 0x3c4   : > { %v1523_v32 = vpack.c.bf16 %v1505_v54, %v1505_v54 }
 0x3c6   : > { %4667 = vmatmul.mubr.msk.bf16.vlgmr.msra.gmra.mxu0 %vm1247_vm8, %v1523_v32 }
 0x3c7   : > { %4679 = vmatpush3.bf16.msra.mxu0 %v1951_v11 }
 0x3c8   : > { %4680 = vmatprep.subr.bf16.mxu0 %v1542_v36 }
 0x3cb   : > { %4681 = vmatpush3.bf16.msra.mxu0 %v1542_v36 }
 0x3cf   : > { %v1451_v57 = vpop.xlane.xlu0 %1450 }
 0x3d0   : > { %4939 = vrcp.f32 %v1451_v57  ;;  %v1448_v28 = vpop.xlane.xlu1 %1447 }
 0x3d1   : > { %4941 = vrcp.f32 %v1448_v28 }
 0x3d3   : > { %v1457_v21 = vpop.xlane.xlu0 %1456 }
 0x3d4   : > { %v1454_v43 = vpop.xlane.xlu1 %1453 }
 0x3d5   : > { %4943 = vrcp.f32 %v1454_v43 }
 0x3d6   : > { %4945 = vrcp.f32 %v1457_v21 }
 0x3d7   : > { %v1463_v13 = vpop.xlane.xlu0 %1462 }
 0x3d8   : > { %4947 = vrcp.f32 %v1463_v13  ;;  %v1460_v15 = vpop.xlane.xlu1 %1459 }
 0x3d9   : > { %4949 = vrcp.f32 %v1460_v15 }
 0x3dd   : > { %v4940_v41 = vpop.eup %4939 }
 0x3de   : > { %v4942_v25 = vpop.eup %4941  ;;  %v1507_v12 = vmul.f32 %v4940_v41, %v5835_v40 }
 0x3df   : > { %v1506_v38 = vmul.f32 %v4942_v25, %v5837_v63 }
 0x3e1   : > { %v1524_v1 = vpack.c.bf16 %v1507_v12, %v1506_v38 }
 0x3e2   : > { %v4944_v49 = vpop.eup %4943 }
 0x3e3   : > { %4674 = vmatprep.mubr.msk.bf16.mxu1 %vm1247_vm8, %v1524_v1  ;;  %v1508_v16 = vmul.f32 %v4944_v49, %v5845_v45  ;;  %v4946_v18 = vpop.eup %4945 }
 0x3e4   : > { %v1509_v34 = vmul.f32 %v4946_v18, %v5843_v0 }
 0x3e5   : > { %v4948_v42 = vpop.eup %4947  ;;  %v1525_v20 = vpack.c.bf16 %v1508_v16, %v1508_v16 }
 0x3e6   : > { %v4950_v4 = vpop.eup %4949  ;;  %v1511_v8 = vmul.f32 %v4948_v42, %v5851_v3 }
 0x3e7   : > { %4675 = vmatmul.mubr.msk.bf16.vlgmr.msra.gmra.mxu1 %vm1247_vm8, %v1525_v20  ;;  %v1510_v40 = vmul.f32 %v4950_v4, %v5853_v55 }
 0x3e8   : > { %v1527_v10 = vpack.c.bf16 %v1511_v8, %v1511_v8  ;;  %4690 = vmatprep.mubr.msk.bf16.mxu1 %vm5110_vm0, %v6920_v6  ;;  %4687 = vmatpush3.bf16.msra.mxu1 %v2134_v24 }
 0x3e9   : > { %v1526_v63 = vpack.c.bf16 %v1510_v40, %v1509_v34  ;;  %4688 = vmatprep.subr.bf16.mxu1 %v6920_v6 }
 0x3eb   : > { %4682 = vmatprep.mubr.msk.bf16.mxu0 %vm1247_vm8, %v1526_v63 }
 0x3ec   : > { %4683 = vmatmul.mubr.msk.bf16.vlgmr.msra.gmra.mxu0 %vm1247_vm8, %v1527_v10  ;;  %4689 = vmatpush3.bf16.msra.mxu1 %v2133_v33 }
 0x41e   : > { %v5934_v45 = vpop.f32.mrf.mxu1 }
 0x420   : > { %v5936_v27 = vpop.f32.mrf.mxu1 }
 0x422   : > { %v4629_v3 = vpop.f32.mrf.mxu1 }
 0x424   : > { %v5938_v35 = vpop.f32.mrf.mxu1 }
 0x45b   : > { %v4636_v60 = vpop.f32.mrf.mxu1 }
 0x45d   : > { %v1645_v0 = vpop.f32.mrf.mxu1 }
 0x45e   : > { %2007 = vrot.lane.b32.xlu1 %v1645_v0, %s5115_s12 }
 0x45f   : > { %v4637_v55 = vpop.f32.mrf.mxu1 }
 0x461   : > { %v1648_v31 = vpop.f32.mrf.mxu1 }
 0x463   : > { %v4644_v62 = vpop.f32.mrf.mxu1 }
 0x465   : > { %v1702_v5 = vpop.f32.mrf.mxu1 }
 0x467   : > { %v4645_v50 = vpop.f32.mrf.mxu1  ;;  %v4652_v14 = vpop.f32.mrf.mxu0 }
 0x469   : > { %v1705_v53 = vpop.f32.mrf.mxu1  ;;  %v1759_v29 = vpop.f32.mrf.mxu0 }
 0x46a   : > { %2055 = vrot.lane.b32.xlu0 %v1759_v29, %s5116_s14 }
 0x46b   : > { %v4653_v17 = vpop.f32.mrf.mxu0  ;;  %v5942_v47 = vpop.f32.mrf.mxu1 }
 0x46d   : > { %v1762_v26 = vpop.f32.mrf.mxu0  ;;  %v5944_v46 = vpop.f32.mrf.mxu1 }
 0x46e   : > { %2009 = vrot.lane.b32.xlu0 %v1648_v31, %s5115_s12  ;;  %2057 = vrot.lane.b32.xlu1 %v1762_v26, %s5116_s14 }
 0x46f   : > { %v4661_v48 = vpop.f32.mrf.mxu1 }
 0x471   : > { %v5960_v44 = vpop.f32.mrf.mxu1 }
 0x472   : > { %2011 = vrot.lane.b32.xlu0 %v4636_v60, %s5115_s12  ;;  %2031 = vrot.lane.b32.xlu1 %v1702_v5, %s5117_s16 }
 0x476   : > { %2035 = vrot.lane.b32.xlu0 %v4644_v62, %s5117_s16  ;;  %2033 = vrot.lane.b32.xlu1 %v1705_v53, %s5117_s16 }
 0x47a   : > { %2059 = vrot.lane.b32.xlu0 %v4652_v14, %s5116_s14 }
 0x486   : > { %v4668_v37 = vpop.f32.mrf.mxu0 }
 0x488   : > { %v1873_v39 = vpop.f32.mrf.mxu0 }
 0x489   : > { %2013 = vrot.lane.b32.xlu1 %v1873_v39, %s5115_s12 }
 0x48a   : > { %v4669_v30 = vpop.f32.mrf.mxu0 }
 0x48c   : > { %v1876_v61 = vpop.f32.mrf.mxu0 }
 0x48d   : > { %2015 = vrot.lane.b32.xlu0 %v1876_v61, %s5115_s12 }
 0x4a7   : > { %v4676_v54 = vpop.f32.mrf.mxu1 }
 0x4a9   : > { %v1930_v32 = vpop.f32.mrf.mxu1 }
 0x4aa   : > { %2037 = vrot.lane.b32.xlu1 %v1930_v32, %s5117_s16 }
 0x4ab   : > { %v4677_v11 = vpop.f32.mrf.mxu1 }
 0x4ac   : > { %v4684_v58 = vpop.f32.mrf.mxu0 }
 0x4ad   : > { %v1933_v36 = vpop.f32.mrf.mxu1 }
 0x4ae   : > { %2039 = vrot.lane.b32.xlu0 %v1933_v36, %s5117_s16  ;;  %v1987_v57 = vpop.f32.mrf.mxu0 }
 0x4af   : > { %2061 = vrot.lane.b32.xlu1 %v1987_v57, %s5116_s14 }
 0x4b0   : > { %v4685_v28 = vpop.f32.mrf.mxu0 }
 0x4b2   : > { %v1990_v21 = vpop.f32.mrf.mxu0 }
 0x4b3   : > { %2017 = vrot.lane.b32.xlu1 %v4668_v37, %s5115_s12  ;;  %2063 = vrot.lane.b32.xlu0 %v1990_v21, %s5116_s14 }
 0x4b7   : > { %2041 = vrot.lane.b32.xlu1 %v4676_v54, %s5117_s16 }
 0x4bb   : > { %2065 = vrot.lane.b32.xlu1 %v4684_v58, %s5116_s14 }
 0x4d0   : > { %v2008_v43 = vpop.permute.xlu1 %2007 }
 0x4d1   : > { %v2073_v41 = vsel %vm690_vm3, %v5936_v27, %v2008_v43 }
 0x4dc   : > { %v2056_v13 = vpop.permute.xlu0 %2055 }
 0x4e0   : > { %v2058_v15 = vpop.permute.xlu1 %2057  ;;  %v2010_v12 = vpop.permute.xlu0 %2009 }
 0x4e1   : > { %v2074_v16 = vsel %vm690_vm3, %v5938_v35, %v2010_v12 }
 0x4e4   : > { %v2032_v25 = vpop.permute.xlu1 %2031  ;;  %v2012_v35 = vpop.permute.xlu0 %2011 }
 0x4e5   : > { %v2080_v38 = vsel %vm6910_vm14, %v2073_v41, %v2032_v25  ;;  %v2075_v62 = vsel %vm690_vm3, %v5934_v45, %v2012_v35 }
 0x4e6   : > { %v2086_v1 = vsel %vm1247_vm8, %v2080_v38, %v2056_v13 }
 0x4e7   : > { %v2098_v49 = vmin.f32 %v2086_v1, 0.0  ;;  %vm2092_vm15 = vcmp.gt.f32.partialorder %v2086_v1, 0.0 }
 0x4e8   : > { %v2034_v18 = vpop.permute.xlu1 %2033  ;;  %v2036_v55 = vpop.permute.xlu0 %2035 }
 0x4e9   : > { %v2104_v42 = vmul.f32 1.442695, %v2098_v49  ;;  %v2081_v20 = vsel %vm6910_vm14, %v2074_v16, %v2034_v18  ;;  %v2082_v5 = vsel %vm6910_vm14, %v2075_v62, %v2036_v55 }
 0x4ea   : > { %v2087_v4 = vsel %vm1247_vm8, %v2081_v20, %v2058_v15 }
 0x4eb   : > { %4951 = vpow2.f32 %v2104_v42  ;;  %v2099_v8 = vmin.f32 %v2087_v4, 0.0  ;;  %vm2093_vm1 = vcmp.gt.f32.partialorder %v2087_v4, 0.0 }
 0x4ec   : > { %v2060_v31 = vpop.permute.xlu0 %2059 }
 0x4ed   : > { %v2106_v34 = vmul.f32 1.442695, %v2099_v8  ;;  %v2088_v50 = vsel %vm1247_vm8, %v2082_v5, %v2060_v31 }
 0x4ee   : > { %v2100_v53 = vmin.f32 %v2088_v50, 0.0  ;;  %vm2094_vm13 = vcmp.gt.f32.partialorder %v2088_v50, 0.0 }
 0x4ef   : > { %4953 = vpow2.f32 %v2106_v34 }
 0x4f0   : > { %v2108_v26 = vmul.f32 1.442695, %v2100_v53 }
 0x4f2   : > { %4955 = vpow2.f32 %v2108_v26 }
 0x4f8   : > { %v4952_v40 = vpop.eup %4951 }
 0x4f9   : > { %v4449_v10 = vadd.f32 -1.0, %v4952_v40  ;;  %v6006_v40 = vld.sshfl [vmem:[%s5226_s22 + $0x4] sm:$0x33 pattern:$0x75316420] }
 0x4fb   : > { %v2122_v3 = vsel %vm2092_vm15, %v2086_v1, %v4449_v10  ;;  %v2014_v14 = vpop.permute.xlu1 %2013  ;;  %v6925_v10 = vld [vmem:[#allocation2_spill] sm:$0xff] }
 0x4fc   : > { %v4954_v63 = vpop.eup %4953  ;;  %v2076_v48 = vsel %vm690_vm3, %v5944_v46, %v2014_v14 }
 0x4fd   : > { %v4450_v27 = vadd.f32 -1.0, %v4954_v63  ;;  %v6010_v63 = vrot.slane %v6006_v40, %v6925_v10 }
 0x4ff   : > { %v2123_v60 = vsel %vm2093_vm1, %v2087_v4, %v4450_v27  ;;  %v2016_v29 = vpop.permute.xlu0 %2015  ;;  %v4956_v28 = vpop.eup %4955  ;;  %vm6923_vm1 = vmmov %vm6922_vm10  ;;  %v6013_v27 = vld.sshfl [vmem:[%s5231_s25 + $0x4] sm:$0x33 pattern:$0x75316420] }
 0x500   : > { %v2139_v0 = vpack.c.bf16 %v2123_v60, %v2122_v3  ;;  %v2077_v56 = vsel %vm690_vm3, %v5960_v44, %v2016_v29  ;;  %v4451_v43 = vadd.f32 -1.0, %v4956_v28  ;;  %vm6924_vm11 = vmmov %vm6923_vm1  ;;  %v6926_v3 = vld [vmem:[#allocation3_spill] sm:$0xff] }
 0x501   : > { %v6017_v60 = vrot.slane %v6010_v63, %v6926_v3 }
 0x502   : > { %4691 = vmatmul.mubr.msk.bf16.vlgmr.msra.gmra.mxu1 %vm6922_vm10, %v2139_v0  ;;  %v2124_v41 = vsel %vm2094_vm13, %v2088_v50, %v4451_v43  ;;  %v6021_v0 = vrot.slane %v6013_v27, %v6925_v10 }
 0x503   : > { %4694 = vmatprep.mubr.msk.bf16.mxu1 %vm5110_vm0, %v6920_v6 }
 0x504   : > { %v6026_v55 = vrot.slane %v6021_v0, %v6926_v3 }
 0x51c   : > { %v2038_v17 = vpop.permute.xlu1 %2037 }
 0x51d   : > { %v2083_v52 = vsel %vm6910_vm14, %v2076_v48, %v2038_v17 }
 0x520   : > { %v2040_v7 = vpop.permute.xlu0 %2039 }
 0x521   : > { %v2062_v24 = vpop.permute.xlu1 %2061  ;;  %v2084_v33 = vsel %vm6910_vm14, %v2077_v56, %v2040_v7 }
 0x522   : > { %v2089_v51 = vsel %vm1247_vm8, %v2083_v52, %v2062_v24 }
 0x523   : > { %v2101_v45 = vmin.f32 %v2089_v51, 0.0  ;;  %vm2095_vm15 = vcmp.gt.f32.partialorder %v2089_v51, 0.0 }
 0x525   : > { %v2110_v37 = vmul.f32 1.442695, %v2101_v45  ;;  %v2018_v39 = vpop.permute.xlu1 %2017  ;;  %v2064_v30 = vpop.permute.xlu0 %2063 }
 0x526   : > { %v2090_v61 = vsel %vm1247_vm8, %v2084_v33, %v2064_v30  ;;  %v2078_v11 = vsel %vm690_vm3, %v5942_v47, %v2018_v39 }
 0x527   : > { %4957 = vpow2.f32 %v2110_v37  ;;  %v2102_v46 = vmin.f32 %v2090_v61, 0.0  ;;  %vm2096_vm10 = vcmp.gt.f32.partialorder %v2090_v61, 0.0 }
 0x529   : > { %v2042_v54 = vpop.permute.xlu1 %2041  ;;  %v2112_v32 = vmul.f32 1.442695, %v2102_v46 }
 0x52a   : > { %v2085_v58 = vsel %vm6910_vm14, %v2078_v11, %v2042_v54 }
 0x52b   : > { %4959 = vpow2.f32 %v2112_v32 }
 0x52d   : > { %v2066_v36 = vpop.permute.xlu1 %2065 }
 0x52e   : > { %v2091_v57 = vsel %vm1247_vm8, %v2085_v58, %v2066_v36 }
 0x52f   : > { %v2103_v44 = vmin.f32 %v2091_v57, 0.0  ;;  %vm2097_vm14 = vcmp.gt.f32.partialorder %v2091_v57, 0.0 }
 0x531   : > { %v2114_v21 = vmul.f32 1.442695, %v2103_v44 }
 0x533   : > { %4961 = vpow2.f32 %v2114_v21  ;;  %v2417_v21 = vcombine.high %v6006_v40, %v6006_v40 }
 0x534   : > { %v4958_v13 = vpop.eup %4957 }
 0x535   : > { %v4452_v15 = vadd.f32 -1.0, %v4958_v13 }
 0x537   : > { %v2125_v25 = vsel %vm2095_vm15, %v2089_v51, %v4452_v15 }
 0x538   : > { %v2140_v12 = vpack.c.bf16 %v2125_v25, %v2124_v41  ;;  %v4960_v47 = vpop.eup %4959  ;;  %v2431_v41 = vrot.slane %v2417_v21, %v6925_v10 }
 0x539   : > { %v4453_v38 = vadd.f32 -1.0, %v4960_v47 }
 0x53a   : > { %4695 = vmatmul.mubr.msk.bf16.gmra.mxu1 %vm6923_vm1, %v2140_v12 }
 0x53b   : > { %4698 = vmatprep.mubr.msk.bf16.mxu1 %vm5110_vm0, %v6920_v6  ;;  %v2126_v16 = vsel %vm2096_vm10, %v2090_v61, %v4453_v38  ;;  %v6094_v38 = vrot.slane %v2431_v41, %v6926_v3 }
 0x540   : > { %v4962_v1 = vpop.eup %4961 }
 0x541   : > { %v4454_v49 = vadd.f32 -1.0, %v4962_v1  ;;  %v2432_v1 = vcombine.high %v6010_v63, %v6010_v63 }
 0x543   : > { %v2127_v18 = vsel %vm2097_vm14, %v2091_v57, %v4454_v49 }
 0x544   : > { %v2141_v42 = vpack.c.bf16 %v2127_v18, %v2126_v16 }
 0x546   : > { %4699 = vmatmul.mubr.msk.bf16.gmra.mxu1 %vm6924_vm11, %v2141_v42 }
 0x5c2   : > { %v2185_v20 = vpop.f32.mrf.mxu1 }
 0x5c3   : > { %2232 = vrot.lane.b32.xlu1 %v2185_v20, %s5112_s26  ;;  %2214 = vrot.lane.b32.xlu0 %v2185_v20, %s5113_s27  ;;  %v2454_v35 = vmul.f32 %v6017_v60, %v2185_v20  ;;  %v2313_v62 = vmul.f32 %v6026_v55, %v2185_v20 }
 0x5c4   : > { %v4692_v4 = vpop.f32.mrf.mxu1 }
 0x5c5   : > { %v2478_v31 = vsel %vm690_vm3, %v2454_v35, 0.0  ;;  %v2337_v5 = vsel %vm690_vm3, %v2313_v62, 0.0  ;;  %v2291_v4 = vcombine.high %v6021_v0, %v6021_v0 }
 0x5c6   : > { %v2188_v8 = vpop.f32.mrf.mxu1 }
 0x5c7   : > { %2216 = vrot.lane.b32.xlu1 %v2188_v8, %s5113_s27  ;;  %2250 = vrot.lane.b32.xlu0 %v2185_v20, %s5114_s28  ;;  %v2455_v50 = vmul.f32 %v6017_v60, %v2188_v8  ;;  %v2314_v53 = vmul.f32 %v6026_v55, %v2188_v8  ;;  %v3142_v52 = vpack.c.bf16 %v2188_v8, %v2185_v20 }
 0x5c8   : > { %v4693_v34 = vpop.f32.mrf.mxu1  ;;  %v6106_v20 = vrot.slane %v2432_v1, %v6926_v3  ;;  %v6120_v35 = vrot.slane %v2291_v4, %v6926_v3 }
 0x5c9   : > { %v2481_v14 = vsel %vm690_vm3, %v2455_v50, 0.0  ;;  %v2340_v29 = vsel %vm690_vm3, %v2314_v53, 0.0 }
 0x5cb   : > { %2252 = vrot.lane.b32.xlu1 %v2188_v8, %s5114_s28 }
 0x5e6   : > { %2479 = vadd.xlane.f32.xlu0 %v2478_v31 }
 0x5ea   : > { %2338 = vadd.xlane.f32.xlu0 %v2337_v5 }
 0x5ef   : > { %2482 = vadd.xlane.f32.xlu1 %v2481_v14 }
 0x5f3   : > { %2341 = vadd.xlane.f32.xlu1 %v2340_v29 }
 0x5fa   : > { %v2193_v17 = vpop.f32.mrf.mxu1 }
 0x5fb   : > { %v3143_v26 = vpack.c.bf16 %v2193_v17, %v2193_v17  ;;  %v2456_v39 = vmul.f32 %v6017_v60, %v2193_v17  ;;  %v2315_v61 = vmul.f32 %v6026_v55, %v2193_v17 }
 0x5fc   : > { %v4696_v48 = vpop.f32.mrf.mxu1 }
 0x5fd   : > { %4822 = vmatprep.subr.msk.bf16.mxu0 %vm1550_vm2, %v3143_v26  ;;  %v3165_v7 = vsel %vm1550_vm2, %v3143_v26, 0  ;;  %v2484_v30 = vsel %vm690_vm3, %v2456_v39, 0.0  ;;  %v2343_v46 = vsel %vm690_vm3, %v2315_v61, 0.0 }
 0x5fe   : > { %v6037_v24 = vpop.f32.mrf.mxu1  ;;  %4703 = vmatpush3.bf16.msra.mxu0 %v3165_v7 }
 0x5ff   : > { %4704 = vmatprep.subr.bf16.mxu0 %v3142_v52  ;;  %v2466_v54 = vmul.f32 %v6017_v60, %v6037_v24  ;;  %v2325_v11 = vmul.f32 %v6026_v55, %v6037_v24 }
 0x600   : > { %v4697_v51 = vpop.f32.mrf.mxu1  ;;  %2234 = vrot.lane.b32.xlu0 %v2188_v8, %s5112_s26  ;;  %v2276_v8 = vcombine.high %v6013_v27, %v6013_v27 }
 0x601   : > { %v2514_v32 = vsel %vm690_vm3, %v2466_v54, 0.0  ;;  %v2373_v58 = vsel %vm690_vm3, %v2325_v11, 0.0 }
 0x602   : > { %4705 = vmatpush3.bf16.msra.mxu0 %v3142_v52 }
 0x604   : > { %2236 = vrot.lane.b32.xlu1 %v2193_v17, %s5112_s26  ;;  %2218 = vrot.lane.b32.xlu0 %v2193_v17, %s5113_s27 }
 0x606   : > { %v6042_v45 = vpop.f32.mrf.mxu1 }
 0x607   : > { %v2467_v36 = vmul.f32 %v6017_v60, %v6042_v45  ;;  %v2326_v28 = vmul.f32 %v6026_v55, %v6042_v45 }
 0x608   : > { %v4700_v56 = vpop.f32.mrf.mxu1  ;;  %2220 = vrot.lane.b32.xlu1 %v6037_v24, %s5113_s27  ;;  %2254 = vrot.lane.b32.xlu0 %v2193_v17, %s5114_s28 }
 0x609   : > { %v2517_v44 = vsel %vm690_vm3, %v2467_v36, 0.0  ;;  %v2376_v13 = vsel %vm690_vm3, %v2326_v28, 0.0 }
 0x60a   : > { %v6047_v33 = vpop.f32.mrf.mxu1 }
 0x60b   : > { %v2468_v15 = vmul.f32 %v6017_v60, %v6047_v33  ;;  %v2327_v47 = vmul.f32 %v6026_v55, %v6047_v33  ;;  %v2290_v55 = vrot.slane %v2276_v8, %v6925_v10  ;;  %v2433_v10 = vcombine.high %v2431_v41, %v2431_v41 }
 0x60c   : > { %v4701_v37 = vpop.f32.mrf.mxu1  ;;  %2256 = vrot.lane.b32.xlu1 %v6037_v24, %s5114_s28 }
 0x60d   : > { %v2520_v12 = vsel %vm690_vm3, %v2468_v15, 0.0  ;;  %v2379_v18 = vsel %vm690_vm3, %v2327_v47, 0.0  ;;  %v6135_v50 = vrot.slane %v2290_v55, %v6926_v3  ;;  %v6152_v52 = vrot.slane %v2433_v10, %v6926_v3 }
 0x60e   : > { %v2292_v51 = vcombine.high %v2290_v55, %v2290_v55 }
 0x610   : > { %v6157_v39 = vrot.slane %v2292_v51, %v6926_v3 }
 0x627   : > { %2485 = vadd.xlane.f32.xlu0 %v2484_v30 }
 0x62b   : > { %2344 = vadd.xlane.f32.xlu0 %v2343_v46 }
 0x630   : > { %2515 = vadd.xlane.f32.xlu1 %v2514_v32 }
 0x634   : > { %2374 = vadd.xlane.f32.xlu1 %v2373_v58 }
 0x635   : > { %v6075_v57 = vpop.permute.xlu0 %2214  ;;  %v6098_v49 = vpop.permute.xlu1 %2232 }
 0x636   : > { %v2457_v42 = vmul.f32 %v6094_v38, %v6075_v57  ;;  %v2460_v60 = vmul.f32 %v6106_v20, %v6098_v49  ;;  %v2319_v62 = vmul.f32 %v6120_v35, %v6098_v49  ;;  %v2316_v21 = vmul.f32 %v6135_v50, %v6075_v57 }
 0x638   : > { %v2487_v63 = vsel %vm690_vm3, %v2457_v42, 0.0  ;;  %v2496_v31 = vsel %vm690_vm3, %v2460_v60, 0.0  ;;  %v2355_v29 = vsel %vm690_vm3, %v2319_v62, 0.0 }
 0x639   : > { %v6082_v43 = vpop.permute.xlu0 %2250  ;;  %v6112_v34 = vpop.permute.xlu1 %2216 }
 0x63a   : > { %v2317_v17 = vmul.f32 %v6135_v50, %v6112_v34  ;;  %v2463_v15 = vmul.f32 %v6152_v52, %v6082_v43  ;;  %v2458_v1 = vmul.f32 %v6094_v38, %v6112_v34 }
 0x63c   : > { %v2349_v56 = vsel %vm690_vm3, %v2317_v17, 0.0  ;;  %v2505_v41 = vsel %vm690_vm3, %v2463_v15, 0.0 }
 0x63d   : > { %v2253_v5 = vpop.permute.xlu1 %2252 }
 0x63e   : > { %v3148_v7 = vpack.c.bf16 %v2253_v5, %v6082_v43  ;;  %v2464_v37 = vmul.f32 %v6152_v52, %v2253_v5  ;;  %v2323_v46 = vmul.f32 %v6157_v39, %v2253_v5 }
 0x640   : > { %v2508_v61 = vsel %vm690_vm3, %v2464_v37, 0.0  ;;  %v2367_v54 = vsel %vm690_vm3, %v2323_v46, 0.0 }
 0x641   : > { %2238 = vrot.lane.b32.xlu0 %v6037_v24, %s5112_s26 }
 0x645   : > { %2240 = vrot.lane.b32.xlu1 %v6042_v45, %s5112_s26  ;;  %2222 = vrot.lane.b32.xlu0 %v6042_v45, %s5113_s27 }
 0x649   : > { %2258 = vrot.lane.b32.xlu0 %v6042_v45, %s5114_s28  ;;  %2224 = vrot.lane.b32.xlu1 %v6047_v33, %s5113_s27 }
 0x64d   : > { %2260 = vrot.lane.b32.xlu1 %v6047_v33, %s5114_s28 }
 0x668   : > { %2518 = vadd.xlane.f32.xlu0 %v2517_v44 }
 0x66c   : > { %2377 = vadd.xlane.f32.xlu0 %v2376_v13  ;;  %v2346_v13 = vsel %vm690_vm3, %v2316_v21, 0.0 }
 0x66f   : > { %v6088_v25 = vpop.xlane.xlu0 %2479 }
 0x671   : > { %2521 = vadd.xlane.f32.xlu1 %v2520_v12  ;;  %v2322_v12 = vmul.f32 %v6157_v39, %v6082_v43 }
 0x673   : > { %v6100_v16 = vpop.xlane.xlu0 %2338  ;;  %v2364_v47 = vsel %vm690_vm3, %v2322_v12, 0.0 }
 0x675   : > { %2380 = vadd.xlane.f32.xlu1 %v2379_v18  ;;  %v2490_v18 = vsel %vm690_vm3, %v2458_v1, 0.0 }
 0x677   : > { %v6114_v40 = vpop.permute.xlu0 %2234 }
 0x678   : > { %v6144_v26 = vpop.xlane.xlu1 %2482  ;;  %v2461_v42 = vmul.f32 %v6106_v20, %v6114_v40  ;;  %v2320_v43 = vmul.f32 %v6120_v35, %v6114_v40 }
 0x679   : > { %2488 = vadd.xlane.f32.xlu1 %v2487_v63 }
 0x67a   : > { %v2499_v63 = vsel %vm690_vm3, %v2461_v42, 0.0  ;;  %v2358_v55 = vsel %vm690_vm3, %v2320_v43, 0.0 }
 0x67b   : > { %v6123_v0 = vpop.permute.xlu0 %2218 }
 0x67c   : > { %v6127_v27 = vpack.c.bf16 %v6123_v0, %v6123_v0  ;;  %v6159_v30 = vpop.xlane.xlu1 %2341  ;;  %v2459_v32 = vmul.f32 %v6094_v38, %v6123_v0 }
 0x67d   : > { %2497 = vadd.xlane.f32.xlu1 %v2496_v31  ;;  %v2318_v31 = vmul.f32 %v6135_v50, %v6123_v0 }
 0x67e   : > { %4823 = vmatprep.subr.msk.bf16.mxu0 %vm1550_vm2, %v6127_v27  ;;  %v2493_v58 = vsel %vm690_vm3, %v2459_v32, 0.0 }
 0x67f   : > { %v6137_v14 = vpop.permute.xlu0 %2254  ;;  %v2352_v10 = vsel %vm690_vm3, %v2318_v31, 0.0 }
 0x680   : > { %v3149_v53 = vpack.c.bf16 %v6137_v14, %v6137_v14  ;;  %v6166_v11 = vpop.permute.xlu1 %2236 }
 0x681   : > { %2356 = vadd.xlane.f32.xlu1 %v2355_v29  ;;  %v2462_v3 = vmul.f32 %v6106_v20, %v6166_v11  ;;  %v2321_v44 = vmul.f32 %v6120_v35, %v6166_v11 }
 0x682   : > { %2242 = vrot.lane.b32.xlu0 %v6047_v33, %s5112_s26  ;;  %4825 = vmatprep.subr.msk.bf16.mxu1 %vm1550_vm2, %v3149_v53  ;;  %v3336_v48 = vsel %vm1550_vm2, %v3149_v53, 0  ;;  %v2465_v53 = vmul.f32 %v6152_v52, %v6137_v14  ;;  %s458_s26 = scalar_lea.vmem %s6891_s6, %s4832_s23 }
 0x683   : > { %4727 = vmatpush3.bf16.msra.mxu1 %v3336_v48  ;;  %v2502_v36 = vsel %vm690_vm3, %v2462_v3, 0.0  ;;  %v2361_v28 = vsel %vm690_vm3, %v2321_v44, 0.0 }
 0x684   : > { %4728 = vmatprep.subr.bf16.mxu1 %v3148_v7  ;;  %v6189_v4 = vpop.permute.xlu1 %2220  ;;  %v2511_v51 = vsel %vm690_vm3, %v2465_v53, 0.0 }
 0x685   : > { %2350 = vadd.xlane.f32.xlu1 %v2349_v56  ;;  %v2324_v56 = vmul.f32 %v6157_v39, %v6137_v14  ;;  %v2469_v32 = vmul.f32 %v6094_v38, %v6189_v4 }
 0x687   : > { %4729 = vmatpush3.bf16.msra.mxu1 %v3148_v7  ;;  %v2523_v44 = vsel %vm690_vm3, %v2469_v32, 0.0 }
 0x688   : > { %v6201_v62 = vpop.permute.xlu1 %2256 }
 0x689   : > { %2509 = vadd.xlane.f32.xlu1 %v2508_v61  ;;  %6927 = vst [vmem:[#allocation4_spill] sm:$0xff] %v6201_v62  ;;  %v2334_v42 = vmul.f32 %v6157_v39, %v6201_v62 }
 0x68d   : > { %2368 = vadd.xlane.f32.xlu1 %v2367_v54  ;;  %v2370_v54 = vsel %vm690_vm3, %v2324_v56, 0.0 }
 0x691   : > { %2494 = vadd.xlane.f32.xlu1 %v2493_v58 }
 0x695   : > { %2503 = vadd.xlane.f32.xlu1 %v2502_v36 }
 0x699   : > { %2362 = vadd.xlane.f32.xlu1 %v2361_v28  ;;  %v2328_v28 = vmul.f32 %v6135_v50, %v6189_v4 }
 0x69b   : > { %v2382_v12 = vsel %vm690_vm3, %v2328_v28, 0.0 }
 0x6a1   : > { %2347 = vadd.xlane.f32.xlu0 %v2346_v13 }
 0x6a5   : > { %2506 = vadd.xlane.f32.xlu0 %v2505_v41 }
 0x6a9   : > { %2365 = vadd.xlane.f32.xlu0 %v2364_v47  ;;  %v2475_v47 = vmul.f32 %v6152_v52, %v6201_v62 }
 0x6ad   : > { %2491 = vadd.xlane.f32.xlu0 %v2490_v18  ;;  %v2541_v18 = vsel %vm690_vm3, %v2475_v47, 0.0 }
 0x6b0   : > { %v6191_v8 = vpop.xlane.xlu0 %2485 }
 0x6b1   : > { %2500 = vadd.xlane.f32.xlu0 %v2499_v63  ;;  %v2400_v63 = vsel %vm690_vm3, %v2334_v42, 0.0  ;;  %v2586_v53 = vrot.slane %v6191_v8, %v5220_v23 }
 0x6b4   : > { %v6196_v60 = vpop.xlane.xlu0 %2344 }
 0x6b5   : > { %2359 = vadd.xlane.f32.xlu0 %v2358_v55 }
 0x6b8   : > { %v6203_v5 = vpop.permute.xlu0 %2238 }
 0x6b9   : > { %v6208_v29 = vpop.xlane.xlu1 %2515  ;;  %2353 = vadd.xlane.f32.xlu0 %v2352_v10  ;;  %v2472_v17 = vmul.f32 %v6106_v20, %v6203_v5  ;;  %v2331_v0 = vmul.f32 %v6120_v35, %v6203_v5  ;;  %v2581_v10 = vrot.slane %v6144_v26, %v5218_v22 }
 0x6ba   : > { %v2633_v47 = vrot.slane %v6208_v29, %v5216_v19 }
 0x6bb   : > { %v2532_v48 = vsel %vm690_vm3, %v2472_v17, 0.0  ;;  %v2391_v61 = vsel %vm690_vm3, %v2331_v0, 0.0  ;;  %v2577_v17 = vrot.slane %v6088_v25, %v5216_v19 }
 0x6bc   : > { %2533 = vadd.xlane.f32.xlu1 %v2532_v48  ;;  %v6215_v7 = vpop.permute.xlu0 %2222 }
 0x6bd   : > { %v6220_v37 = vpop.xlane.xlu1 %2374  ;;  %2512 = vadd.xlane.f32.xlu0 %v2511_v51  ;;  %v2470_v46 = vmul.f32 %v6094_v38, %v6215_v7  ;;  %v2329_v14 = vmul.f32 %v6135_v50, %v6215_v7  ;;  %v2582_v51 = vsel %vm939_vm4, %v2581_v10, %v2577_v17 }
 0x6be   : > { %v2587_v56 = vsel %vm946_vm5, %v2586_v53, %v2582_v51 }
 0x6bf   : > { %v2526_v3 = vsel %vm690_vm3, %v2470_v46, 0.0  ;;  %v2385_v15 = vsel %vm690_vm3, %v2329_v14, 0.0  ;;  %v2743_v8 = vadd.f32 %v2587_v56, %v6159_v30 }
 0x6c0   : > { %2392 = vadd.xlane.f32.xlu1 %v2391_v61  ;;  %v6233_v36 = vpop.permute.xlu0 %2258 }
 0x6c1   : > { %v6228_v58 = vpop.permute.xlu1 %2240  ;;  %2371 = vadd.xlane.f32.xlu0 %v2370_v54  ;;  %6928 = vst [vmem:[#allocation2_spill] sm:$0xff] %v6233_v36  ;;  %v2476_v41 = vmul.f32 %v6152_v52, %v6233_v36  ;;  %vm2767_vm11 = vcmp.gt.f32.partialorder %v2743_v8, 0.0  ;;  %v2335_v17 = vmul.f32 %v6157_v39, %v6233_v36 }
 0x6c2   : > { %v2473_v43 = vmul.f32 %v6106_v20, %v6228_v58  ;;  %v2332_v31 = vmul.f32 %v6120_v35, %v6228_v58 }
 0x6c3   : > { %v2544_v1 = vsel %vm690_vm3, %v2476_v41, 0.0 }
 0x6c4   : > { %2527 = vadd.xlane.f32.xlu1 %v2526_v3  ;;  %v2535_v55 = vsel %vm690_vm3, %v2473_v43, 0.0  ;;  %v2394_v48 = vsel %vm690_vm3, %v2332_v31, 0.0 }
 0x6c5   : > { %v2225_v21 = vpop.permute.xlu1 %2224  ;;  %2524 = vadd.xlane.f32.xlu0 %v2523_v44 }
 0x6c6   : > { %v6238_v13 = vpack.c.bf16 %v2225_v21, %v2225_v21  ;;  %v2471_v0 = vmul.f32 %v6094_v38, %v2225_v21  ;;  %v2330_v46 = vmul.f32 %v6135_v50, %v2225_v21  ;;  %v2791_v38 = vmul.f32 0.2, %v2743_v8 }
 0x6c8   : > { %4827 = vmatprep.subr.msk.bf16.mxu1 %vm1550_vm2, %v6238_v13  ;;  %2386 = vadd.xlane.f32.xlu1 %v2385_v15  ;;  %v2529_v61 = vsel %vm690_vm3, %v2471_v0, 0.0  ;;  %v2388_v25 = vsel %vm690_vm3, %v2330_v46, 0.0  ;;  %v2815_v50 = vsel %vm2767_vm11, %v2743_v8, %v2791_v38  ;;  %v2403_v46 = vsel %vm690_vm3, %v2335_v17, 0.0 }
 0x6c9   : > { %2383 = vadd.xlane.f32.xlu0 %v2382_v12  ;;  %v6270_v26 = vpop.permute.xlu1 %2260  ;;  %v6282_v30 = vsel %vm1206_vm7, %v2815_v50, -1e+09  ;;  %v2742_v12 = vadd.f32 %v2587_v56, %v6100_v16  ;;  %v2744_v16 = vadd.f32 %v2587_v56, %v6196_v60 }
 0x6ca   : > { %v2477_v54 = vmul.f32 %v6152_v52, %v6270_v26  ;;  %v2336_v3 = vmul.f32 %v6157_v39, %v6270_v26  ;;  %v2865_v52 = vsel %vm1247_vm8, %v6282_v30, -inf }
 0x6cb   : > { %v2790_v29 = vmul.f32 0.2, %v2742_v12  ;;  %vm2766_vm14 = vcmp.gt.f32.partialorder %v2742_v12, 0.0  ;;  %vm2768_vm15 = vcmp.gt.f32.partialorder %v2744_v16, 0.0 }
 0x6cc   : > { %2545 = vadd.xlane.f32.xlu1 %v2544_v1  ;;  %v2547_v32 = vsel %vm690_vm3, %v2477_v54, 0.0  ;;  %v2406_v14 = vsel %vm690_vm3, %v2336_v3, 0.0 }
 0x6cd   : > { %2542 = vadd.xlane.f32.xlu0 %v2541_v18  ;;  %v2814_v51 = vsel %vm2766_vm14, %v2742_v12, %v2790_v29  ;;  %vm6933_vm14 = vcmp.gt.f32.partialorder %v5581_v2, 0.0 }
 0x6ce   : > { %v6314_v8 = vsel %vm1205_vm12, %v2814_v51, -1e+09 }
 0x6cf   : > { %v2862_v38 = vsel %vm1247_vm8, %v6314_v8, -inf }
 0x6d1   : > { %2401 = vadd.xlane.f32.xlu0 %v2400_v63 }
 0x6d5   : > { %2536 = vadd.xlane.f32.xlu0 %v2535_v55 }
 0x6d9   : > { %2395 = vadd.xlane.f32.xlu0 %v2394_v48  ;;  %v2792_v48 = vmul.f32 0.2, %v2744_v16 }
 0x6dd   : > { %2530 = vadd.xlane.f32.xlu0 %v2529_v61 }
 0x6e1   : > { %2389 = vadd.xlane.f32.xlu0 %v2388_v25  ;;  %v2816_v25 = vsel %vm2768_vm15, %v2744_v16, %v2792_v48 }
 0x6e5   : > { %2548 = vadd.xlane.f32.xlu0 %v2547_v32  ;;  %v6931_v32 = vld [vmem:[#allocation7_spill] sm:$0xff] }
 0x6e6   : > { %vm6932_vm10 = vcmp.gt.f32.partialorder %v6931_v32, 0.0 }
 0x6e7   : > { %v6320_v3 = vsel %vm6932_vm10, %v2816_v25, -1e+09 }
 0x6e9   : > { %2407 = vadd.xlane.f32.xlu0 %v2406_v14 }
 0x6ed   : > { %2866 = vmax.xlane.f32.xlu0 %v2865_v52  ;;  %v2868_v52 = vsel %vm1247_vm8, %v6320_v3, -inf }
 0x6f1   : > { %v2519_v28 = vpop.xlane.xlu0 %2518 }
 0x6f2   : > { %v2637_v15 = vrot.slane %v2519_v28, %v5218_v22 }
 0x6f4   : > { %v2638_v43 = vsel %vm939_vm4, %v2637_v15, %v2633_v47 }
 0x6f5   : > { %v2378_v21 = vpop.xlane.xlu0 %2377 }
 0x6f9   : > { %v6287_v41 = vpop.permute.xlu0 %2242 }
 0x6fa   : > { %v2522_v1 = vpop.xlane.xlu1 %2521  ;;  %v2474_v18 = vmul.f32 %v6106_v20, %v6287_v41  ;;  %v2333_v55 = vmul.f32 %v6120_v35, %v6287_v41 }
 0x6fb   : > { %v2642_v42 = vrot.slane %v2522_v1, %v5220_v23 }
 0x6fc   : > { %v2538_v63 = vsel %vm690_vm3, %v2474_v18, 0.0  ;;  %v2397_v53 = vsel %vm690_vm3, %v2333_v55, 0.0 }
 0x6fd   : > { %2539 = vadd.xlane.f32.xlu1 %v2538_v63  ;;  %v2643_v31 = vsel %vm946_vm5, %v2642_v42, %v2638_v43 }
 0x6fe   : > { %v2755_v10 = vadd.f32 %v2643_v31, %v2378_v21  ;;  %v2754_v0 = vadd.f32 %v2643_v31, %v6220_v37  ;;  %v2381_v61 = vpop.xlane.xlu1 %2380 }
 0x6ff   : > { %v2756_v37 = vadd.f32 %v2643_v31, %v2381_v61 }
 0x700   : > { %vm2779_vm13 = vcmp.gt.f32.partialorder %v2755_v10, 0.0  ;;  %v2803_v20 = vmul.f32 0.2, %v2755_v10  ;;  %v2802_v54 = vmul.f32 0.2, %v2754_v0  ;;  %vm2778_vm1 = vcmp.gt.f32.partialorder %v2754_v0, 0.0 }
 0x701   : > { %2398 = vadd.xlane.f32.xlu1 %v2397_v53  ;;  %v2804_v50 = vmul.f32 0.2, %v2756_v37  ;;  %vm2780_vm11 = vcmp.gt.f32.partialorder %v2756_v37, 0.0 }
 0x702   : > { %v2827_v35 = vsel %vm2779_vm13, %v2755_v10, %v2803_v20  ;;  %v2826_v14 = vsel %vm2778_vm1, %v2754_v0, %v2802_v54  ;;  %v2489_v21 = vpop.xlane.xlu1 %2488 }
 0x703   : > { %v6307_v60 = vsel %vm1209_vm9, %v2827_v35, -1e+09  ;;  %v6326_v28 = vsel %vm1208_vm6, %v2826_v14, -1e+09  ;;  %v2828_v15 = vsel %vm2780_vm11, %v2756_v37, %v2804_v50  ;;  %v2591_v20 = vrot.slane %v2489_v21, %v5216_v19 }
 0x704   : > { %v2901_v56 = vsel %vm1247_vm8, %v6307_v60, -inf  ;;  %v2898_v12 = vsel %vm1247_vm8, %v6326_v28, -inf  ;;  %v6332_v47 = vsel %vm6933_vm14, %v2828_v15, -1e+09 }
 0x705   : > { %2902 = vmax.xlane.f32.xlu0 %v2901_v56  ;;  %2404 = vadd.xlane.f32.xlu1 %v2403_v46  ;;  %v2904_v18 = vsel %vm1247_vm8, %v6332_v47, -inf }
 0x706   : > { %v2498_v1 = vpop.xlane.xlu1 %2497 }
 0x707   : > { %v2605_v56 = vrot.slane %v2498_v1, %v5216_v19 }
 0x709   : > { %2863 = vmax.xlane.f32.xlu1 %v2862_v38 }
 0x70a   : > { %v2357_v42 = vpop.xlane.xlu1 %2356 }
 0x70d   : > { %2869 = vmax.xlane.f32.xlu1 %v2868_v52 }
 0x70e   : > { %v2351_v63 = vpop.xlane.xlu1 %2350 }
 0x711   : > { %2899 = vmax.xlane.f32.xlu1 %v2898_v12 }
 0x712   : > { %v6336_v43 = vpop.xlane.xlu1 %2509 }
 0x715   : > { %2905 = vmax.xlane.f32.xlu1 %v2904_v18 }
 0x716   : > { %v6338_v31 = vpop.xlane.xlu1 %2368 }
 0x71a   : > { %v2495_v10 = vpop.xlane.xlu1 %2494 }
 0x71b   : > { %v2600_v48 = vrot.slane %v2495_v10, %v5220_v23 }
 0x71e   : > { %v2504_v0 = vpop.xlane.xlu1 %2503 }
 0x71f   : > { %v2614_v54 = vrot.slane %v2504_v0, %v5220_v23 }
 0x722   : > { %v2363_v14 = vpop.xlane.xlu1 %2362 }
 0x72a   : > { %v2348_v55 = vpop.xlane.xlu0 %2347 }
 0x72e   : > { %v2507_v16 = vpop.xlane.xlu0 %2506 }
 0x732   : > { %v2366_v29 = vpop.xlane.xlu0 %2365 }
 0x736   : > { %v2492_v53 = vpop.xlane.xlu0 %2491 }
 0x737   : > { %v2595_v17 = vrot.slane %v2492_v53, %v5218_v22 }
 0x739   : > { %v2596_v35 = vsel %vm939_vm4, %v2595_v17, %v2591_v20 }
 0x73a   : > { %v2601_v51 = vsel %vm946_vm5, %v2600_v48, %v2596_v35  ;;  %v2501_v61 = vpop.xlane.xlu0 %2500 }
 0x73b   : > { %v2609_v46 = vrot.slane %v2501_v61, %v5218_v22  ;;  %v2746_v37 = vadd.f32 %v2601_v51, %v2351_v63  ;;  %v2745_v25 = vadd.f32 %v2601_v51, %v2348_v55 }
 0x73d   : > { %v2610_v38 = vsel %vm939_vm4, %v2609_v46, %v2605_v56  ;;  %vm2770_vm13 = vcmp.gt.f32.partialorder %v2746_v37, 0.0  ;;  %v2794_v50 = vmul.f32 0.2, %v2746_v37  ;;  %vm2769_vm15 = vcmp.gt.f32.partialorder %v2745_v25, 0.0 }
 0x73e   : > { %v2615_v52 = vsel %vm946_vm5, %v2614_v54, %v2610_v38  ;;  %v2360_v21 = vpop.xlane.xlu0 %2359  ;;  %v2793_v15 = vmul.f32 0.2, %v2745_v25  ;;  %v2619_v56 = vrot.slane %v2507_v16, %v5216_v19  ;;  %v2623_v38 = vrot.slane %v6336_v43, %v5218_v22 }
 0x73f   : > { %v2748_v12 = vadd.f32 %v2615_v52, %v2357_v42  ;;  %v2750_v18 = vadd.f32 %v2615_v52, %v2363_v14  ;;  %v2749_v10 = vadd.f32 %v2615_v52, %v2360_v21  ;;  %v2818_v1 = vsel %vm2770_vm13, %v2746_v37, %v2794_v50 }
 0x740   : > { %v6352_v63 = vsel %vm1206_vm7, %v2818_v1, -1e+09  ;;  %v2817_v55 = vsel %vm2769_vm15, %v2745_v25, %v2793_v15  ;;  %vm6934_vm13 = vcmp.gt.f32.partialorder %v6931_v32, 0.0 }
 0x741   : > { %v2874_v53 = vsel %vm1247_vm8, %v6352_v63, -inf  ;;  %v6358_v20 = vsel %vm1205_vm12, %v2817_v55, -1e+09  ;;  %vm2772_vm1 = vcmp.gt.f32.partialorder %v2748_v12, 0.0  ;;  %v2796_v48 = vmul.f32 0.2, %v2748_v12  ;;  %vm6935_vm15 = vmmov %vm6934_vm13 }
 0x742   : > { %2875 = vmax.xlane.f32.xlu1 %v2874_v53  ;;  %v2871_v42 = vsel %vm1247_vm8, %v6358_v20, -inf  ;;  %v2354_v17 = vpop.xlane.xlu0 %2353  ;;  %vm2774_vm10 = vcmp.gt.f32.partialorder %v2750_v18, 0.0  ;;  %v2798_v0 = vmul.f32 0.2, %v2750_v18  ;;  %v2797_v35 = vmul.f32 0.2, %v2749_v10 }
 0x743   : > { %2872 = vmax.xlane.f32.xlu0 %v2871_v42  ;;  %v2747_v61 = vadd.f32 %v2601_v51, %v2354_v17  ;;  %v2820_v46 = vsel %vm2772_vm1, %v2748_v12, %v2796_v48  ;;  %vm2773_vm11 = vcmp.gt.f32.partialorder %v2749_v10, 0.0  ;;  %v2624_v12 = vsel %vm939_vm4, %v2623_v38, %v2619_v56 }
 0x744   : > { %v2822_v37 = vsel %vm2774_vm10, %v2750_v18, %v2798_v0  ;;  %v6365_v54 = vsel %vm1205_vm12, %v2820_v46, -1e+09  ;;  %v2821_v21 = vsel %vm2773_vm11, %v2749_v10, %v2797_v35 }
 0x745   : > { %vm2771_vm14 = vcmp.gt.f32.partialorder %v2747_v61, 0.0  ;;  %v2795_v25 = vmul.f32 0.2, %v2747_v61  ;;  %v2880_v50 = vsel %vm1247_vm8, %v6365_v54, -inf  ;;  %v6374_v16 = vsel %vm6934_vm13, %v2822_v37, -1e+09  ;;  %v2534_v44 = vpop.xlane.xlu1 %2533 }
 0x746   : > { %v2513_v14 = vpop.xlane.xlu0 %2512  ;;  %2881 = vmax.xlane.f32.xlu1 %v2880_v50  ;;  %v2886_v1 = vsel %vm1247_vm8, %v6374_v16, -inf  ;;  %v6389_v10 = vsel %vm1206_vm7, %v2821_v21, -1e+09 }
 0x747   : > { %v2628_v51 = vrot.slane %v2513_v14, %v5220_v23  ;;  %v2819_v52 = vsel %vm2771_vm14, %v2747_v61, %v2795_v25  ;;  %v2883_v61 = vsel %vm1247_vm8, %v6389_v10, -inf  ;;  %vm6936_vm14 = vmmov %vm6934_vm13 }
 0x748   : > { %v6378_v15 = vsel %vm6935_vm15, %v2819_v52, -1e+09  ;;  %vm6937_vm15 = vcmp.gt.f32.partialorder %v5581_v2, 0.0 }
 0x749   : > { %v2877_v43 = vsel %vm1247_vm8, %v6378_v15, -inf  ;;  %v2629_v18 = vsel %vm946_vm5, %v2628_v51, %v2624_v12  ;;  %v2393_v12 = vpop.xlane.xlu1 %2392 }
 0x74a   : > { %2878 = vmax.xlane.f32.xlu0 %v2877_v43  ;;  %v2751_v55 = vadd.f32 %v2629_v18, %v2366_v29  ;;  %v2752_v53 = vadd.f32 %v2629_v18, %v6338_v31  ;;  %v2372_v42 = vpop.xlane.xlu0 %2371  ;;  %2887 = vmax.xlane.f32.xlu1 %v2886_v1 }
 0x74b   : > { %v2753_v17 = vadd.f32 %v2629_v18, %v2372_v42 }
 0x74c   : > { %vm2776_vm1 = vcmp.gt.f32.partialorder %v2752_v53, 0.0  ;;  %v2800_v48 = vmul.f32 0.2, %v2752_v53  ;;  %vm2775_vm10 = vcmp.gt.f32.partialorder %v2751_v55, 0.0  ;;  %v2799_v0 = vmul.f32 0.2, %v2751_v55 }
 0x74d   : > { %vm2777_vm11 = vcmp.gt.f32.partialorder %v2753_v17, 0.0  ;;  %v2801_v35 = vmul.f32 0.2, %v2753_v17  ;;  %v2528_v18 = vpop.xlane.xlu1 %2527 }
 0x74e   : > { %2884 = vmax.xlane.f32.xlu0 %v2883_v61  ;;  %v2525_v29 = vpop.xlane.xlu0 %2524  ;;  %v2824_v56 = vsel %vm2776_vm1, %v2752_v53, %v2800_v48  ;;  %v2823_v31 = vsel %vm2775_vm10, %v2751_v55, %v2799_v0  ;;  %v2651_v55 = vrot.slane %v2528_v18, %v5218_v22 }
 0x74f   : > { %v6395_v46 = vsel %vm1206_vm7, %v2824_v56, -1e+09  ;;  %v6399_v37 = vsel %vm1205_vm12, %v2823_v31, -1e+09  ;;  %v2825_v25 = vsel %vm2777_vm11, %v2753_v17, %v2801_v35  ;;  %v2647_v53 = vrot.slane %v2525_v29, %v5216_v19 }
 0x750   : > { %v2892_v38 = vsel %vm1247_vm8, %v6395_v46, -inf  ;;  %v2889_v50 = vsel %vm1247_vm8, %v6399_v37, -inf  ;;  %v6407_v51 = vsel %vm6936_vm14, %v2825_v25, -1e+09 }
 0x751   : > { %2893 = vmax.xlane.f32.xlu1 %v2892_v38  ;;  %v2895_v39 = vsel %vm1247_vm8, %v6407_v51, -inf  ;;  %v2652_v17 = vsel %vm939_vm4, %v2651_v55, %v2647_v53  ;;  %v2387_v48 = vpop.xlane.xlu1 %2386 }
 0x752   : > { %2890 = vmax.xlane.f32.xlu0 %v2889_v50  ;;  %v2384_v14 = vpop.xlane.xlu0 %2383 }
 0x756   : > { %2896 = vmax.xlane.f32.xlu0 %v2895_v39  ;;  %v2543_v52 = vpop.xlane.xlu0 %2542 }
 0x75a   : > { %v2402_v21 = vpop.xlane.xlu0 %2401 }
 0x75e   : > { %v2537_v43 = vpop.xlane.xlu0 %2536 }
 0x762   : > { %v2396_v1 = vpop.xlane.xlu0 %2395 }
 0x766   : > { %v2531_v42 = vpop.xlane.xlu0 %2530 }
 0x767   : > { %v2656_v32 = vrot.slane %v2531_v42, %v5220_v23 }
 0x769   : > { %v2657_v0 = vsel %vm946_vm5, %v2656_v32, %v2652_v17 }
 0x76a   : > { %v2757_v35 = vadd.f32 %v2657_v0, %v2384_v14  ;;  %v2758_v61 = vadd.f32 %v2657_v0, %v2387_v48  ;;  %v2390_v56 = vpop.xlane.xlu0 %2389 }
 0x76b   : > { %v2759_v31 = vadd.f32 %v2657_v0, %v2390_v56  ;;  %v2546_v0 = vpop.xlane.xlu1 %2545  ;;  %v2675_v56 = vrot.slane %v2543_v52, %v5216_v19 }
 0x76c   : > { %vm2782_vm7 = vcmp.gt.f32.partialorder %v2758_v61, 0.0  ;;  %v2806_v25 = vmul.f32 0.2, %v2758_v61  ;;  %vm2781_vm12 = vcmp.gt.f32.partialorder %v2757_v35, 0.0  ;;  %v2805_v38 = vmul.f32 0.2, %v2757_v35 }
 0x76d   : > { %vm2783_vm13 = vcmp.gt.f32.partialorder %v2759_v31, 0.0  ;;  %v2807_v50 = vmul.f32 0.2, %v2759_v31 }
 0x76e   : > { %v2830_v39 = vsel %vm2782_vm7, %v2758_v61, %v2806_v25  ;;  %v2829_v29 = vsel %vm2781_vm12, %v2757_v35, %v2805_v38  ;;  %v2549_v17 = vpop.xlane.xlu0 %2548  ;;  %v2679_v61 = vrot.slane %v2546_v0, %v5218_v22 }
 0x76f   : > { %v6418_v18 = vsel %vm1209_vm9, %v2830_v39, -1e+09  ;;  %v6422_v55 = vsel %vm1208_vm6, %v2829_v29, -1e+09  ;;  %v2831_v14 = vsel %vm2783_vm13, %v2759_v31, %v2807_v50  ;;  %v2684_v31 = vrot.slane %v2549_v17, %v5220_v23 }
 0x770   : > { %v2910_v53 = vsel %vm1247_vm8, %v6418_v18, -inf  ;;  %v2907_v42 = vsel %vm1247_vm8, %v6422_v55, -inf  ;;  %v6430_v32 = vsel %vm6937_vm15, %v2831_v14, -1e+09  ;;  %v2680_v38 = vsel %vm939_vm4, %v2679_v61, %v2675_v56 }
 0x771   : > { %2911 = vmax.xlane.f32.xlu1 %v2910_v53  ;;  %2908 = vmax.xlane.f32.xlu0 %v2907_v42  ;;  %v2913_v48 = vsel %vm1247_vm8, %v6430_v32, -inf  ;;  %v2685_v50 = vsel %vm946_vm5, %v2684_v31, %v2680_v38  ;;  %v2665_v29 = vrot.slane %v2537_v43, %v5218_v22  ;;  %v2661_v53 = vrot.slane %v2534_v44, %v5216_v19 }
 0x772   : > { %v2408_v35 = vpop.xlane.xlu0 %2407  ;;  %v2763_v14 = vadd.f32 %v2685_v50, %v2402_v21 }
 0x773   : > { %v2666_v52 = vsel %vm939_vm4, %v2665_v29, %v2661_v53  ;;  %v2765_v62 = vadd.f32 %v2685_v50, %v2408_v35 }
 0x774   : > { %v2811_v36 = vmul.f32 0.2, %v2763_v14  ;;  %vm2787_vm1 = vcmp.gt.f32.partialorder %v2763_v14, 0.0 }
 0x775   : > { %2914 = vmax.xlane.f32.xlu0 %v2913_v48  ;;  %vm2789_vm7 = vcmp.gt.f32.partialorder %v2765_v62, 0.0 }
 0x776   : > { %v2867_v25 = vpop.xlane.xlu0 %2866  ;;  %v2835_v21 = vsel %vm2787_vm1, %v2763_v14, %v2811_v36 }
 0x777   : > { %v2935_v39 = vsub.f32 %v6282_v30, %v2867_v25 }
 0x779   : > { %v2960_v48 = vmul.f32 1.442695, %v2935_v39 }
 0x77b   : > { %4963 = vpow2.f32 %v2960_v48 }
 0x786   : > { %v2540_v42 = vpop.xlane.xlu1 %2539 }
 0x787   : > { %v2670_v0 = vrot.slane %v2540_v42, %v5220_v23  ;;  %v2813_v23 = vmul.f32 0.2, %v2765_v62 }
 0x789   : > { %v2671_v17 = vsel %vm946_vm5, %v2670_v0, %v2666_v52  ;;  %vm6938_vm5 = vmmov %vm6937_vm15  ;;  %v2837_v52 = vsel %vm2789_vm7, %v2765_v62, %v2813_v23  ;;  %vm6946_vm15 = vcmask 261120  }
 0x78a   : > { %v2399_v61 = vpop.xlane.xlu1 %2398  ;;  %v2760_v56 = vadd.f32 %v2671_v17, %v2393_v12  ;;  %v2761_v31 = vadd.f32 %v2671_v17, %v2396_v1 }
 0x78b   : > { %v2762_v30 = vadd.f32 %v2671_v17, %v2399_v61 }
 0x78c   : > { %vm2784_vm10 = vcmp.gt.f32.partialorder %v2760_v56, 0.0  ;;  %v2808_v22 = vmul.f32 0.2, %v2760_v56  ;;  %vm2785_vm11 = vcmp.gt.f32.partialorder %v2761_v31, 0.0  ;;  %v2809_v19 = vmul.f32 0.2, %v2761_v31 }
 0x78d   : > { %vm2786_vm14 = vcmp.gt.f32.partialorder %v2762_v30, 0.0  ;;  %v2810_v44 = vmul.f32 0.2, %v2762_v30 }
 0x78e   : > { %v2405_v43 = vpop.xlane.xlu1 %2404  ;;  %v2903_v25 = vpop.xlane.xlu0 %2902  ;;  %v2832_v38 = vsel %vm2784_vm10, %v2760_v56, %v2808_v22  ;;  %v2833_v39 = vsel %vm2785_vm11, %v2761_v31, %v2809_v19  ;;  %vm6948_vm10 = vmmov %vm6946_vm15 }
 0x78f   : > { %v2764_v35 = vadd.f32 %v2685_v50, %v2405_v43  ;;  %v2947_v12 = vsub.f32 %v6307_v60, %v2903_v25  ;;  %v6448_v1 = vsel %vm1208_vm6, %v2832_v38, -1e+09  ;;  %v6452_v29 = vsel %vm1209_vm9, %v2833_v39, -1e+09  ;;  %v6481_v19 = vpop.eup %4963 }
 0x790   : > { %v2916_v36 = vsel %vm1247_vm8, %v6448_v1, -inf  ;;  %v2919_v14 = vsel %vm1247_vm8, %v6452_v29, -inf  ;;  %v2834_v53 = vsel %vm2786_vm14, %v2762_v30, %v2810_v44  ;;  %v6460_v50 = vsel %vm1208_vm6, %v2835_v21, -1e+09  ;;  %vm6939_vm6 = vmmov %vm6938_vm5 }
 0x791   : > { %vm2788_vm4 = vcmp.gt.f32.partialorder %v2764_v35, 0.0  ;;  %v2812_v60 = vmul.f32 0.2, %v2764_v35  ;;  %v2984_v42 = vmul.f32 1.442695, %v2947_v12  ;;  %2917 = vmax.xlane.f32.xlu1 %v2916_v36  ;;  %2920 = vmax.xlane.f32.xlu0 %v2919_v14  ;;  %v2925_v56 = vsel %vm1247_vm8, %v6460_v50, -inf }
 0x792   : > { %v2864_v48 = vpop.xlane.xlu1 %2863  ;;  %v6464_v0 = vsel %vm6938_vm5, %v2834_v53, -1e+09  ;;  %v6478_v62 = vsel %vm6939_vm6, %v2837_v52, -1e+09  ;;  %v3009_v43 = vsel %vm1247_vm8, %v6481_v19, 0.0 }
 0x793   : > { %4965 = vpow2.f32 %v2984_v42  ;;  %v2934_v17 = vsub.f32 %v6314_v8, %v2864_v48  ;;  %v2836_v61 = vsel %vm2788_vm4, %v2764_v35, %v2812_v60  ;;  %v2922_v59 = vsel %vm1247_vm8, %v6464_v0, -inf }
 0x794   : > { %v6474_v30 = vsel %vm1209_vm9, %v2836_v61, -1e+09  ;;  %v2931_v21 = vsel %vm1247_vm8, %v6478_v62, -inf  ;;  %vm3829_vm4 = vcmask 7168  }
 0x795   : > { %v2958_v31 = vmul.f32 1.442695, %v2934_v17  ;;  %2923 = vmax.xlane.f32.xlu1 %v2922_v59  ;;  %2926 = vmax.xlane.f32.xlu0 %v2925_v56  ;;  %v2928_v44 = vsel %vm1247_vm8, %v6474_v30, -inf }
 0x796   : > { %v2870_v22 = vpop.xlane.xlu1 %2869 }
 0x797   : > { %4967 = vpow2.f32 %v2958_v31  ;;  %v2936_v8 = vsub.f32 %v6320_v3, %v2870_v22 }
 0x799   : > { %v2962_v23 = vmul.f32 1.442695, %v2936_v8  ;;  %2929 = vmax.xlane.f32.xlu1 %v2928_v44  ;;  %2932 = vmax.xlane.f32.xlu0 %v2931_v21 }
 0x79a   : > { %v2900_v9 = vpop.xlane.xlu1 %2899 }
 0x79b   : > { %4969 = vpow2.f32 %v2962_v23  ;;  %v2946_v2 = vsub.f32 %v6326_v28, %v2900_v9 }
 0x79d   : > { %v2982_v25 = vmul.f32 1.442695, %v2946_v2  ;;  %3010 = vadd.xlane.f32.xlu0 %v3009_v43 }
 0x79e   : > { %v2906_v3 = vpop.xlane.xlu1 %2905 }
 0x79f   : > { %4971 = vpow2.f32 %v2982_v25  ;;  %v2948_v38 = vsub.f32 %v6332_v47, %v2906_v3 }
 0x7a0   : > { %v6491_v39 = vpop.eup %4965 }
 0x7a1   : > { %v2986_v35 = vmul.f32 1.442695, %v2948_v38  ;;  %v3045_v12 = vsel %vm1247_vm8, %v6491_v39, 0.0 }
 0x7a2   : > { %3046 = vadd.xlane.f32.xlu0 %v3045_v12 }
 0x7a3   : > { %4973 = vpow2.f32 %v2986_v35 }
 0x7a4   : > { %v6495_v36 = vpop.eup %4967 }
 0x7a5   : > { %v3006_v28 = vsel %vm1247_vm8, %v6495_v36, 0.0 }
 0x7a6   : > { %3007 = vadd.xlane.f32.xlu1 %v3006_v28 }
 0x7a8   : > { %v6499_v14 = vpop.eup %4969 }
 0x7a9   : > { %v3012_v53 = vsel %vm1247_vm8, %v6499_v14, 0.0 }
 0x7aa   : > { %3013 = vadd.xlane.f32.xlu1 %v3012_v53 }
 0x7ac   : > { %v6503_v47 = vpop.eup %4971 }
 0x7ad   : > { %v3042_v60 = vsel %vm1247_vm8, %v6503_v47, 0.0 }
 0x7ae   : > { %3043 = vadd.xlane.f32.xlu1 %v3042_v60 }
 0x7b0   : > { %v6507_v42 = vpop.eup %4973 }
 0x7b1   : > { %v3048_v48 = vsel %vm1247_vm8, %v6507_v42, 0.0 }
 0x7b2   : > { %3049 = vadd.xlane.f32.xlu1 %v3048_v48 }
 0x7cb   : > { %v2876_v52 = vpop.xlane.xlu1 %2875 }
 0x7cc   : > { %v2938_v17 = vsub.f32 %v6352_v63, %v2876_v52  ;;  %v2873_v61 = vpop.xlane.xlu0 %2872 }
 0x7cd   : > { %v2937_v59 = vsub.f32 %v6358_v20, %v2873_v61 }
 0x7ce   : > { %v2966_v56 = vmul.f32 1.442695, %v2938_v17 }
 0x7cf   : > { %v2964_v31 = vmul.f32 1.442695, %v2937_v59  ;;  %v2882_v22 = vpop.xlane.xlu1 %2881 }
 0x7d0   : > { %4975 = vpow2.f32 %v2966_v56  ;;  %v2940_v8 = vsub.f32 %v6365_v54, %v2882_v22 }
 0x7d1   : > { %4977 = vpow2.f32 %v2964_v31 }
 0x7d2   : > { %v2970_v44 = vmul.f32 1.442695, %v2940_v8 }
 0x7d3   : > { %v2879_v21 = vpop.xlane.xlu0 %2878  ;;  %v2888_v23 = vpop.xlane.xlu1 %2887 }
 0x7d4   : > { %v2939_v9 = vsub.f32 %v6378_v15, %v2879_v21  ;;  %4979 = vpow2.f32 %v2970_v44  ;;  %v2942_v2 = vsub.f32 %v6374_v16, %v2888_v23 }
 0x7d6   : > { %v2968_v43 = vmul.f32 1.442695, %v2939_v9  ;;  %v2974_v63 = vmul.f32 1.442695, %v2942_v2 }
 0x7d7   : > { %v2885_v25 = vpop.xlane.xlu0 %2884 }
 0x7d8   : > { %4981 = vpow2.f32 %v2968_v43  ;;  %v2941_v20 = vsub.f32 %v6389_v10, %v2885_v25 }
 0x7d9   : > { %4983 = vpow2.f32 %v2974_v63 }
 0x7da   : > { %v2972_v3 = vmul.f32 1.442695, %v2941_v20  ;;  %v2894_v38 = vpop.xlane.xlu1 %2893 }
 0x7db   : > { %v2944_v35 = vsub.f32 %v6395_v46, %v2894_v38  ;;  %v2891_v54 = vpop.xlane.xlu0 %2890 }
 0x7dc   : > { %4985 = vpow2.f32 %v2972_v3  ;;  %v2943_v12 = vsub.f32 %v6399_v37, %v2891_v54 }
 0x7dd   : > { %v6519_v28 = vpop.eup %4975  ;;  %v2978_v15 = vmul.f32 1.442695, %v2944_v35 }
 0x7de   : > { %v6521_v53 = vpop.eup %4977  ;;  %v2976_v16 = vmul.f32 1.442695, %v2943_v12  ;;  %v3018_v60 = vsel %vm1247_vm8, %v6519_v28, 0.0 }
 0x7df   : > { %4987 = vpow2.f32 %v2978_v15  ;;  %3019 = vadd.xlane.f32.xlu1 %v3018_v60  ;;  %v3015_v10 = vsel %vm1247_vm8, %v6521_v53, 0.0  ;;  %v2897_v48 = vpop.xlane.xlu0 %2896 }
 0x7e0   : > { %4989 = vpow2.f32 %v2976_v16  ;;  %3016 = vadd.xlane.f32.xlu0 %v3015_v10  ;;  %v2945_v46 = vsub.f32 %v6407_v51, %v2897_v48 }
 0x7e1   : > { %v6528_v37 = vpop.eup %4979 }
 0x7e2   : > { %v2980_v52 = vmul.f32 1.442695, %v2945_v46  ;;  %v3024_v17 = vsel %vm1247_vm8, %v6528_v37, 0.0 }
 0x7e3   : > { %3025 = vadd.xlane.f32.xlu1 %v3024_v17 }
 0x7e4   : > { %4991 = vpow2.f32 %v2980_v52 }
 0x7e5   : > { %v6532_v61 = vpop.eup %4981 }
 0x7e6   : > { %v6534_v59 = vpop.eup %4983  ;;  %v3021_v56 = vsel %vm1247_vm8, %v6532_v61, 0.0 }
 0x7e7   : > { %v3030_v31 = vsel %vm1247_vm8, %v6534_v59, 0.0  ;;  %3022 = vadd.xlane.f32.xlu0 %v3021_v56 }
 0x7e8   : > { %3031 = vadd.xlane.f32.xlu1 %v3030_v31 }
 0x7e9   : > { %v6540_v51 = vpop.eup %4985 }
 0x7ea   : > { %v3027_v22 = vsel %vm1247_vm8, %v6540_v51, 0.0 }
 0x7eb   : > { %3028 = vadd.xlane.f32.xlu0 %v3027_v22 }
 0x7ec   : > { %v6544_v8 = vpop.eup %4987 }
 0x7ed   : > { %v6546_v44 = vpop.eup %4989  ;;  %v3036_v21 = vsel %vm1247_vm8, %v6544_v8, 0.0 }
 0x7ee   : > { %3037 = vadd.xlane.f32.xlu1 %v3036_v21  ;;  %v3033_v23 = vsel %vm1247_vm8, %v6546_v44, 0.0 }
 0x7ef   : > { %3034 = vadd.xlane.f32.xlu0 %v3033_v23 }
 0x7f1   : > { %v6552_v9 = vpop.eup %4991 }
 0x7f2   : > { %v3039_v2 = vsel %vm1247_vm8, %v6552_v9, 0.0 }
 0x7f3   : > { %3040 = vadd.xlane.f32.xlu0 %v3039_v2 }
 0x7fa   : > { %v2912_v43 = vpop.xlane.xlu1 %2911  ;;  %v2909_v63 = vpop.xlane.xlu0 %2908 }
 0x7fb   : > { %v2950_v25 = vsub.f32 %v6418_v18, %v2912_v43  ;;  %v2949_v20 = vsub.f32 %v6422_v55, %v2909_v63 }
 0x7fd   : > { %v2990_v3 = vmul.f32 1.442695, %v2950_v25  ;;  %v2988_v38 = vmul.f32 1.442695, %v2949_v20 }
 0x7fe   : > { %v2915_v35 = vpop.xlane.xlu0 %2914 }
 0x7ff   : > { %4993 = vpow2.f32 %v2990_v3  ;;  %v2951_v54 = vsub.f32 %v6430_v32, %v2915_v35 }
 0x800   : > { %4995 = vpow2.f32 %v2988_v38 }
 0x801   : > { %v2992_v12 = vmul.f32 1.442695, %v2951_v54 }
 0x803   : > { %4997 = vpow2.f32 %v2992_v12 }
 0x80c   : > { %v6559_v15 = vpop.eup %4993 }
 0x80d   : > { %v6561_v16 = vpop.eup %4995  ;;  %v3054_v60 = vsel %vm1247_vm8, %v6559_v15, 0.0 }
 0x80e   : > { %3055 = vadd.xlane.f32.xlu1 %v3054_v60  ;;  %v3051_v18 = vsel %vm1247_vm8, %v6561_v16, 0.0 }
 0x80f   : > { %3052 = vadd.xlane.f32.xlu0 %v3051_v18 }
 0x810   : > { %v6567_v55 = vpop.eup %4997 }
 0x811   : > { %v3057_v32 = vsel %vm1247_vm8, %v6567_v55, 0.0 }
 0x813   : > { %3058 = vadd.xlane.f32.xlu0 %v3057_v32 }
 0x81a   : > { %v2918_v10 = vpop.xlane.xlu1 %2917  ;;  %v2921_v48 = vpop.xlane.xlu0 %2920 }
 0x81b   : > { %v2952_v46 = vsub.f32 %v6448_v1, %v2918_v10  ;;  %v2953_v52 = vsub.f32 %v6452_v29, %v2921_v48 }
 0x81d   : > { %v2994_v17 = vmul.f32 1.442695, %v2952_v46  ;;  %v2996_v56 = vmul.f32 1.442695, %v2953_v52 }
 0x81e   : > { %v2924_v31 = vpop.xlane.xlu1 %2923  ;;  %v2927_v22 = vpop.xlane.xlu0 %2926 }
 0x81f   : > { %4999 = vpow2.f32 %v2994_v17  ;;  %v2954_v21 = vsub.f32 %v6464_v0, %v2924_v31  ;;  %v2955_v23 = vsub.f32 %v6460_v50, %v2927_v22 }
 0x820   : > { %5001 = vpow2.f32 %v2996_v56 }
 0x821   : > { %v2998_v2 = vmul.f32 1.442695, %v2954_v21  ;;  %v3000_v43 = vmul.f32 1.442695, %v2955_v23 }
 0x822   : > { %v2930_v63 = vpop.xlane.xlu1 %2929  ;;  %v2933_v25 = vpop.xlane.xlu0 %2932 }
 0x823   : > { %5003 = vpow2.f32 %v2998_v2  ;;  %v2956_v20 = vsub.f32 %v6474_v30, %v2930_v63  ;;  %v2957_v1 = vsub.f32 %v6478_v62, %v2933_v25  ;;  %v3222_v63 = vsel %vm1550_vm2, %v6127_v27, 0 }
 0x824   : > { %5005 = vpow2.f32 %v3000_v43  ;;  %v3144_v25 = vpack.c.bf16 %v6112_v34, %v6075_v57 }
 0x825   : > { %v3002_v29 = vmul.f32 1.442695, %v2956_v20  ;;  %v3004_v3 = vmul.f32 1.442695, %v2957_v1 }
 0x826   : > { %v3011_v38 = vpop.xlane.xlu0 %3010 }
 0x827   : > { %5007 = vpow2.f32 %v3002_v29 }
 0x828   : > { %5009 = vpow2.f32 %v3004_v3 }
 0x829   : > { %5011 = vrcp.f32 %v3011_v38 }
 0x82c   : > { %v6577_v35 = vpop.eup %4999 }
 0x82d   : > { %v6579_v0 = vpop.eup %5001  ;;  %v3060_v50 = vsel %vm1247_vm8, %v6577_v35, 0.0 }
 0x82e   : > { %3061 = vadd.xlane.f32.xlu1 %v3060_v50  ;;  %v3063_v30 = vsel %vm1247_vm8, %v6579_v0, 0.0 }
 0x82f   : > { %3064 = vadd.xlane.f32.xlu0 %v3063_v30  ;;  %v3008_v62 = vpop.xlane.xlu1 %3007 }
 0x830   : > { %v6585_v54 = vpop.eup %5003  ;;  %5013 = vrcp.f32 %v3008_v62 }
 0x831   : > { %v6587_v12 = vpop.eup %5005  ;;  %v3066_v60 = vsel %vm1247_vm8, %v6585_v54, 0.0 }
 0x832   : > { %3067 = vadd.xlane.f32.xlu1 %v3066_v60  ;;  %v3069_v18 = vsel %vm1247_vm8, %v6587_v12, 0.0 }
 0x833   : > { %3070 = vadd.xlane.f32.xlu0 %v3069_v18  ;;  %v3014_v32 = vpop.xlane.xlu1 %3013 }
 0x834   : > { %v6593_v10 = vpop.eup %5007  ;;  %5015 = vrcp.f32 %v3014_v32 }
 0x835   : > { %v6595_v48 = vpop.eup %5009  ;;  %v3072_v46 = vsel %vm1247_vm8, %v6593_v10, 0.0 }
 0x836   : > { %3073 = vadd.xlane.f32.xlu1 %v3072_v46  ;;  %v3075_v52 = vsel %vm1247_vm8, %v6595_v48, 0.0  ;;  %v5012_v17 = vpop.eup %5011 }
 0x837   : > { %3076 = vadd.xlane.f32.xlu0 %v3075_v52  ;;  %v3103_v22 = vmul.f32 %v5012_v17, %v6481_v19  ;;  %v3147_v19 = vpack.c.bf16 %v6166_v11, %v6166_v11 }
 0x83d   : > { %v5014_v56 = vpop.eup %5013 }
 0x83e   : > { %v3102_v31 = vmul.f32 %v5014_v56, %v6495_v36  ;;  %v3044_v36 = vpop.xlane.xlu1 %3043 }
 0x840   : > { %v3126_v21 = vpack.c.bf16 %v3103_v22, %v3102_v31 }
 0x841   : > { %v5016_v23 = vpop.eup %5015 }
 0x842   : > { %4706 = vmatprep.mubr.msk.bf16.mxu0 %vm1247_vm8, %v3126_v21  ;;  %v3104_v2 = vmul.f32 %v5016_v23, %v6499_v14  ;;  %v3050_v20 = vpop.xlane.xlu1 %3049  ;;  %v3047_v14 = vpop.xlane.xlu0 %3046 }
 0x844   : > { %v3127_v43 = vpack.c.bf16 %v3104_v2, %v3104_v2 }
 0x846   : > { %4707 = vmatmul.mubr.msk.bf16.vlgmr.msra.gmra.mxu0 %vm1247_vm8, %v3127_v43 }
 0x847   : > { %4711 = vmatpush3.bf16.msra.mxu0 %v3222_v63 }
 0x848   : > { %4712 = vmatprep.subr.bf16.mxu0 %v3144_v25 }
 0x84b   : > { %4713 = vmatpush3.bf16.msra.mxu0 %v3144_v25 }
 0x84c   : > { %4824 = vmatprep.subr.msk.bf16.mxu0 %vm1550_vm2, %v3147_v19 }
 0x868   : > { %v3020_v1 = vpop.xlane.xlu1 %3019 }
 0x869   : > { %5017 = vrcp.f32 %v3020_v1  ;;  %v3017_v29 = vpop.xlane.xlu0 %3016 }
 0x86a   : > { %5019 = vrcp.f32 %v3017_v29 }
 0x86c   : > { %v3026_v3 = vpop.xlane.xlu1 %3025 }
 0x870   : > { %v3023_v27 = vpop.xlane.xlu0 %3022 }
 0x871   : > { %v3032_v38 = vpop.xlane.xlu1 %3031  ;;  %5021 = vrcp.f32 %v3023_v27  ;;  %v3152_v27 = vpack.c.bf16 %v6215_v7, %v6189_v4 }
 0x872   : > { %5023 = vrcp.f32 %v3026_v3  ;;  %v3155_v3 = vpack.c.bf16 %v6287_v41, %v6287_v41 }
 0x873   : > { %5025 = vrcp.f32 %v3032_v38 }
 0x874   : > { %v3029_v57 = vpop.xlane.xlu0 %3028  ;;  %v3507_v41 = vsel %vm1550_vm2, %v3155_v3, 0 }
 0x875   : > { %5027 = vrcp.f32 %v3029_v57 }
 0x876   : > { %v5018_v34 = vpop.eup %5017  ;;  %5029 = vrcp.f32 %v3044_v36 }
 0x877   : > { %v5020_v11 = vpop.eup %5019  ;;  %5031 = vrcp.f32 %v3047_v14  ;;  %v3038_v50 = vpop.xlane.xlu1 %3037  ;;  %v3106_v30 = vmul.f32 %v5018_v34, %v6519_v28  ;;  %v3279_v28 = vsel %vm1550_vm2, %v3147_v19, 0 }
 0x878   : > { %5033 = vrcp.f32 %v3038_v50  ;;  %v3035_v62 = vpop.xlane.xlu0 %3034  ;;  %v3105_v60 = vmul.f32 %v5020_v11, %v6521_v53  ;;  %v3146_v53 = vpack.c.bf16 %v6114_v40, %v6098_v49  ;;  %v3151_v49 = vpack.c.bf16 %v6047_v33, %v6047_v33 }
 0x879   : > { %5035 = vrcp.f32 %v3035_v62  ;;  %v6940_v62 = vld [vmem:[#allocation4_spill] sm:$0xff] }
 0x87a   : > { %v3128_v18 = vpack.c.bf16 %v3106_v30, %v3105_v60  ;;  %5037 = vrcp.f32 %v3050_v20  ;;  %v3393_v33 = vsel %vm1550_vm2, %v3151_v49, 0  ;;  %v6941_v60 = vld [vmem:[#allocation2_spill] sm:$0xff] }
 0x87c   : > { %4714 = vmatprep.mubr.msk.bf16.mxu0 %vm1247_vm8, %v3128_v18  ;;  %v3041_v32 = vpop.xlane.xlu0 %3040  ;;  %v3156_v18 = vpack.c.bf16 %v6941_v60, %v6940_v62 }
 0x87d   : > { %5039 = vrcp.f32 %v3041_v32 }
 0x87e   : > { %v5022_v46 = vpop.eup %5021 }
 0x87f   : > { %v3107_v52 = vmul.f32 %v5022_v46, %v6532_v61  ;;  %v5024_v17 = vpop.eup %5023 }
 0x880   : > { %v5026_v56 = vpop.eup %5025  ;;  %v3108_v23 = vmul.f32 %v5024_v17, %v6528_v37 }
 0x881   : > { %v3129_v31 = vpack.c.bf16 %v3107_v52, %v3107_v52  ;;  %v3110_v25 = vmul.f32 %v5026_v56, %v6534_v59 }
 0x882   : > { %v5028_v22 = vpop.eup %5027 }
 0x883   : > { %v5030_v21 = vpop.eup %5029  ;;  %4715 = vmatmul.mubr.msk.bf16.vlgmr.msra.gmra.mxu0 %vm1247_vm8, %v3129_v31  ;;  %v3109_v2 = vmul.f32 %v5028_v22, %v6540_v51  ;;  %v3131_v19 = vpack.c.bf16 %v3110_v25, %v3110_v25 }
 0x884   : > { %v5032_v43 = vpop.eup %5031  ;;  %4719 = vmatpush3.bf16.msra.mxu0 %v3279_v28  ;;  %v3114_v14 = vmul.f32 %v5030_v21, %v6503_v47  ;;  %v3150_v47 = vpack.c.bf16 %v6042_v45, %v6037_v24  ;;  %v3157_v45 = vpack.c.bf16 %v6270_v26, %v6270_v26 }
 0x885   : > { %v5034_v63 = vpop.eup %5033  ;;  %4720 = vmatprep.subr.bf16.mxu0 %v3146_v53  ;;  %v3130_v61 = vpack.c.bf16 %v3109_v2, %v3108_v23  ;;  %v3115_v37 = vmul.f32 %v5032_v43, %v6491_v39 }
 0x886   : > { %v5036_v36 = vpop.eup %5035  ;;  %v3112_v20 = vmul.f32 %v5034_v63, %v6544_v8  ;;  %v3564_v30 = vsel %vm1550_vm2, %v3157_v45, 0 }
 0x887   : > { %4722 = vmatprep.mubr.msk.bf16.mxu0 %vm1247_vm8, %v3130_v61  ;;  %v3111_v40 = vmul.f32 %v5036_v36, %v6546_v44  ;;  %v5038_v51 = vpop.eup %5037  ;;  %v3134_v29 = vpack.c.bf16 %v3115_v37, %v3114_v14 }
 0x888   : > { %4721 = vmatpush3.bf16.msra.mxu0 %v3146_v53  ;;  %v3116_v44 = vmul.f32 %v5038_v51, %v6507_v42  ;;  %v3154_v42 = vpack.c.bf16 %v6228_v58, %v6203_v5 }
 0x889   : > { %4826 = vmatprep.subr.msk.bf16.mxu0 %vm1550_vm2, %v3151_v49  ;;  %v3132_v59 = vpack.c.bf16 %v3112_v20, %v3111_v40 }
 0x88a   : > { %v5040_v1 = vpop.eup %5039  ;;  %v3135_v24 = vpack.c.bf16 %v3116_v44, %v3116_v44 }
 0x88b   : > { %v3113_v8 = vmul.f32 %v5040_v1, %v6552_v9  ;;  %4723 = vmatmul.mubr.msk.bf16.vlgmr.msra.gmra.mxu0 %vm1247_vm8, %v3131_v19  ;;  %4730 = vmatprep.mubr.msk.bf16.mxu1 %vm1247_vm8, %v3132_v59  ;;  %v3450_v9 = vsel %vm1550_vm2, %v6238_v13, 0 }
 0x88c   : > { %4735 = vmatpush3.bf16.msra.mxu0 %v3393_v33  ;;  %4738 = vmatprep.mubr.msk.bf16.mxu0 %vm1247_vm8, %v3134_v29 }
 0x88d   : > { %v3133_v39 = vpack.c.bf16 %v3113_v8, %v3113_v8  ;;  %4736 = vmatprep.subr.bf16.mxu0 %v3150_v47 }
 0x88f   : > { %4731 = vmatmul.mubr.msk.bf16.vlgmr.msra.gmra.mxu1 %vm1247_vm8, %v3133_v39 }
 0x890   : > { %4737 = vmatpush3.bf16.msra.mxu0 %v3150_v47  ;;  %4743 = vmatpush3.bf16.msra.mxu1 %v3450_v9 }
 0x891   : > { %4744 = vmatprep.subr.bf16.mxu1 %v3152_v27  ;;  %4828 = vmatprep.subr.msk.bf16.mxu0 %vm1550_vm2, %v3155_v3 }
 0x893   : > { %4739 = vmatmul.mubr.msk.bf16.vlgmr.msra.gmra.mxu0 %vm1247_vm8, %v3135_v24 }
 0x894   : > { %4745 = vmatpush3.bf16.msra.mxu1 %v3152_v27  ;;  %4751 = vmatpush3.bf16.msra.mxu0 %v3507_v41  ;;  %v3718_v41 = vld [vmem:[%s6704_s20 + $0x10] sm:$0xff] }
 0x895   : > { %4752 = vmatprep.subr.bf16.mxu0 %v3154_v42  ;;  %4829 = vmatprep.subr.msk.bf16.mxu1 %vm1550_vm2, %v3157_v45  ;;  %vm6942_vm2 = vcmask 130048  }
 0x896   : > { %vm6943_vm9 = vmmov %vm6942_vm2 }
 0x897   : > { %v3056_v4 = vpop.xlane.xlu1 %3055  ;;  %vm6944_vm12 = vmmov %vm6942_vm2 }
 0x898   : > { %5041 = vrcp.f32 %v3056_v4  ;;  %4753 = vmatpush3.bf16.msra.mxu0 %v3154_v42  ;;  %v3053_v7 = vpop.xlane.xlu0 %3052  ;;  %v3719_v42 = vld [vmem:[%s6704_s20 + $0x18] sm:$0xff]  ;;  %vm6945_vm13 = vmmov %vm6942_vm2 }
 0x899   : > { %5043 = vrcp.f32 %v3053_v7  ;;  %4766 = vmatprep.subr.bf16.mxu0 %v6920_v6  ;;  %v3721_v7 = vpack.c.bf16 %v3719_v42, %v3718_v41  ;;  %vm6947_vm1 = vmmov %vm6942_vm2 }
 0x89a   : > { %vm6949_vm11 = vmmov %vm6947_vm1 }
 0x89c   : > { %v3059_v13 = vpop.xlane.xlu0 %3058 }
 0x89d   : > { %5045 = vrcp.f32 %v3059_v13 }
 0x8a5   : > { %v5042_v26 = vpop.eup %5041 }
 0x8a6   : > { %v5044_v38 = vpop.eup %5043  ;;  %v3118_v57 = vmul.f32 %v5042_v26, %v6559_v15  ;;  %v3716_v26 = vld [vmem:[%s6704_s20] sm:$0xff] }
 0x8a7   : > { %v3117_v5 = vmul.f32 %v5044_v38, %v6561_v16  ;;  %v3717_v38 = vld [vmem:[%s6704_s20 + $0x8] sm:$0xff] }
 0x8a9   : > { %v3136_v58 = vpack.c.bf16 %v3118_v57, %v3117_v5  ;;  %v3720_v5 = vpack.c.bf16 %v3717_v38, %v3716_v26  ;;  %v4497_v26 = vld [vmem:[%s6704_s20 + $0x40] sm:$0xff]  ;;  %v4498_v38 = vld [vmem:[%s6704_s20 + $0x48] sm:$0xff] }
 0x8aa   : > { %v5046_v34 = vpop.eup %5045 }
 0x8ab   : > { %4746 = vmatprep.mubr.msk.bf16.mxu1 %vm1247_vm8, %v3136_v58  ;;  %v3119_v11 = vmul.f32 %v5046_v34, %v6567_v55 }
 0x8ad   : > { %v3137_v50 = vpack.c.bf16 %v3119_v11, %v3119_v11 }
 0x8af   : > { %4747 = vmatmul.mubr.msk.bf16.vlgmr.msra.gmra.mxu1 %vm1247_vm8, %v3137_v50 }
 0x8b0   : > { %4759 = vmatpush3.bf16.msra.mxu1 %v3564_v30 }
 0x8b1   : > { %4760 = vmatprep.subr.bf16.mxu1 %v3156_v18 }
 0x8b4   : > { %4761 = vmatpush3.bf16.msra.mxu1 %v3156_v18 }
 0x8b5   : > { %4774 = vmatprep.subr.bf16.mxu1 %v6920_v6 }
 0x8b7   : > { %v3062_v15 = vpop.xlane.xlu1 %3061 }
 0x8b8   : > { %5047 = vrcp.f32 %v3062_v15  ;;  %v3065_v16 = vpop.xlane.xlu0 %3064 }
 0x8b9   : > { %5049 = vrcp.f32 %v3065_v16 }
 0x8bb   : > { %v3068_v32 = vpop.xlane.xlu1 %3067 }
 0x8bc   : > { %5051 = vrcp.f32 %v3068_v32  ;;  %v3071_v55 = vpop.xlane.xlu0 %3070 }
 0x8bd   : > { %5053 = vrcp.f32 %v3071_v55 }
 0x8bf   : > { %v3074_v46 = vpop.xlane.xlu1 %3073 }
 0x8c0   : > { %5055 = vrcp.f32 %v3074_v46  ;;  %v3077_v52 = vpop.xlane.xlu0 %3076 }
 0x8c1   : > { %5057 = vrcp.f32 %v3077_v52 }
 0x8c5   : > { %v5048_v17 = vpop.eup %5047 }
 0x8c6   : > { %v5050_v56 = vpop.eup %5049  ;;  %v3120_v31 = vmul.f32 %v5048_v17, %v6577_v35 }
 0x8c7   : > { %v3121_v22 = vmul.f32 %v5050_v56, %v6579_v0 }
 0x8c9   : > { %v5052_v21 = vpop.eup %5051  ;;  %v3138_v28 = vpack.c.bf16 %v3121_v22, %v3120_v31 }
 0x8ca   : > { %v3122_v53 = vmul.f32 %v5052_v21, %v6585_v54  ;;  %v5054_v23 = vpop.eup %5053 }
 0x8cb   : > { %4754 = vmatprep.mubr.msk.bf16.mxu0 %vm1247_vm8, %v3138_v28  ;;  %v3123_v61 = vmul.f32 %v5054_v23, %v6587_v12  ;;  %v5095_v28 = vld [vmem:[%s5199_s18] sm:$0xff] }
 0x8cc   : > { %v3139_v2 = vpack.c.bf16 %v3122_v53, %v3122_v53 }
 0x8cd   : > { %v5056_v43 = vpop.eup %5055 }
 0x8ce   : > { %v5058_v63 = vpop.eup %5057  ;;  %4755 = vmatmul.mubr.msk.bf16.vlgmr.msra.gmra.mxu0 %vm1247_vm8, %v3139_v2  ;;  %v3124_v25 = vmul.f32 %v5056_v43, %v6593_v10 }
 0x8cf   : > { %v3125_v35 = vmul.f32 %v5058_v63, %v6595_v48  ;;  %4770 = vmatprep.mubr.msk.bf16.mxu0 %vm5110_vm0, %v6920_v6  ;;  %4767 = vmatpush3.bf16.msra.mxu0 %v3721_v7 }
 0x8d0   : > { %v3140_v0 = vpack.c.bf16 %v3124_v25, %v3123_v61  ;;  %4768 = vmatprep.subr.bf16.mxu0 %v6920_v6  ;;  %v5096_v25 = vld [vmem:[%s5199_s18 + $0x18] sm:$0xff] }
 0x8d1   : > { %v3141_v36 = vpack.c.bf16 %v3125_v35, %v3125_v35 }
 0x8d2   : > { %4762 = vmatprep.mubr.msk.bf16.mxu1 %vm1247_vm8, %v3140_v0  ;;  %v4487_v0 = vld [vmem:[%s6704_s20 + $0x30] sm:$0xff] }
 0x8d3   : > { %4763 = vmatmul.mubr.msk.bf16.vlgmr.msra.gmra.mxu1 %vm1247_vm8, %v3141_v36  ;;  %4769 = vmatpush3.bf16.msra.mxu0 %v3720_v5  ;;  %v4488_v36 = vld [vmem:[%s6704_s20 + $0x38] sm:$0xff] }
 0x8d4   : > { %4778 = vmatprep.mubr.msk.bf16.mxu1 %vm5110_vm0, %v6920_v6  ;;  %4782 = vmatprep.subr.bf16.mxu0 %v6920_v6 }
 0x906   : > { %v6679_v54 = vpop.f32.mrf.mxu0 }
 0x908   : > { %v6681_v20 = vpop.f32.mrf.mxu0 }
 0x90a   : > { %v4709_v12 = vpop.f32.mrf.mxu0 }
 0x90c   : > { %v6683_v10 = vpop.f32.mrf.mxu0 }
 0x943   : > { %v4716_v48 = vpop.f32.mrf.mxu0 }
 0x945   : > { %v3258_v14 = vpop.f32.mrf.mxu0 }
 0x946   : > { %3620 = vrot.lane.b32.xlu1 %v3258_v14, %s5115_s12 }
 0x947   : > { %v4717_v49 = vpop.f32.mrf.mxu0 }
 0x949   : > { %v3261_v40 = vpop.f32.mrf.mxu0 }
 0x94b   : > { %v4724_v37 = vpop.f32.mrf.mxu0 }
 0x94d   : > { %v3315_v51 = vpop.f32.mrf.mxu0 }
 0x94e   : > { %3644 = vrot.lane.b32.xlu1 %v3315_v51, %s5117_s16 }
 0x94f   : > { %v4725_v19 = vpop.f32.mrf.mxu0  ;;  %v4732_v59 = vpop.f32.mrf.mxu1 }
 0x951   : > { %v3318_v1 = vpop.f32.mrf.mxu0  ;;  %v3372_v29 = vpop.f32.mrf.mxu1 }
 0x952   : > { %3668 = vrot.lane.b32.xlu0 %v3372_v29, %s5116_s14 }
 0x953   : > { %v4733_v8 = vpop.f32.mrf.mxu1  ;;  %v6688_v33 = vpop.f32.mrf.mxu0 }
 0x955   : > { %v3429_v47 = vpop.f32.mrf.mxu0  ;;  %v3375_v44 = vpop.f32.mrf.mxu1 }
 0x956   : > { %3622 = vrot.lane.b32.xlu0 %v3261_v40, %s5115_s12  ;;  %v4485_v40 = vld [vmem:[%s6704_s20 + $0x20] sm:$0xff] }
 0x957   : > { %v4741_v39 = vpop.f32.mrf.mxu0 }
 0x959   : > { %v3432_v45 = vpop.f32.mrf.mxu0 }
 0x96f   : > { %v4748_v3 = vpop.f32.mrf.mxu1 }
 0x971   : > { %v3486_v9 = vpop.f32.mrf.mxu1 }
 0x972   : > { %3626 = vrot.lane.b32.xlu0 %v3486_v9, %s5115_s12  ;;  %v4499_v9 = vld [vmem:[%s6704_s20 + $0x50] sm:$0xff] }
 0x973   : > { %v4749_v27 = vpop.f32.mrf.mxu1 }
 0x974   : > { %v4500_v27 = vld [vmem:[%s6704_s20 + $0x58] sm:$0xff] }
 0x975   : > { %v3489_v24 = vpop.f32.mrf.mxu1 }
 0x976   : > { %3670 = vrot.lane.b32.xlu0 %v3375_v44, %s5116_s14  ;;  %3628 = vrot.lane.b32.xlu1 %v3489_v24, %s5115_s12  ;;  %v5098_v44 = vld [vmem:[%s5199_s18 + $0x20] sm:$0xff] }
 0x97a   : > { %3646 = vrot.lane.b32.xlu0 %v3318_v1, %s5117_s16  ;;  %v5097_v1 = vld [vmem:[%s5199_s18 + $0x8] sm:$0xff] }
 0x97e   : > { %3624 = vrot.lane.b32.xlu0 %v4716_v48, %s5115_s12 }
 0x982   : > { %3648 = vrot.lane.b32.xlu0 %v4724_v37, %s5117_s16  ;;  %v4486_v37 = vld [vmem:[%s6704_s20 + $0x28] sm:$0xff] }
 0x983   : > { %v3899_v39 = vpack.c.bf16 %v4486_v37, %v4485_v40  ;;  %v4506_v37 = vld [vmem:[%s458_s26 + $0x2] ss:$0 sm:$0xff] }
 0x986   : > { %3672 = vrot.lane.b32.xlu0 %v4732_v59, %s5116_s14 }
 0x98e   : > { %v4756_v4 = vpop.f32.mrf.mxu0 }
 0x990   : > { %v3543_v13 = vpop.f32.mrf.mxu0 }
 0x992   : > { %v4757_v57 = vpop.f32.mrf.mxu0 }
 0x993   : > { %v4764_v58 = vpop.f32.mrf.mxu1 }
 0x994   : > { %v3546_v30 = vpop.f32.mrf.mxu0 }
 0x995   : > { %v3600_v34 = vpop.f32.mrf.mxu1 }
 0x996   : > { %3674 = vrot.lane.b32.xlu1 %v3600_v34, %s5116_s14  ;;  %v4079_v34 = vpack.c.bf16 %v4498_v38, %v4497_v26 }
 0x997   : > { %v4765_v11 = vpop.f32.mrf.mxu1 }
 0x998   : > { %v5099_v11 = vld [vmem:[%s5199_s18 + $0x10] sm:$0xff] }
 0x999   : > { %v3603_v50 = vpop.f32.mrf.mxu1 }
 0x99a   : > { %3650 = vrot.lane.b32.xlu1 %v3543_v13, %s5117_s16 }
 0x99e   : > { %3676 = vrot.lane.b32.xlu1 %v3603_v50, %s5116_s14 }
 0x9a2   : > { %3652 = vrot.lane.b32.xlu1 %v3546_v30, %s5117_s16 }
 0x9a6   : > { %3630 = vrot.lane.b32.xlu1 %v4748_v3, %s5115_s12  ;;  %s5120_s12 = smov 64  }
 0x9aa   : > { %3654 = vrot.lane.b32.xlu1 %v4756_v4, %s5117_s16  ;;  %v4080_v4 = vpack.c.bf16 %v4500_v27, %v4499_v9 }
 0x9ae   : > { %3678 = vrot.lane.b32.xlu1 %v4764_v58, %s5116_s14  ;;  %s4427_s14 = sshll.u32 %s6962_s10, 1 }
 0x9af   : > { %s467_s17 = scalar_lea.vmem %s6894_s9, %s4427_s14 }
 0x9b8   : > { %v3621_v18 = vpop.permute.xlu1 %3620 }
 0x9b9   : > { %v3686_v46 = vsel %vm690_vm3, %v6681_v20, %v3621_v18  ;;  %v5100_v18 = vld [vmem:[%s5199_s18 + $0x28] sm:$0xff]  ;;  %s6800_s18 = scalar_lea.vmem %s6892_s7, %s4831_s15 }
 0x9ba   : > { %v4493_v40 = vld [vmem:[%s6800_s18 + $0x38] sm:$0xff]  ;;  %v4491_v9 = vld [vmem:[%s6800_s18 + $0x28] sm:$0xff] }
 0x9c0   : > { %v3645_v16 = vpop.permute.xlu1 %3644 }
 0x9c1   : > { %v3692_v56 = vsel %vm6942_vm2, %v3686_v46, %v3645_v16  ;;  %v3726_v46 = vld [vmem:[%s6800_s18 + $0x18] sm:$0xff]  ;;  %vm1046_vm2 = vcmask 1041409  }
 0x9c4   : > { %v3669_v62 = vpop.permute.xlu0 %3668 }
 0x9c5   : > { %v3698_v31 = vsel %vm1247_vm8, %v3692_v56, %v3669_v62  ;;  %v3724_v56 = vld [vmem:[%s6800_s18 + $0x8] sm:$0xff] }
 0x9c6   : > { %v6725_v53 = vadd.f32 %v5095_v28, %v3698_v31 }
 0x9c8   : > { %v3623_v60 = vpop.permute.xlu0 %3622  ;;  %v3710_v12 = vmax.f32 %v6725_v53, 0.0 }
 0x9c9   : > { %v3687_v2 = vsel %vm690_vm3, %v6683_v10, %v3623_v60  ;;  %v3900_v10 = vpack.c.bf16 %v4488_v36, %v4487_v0 }
 0x9e4   : > { %v3627_v15 = vpop.permute.xlu0 %3626 }
 0x9e5   : > { %v3689_v22 = vsel %vm690_vm3, %v3429_v47, %v3627_v15 }
 0x9e8   : > { %v3671_v32 = vpop.permute.xlu0 %3670  ;;  %v3629_v55 = vpop.permute.xlu1 %3628 }
 0x9e9   : > { %v3690_v51 = vsel %vm690_vm3, %v3432_v45, %v3629_v55  ;;  %v3725_v55 = vld [vmem:[%s6800_s18 + $0x10] sm:$0xff] }
 0x9ec   : > { %v3647_v52 = vpop.permute.xlu0 %3646 }
 0x9ed   : > { %v3693_v61 = vsel %vm6944_vm12, %v3687_v2, %v3647_v52  ;;  %v3728_v52 = vpack.c.bf16 %v3726_v46, %v3725_v55 }
 0x9ee   : > { %v3699_v14 = vsel %vm1247_vm8, %v3693_v61, %v3671_v32  ;;  %v4494_v61 = vld [vmem:[%s458_s26 + $0x1] ss:$0 sm:$0xff] }
 0x9ef   : > { %v6748_v29 = vadd.f32 %v5097_v1, %v3699_v14  ;;  %4775 = vmatpush3.bf16.msra.mxu1 %v3728_v52 }
 0x9f0   : > { %v3625_v43 = vpop.permute.xlu0 %3624  ;;  %4776 = vmatprep.subr.bf16.mxu1 %v6920_v6 }
 0x9f1   : > { %v3711_v45 = vmax.f32 %v6748_v29, 0.0  ;;  %v3688_v7 = vsel %vm690_vm3, %v6679_v54, %v3625_v43 }
 0x9f4   : > { %v3649_v19 = vpop.permute.xlu0 %3648 }
 0x9f5   : > { %v3694_v57 = vsel %vm6947_vm1, %v3688_v7, %v3649_v19  ;;  %v4504_v7 = vld [vmem:[%s6800_s18 + $0x50] sm:$0xff]  ;;  %vm4273_vm1 = vcmask 779264  }
 0x9f8   : > { %v3673_v42 = vpop.permute.xlu0 %3672 }
 0x9f9   : > { %v3700_v58 = vsel %vm1247_vm8, %v3694_v57, %v3673_v42 }
 0x9fa   : > { %v6781_v50 = vadd.f32 %v5099_v11, %v3700_v58  ;;  %v4502_v58 = vld [vmem:[%s6800_s18 + $0x40] sm:$0xff] }
 0x9fc   : > { %v3712_v16 = vmax.f32 %v6781_v50, 0.0 }
 0xa08   : > { %v3675_v17 = vpop.permute.xlu1 %3674 }
 0xa0c   : > { %v3651_v21 = vpop.permute.xlu1 %3650 }
 0xa0d   : > { %v3695_v23 = vsel %vm6943_vm9, %v3689_v22, %v3651_v21  ;;  %v4482_v22 = vld [vmem:[%s458_s26] ss:$0 sm:$0xff] }
 0xa0e   : > { %v3701_v63 = vsel %vm1247_vm8, %v3695_v23, %v3675_v17  ;;  %v3723_v17 = vld [vmem:[%s6800_s18] sm:$0xff] }
 0xa0f   : > { %v6733_v35 = vadd.f32 %v5096_v25, %v3701_v63  ;;  %v3727_v31 = vpack.c.bf16 %v3724_v56, %v3723_v17 }
 0xa10   : > { %v3677_v20 = vpop.permute.xlu1 %3676 }
 0xa11   : > { %v3713_v48 = vmax.f32 %v6733_v35, 0.0  ;;  %4777 = vmatpush3.bf16.msra.mxu1 %v3727_v31 }
 0xa12   : > { %4790 = vmatprep.subr.bf16.mxu1 %v6920_v6 }
 0xa13   : > { %v3729_v49 = vpack.c.bf16 %v3713_v48, %v3710_v12 }
 0xa14   : > { %v3653_v59 = vpop.permute.xlu1 %3652 }
 0xa15   : > { %v3696_v8 = vsel %vm6945_vm13, %v3690_v51, %v3653_v59  ;;  %4771 = vmatmul.mubr.msk.bf16.vlgmr.msra.gmra.mxu0 %vm6946_vm15, %v3729_v49  ;;  %v4492_v49 = vld [vmem:[%s6800_s18 + $0x30] sm:$0xff]  ;;  %vm4271_vm15 = vcmask 523264  }
 0xa16   : > { %v3702_v47 = vsel %vm1247_vm8, %v3696_v8, %v3677_v20  ;;  %4783 = vmatpush3.bf16.msra.mxu0 %v3900_v10  ;;  %4786 = vmatprep.mubr.msk.bf16.mxu0 %vm5110_vm0, %v6920_v6  ;;  %v3909_v1 = vpack.c.bf16 %v4493_v40, %v4492_v49 }
 0xa17   : > { %v6756_v3 = vadd.f32 %v5098_v44, %v3702_v47  ;;  %4784 = vmatprep.subr.bf16.mxu0 %v6920_v6  ;;  %v4490_v44 = vld [vmem:[%s6800_s18 + $0x20] sm:$0xff] }
 0xa18   : > { %v3631_v24 = vpop.permute.xlu1 %3630  ;;  %v3908_v42 = vpack.c.bf16 %v4491_v9, %v4490_v44 }
 0xa19   : > { %v3714_v41 = vmax.f32 %v6756_v3, 0.0  ;;  %v3691_v54 = vsel %vm690_vm3, %v6688_v33, %v3631_v24  ;;  %vm6950_vm3 = vmmov %vm6948_vm10 }
 0xa1a   : > { %4785 = vmatpush3.bf16.msra.mxu0 %v3899_v39  ;;  %vm6952_vm14 = vmmov %vm6950_vm3 }
 0xa1b   : > { %v3910_v13 = vpack.c.bf16 %v3714_v41, %v3711_v45  ;;  %4798 = vmatprep.subr.bf16.mxu0 %v6920_v6  ;;  %vm6953_vm7 = vmmov %vm6950_vm3 }
 0xa1c   : > { %v3655_v5 = vpop.permute.xlu1 %3654 }
 0xa1d   : > { %4787 = vmatmul.mubr.msk.bf16.vlgmr.msra.gmra.mxu0 %vm6948_vm10, %v3910_v13  ;;  %v3697_v30 = vsel %vm6949_vm11, %v3691_v54, %v3655_v5  ;;  %v4505_v13 = vld [vmem:[%s6800_s18 + $0x58] sm:$0xff] }
 0xa1e   : > { %4799 = vmatpush3.bf16.msra.mxu0 %v4080_v4  ;;  %4802 = vmatprep.mubr.msk.bf16.mxu0 %vm5110_vm0, %v6920_v6  ;;  %v4089_v57 = vpack.c.bf16 %v4505_v13, %v4504_v7 }
 0xa1f   : > { %4800 = vmatprep.subr.bf16.mxu0 %v6920_v6 }
 0xa20   : > { %v3679_v62 = vpop.permute.xlu1 %3678 }
 0xa21   : > { %v3703_v60 = vsel %vm1247_vm8, %v3697_v30, %v3679_v62  ;;  %vm6951_vm8 = vmmov %vm6950_vm3 }
 0xa22   : > { %v6786_v15 = vadd.f32 %v5100_v18, %v3703_v60  ;;  %4801 = vmatpush3.bf16.msra.mxu0 %v4079_v34  ;;  %v4503_v34 = vld [vmem:[%s6800_s18 + $0x48] sm:$0xff]  ;;  %v5118_v60 = vmov 0   ;;  %v481_v18 = vld [vmem:[%s6893_s8] sm:$0xff] }
 0xa23   : > { %v4088_v54 = vpack.c.bf16 %v4503_v34, %v4502_v58  ;;  %4853 = vset.pattern.permute.xlu0 %v5118_v60  ;;  %4854 = vset.pattern.permute.xlu1 %v5118_v60 }
 0xa24   : > { %v3715_v32 = vmax.f32 %v6786_v15, 0.0 }
 0xa26   : > { %v4090_v33 = vpack.c.bf16 %v3715_v32, %v3712_v16 }
 0xa28   : > { %4803 = vmatmul.mubr.msk.bf16.vlgmr.msra.gmra.mxu0 %vm6950_vm3, %v4090_v33 }
 0xad5   : > { %v3773_v21 = vpop.f32.mrf.mxu0 }
 0xad6   : > { %v3774_v28 = vadd.f32 %v4482_v22, %v3773_v21 }
 0xad7   : > { %v4772_v23 = vpop.f32.mrf.mxu0 }
 0xad8   : > { %5059 = vtanh.f32 %v3774_v28 }
 0xad9   : > { %v3776_v2 = vpop.f32.mrf.mxu0 }
 0xada   : > { %v3777_v43 = vadd.f32 %v4482_v22, %v3776_v2 }
 0xadb   : > { %v4773_v63 = vpop.f32.mrf.mxu0 }
 0xadc   : > { %5061 = vtanh.f32 %v3777_v43 }
 0xadd   : > { %v3954_v25 = vpop.f32.mrf.mxu0 }
 0xade   : > { %v3955_v0 = vadd.f32 %v4494_v61, %v3954_v25 }
 0xadf   : > { %v4788_v36 = vpop.f32.mrf.mxu0 }
 0xae0   : > { %5063 = vtanh.f32 %v3955_v0 }
 0xae1   : > { %v3957_v20 = vpop.f32.mrf.mxu0 }
 0xae2   : > { %v3958_v14 = vadd.f32 %v4494_v61, %v3957_v20 }
 0xae3   : > { %v4789_v10 = vpop.f32.mrf.mxu0 }
 0xae4   : > { %5065 = vtanh.f32 %v3958_v14 }
 0xae5   : > { %v5060_v51 = vpop.eup %5059 }
 0xae8   : > { %v4134_v19 = vpop.f32.mrf.mxu0 }
 0xae9   : > { %v5062_v59 = vpop.eup %5061  ;;  %v4135_v8 = vadd.f32 %v4506_v37, %v4134_v19 }
 0xaea   : > { %v4804_v47 = vpop.f32.mrf.mxu0  ;;  %v3782_v39 = vpack.c.bf16 %v5062_v59, %v5060_v51 }
 0xaeb   : > { %5067 = vtanh.f32 %v4135_v8 }
 0xaec   : > { %4779 = vmatmul.mubr.msk.bf16.vlgmr.msra.gmra.mxu1 %vm6951_vm8, %v3782_v39  ;;  %v4137_v27 = vpop.f32.mrf.mxu0 }
 0xaed   : > { %v4138_v24 = vadd.f32 %v4506_v37, %v4137_v27  ;;  %4791 = vmatpush3.bf16.msra.mxu1 %v3909_v1  ;;  %4794 = vmatprep.mubr.msk.bf16.mxu1 %vm5110_vm0, %v6920_v6  ;;  %v5064_v26 = vpop.eup %5063 }
 0xaee   : > { %v4805_v4 = vpop.f32.mrf.mxu0  ;;  %4792 = vmatprep.subr.bf16.mxu1 %v6920_v6 }
 0xaef   : > { %5069 = vtanh.f32 %v4138_v24 }
 0xaf1   : > { %v5066_v38 = vpop.eup %5065  ;;  %4793 = vmatpush3.bf16.msra.mxu1 %v3908_v42 }
 0xaf2   : > { %v3963_v5 = vpack.c.bf16 %v5066_v38, %v5064_v26  ;;  %4806 = vmatprep.subr.bf16.mxu1 %v6920_v6 }
 0xaf4   : > { %4795 = vmatmul.mubr.msk.bf16.vlgmr.msra.gmra.mxu1 %vm6952_vm14, %v3963_v5 }
 0xaf5   : > { %4807 = vmatpush3.bf16.msra.mxu1 %v4089_v57  ;;  %4810 = vmatprep.mubr.msk.bf16.mxu1 %vm5110_vm0, %v6920_v6  ;;  %vm6954_vm0 = vmmov %vm6950_vm3 }
 0xaf6   : > { %4808 = vmatprep.subr.bf16.mxu1 %v6920_v6  ;;  %v482_v6 = vld [vmem:[%s6893_s8 + $0x8] sm:$0xff]  ;;  %vm6955_vm5 = vmmov %vm6954_vm0 }
 0xaf7   : > { %vm6956_vm6 = vmmov %vm6954_vm0 }
 0xaf8   : > { %v5068_v11 = vpop.eup %5067  ;;  %vm6957_vm9 = vmmov %vm6954_vm0 }
 0xaf9   : > { %4809 = vmatpush3.bf16.msra.mxu1 %v4088_v54  ;;  %vm6958_vm12 = vmmov %vm6954_vm0 }
 0xafa   : > { %vm6959_vm13 = vmmov %vm6954_vm0 }
 0xafb   : > { %vm6960_vm10 = vmmov %vm6954_vm0 }
 0xafc   : > { %v5070_v30 = vpop.eup %5069 }
 0xafd   : > { %v4143_v62 = vpack.c.bf16 %v5070_v30, %v5068_v11 }
 0xaff   : > { %4811 = vmatmul.mubr.msk.bf16.vlgmr.msra.gmra.mxu1 %vm6953_vm7, %v4143_v62 }
 0xbac   : > { %v3820_v33 = vpop.f32.mrf.mxu1 }
 0xbad   : > { %v3827_v55 = vadd.f32 %v3820_v33, %v481_v18 }
 0xbae   : > { %v4780_v46 = vpop.f32.mrf.mxu1 }
 0xbaf   : > { %v3830_v52 = vsel %vm3829_vm4, %v3827_v55, -inf }
 0xbb0   : > { %v3831_v17 = vrot.slane %v3830_v52, 4  ;;  %v3823_v56 = vpop.f32.mrf.mxu1 }
 0xbb1   : > { %v3828_v31 = vadd.f32 %v3823_v56, %v482_v6 }
 0xbb2   : > { %v3832_v22 = vmax.f32 %v3830_v52, %v3831_v17  ;;  %v4781_v21 = vpop.f32.mrf.mxu1 }
 0xbb3   : > { %v3837_v28 = vsel %vm3829_vm4, %v3828_v31, -inf }
 0xbb4   : > { %v3833_v23 = vrot.slane %v3832_v22, 2  ;;  %v3838_v2 = vrot.slane %v3837_v28, 4  ;;  %v4001_v43 = vpop.f32.mrf.mxu1 }
 0xbb5   : > { %v4008_v63 = vadd.f32 %v4001_v43, %v481_v18 }
 0xbb6   : > { %v3834_v61 = vmax.f32 %v3832_v22, %v3833_v23  ;;  %v3839_v25 = vmax.f32 %v3837_v28, %v3838_v2  ;;  %v4796_v0 = vpop.f32.mrf.mxu1 }
 0xbb7   : > { %v4010_v36 = vsel %vm3829_vm4, %v4008_v63, -inf }
 0xbb8   : > { %v3835_v20 = vrot.slane %v3834_v61, 1  ;;  %v3840_v14 = vrot.slane %v3839_v25, 2  ;;  %v4011_v10 = vrot.slane %v4010_v36, 4  ;;  %v4004_v49 = vpop.f32.mrf.mxu1 }
 0xbb9   : > { %v4009_v40 = vadd.f32 %v4004_v49, %v482_v6 }
 0xbba   : > { %v3836_v37 = vmax.f32 %v3834_v61, %v3835_v20  ;;  %v3841_v51 = vmax.f32 %v3839_v25, %v3840_v14  ;;  %v4012_v19 = vmax.f32 %v4010_v36, %v4011_v10  ;;  %v4797_v59 = vpop.f32.mrf.mxu1 }
 0xbbb   : > { %v4017_v1 = vsel %vm3829_vm4, %v4009_v40, -inf }
 0xbbc   : > { %v3842_v8 = vrot.slane %v3841_v51, 1  ;;  %v4013_v47 = vrot.slane %v4012_v19, 2  ;;  %v4018_v39 = vrot.slane %v4017_v1, 4  ;;  %v3844_v44 = vsub.f32 %v3827_v55, %v3836_v37 }
 0xbbe   : > { %v3843_v9 = vmax.f32 %v3841_v51, %v3842_v8  ;;  %v4014_v27 = vmax.f32 %v4012_v19, %v4013_v47  ;;  %v4019_v24 = vmax.f32 %v4017_v1, %v4018_v39  ;;  %v3846_v13 = vmul.f32 1.442695, %v3844_v44 }
 0xbbf   : > { %v4181_v42 = vpop.f32.mrf.mxu1 }
 0xbc0   : > { %v4015_v4 = vrot.slane %v4014_v27, 1  ;;  %v4020_v7 = vrot.slane %v4019_v24, 2  ;;  %v4188_v26 = vadd.f32 %v4181_v42, %v481_v18  ;;  %v3845_v57 = vsub.f32 %v3828_v31, %v3843_v9 }
 0xbc1   : > { %v4812_v38 = vpop.f32.mrf.mxu1  ;;  %5071 = vpow2.f32 %v3846_v13 }
 0xbc2   : > { %v4016_v5 = vmax.f32 %v4014_v27, %v4015_v4  ;;  %v4021_v58 = vmax.f32 %v4019_v24, %v4020_v7  ;;  %v4190_v34 = vsel %vm3829_vm4, %v4188_v26, -inf  ;;  %v3848_v55 = vmul.f32 1.442695, %v3845_v57 }
 0xbc3   : > { %v4184_v54 = vpop.f32.mrf.mxu1  ;;  %v4191_v62 = vrot.slane %v4190_v34, 4 }
 0xbc4   : > { %v4024_v11 = vsub.f32 %v4008_v63, %v4016_v5  ;;  %v4022_v30 = vrot.slane %v4021_v58, 1  ;;  %v4189_v60 = vadd.f32 %v4184_v54, %v482_v6 }
 0xbc5   : > { %v4813_v33 = vpop.f32.mrf.mxu1  ;;  %v4192_v17 = vmax.f32 %v4190_v34, %v4191_v62 }
 0xbc6   : > { %v4026_v46 = vmul.f32 1.442695, %v4024_v11  ;;  %v4023_v52 = vmax.f32 %v4021_v58, %v4022_v30  ;;  %v4197_v56 = vsel %vm3829_vm4, %v4189_v60, -inf }
 0xbc7   : > { %v4193_v31 = vrot.slane %v4192_v17, 2  ;;  %v4198_v22 = vrot.slane %v4197_v56, 4 }
 0xbc8   : > { %5073 = vpow2.f32 %v4026_v46  ;;  %v4025_v18 = vsub.f32 %v4009_v40, %v4023_v52 }
 0xbc9   : > { %5075 = vpow2.f32 %v3848_v55  ;;  %v4194_v28 = vmax.f32 %v4192_v17, %v4193_v31  ;;  %v4199_v23 = vmax.f32 %v4197_v56, %v4198_v22 }
 0xbca   : > { %v4028_v21 = vmul.f32 1.442695, %v4025_v18 }
 0xbcb   : > { %v4195_v2 = vrot.slane %v4194_v28, 1  ;;  %v4200_v43 = vrot.slane %v4199_v23, 2 }
 0xbcc   : > { %5077 = vpow2.f32 %v4028_v21 }
 0xbcd   : > { %v4196_v63 = vmax.f32 %v4194_v28, %v4195_v2  ;;  %v4201_v6 = vmax.f32 %v4199_v23, %v4200_v43 }
 0xbce   : > { %v6842_v0 = vpop.eup %5071 }
 0xbcf   : > { %v4204_v61 = vsub.f32 %v4188_v26, %v4196_v63  ;;  %v4202_v25 = vrot.slane %v4201_v6, 1  ;;  %v3850_v49 = vsel %vm3829_vm4, %v6842_v0, 0.0 }
 0xbd0   : > { %v3851_v1 = vrot.slane %v3850_v49, 4 }
 0xbd1   : > { %v4206_v36 = vmul.f32 1.442695, %v4204_v61  ;;  %v4203_v20 = vmax.f32 %v4201_v6, %v4202_v25 }
 0xbd2   : > { %v3852_v27 = vadd.f32 %v3851_v1, %v3850_v49 }
 0xbd3   : > { %5079 = vpow2.f32 %v4206_v36  ;;  %v4205_v14 = vsub.f32 %v4189_v60, %v4203_v20 }
 0xbd4   : > { %v3853_v38 = vrot.slane %v3852_v27, 2 }
 0xbd5   : > { %v5074_v10 = vpop.eup %5073  ;;  %v4208_v37 = vmul.f32 1.442695, %v4205_v14 }
 0xbd6   : > { %v4030_v40 = vsel %vm3829_vm4, %v5074_v10, 0.0  ;;  %v6847_v51 = vpop.eup %5075  ;;  %v3854_v62 = vadd.f32 %v3853_v38, %v3852_v27 }
 0xbd7   : > { %v4031_v19 = vrot.slane %v4030_v40, 4  ;;  %5081 = vpow2.f32 %v4208_v37  ;;  %v3857_v47 = vsel %vm3829_vm4, %v6847_v51, 0.0 }
 0xbd8   : > { %v3858_v24 = vrot.slane %v3857_v47, 4  ;;  %v3855_v56 = vrot.slane %v3854_v62, 1 }
 0xbd9   : > { %v5078_v59 = vpop.eup %5077  ;;  %v4032_v8 = vadd.f32 %v4031_v19, %v4030_v40 }
 0xbda   : > { %v4037_v39 = vsel %vm3829_vm4, %v5078_v59, 0.0  ;;  %v3859_v57 = vadd.f32 %v3858_v24, %v3857_v47  ;;  %v3856_v63 = vadd.f32 %v3855_v56, %v3854_v62 }
 0xbdb   : > { %v4033_v44 = vrot.slane %v4032_v8, 2  ;;  %v4038_v9 = vrot.slane %v4037_v39, 4 }
 0xbdc   : > { %v3860_v60 = vrot.slane %v3859_v57, 2 }
 0xbdd   : > { %v4034_v42 = vadd.f32 %v4033_v44, %v4032_v8  ;;  %v4039_v4 = vadd.f32 %v4038_v9, %v4037_v39 }
 0xbde   : > { %v3861_v18 = vadd.f32 %v3860_v60, %v3859_v57 }
 0xbdf   : > { %v4035_v7 = vrot.slane %v4034_v42, 1  ;;  %v4040_v13 = vrot.slane %v4039_v4, 2 }
 0xbe0   : > { %v5080_v26 = vpop.eup %5079  ;;  %v3862_v23 = vrot.slane %v3861_v18, 1 }
 0xbe1   : > { %v4041_v5 = vadd.f32 %v4040_v13, %v4039_v4  ;;  %v4036_v58 = vadd.f32 %v4035_v7, %v4034_v42  ;;  %v4210_v34 = vsel %vm3829_vm4, %v5080_v26, 0.0 }
 0xbe2   : > { %v4211_v11 = vrot.slane %v4210_v34, 4  ;;  %v3863_v20 = vadd.f32 %v3862_v23, %v3861_v18 }
 0xbe3   : > { %v4042_v54 = vrot.slane %v4041_v5, 1  ;;  %5083 = vrcp.f32 %v4036_v58 }
 0xbe4   : > { %v5082_v30 = vpop.eup %5081  ;;  %v4212_v33 = vadd.f32 %v4211_v11, %v4210_v34 }
 0xbe5   : > { %v4043_v55 = vadd.f32 %v4042_v54, %v4041_v5  ;;  %v4217_v46 = vsel %vm3829_vm4, %v5082_v30, 0.0 }
 0xbe6   : > { %v4213_v52 = vrot.slane %v4212_v33, 2  ;;  %v4218_v17 = vrot.slane %v4217_v46, 4 }
 0xbe7   : > { %5085 = vrcp.f32 %v4043_v55 }
 0xbe8   : > { %v4214_v31 = vadd.f32 %v4213_v52, %v4212_v33  ;;  %v4219_v22 = vadd.f32 %v4218_v17, %v4217_v46 }
 0xbea   : > { %v4215_v21 = vrot.slane %v4214_v31, 1  ;;  %v4220_v28 = vrot.slane %v4219_v22, 2 }
 0xbec   : > { %v4221_v2 = vadd.f32 %v4220_v28, %v4219_v22  ;;  %v4216_v43 = vadd.f32 %v4215_v21, %v4214_v31 }
 0xbee   : > { %v4222_v6 = vrot.slane %v4221_v2, 1  ;;  %5087 = vrcp.f32 %v4216_v43 }
 0xbef   : > { %5089 = vrcp.f32 %v3856_v63 }
 0xbf0   : > { %v5084_v61 = vpop.eup %5083  ;;  %v4223_v36 = vadd.f32 %v4222_v6, %v4221_v2 }
 0xbf1   : > { %v4046_v25 = vmul.f32 %v5084_v61, %v5074_v10 }
 0xbf2   : > { %5091 = vrcp.f32 %v4223_v36 }
 0xbf3   : > { %4050 = vperm.xlu0 %4853, %v4046_v25   ;;  %5093 = vrcp.f32 %v3863_v20 }
 0xbf4   : > { %v5086_v14 = vpop.eup %5085 }
 0xbf5   : > { %v4047_v49 = vmul.f32 %v5086_v14, %v5078_v59 }
 0xbf7   : > { %4055 = vperm.xlu1 %4854, %v4047_v49  }
 0xbfb   : > { %v5088_v40 = vpop.eup %5087 }
 0xbfc   : > { %v4226_v37 = vmul.f32 %v5088_v40, %v5080_v26  ;;  %v5090_v19 = vpop.eup %5089 }
 0xbfd   : > { %v3866_v8 = vmul.f32 %v5090_v19, %v6842_v0 }
 0xbfe   : > { %4230 = vperm.xlu1 %4854, %v4226_v37  }
 0xbff   : > { %v5092_v1 = vpop.eup %5091 }
 0xc00   : > { %v4227_v47 = vmul.f32 %v5092_v1, %v5082_v30  ;;  %v5094_v39 = vpop.eup %5093 }
 0xc01   : > { %v3867_v10 = vmul.f32 %v5094_v39, %v6847_v51 }
 0xc02   : > { %3870 = vperm.xlu1 %4854, %v3866_v8   ;;  %4235 = vperm.xlu0 %4853, %v4227_v47  }
 0xc06   : > { %3875 = vperm.xlu0 %4853, %v3867_v10  }
 0xc6e   : > { %v4051_v44 = vpop.permute.xlu0 %4050 }
 0xc6f   : > { %v4058_v59 = vmul.f32 %v4051_v44, %v3711_v45 }
 0xc71   : > { %v4060_v9 = vsel %vm6954_vm0, %v4058_v59, 0.0 }
 0xc72   : > { %v4061_v27 = vrot.slane %v4060_v9, 4  ;;  %v4056_v24 = vpop.permute.xlu1 %4055 }
 0xc73   : > { %v4059_v42 = vmul.f32 %v4056_v24, %v3714_v41 }
 0xc74   : > { %v4062_v4 = vadd.f32 %v4061_v27, %v4060_v9 }
 0xc75   : > { %v4067_v0 = vsel %vm6955_vm5, %v4059_v42, 0.0 }
 0xc76   : > { %v4063_v7 = vrot.slane %v4062_v4, 2  ;;  %v4068_v13 = vrot.slane %v4067_v0, 4 }
 0xc78   : > { %v4064_v26 = vadd.f32 %v4063_v7, %v4062_v4  ;;  %v4069_v38 = vadd.f32 %v4068_v13, %v4067_v0 }
 0xc79   : > { %v4231_v57 = vpop.permute.xlu1 %4230 }
 0xc7a   : > { %v4070_v51 = vrot.slane %v4069_v38, 2  ;;  %v4238_v29 = vmul.f32 %v4231_v57, %v3712_v16  ;;  %v4065_v45 = vrot.slane %v4064_v26, 1 }
 0xc7c   : > { %v4071_v5 = vadd.f32 %v4070_v51, %v4069_v38  ;;  %v4240_v58 = vsel %vm6956_vm6, %v4238_v29, 0.0  ;;  %v4066_v11 = vadd.f32 %v4065_v45, %v4064_v26 }
 0xc7d   : > { %v4241_v54 = vrot.slane %v4240_v58, 4  ;;  %v4236_v3 = vpop.permute.xlu0 %4235  ;;  %v3871_v21 = vpop.permute.xlu1 %3870 }
 0xc7e   : > { %v4072_v34 = vrot.slane %v4071_v5, 1  ;;  %v4239_v41 = vmul.f32 %v4236_v3, %v3715_v32  ;;  %v3878_v23 = vmul.f32 %v3871_v21, %v3710_v12 }
 0xc7f   : > { %v4242_v62 = vadd.f32 %v4241_v54, %v4240_v58 }
 0xc80   : > { %v4073_v30 = vadd.f32 %v4072_v34, %v4071_v5  ;;  %v4247_v60 = vsel %vm6957_vm9, %v4239_v41, 0.0  ;;  %v3880_v43 = vsel %vm6959_vm13, %v3878_v23, 0.0 }
 0xc81   : > { %v4243_v33 = vrot.slane %v4242_v62, 2  ;;  %v4248_v55 = vrot.slane %v4247_v60, 4  ;;  %v3876_v22 = vpop.permute.xlu0 %3875  ;;  %v3881_v6 = vrot.slane %v3880_v43, 4 }
 0xc82   : > { %v4260_v50 = vsel %vm1046_vm2, %v4073_v30, %v4066_v11  ;;  %v3879_v28 = vmul.f32 %v3876_v22, %v3713_v48 }
 0xc83   : > { %4261 = vrot.lane.b32.xlu1 %v4260_v50, %s5119_s13  ;;  %v4244_v16 = vadd.f32 %v4243_v33, %v4242_v62  ;;  %v4249_v46 = vadd.f32 %v4248_v55, %v4247_v60  ;;  %v3882_v25 = vadd.f32 %v3881_v6, %v3880_v43 }
 0xc84   : > { %v3887_v2 = vsel %vm6958_vm12, %v3879_v28, 0.0 }
 0xc85   : > { %v4250_v52 = vrot.slane %v4249_v46, 2  ;;  %v4245_v17 = vrot.slane %v4244_v16, 1  ;;  %v3888_v63 = vrot.slane %v3887_v2, 4  ;;  %v3883_v20 = vrot.slane %v3882_v25, 2 }
 0xc87   : > { %v4251_v56 = vadd.f32 %v4250_v52, %v4249_v46  ;;  %v4246_v15 = vadd.f32 %v4245_v17, %v4244_v16  ;;  %v3889_v61 = vadd.f32 %v3888_v63, %v3887_v2  ;;  %v3884_v49 = vadd.f32 %v3883_v20, %v3882_v25 }
 0xc89   : > { %v4252_v18 = vrot.slane %v4251_v56, 1  ;;  %v3890_v36 = vrot.slane %v3889_v61, 2  ;;  %v3885_v37 = vrot.slane %v3884_v49, 1 }
 0xc8b   : > { %v4253_v32 = vadd.f32 %v4252_v18, %v4251_v56  ;;  %v3891_v14 = vadd.f32 %v3890_v36, %v3889_v61  ;;  %v3886_v48 = vadd.f32 %v3885_v37, %v3884_v49 }
 0xc8d   : > { %v4266_v31 = vsel %vm1046_vm2, %v4253_v32, %v4246_v15  ;;  %v3892_v40 = vrot.slane %v3891_v14, 1 }
 0xc8e   : > { %4267 = vrot.lane.b32.xlu0 %v4266_v31, %s5120_s12 }
 0xc8f   : > { %v3893_v35 = vadd.f32 %v3892_v40, %v3891_v14 }
 0xc91   : > { %v4256_v53 = vsel %vm1046_vm2, %v3893_v35, %v3886_v48 }
 0xcf5   : > { %v4262_v19 = vpop.permute.xlu1 %4261 }
 0xcf6   : > { %v4270_v12 = vsel %vm6960_vm10, %v4256_v53, %v4262_v19 }
 0xd00   : > { %v4268_v1 = vpop.permute.xlu0 %4267 }
 0xd01   : > { %v4272_v8 = vsel %vm4271_vm15, %v4270_v12, %v4268_v1 }
 0xd02   : > { %4274 = vst.msk [vmem:[%s467_s17] sm:$0x3] %vm4273_vm1, %v4272_v8 }
 0xd03 PF: > { %s19_s30 = sadd.s32 1, %s5107_s30  }
 0xd04   : > { %p16_p4 = scmp.ge.s32.totalorder %s19_s30, 4  }
 0xd06   :  { %18 = sbr.rel (!%p16_p4) target bundleno = 1 (0x1), region = 116 }

// kernel: _lambda_.7
= control target key start
LH: loop header
LB: loop body
LE: loop exit
PB: predicated region body
PF: predicated region fallthrough
CT: control target
= control target key end

     0   :  { %s2963_s30 = smov 0   ;;  %s3481_s0 = inlined_call_operand.vmem [shape: f32[6,2,8,32], index: 0, kind: input, shape index: {}]   ;;  %s3482_s1 = inlined_call_operand.vmem [shape: f32[6,2,8,8], index: 1, kind: input, shape index: {}]   ;;  %s3483_s2 = inlined_call_operand.vmem [shape: f32[6,2,32,32], index: 2, kind: input, shape index: {}]   ;;  %s3484_s3 = inlined_call_operand.vmem [shape: f32[6,2,4,8], index: 3, kind: input, shape index: {}]   ;;  %s3485_s4 = inlined_call_operand.vmem [shape: f32[6,2,4,8], index: 4, kind: input, shape index: {}]   ;;  %s3486_s5 = inlined_call_operand.vmem [shape: f32[6,1,32,32], index: 5, kind: input, shape index: {}]   ;;  %s3487_s6 = inlined_call_operand.vmem [shape: f32[6,1,1,32], index: 6, kind: input, shape index: {}]   ;;  %s3488_s7 = inlined_call_operand.vmem [shape: f32[6,1,32,1], index: 7, kind: input, shape index: {}]   ;;  %s3489_s8 = inlined_call_operand.vmem [shape: f32[2,8,1], index: 8, kind: input, shape index: {}]   ;;  %s3490_s9 = inlined_call_operand.vmem [shape: f32[6,2,32], index: 9, kind: output, shape index: {}]  }
   0x1 LB: > { %s2559_s10 = sadd.s32 4294967295, %s2901_s30   ;;  %p2563_p0 = scmp.ge.s32.totalorder %s2901_s30, 1  ;;  %s2901_s30 = sphi %s2963_s30, %s19_s30  }
   0x2   : > { %p355_p1 = scmp.lt.s32.totalorder %s2901_s30, 7 }
   0x4   : > { %p356_p2 = pnand %p2563_p0, %p355_p1 }
   0x5   : > { %p423_p3 = scmp.lt.s32.totalorder (!%p356_p2), %s2559_s10, 5  ;;  %s2906_s26 = smov (!%p356_p2), 104  }
   0x6   : > { %359 = sbr.rel (%p356_p2) target bundleno = 2882 (0xb42), region = 56  ;;  %s2907_s27 = smov (!%p356_p2), 120  }
   0x7   : > { %s2908_s28 = smov (!%p356_p2), 112   ;;  %s2910_s14 = smov (!%p356_p2), 16  }
   0x8   : > { %s2911_s16 = smov (!%p356_p2), 24  }
   0xb   : > { %v2903_v0 = vmov 0.0   ;;  %vm2904_vm0 = vmmov 0   ;;  %s3492_s10 = smov (!%p423_p3, %s2559_s10), 5  ;;  %vm481_vm1 = vcmask 261120   ;;  %v558_v10 = vlaneseq }
   0xc   : > { %2665 = vmatprep.subr.bf16.mxu0 %v2903_v0  ;;  %2669 = vmatprep.mubr.msk.bf16.mxu0 %vm2904_vm0, %v2903_v0  ;;  %s2616_s11 = sshll.u32 %s3492_s10, 6  ;;  %s2614_s12 = sshll.u32 %s3492_s10, 4  ;;  %v2905_v14 = vmov 1966171168   ;;  %vm959_vm2 = vcmask 1043456   ;;  %vm599_vm3 = vcmask 64512  }
   0xd   : > { %2673 = vmatprep.subr.bf16.mxu1 %v2903_v0  ;;  %2675 = vmatprep.mubr.msk.bf16.mxu1 %vm2904_vm0, %v2903_v0  ;;  %s2984_s15 = scalar_lea.vmem %s3483_s2, %s2616_s11  ;;  %s2994_s18 = scalar_lea.vmem %s3481_s0, %s2614_s12  ;;  %v559_v11 = vshrl.u32 %v558_v10, 7  ;;  %v710_v12 = vand.u32 127, %v558_v10  ;;  %v556_v15 = vunpack.c.l.s4 %v2905_v14  ;;  %vm1351_vm14 = vcmask 130048  }
   0xe   : > { %v474_v1 = vld [vmem:[%s2984_s15 + $0x10] sm:$0xff]  ;;  %v475_v2 = vld [vmem:[%s2984_s15 + $0x18] sm:$0xff]  ;;  %v472_v3 = vld [vmem:[%s2984_s15] sm:$0xff]  ;;  %s2617_s19 = sshll.u32 %s3492_s10, 3  ;;  %s3093_s13 = scalar_lea.vmem %s3482_s1, %s2614_s12  ;;  %vm1354_vm15 = vcmask 195584  }
   0xf   : > { %v477_v4 = vpack.c.bf16 %v475_v2, %v474_v1  ;;  %v473_v5 = vld [vmem:[%s2984_s15 + $0x8] sm:$0xff]  ;;  %v466_v7 = vld [vmem:[%s2994_s18] sm:$0xff]  ;;  %v3004_v13 = vsub.s32 %v710_v12, %v559_v11  ;;  %v557_v16 = vunpack.c.0.s8 %v556_v15  ;;  %s3010_s22 = scalar_lea.vmem %s3485_s4, %s2617_s19  ;;  %s3015_s25 = scalar_lea.vmem %s3484_s3, %s2617_s19  ;;  %v3021_v20 = vsub.s32 0, %v559_v11 }
  0x10   : > { %v476_v6 = vpack.c.bf16 %v473_v5, %v472_v3  ;;  %v467_v8 = vld [vmem:[%s2994_s18 + $0x8] sm:$0xff]  ;;  %v2581_v17 = vld.sshfl [vmem:[%s3010_s22] sm:$0x33 pattern:$0x75316420]  ;;  %s2909_s12 = smov 8  }
  0x11   : > { %2666 = vmatpush3.bf16.msra.mxu0 %v477_v4  ;;  %v480_v9 = vpack.c.bf16 %v467_v8, %v466_v7  ;;  %v3018_v18 = vsub.s32 %v557_v16, %v559_v11  ;;  %v2580_v19 = vld.sshfl [vmem:[%s3015_s25] sm:$0x33 pattern:$0x75316420]  ;;  %v632_v37 = vcombine.high %v2581_v17, %v2581_v17  ;;  %s2578_s11 = sshll.u32 %s3492_s10, 1 }
  0x12   : > { %2667 = vmatprep.subr.bf16.mxu0 %v2903_v0  ;;  %v554_v38 = vcombine.high %v2580_v19, %v2580_v19 }
  0x13   : > { %v639_v21 = vrot.slane %v2581_v17, %v3018_v18  ;;  %v561_v22 = vrot.slane %v2580_v19, %v3018_v18  ;;  %v646_v39 = vrot.slane %v632_v37, %v3018_v18 }
  0x14   : > { %v568_v41 = vrot.slane %v554_v38, %v3018_v18 }
  0x15   : > { %2668 = vmatpush3.bf16.msra.mxu0 %v476_v6  ;;  %v652_v27 = vrot.slane %v639_v21, %v3021_v20  ;;  %v574_v28 = vrot.slane %v561_v22, %v3021_v20  ;;  %v656_v40 = vrot.slane %v646_v39, %v3021_v20  ;;  %v647_v42 = vcombine.high %v639_v21, %v639_v21 }
  0x16   : > { %2685 = vmatprep.subr.bf16.mxu0 %v2903_v0  ;;  %v578_v43 = vrot.slane %v568_v41, %v3021_v20  ;;  %v648_v44 = vcombine.high %v646_v39, %v646_v39  ;;  %v569_v46 = vcombine.high %v561_v22, %v561_v22  ;;  %v570_v49 = vcombine.high %v568_v41, %v568_v41 }
  0x17   : > { %v660_v48 = vrot.slane %v647_v42, %v3021_v20 }
  0x18   : > { %2670 = vmatmul.mubr.msk.bf16.vlgmr.msra.gmra.mxu0 %vm481_vm1, %v480_v9  ;;  %v664_v52 = vrot.slane %v648_v44, %v3021_v20  ;;  %v582_v55 = vrot.slane %v569_v46, %v3021_v20  ;;  %v586_v58 = vrot.slane %v570_v49, %v3021_v20 }
  0x19   : > { %2687 = vmatprep.mubr.msk.bf16.mxu0 %vm2904_vm0, %v2903_v0 }
  0xd8   : > { %v519_v23 = vpop.f32.mrf.mxu0 }
  0xd9   : > { %540 = vrot.lane.b32.xlu1 %v519_v23, %s2906_s26  ;;  %528 = vrot.lane.b32.xlu0 %v519_v23, %s2907_s27  ;;  %v948_v24 = vpack.c.bf16 %v519_v23, %v519_v23  ;;  %v669_v33 = vmul.f32 %v652_v27, %v519_v23  ;;  %v591_v35 = vmul.f32 %v574_v28, %v519_v23 }
  0xda   : > { %v2671_v25 = vpop.f32.mrf.mxu0 }
  0xdb   : > { %v961_v26 = vsel %vm959_vm2, %v948_v24, 0  ;;  %v677_v34 = vsel %vm599_vm3, %v669_v33, 0.0  ;;  %v600_v36 = vsel %vm599_vm3, %v591_v35, 0.0 }
  0xdc   : > { %v3030_v29 = vpop.f32.mrf.mxu0  ;;  %2674 = vmatpush3.bf16.msra.mxu1 %v961_v26 }
  0xdd   : > { %534 = vrot.lane.b32.xlu0 %v519_v23, %s2908_s28  ;;  %530 = vrot.lane.b32.xlu1 %v3030_v29, %s2907_s27  ;;  %v673_v30 = vmul.f32 %v652_v27, %v3030_v29  ;;  %v595_v31 = vmul.f32 %v574_v28, %v3030_v29  ;;  %v3097_v27 = vld [vmem:[%s3093_s13] sm:$0xff] }
  0xde   : > { %v2672_v32 = vpop.f32.mrf.mxu0  ;;  %2679 = vmatprep.subr.bf16.mxu1 %v2903_v0  ;;  %vm838_vm4 = vcmp.gt.f32.partialorder %v3097_v27, 0.0 }
  0xdf   : > { %v689_v7 = vsel %vm599_vm3, %v673_v30, 0.0  ;;  %v612_v12 = vsel %vm599_vm3, %v595_v31, 0.0 }
  0xe1   : > { %536 = vrot.lane.b32.xlu0 %v3030_v29, %s2908_s28  ;;  %542 = vrot.lane.b32.xlu1 %v3030_v29, %s2906_s26 }
 0x100   : > { %678 = vadd.xlane.f32.xlu0 %v677_v34 }
 0x105   : > { %601 = vadd.xlane.f32.xlu1 %v600_v36 }
 0x14b   : > { %v3048_v45 = vpop.permute.xlu0 %528  ;;  %v3055_v53 = vpop.permute.xlu1 %540 }
 0x14c   : > { %v670_v47 = vmul.f32 %v656_v40, %v3048_v45  ;;  %v592_v51 = vmul.f32 %v578_v43, %v3048_v45  ;;  %v672_v62 = vmul.f32 %v664_v52, %v3055_v53  ;;  %v594_v2 = vmul.f32 %v586_v58, %v3055_v53 }
 0x14e   : > { %v680_v50 = vsel %vm599_vm3, %v670_v47, 0.0  ;;  %v603_v60 = vsel %vm599_vm3, %v592_v51, 0.0  ;;  %v686_v1 = vsel %vm599_vm3, %v672_v62, 0.0  ;;  %v609_v5 = vsel %vm599_vm3, %v594_v2, 0.0 }
 0x14f   : > { %v535_v54 = vpop.permute.xlu0 %534  ;;  %681 = vadd.xlane.f32.xlu0 %v680_v50  ;;  %v3066_v3 = vpop.permute.xlu1 %530 }
 0x150   : > { %v950_v56 = vpack.c.bf16 %v535_v54, %v535_v54  ;;  %v671_v57 = vmul.f32 %v660_v48, %v535_v54  ;;  %v593_v63 = vmul.f32 %v582_v55, %v535_v54  ;;  %v674_v6 = vmul.f32 %v656_v40, %v3066_v3 }
 0x151   : > { %v596_v10 = vmul.f32 %v578_v43, %v3066_v3 }
 0x152   : > { %v1053_v59 = vsel %vm959_vm2, %v950_v56, 0  ;;  %v683_v61 = vsel %vm599_vm3, %v671_v57, 0.0  ;;  %v606_v4 = vsel %vm599_vm3, %v593_v63, 0.0  ;;  %v692_v9 = vsel %vm599_vm3, %v674_v6, 0.0 }
 0x153   : > { %2686 = vmatpush3.bf16.msra.mxu0 %v1053_v59  ;;  %604 = vadd.xlane.f32.xlu0 %v603_v60  ;;  %v3072_v8 = vpop.permute.xlu0 %536  ;;  %v3076_v11 = vpop.permute.xlu1 %542  ;;  %v615_v15 = vsel %vm599_vm3, %v596_v10, 0.0 }
 0x154   : > { %684 = vadd.xlane.f32.xlu1 %v683_v61  ;;  %2697 = vmatprep.subr.bf16.mxu0 %v2903_v0  ;;  %v675_v14 = vmul.f32 %v660_v48, %v3072_v8  ;;  %v676_v16 = vmul.f32 %v664_v52, %v3076_v11  ;;  %v597_v19 = vmul.f32 %v582_v55, %v3072_v8  ;;  %v3120_v61 = vld [vmem:[%s3093_s13 + $0x8] sm:$0xff] }
 0x155   : > { %v598_v22 = vmul.f32 %v586_v58, %v3076_v11  ;;  %vm839_vm9 = vcmp.gt.f32.partialorder %v3120_v61, 0.0 }
 0x156   : > { %v695_v17 = vsel %vm599_vm3, %v675_v14, 0.0  ;;  %v698_v21 = vsel %vm599_vm3, %v676_v16, 0.0  ;;  %v618_v23 = vsel %vm599_vm3, %v597_v19, 0.0 }
 0x157   : > { %687 = vadd.xlane.f32.xlu0 %v686_v1  ;;  %v621_v24 = vsel %vm599_vm3, %v598_v22, 0.0 }
 0x158   : > { %607 = vadd.xlane.f32.xlu1 %v606_v4 }
 0x15b   : > { %610 = vadd.xlane.f32.xlu0 %v609_v5 }
 0x15c   : > { %690 = vadd.xlane.f32.xlu1 %v689_v7 }
 0x15f   : > { %693 = vadd.xlane.f32.xlu0 %v692_v9 }
 0x160   : > { %613 = vadd.xlane.f32.xlu1 %v612_v12 }
 0x163   : > { %616 = vadd.xlane.f32.xlu0 %v615_v15 }
 0x164   : > { %696 = vadd.xlane.f32.xlu1 %v695_v17 }
 0x167   : > { %699 = vadd.xlane.f32.xlu0 %v698_v21 }
 0x168   : > { %619 = vadd.xlane.f32.xlu1 %v618_v23 }
 0x16b   : > { %622 = vadd.xlane.f32.xlu0 %v621_v24 }
 0x189   : > { %v679_v25 = vpop.xlane.xlu0 %678 }
 0x18a   : > { %v714_v26 = vrot.slane %v679_v25, %v3004_v13 }
 0x18e   : > { %v602_v28 = vpop.xlane.xlu1 %601 }
 0x18f   : > { %v806_v30 = vadd.f32 %v714_v26, %v602_v28 }
 0x191   : > { %v822_v31 = vmul.f32 0.2, %v806_v30  ;;  %vm814_vm5 = vcmp.gt.f32.partialorder %v806_v30, 0.0 }
 0x193   : > { %v830_v32 = vsel %vm814_vm5, %v806_v30, %v822_v31 }
 0x194   : > { %v3102_v33 = vsel %vm838_vm4, %v830_v32, -1e+09 }
 0x195   : > { %v852_v34 = vsel %vm599_vm3, %v3102_v33, -inf }
 0x196   : > { %853 = vmax.xlane.f32.xlu1 %v852_v34 }
 0x1d8   : > { %v682_v35 = vpop.xlane.xlu0 %681 }
 0x1d9   : > { %v718_v36 = vrot.slane %v682_v35, %v3004_v13 }
 0x1dc   : > { %v605_v37 = vpop.xlane.xlu0 %604 }
 0x1dd   : > { %v807_v38 = vadd.f32 %v718_v36, %v605_v37  ;;  %v685_v39 = vpop.xlane.xlu1 %684 }
 0x1de   : > { %v722_v41 = vrot.slane %v685_v39, %v3004_v13 }
 0x1df   : > { %v823_v40 = vmul.f32 0.2, %v807_v38  ;;  %vm815_vm6 = vcmp.gt.f32.partialorder %v807_v38, 0.0 }
 0x1e0   : > { %v688_v42 = vpop.xlane.xlu0 %687 }
 0x1e1   : > { %v608_v43 = vpop.xlane.xlu1 %607  ;;  %v831_v44 = vsel %vm815_vm6, %v807_v38, %v823_v40  ;;  %v726_v48 = vrot.slane %v688_v42, %v3004_v13 }
 0x1e2   : > { %v808_v46 = vadd.f32 %v722_v41, %v608_v43  ;;  %v3110_v47 = vsel %vm838_vm4, %v831_v44, -1e+09 }
 0x1e3   : > { %v855_v49 = vsel %vm599_vm3, %v3110_v47, -inf }
 0x1e4   : > { %v824_v50 = vmul.f32 0.2, %v808_v46  ;;  %v611_v51 = vpop.xlane.xlu0 %610  ;;  %856 = vmax.xlane.f32.xlu0 %v855_v49  ;;  %vm816_vm7 = vcmp.gt.f32.partialorder %v808_v46, 0.0 }
 0x1e5   : > { %v809_v52 = vadd.f32 %v726_v48, %v611_v51  ;;  %v691_v54 = vpop.xlane.xlu1 %690 }
 0x1e6   : > { %v832_v55 = vsel %vm816_vm7, %v808_v46, %v824_v50  ;;  %v730_v58 = vrot.slane %v691_v54, %v3004_v13 }
 0x1e7   : > { %v825_v56 = vmul.f32 0.2, %v809_v52  ;;  %v846_v57 = vsel %vm838_vm4, %v832_v55, -1e+09  ;;  %vm817_vm8 = vcmp.gt.f32.partialorder %v809_v52, 0.0 }
 0x1e8   : > { %v694_v59 = vpop.xlane.xlu0 %693  ;;  %v858_v60 = vsel %vm599_vm3, %v846_v57, -inf }
 0x1e9   : > { %859 = vmax.xlane.f32.xlu1 %v858_v60  ;;  %v614_v62 = vpop.xlane.xlu1 %613  ;;  %v833_v63 = vsel %vm817_vm8, %v809_v52, %v825_v56  ;;  %v734_v4 = vrot.slane %v694_v59, %v3004_v13 }
 0x1ea   : > { %v810_v1 = vadd.f32 %v730_v58, %v614_v62  ;;  %v847_v2 = vsel %vm838_vm4, %v833_v63, -1e+09 }
 0x1eb   : > { %v861_v5 = vsel %vm599_vm3, %v847_v2, -inf }
 0x1ec   : > { %v826_v6 = vmul.f32 0.2, %v810_v1  ;;  %v617_v7 = vpop.xlane.xlu0 %616  ;;  %862 = vmax.xlane.f32.xlu0 %v861_v5  ;;  %vm818_vm10 = vcmp.gt.f32.partialorder %v810_v1, 0.0 }
 0x1ed   : > { %v811_v9 = vadd.f32 %v734_v4, %v617_v7  ;;  %v697_v10 = vpop.xlane.xlu1 %696 }
 0x1ee   : > { %v834_v12 = vsel %vm818_vm10, %v810_v1, %v826_v6  ;;  %v738_v16 = vrot.slane %v697_v10, %v3004_v13 }
 0x1ef   : > { %v827_v14 = vmul.f32 0.2, %v811_v9  ;;  %v848_v15 = vsel %vm839_vm9, %v834_v12, -1e+09  ;;  %vm819_vm11 = vcmp.gt.f32.partialorder %v811_v9, 0.0 }
 0x1f0   : > { %v700_v17 = vpop.xlane.xlu0 %699  ;;  %v864_v19 = vsel %vm599_vm3, %v848_v15, -inf }
 0x1f1   : > { %865 = vmax.xlane.f32.xlu1 %v864_v19  ;;  %v620_v21 = vpop.xlane.xlu1 %619  ;;  %v835_v22 = vsel %vm819_vm11, %v811_v9, %v827_v14  ;;  %v742_v25 = vrot.slane %v700_v17, %v3004_v13 }
 0x1f2   : > { %v812_v23 = vadd.f32 %v738_v16, %v620_v21  ;;  %v849_v24 = vsel %vm839_vm9, %v835_v22, -1e+09 }
 0x1f3   : > { %v867_v26 = vsel %vm599_vm3, %v849_v24, -inf }
 0x1f4   : > { %v828_v28 = vmul.f32 0.2, %v812_v23  ;;  %868 = vmax.xlane.f32.xlu0 %v867_v26  ;;  %v623_v30 = vpop.xlane.xlu0 %622  ;;  %vm820_vm12 = vcmp.gt.f32.partialorder %v812_v23, 0.0 }
 0x1f5   : > { %v813_v31 = vadd.f32 %v742_v25, %v623_v30 }
 0x1f6   : > { %v836_v32 = vsel %vm820_vm12, %v812_v23, %v828_v28  ;;  %v949_v28 = vpack.c.bf16 %v3048_v45, %v3048_v45 }
 0x1f7   : > { %v829_v34 = vmul.f32 0.2, %v813_v31  ;;  %v850_v35 = vsel %vm839_vm9, %v836_v32, -1e+09  ;;  %vm821_vm13 = vcmp.gt.f32.partialorder %v813_v31, 0.0 }
 0x1f8   : > { %v870_v36 = vsel %vm599_vm3, %v850_v35, -inf  ;;  %v1007_v32 = vsel %vm959_vm2, %v949_v28, 0 }
 0x1f9   : > { %871 = vmax.xlane.f32.xlu1 %v870_v36  ;;  %v837_v37 = vsel %vm821_vm13, %v813_v31, %v829_v34 }
 0x1fa   : > { %v851_v38 = vsel %vm839_vm9, %v837_v37, -1e+09 }
 0x1fb   : > { %v873_v39 = vsel %vm599_vm3, %v851_v38, -inf }
 0x1fc   : > { %874 = vmax.xlane.f32.xlu0 %v873_v39 }
 0x21f   : > { %v854_v40 = vpop.xlane.xlu1 %853 }
 0x220   : > { %v876_v41 = vsub.f32 %v3102_v33, %v854_v40 }
 0x222   : > { %v884_v42 = vmul.f32 1.442695, %v876_v41 }
 0x224   : > { %2813 = vpow2.f32 %v884_v42 }
 0x231   : > { %v2814_v43 = vpop.eup %2813 }
 0x232   : > { %v900_v44 = vsel %vm599_vm3, %v2814_v43, 0.0 }
 0x233   : > { %901 = vadd.xlane.f32.xlu1 %v900_v44 }
 0x26d   : > { %v857_v46 = vpop.xlane.xlu0 %856 }
 0x26e   : > { %v877_v48 = vsub.f32 %v3110_v47, %v857_v46  ;;  %v952_v46 = vpack.c.bf16 %v3030_v29, %v3030_v29 }
 0x270   : > { %v886_v49 = vmul.f32 1.442695, %v877_v48 }
 0x272   : > { %2815 = vpow2.f32 %v886_v49  ;;  %v860_v50 = vpop.xlane.xlu1 %859 }
 0x273   : > { %v878_v51 = vsub.f32 %v846_v57, %v860_v50  ;;  %v953_v50 = vpack.c.bf16 %v3066_v3, %v3066_v3  ;;  %v954_v3 = vpack.c.bf16 %v3072_v8, %v3072_v8 }
 0x275   : > { %v888_v52 = vmul.f32 1.442695, %v878_v51  ;;  %v863_v54 = vpop.xlane.xlu0 %862 }
 0x276   : > { %v879_v55 = vsub.f32 %v847_v2, %v863_v54 }
 0x277   : > { %2817 = vpow2.f32 %v888_v52  ;;  %v1145_v52 = vsel %vm959_vm2, %v952_v46, 0  ;;  %v2595_v46 = vld [vmem:[%s2984_s15 + $0x38] sm:$0xff] }
 0x278   : > { %v890_v56 = vmul.f32 1.442695, %v879_v55 }
 0x27a   : > { %2819 = vpow2.f32 %v890_v56  ;;  %v866_v33 = vpop.xlane.xlu1 %865  ;;  %v1191_v56 = vsel %vm959_vm2, %v953_v50, 0  ;;  %v2593_v50 = vld [vmem:[%s2984_s15 + $0x28] sm:$0xff] }
 0x27b   : > { %v880_v58 = vsub.f32 %v848_v15, %v866_v33 }
 0x27d   : > { %v892_v59 = vmul.f32 1.442695, %v880_v58  ;;  %v869_v60 = vpop.xlane.xlu0 %868 }
 0x27e   : > { %v881_v62 = vsub.f32 %v849_v24, %v869_v60  ;;  %v955_v60 = vpack.c.bf16 %v3076_v11, %v3076_v11 }
 0x27f   : > { %v2816_v63 = vpop.eup %2815  ;;  %2821 = vpow2.f32 %v892_v59 }
 0x280   : > { %v894_v1 = vmul.f32 1.442695, %v881_v62  ;;  %v903_v47 = vsel %vm599_vm3, %v2816_v63, 0.0 }
 0x281   : > { %904 = vadd.xlane.f32.xlu0 %v903_v47  ;;  %v1283_v47 = vsel %vm959_vm2, %v955_v60, 0 }
 0x282   : > { %2823 = vpow2.f32 %v894_v1  ;;  %v872_v4 = vpop.xlane.xlu1 %871 }
 0x283   : > { %v882_v57 = vsub.f32 %v850_v35, %v872_v4 }
 0x284   : > { %v2818_v5 = vpop.eup %2817 }
 0x285   : > { %v896_v6 = vmul.f32 1.442695, %v882_v57  ;;  %v875_v2 = vpop.xlane.xlu0 %874  ;;  %v906_v7 = vsel %vm599_vm3, %v2818_v5, 0.0 }
 0x286   : > { %v883_v9 = vsub.f32 %v851_v38, %v875_v2  ;;  %907 = vadd.xlane.f32.xlu1 %v906_v7  ;;  %v951_v38 = vpack.c.bf16 %v3055_v53, %v3055_v53 }
 0x287   : > { %v2820_v10 = vpop.eup %2819  ;;  %2825 = vpow2.f32 %v896_v6 }
 0x288   : > { %v898_v12 = vmul.f32 1.442695, %v883_v9  ;;  %v909_v14 = vsel %vm599_vm3, %v2820_v10, 0.0 }
 0x289   : > { %910 = vadd.xlane.f32.xlu0 %v909_v14 }
 0x28a   : > { %2827 = vpow2.f32 %v898_v12 }
 0x28c   : > { %v3147_v15 = vpop.eup %2821 }
 0x28d   : > { %v912_v16 = vsel %vm599_vm3, %v3147_v15, 0.0 }
 0x28e   : > { %913 = vadd.xlane.f32.xlu1 %v912_v16 }
 0x28f   : > { %v3151_v17 = vpop.eup %2823 }
 0x290   : > { %v915_v19 = vsel %vm599_vm3, %v3151_v17, 0.0 }
 0x291   : > { %916 = vadd.xlane.f32.xlu0 %v915_v19 }
 0x294   : > { %v3155_v21 = vpop.eup %2825 }
 0x295   : > { %v918_v22 = vsel %vm599_vm3, %v3155_v21, 0.0 }
 0x296   : > { %919 = vadd.xlane.f32.xlu1 %v918_v22 }
 0x297   : > { %v3159_v23 = vpop.eup %2827 }
 0x298   : > { %v921_v24 = vsel %vm599_vm3, %v3159_v23, 0.0 }
 0x299   : > { %922 = vadd.xlane.f32.xlu0 %v921_v24 }
 0x2bc   : > { %v902_v25 = vpop.xlane.xlu1 %901 }
 0x2bd   : > { %2829 = vrcp.f32 %v902_v25 }
 0x2ca   : > { %v2830_v26 = vpop.eup %2829 }
 0x2cb   : > { %v932_v30 = vmul.f32 %v2830_v26, %v2814_v43  ;;  %v1099_v43 = vsel %vm959_vm2, %v951_v38, 0 }
 0x2cd   : > { %v940_v31 = vpack.c.bf16 %v932_v30, %v932_v30 }
 0x2cf   : > { %2676 = vmatmul.mubr.msk.bf16.vlgmr.msra.gmra.mxu1 %vm599_vm3, %v940_v31 }
 0x2d0   : > { %2680 = vmatpush3.bf16.msra.mxu1 %v1007_v32  ;;  %2681 = vmatprep.mubr.msk.bf16.mxu1 %vm2904_vm0, %v2903_v0 }
 0x2d1   : > { %2691 = vmatprep.subr.bf16.mxu1 %v2903_v0 }
 0x30a   : > { %v905_v34 = vpop.xlane.xlu0 %904 }
 0x30b   : > { %2831 = vrcp.f32 %v905_v34 }
 0x30f   : > { %v908_v35 = vpop.xlane.xlu1 %907 }
 0x310   : > { %2833 = vrcp.f32 %v908_v35 }
 0x312   : > { %v911_v36 = vpop.xlane.xlu0 %910 }
 0x313   : > { %2835 = vrcp.f32 %v911_v36 }
 0x317   : > { %v914_v37 = vpop.xlane.xlu1 %913 }
 0x318   : > { %v2832_v45 = vpop.eup %2831  ;;  %2837 = vrcp.f32 %v914_v37 }
 0x319   : > { %v933_v39 = vmul.f32 %v2832_v45, %v2816_v63  ;;  %v1237_v63 = vsel %vm959_vm2, %v954_v3, 0 }
 0x31a   : > { %v917_v40 = vpop.xlane.xlu0 %916 }
 0x31b   : > { %2839 = vrcp.f32 %v917_v40  ;;  %v941_v41 = vpack.c.bf16 %v933_v39, %v933_v39 }
 0x31d   : > { %v2834_v42 = vpop.eup %2833  ;;  %2682 = vmatmul.mubr.msk.bf16.vlgmr.msra.gmra.mxu1 %vm599_vm3, %v941_v41 }
 0x31e   : > { %2692 = vmatpush3.bf16.msra.mxu1 %v1099_v43  ;;  %v934_v44 = vmul.f32 %v2834_v42, %v2818_v5  ;;  %2693 = vmatprep.mubr.msk.bf16.mxu1 %vm2904_vm0, %v2903_v0 }
 0x31f   : > { %v920_v48 = vpop.xlane.xlu1 %919  ;;  %2703 = vmatprep.subr.bf16.mxu1 %v2903_v0 }
 0x320   : > { %v2836_v53 = vpop.eup %2835  ;;  %2841 = vrcp.f32 %v920_v48  ;;  %v942_v49 = vpack.c.bf16 %v934_v44, %v934_v44  ;;  %v2594_v44 = vld [vmem:[%s2984_s15 + $0x30] sm:$0xff] }
 0x321   : > { %v935_v51 = vmul.f32 %v2836_v53, %v2820_v10  ;;  %v1375_v48 = vpack.c.bf16 %v2595_v46, %v2594_v44 }
 0x322   : > { %2688 = vmatmul.mubr.msk.bf16.vlgmr.msra.gmra.mxu0 %vm599_vm3, %v942_v49  ;;  %v923_v54 = vpop.xlane.xlu0 %922  ;;  %v2592_v49 = vld [vmem:[%s2984_s15 + $0x20] sm:$0xff]  ;;  %s2619_s15 = sshll.u32 %s3492_s10, 5 }
 0x323   : > { %2698 = vmatpush3.bf16.msra.mxu0 %v1145_v52  ;;  %2843 = vrcp.f32 %v923_v54  ;;  %v943_v29 = vpack.c.bf16 %v935_v51, %v935_v51  ;;  %2699 = vmatprep.mubr.msk.bf16.mxu0 %vm2904_vm0, %v2903_v0  ;;  %v1374_v51 = vpack.c.bf16 %v2593_v50, %v2592_v49  ;;  %s452_s20 = scalar_lea.vmem %s3486_s5, %s2619_s15  ;;  %s460_s23 = scalar_lea.vmem %s3488_s7, %s2619_s15 }
 0x324   : > { %2709 = vmatprep.subr.bf16.mxu0 %v2903_v0 }
 0x325   : > { %v2838_v55 = vpop.eup %2837  ;;  %2694 = vmatmul.mubr.msk.bf16.vlgmr.msra.gmra.mxu1 %vm599_vm3, %v943_v29 }
 0x326   : > { %2704 = vmatpush3.bf16.msra.mxu1 %v1191_v56  ;;  %v936_v33 = vmul.f32 %v2838_v55, %v3147_v15  ;;  %2705 = vmatprep.mubr.msk.bf16.mxu1 %vm2904_vm0, %v2903_v0 }
 0x327   : > { %2715 = vmatprep.subr.bf16.mxu1 %v2903_v0 }
 0x328   : > { %v2840_v58 = vpop.eup %2839  ;;  %v944_v59 = vpack.c.bf16 %v936_v33, %v936_v33 }
 0x329   : > { %v937_v62 = vmul.f32 %v2840_v58, %v3151_v17 }
 0x32a   : > { %2700 = vmatmul.mubr.msk.bf16.vlgmr.msra.gmra.mxu0 %vm599_vm3, %v944_v59 }
 0x32b   : > { %2710 = vmatpush3.bf16.msra.mxu0 %v1237_v63  ;;  %v945_v8 = vpack.c.bf16 %v937_v62, %v937_v62  ;;  %2711 = vmatprep.mubr.msk.bf16.mxu0 %vm2904_vm0, %v2903_v0 }
 0x32c   : > { %2721 = vmatprep.subr.bf16.mxu0 %v2903_v0 }
 0x32d   : > { %v2842_v1 = vpop.eup %2841  ;;  %2706 = vmatmul.mubr.msk.bf16.vlgmr.msra.gmra.mxu1 %vm599_vm3, %v945_v8 }
 0x32e   : > { %2716 = vmatpush3.bf16.msra.mxu1 %v1283_v47  ;;  %v938_v11 = vmul.f32 %v2842_v1, %v3155_v21  ;;  %2717 = vmatprep.mubr.msk.bf16.mxu1 %vm2904_vm0, %v2903_v0 }
 0x32f   : > { %2729 = vmatprep.subr.bf16.mxu1 %v2903_v0 }
 0x330   : > { %v2844_v4 = vpop.eup %2843  ;;  %v946_v57 = vpack.c.bf16 %v938_v11, %v938_v11 }
 0x331   : > { %v939_v5 = vmul.f32 %v2844_v4, %v3159_v23 }
 0x332   : > { %2712 = vmatmul.mubr.msk.bf16.vlgmr.msra.gmra.mxu0 %vm599_vm3, %v946_v57 }
 0x333   : > { %v947_v6 = vpack.c.bf16 %v939_v5, %v939_v5  ;;  %2725 = vmatprep.mubr.msk.bf16.mxu0 %vm2904_vm0, %v2903_v0  ;;  %2722 = vmatpush3.bf16.msra.mxu0 %v1375_v48 }
 0x334   : > { %2723 = vmatprep.subr.bf16.mxu0 %v2903_v0 }
 0x335   : > { %2718 = vmatmul.mubr.msk.bf16.vlgmr.msra.gmra.mxu1 %vm599_vm3, %v947_v6 }
 0x336   : > { %2731 = vmatprep.mubr.msk.bf16.mxu1 %vm2904_vm0, %v2903_v0 }
 0x337   : > { %2724 = vmatpush3.bf16.msra.mxu0 %v1374_v51 }
 0x338   : > { %2735 = vmatprep.subr.bf16.mxu0 %v2903_v0 }
 0x38f   : > { %v997_v2 = vpop.f32.mrf.mxu1 }
 0x391   : > { %v2677_v7 = vpop.f32.mrf.mxu1 }
 0x393   : > { %v1000_v9 = vpop.f32.mrf.mxu1 }
 0x395   : > { %v2678_v10 = vpop.f32.mrf.mxu1 }
 0x396   : > { %v2600_v10 = vld.sshfl [vmem:[%s3010_s22 + $0x4] sm:$0x33 pattern:$0x75316420] }
 0x3dd   : > { %v1043_v12 = vpop.f32.mrf.mxu1 }
 0x3de   : > { %1327 = vrot.lane.b32.xlu1 %v1043_v12, %s2909_s12  ;;  %v2599_v12 = vld.sshfl [vmem:[%s3015_s25 + $0x4] sm:$0x33 pattern:$0x75316420]  ;;  %s455_s25 = scalar_lea.vmem %s3487_s6, %s3492_s10 }
 0x3df   : > { %v2683_v14 = vpop.f32.mrf.mxu1 }
 0x3e0   : > { %v1537_v14 = vrot.slane %v2600_v10, %v3018_v18 }
 0x3e1   : > { %v1046_v15 = vpop.f32.mrf.mxu1 }
 0x3e2   : > { %v1089_v16 = vpop.f32.mrf.mxu0  ;;  %v1460_v15 = vrot.slane %v2599_v12, %v3018_v18 }
 0x3e3   : > { %1335 = vrot.lane.b32.xlu1 %v1089_v16, %s2910_s14  ;;  %v2684_v17 = vpop.f32.mrf.mxu1 }
 0x3e4   : > { %v2689_v19 = vpop.f32.mrf.mxu0  ;;  %v1468_v46 = vcombine.high %v1460_v15, %v1460_v15 }
 0x3e5   : > { %v1135_v21 = vpop.f32.mrf.mxu1 }
 0x3e6   : > { %v1092_v22 = vpop.f32.mrf.mxu0 }
 0x3e7   : > { %v2695_v23 = vpop.f32.mrf.mxu1  ;;  %v1550_v22 = vrot.slane %v1537_v14, %v3021_v20 }
 0x3e8   : > { %v2690_v24 = vpop.f32.mrf.mxu0  ;;  %v1473_v23 = vrot.slane %v1460_v15, %v3021_v20 }
 0x3e9   : > { %v1138_v25 = vpop.f32.mrf.mxu1 }
 0x3ea   : > { %v1181_v26 = vpop.f32.mrf.mxu0 }
 0x3eb   : > { %v2696_v28 = vpop.f32.mrf.mxu1 }
 0x3ec   : > { %v2701_v30 = vpop.f32.mrf.mxu0 }
 0x3ed   : > { %v1227_v31 = vpop.f32.mrf.mxu1 }
 0x3ee   : > { %v1184_v32 = vpop.f32.mrf.mxu0  ;;  %1329 = vrot.lane.b32.xlu0 %v1227_v31, %s2909_s12 }
 0x3ef   : > { %v2707_v34 = vpop.f32.mrf.mxu1 }
 0x3f0   : > { %v2702_v35 = vpop.f32.mrf.mxu0 }
 0x3f1   : > { %v1230_v36 = vpop.f32.mrf.mxu1  ;;  %v1453_v35 = vcombine.high %v2599_v12, %v2599_v12 }
 0x3f2   : > { %v1273_v37 = vpop.f32.mrf.mxu0  ;;  %1343 = vrot.lane.b32.xlu0 %v1135_v21, %s2911_s16  ;;  %v1530_v36 = vcombine.high %v2600_v10, %v2600_v10 }
 0x3f3   : > { %1337 = vrot.lane.b32.xlu1 %v1273_v37, %s2910_s14  ;;  %v2708_v45 = vpop.f32.mrf.mxu1  ;;  %v1467_v37 = vrot.slane %v1453_v35, %v3018_v18 }
 0x3f4   : > { %v2713_v38 = vpop.f32.mrf.mxu0  ;;  %v1544_v45 = vrot.slane %v1530_v36, %v3018_v18 }
 0x3f5   : > { %v1319_v39 = vpop.f32.mrf.mxu1  ;;  %v1545_v38 = vcombine.high %v1537_v14, %v1537_v14 }
 0x3f6   : > { %v1276_v40 = vpop.f32.mrf.mxu0 }
 0x3f7   : > { %1345 = vrot.lane.b32.xlu1 %v1319_v39, %s2911_s16  ;;  %v2719_v41 = vpop.f32.mrf.mxu1  ;;  %v1477_v39 = vrot.slane %v1467_v37, %v3021_v20  ;;  %v1554_v40 = vrot.slane %v1544_v45, %v3021_v20  ;;  %v1558_v44 = vrot.slane %v1545_v38, %v3021_v20 }
 0x3f8   : > { %v2714_v42 = vpop.f32.mrf.mxu0  ;;  %v1546_v41 = vcombine.high %v1544_v45, %v1544_v45 }
 0x3f9   : > { %v1322_v43 = vpop.f32.mrf.mxu1  ;;  %v1469_v42 = vcombine.high %v1467_v37, %v1467_v37 }
 0x3fa   : > { %v1562_v51 = vrot.slane %v1546_v41, %v3021_v20 }
 0x3fb   : > { %v2720_v53 = vpop.f32.mrf.mxu1 }
 0x450   : > { %v1328_v52 = vpop.permute.xlu1 %1327 }
 0x451   : > { %v1349_v55 = vsel %vm599_vm3, %v997_v2, %v1328_v52 }
 0x455   : > { %v1336_v29 = vpop.permute.xlu1 %1335 }
 0x456   : > { %v1352_v56 = vsel %vm1351_vm14, %v1349_v55, %v1336_v29  ;;  %v1485_v29 = vrot.slane %v1469_v42, %v3021_v20 }
 0x460   : > { %v1330_v54 = vpop.permute.xlu0 %1329 }
 0x461   : > { %v1350_v60 = vsel %vm599_vm3, %v1181_v26, %v1330_v54 }
 0x464   : > { %v1344_v3 = vpop.permute.xlu0 %1343 }
 0x465   : > { %v1355_v33 = vsel %vm1354_vm15, %v1352_v56, %v1344_v3  ;;  %v1338_v58 = vpop.permute.xlu1 %1337  ;;  %v1481_v3 = vrot.slane %v1468_v46, %v3021_v20 }
 0x466   : > { %v1359_v59 = vmin.f32 %v1355_v33, 0.0  ;;  %v1353_v63 = vsel %vm1351_vm14, %v1350_v60, %v1338_v58  ;;  %vm1357_vm5 = vcmp.gt.f32.partialorder %v1355_v33, 0.0 }
 0x468   : > { %v1361_v62 = vmul.f32 1.442695, %v1359_v59 }
 0x469   : > { %v1346_v8 = vpop.permute.xlu1 %1345 }
 0x46a   : > { %v1356_v1 = vsel %vm1354_vm15, %v1353_v63, %v1346_v8  ;;  %2845 = vpow2.f32 %v1361_v62 }
 0x46b   : > { %v1360_v47 = vmin.f32 %v1356_v1, 0.0  ;;  %vm1358_vm6 = vcmp.gt.f32.partialorder %v1356_v1, 0.0 }
 0x46d   : > { %v1363_v11 = vmul.f32 1.442695, %v1360_v47 }
 0x46f   : > { %2847 = vpow2.f32 %v1363_v11 }
 0x477   : > { %v2846_v4 = vpop.eup %2845 }
 0x478   : > { %v2590_v57 = vadd.f32 -1.0, %v2846_v4 }
 0x47a   : > { %v1367_v2 = vsel %vm1357_vm5, %v1355_v33, %v2590_v57 }
 0x47c   : > { %v2848_v5 = vpop.eup %2847 }
 0x47d   : > { %v2591_v6 = vadd.f32 -1.0, %v2848_v5 }
 0x47f   : > { %v1368_v7 = vsel %vm1358_vm6, %v1356_v1, %v2591_v6 }
 0x480   : > { %v1380_v9 = vpack.c.bf16 %v1368_v7, %v1367_v2 }
 0x482   : > { %2726 = vmatmul.mubr.msk.bf16.vlgmr.msra.gmra.mxu0 %vm481_vm1, %v1380_v9 }
 0x483   : > { %2737 = vmatprep.mubr.msk.bf16.mxu0 %vm2904_vm0, %v2903_v0 }
 0x542   : > { %v1418_v16 = vpop.f32.mrf.mxu0 }
 0x543   : > { %1433 = vrot.lane.b32.xlu1 %v1418_v16, %s2908_s28  ;;  %1427 = vrot.lane.b32.xlu0 %v1418_v16, %s2907_s27  ;;  %v1831_v17 = vpack.c.bf16 %v1418_v16, %v1418_v16  ;;  %v1567_v30 = vmul.f32 %v1550_v22, %v1418_v16  ;;  %v1490_v32 = vmul.f32 %v1473_v23, %v1418_v16 }
 0x544   : > { %v2727_v19 = vpop.f32.mrf.mxu0 }
 0x545   : > { %v1843_v21 = vsel %vm959_vm2, %v1831_v17, 0  ;;  %v1575_v31 = vsel %vm599_vm3, %v1567_v30, 0.0  ;;  %v1498_v34 = vsel %vm599_vm3, %v1490_v32, 0.0 }
 0x546   : > { %v3245_v24 = vpop.f32.mrf.mxu0  ;;  %2730 = vmatpush3.bf16.msra.mxu1 %v1843_v21 }
 0x547   : > { %1439 = vrot.lane.b32.xlu0 %v1418_v16, %s2906_s26  ;;  %1429 = vrot.lane.b32.xlu1 %v3245_v24, %s2907_s27  ;;  %v1571_v25 = vmul.f32 %v1550_v22, %v3245_v24  ;;  %v1494_v26 = vmul.f32 %v1473_v23, %v3245_v24 }
 0x548   : > { %v2728_v28 = vpop.f32.mrf.mxu0  ;;  %2741 = vmatprep.subr.bf16.mxu1 %v2903_v0 }
 0x549   : > { %v1587_v57 = vsel %vm599_vm3, %v1571_v25, 0.0  ;;  %v1510_v7 = vsel %vm599_vm3, %v1494_v26, 0.0 }
 0x54b   : > { %1435 = vrot.lane.b32.xlu0 %v3245_v24, %s2908_s28  ;;  %1441 = vrot.lane.b32.xlu1 %v3245_v24, %s2906_s26 }
 0x56a   : > { %1576 = vadd.xlane.f32.xlu0 %v1575_v31 }
 0x56e   : > { %1499 = vadd.xlane.f32.xlu0 %v1498_v34 }
 0x5b5   : > { %v1428_v43 = vpop.permute.xlu0 %1427  ;;  %v3264_v48 = vpop.permute.xlu1 %1433 }
 0x5b6   : > { %v1832_v53 = vpack.c.bf16 %v1428_v43, %v1428_v43  ;;  %v1491_v49 = vmul.f32 %v1477_v39, %v1428_v43  ;;  %v1568_v50 = vmul.f32 %v1554_v40, %v1428_v43  ;;  %v1569_v56 = vmul.f32 %v1558_v44, %v3264_v48 }
 0x5b7   : > { %v1492_v63 = vmul.f32 %v1481_v3, %v3264_v48 }
 0x5b8   : > { %v1889_v18 = vsel %vm959_vm2, %v1832_v53, 0  ;;  %v1501_v52 = vsel %vm599_vm3, %v1491_v49, 0.0  ;;  %v1578_v54 = vsel %vm599_vm3, %v1568_v50, 0.0  ;;  %v1581_v62 = vsel %vm599_vm3, %v1569_v56, 0.0 }
 0x5b9   : > { %2736 = vmatpush3.bf16.msra.mxu0 %v1889_v18  ;;  %v3271_v55 = vpop.permute.xlu0 %1439  ;;  %1502 = vadd.xlane.f32.xlu0 %v1501_v52  ;;  %v3279_v60 = vpop.permute.xlu1 %1429  ;;  %v1504_v1 = vsel %vm599_vm3, %v1492_v63, 0.0 }
 0x5ba   : > { %1579 = vadd.xlane.f32.xlu1 %v1578_v54  ;;  %v1570_v33 = vmul.f32 %v1562_v51, %v3271_v55  ;;  %2747 = vmatprep.subr.bf16.mxu0 %v2903_v0  ;;  %v1493_v59 = vmul.f32 %v1485_v29, %v3271_v55  ;;  %v1572_v20 = vmul.f32 %v1554_v40, %v3279_v60 }
 0x5bb   : > { %v1495_v11 = vmul.f32 %v1477_v39, %v3279_v60 }
 0x5bc   : > { %v1584_v58 = vsel %vm599_vm3, %v1570_v33, 0.0  ;;  %v1507_v8 = vsel %vm599_vm3, %v1493_v59, 0.0  ;;  %v1590_v47 = vsel %vm599_vm3, %v1572_v20, 0.0 }
 0x5bd   : > { %1585 = vadd.xlane.f32.xlu0 %v1584_v58  ;;  %v3288_v4 = vpop.permute.xlu1 %1441  ;;  %v3291_v5 = vpop.permute.xlu0 %1435  ;;  %v1513_v6 = vsel %vm599_vm3, %v1495_v11, 0.0 }
 0x5be   : > { %1582 = vadd.xlane.f32.xlu1 %v1581_v62  ;;  %v1574_v2 = vmul.f32 %v1562_v51, %v3288_v4  ;;  %v1573_v9 = vmul.f32 %v1558_v44, %v3291_v5  ;;  %v1497_v12 = vmul.f32 %v1485_v29, %v3288_v4  ;;  %v1496_v15 = vmul.f32 %v1481_v3, %v3291_v5 }
 0x5c0   : > { %v1596_v10 = vsel %vm599_vm3, %v1574_v2, 0.0  ;;  %v1593_v14 = vsel %vm599_vm3, %v1573_v9, 0.0  ;;  %v1519_v16 = vsel %vm599_vm3, %v1497_v12, 0.0  ;;  %v1516_v17 = vsel %vm599_vm3, %v1496_v15, 0.0 }
 0x5c1   : > { %1508 = vadd.xlane.f32.xlu0 %v1507_v8 }
 0x5c2   : > { %1505 = vadd.xlane.f32.xlu1 %v1504_v1 }
 0x5c5   : > { %1591 = vadd.xlane.f32.xlu0 %v1590_v47 }
 0x5c6   : > { %1588 = vadd.xlane.f32.xlu1 %v1587_v57 }
 0x5c9   : > { %1514 = vadd.xlane.f32.xlu0 %v1513_v6 }
 0x5ca   : > { %1511 = vadd.xlane.f32.xlu1 %v1510_v7 }
 0x5cd   : > { %1597 = vadd.xlane.f32.xlu0 %v1596_v10 }
 0x5ce   : > { %1594 = vadd.xlane.f32.xlu1 %v1593_v14 }
 0x5d1   : > { %1520 = vadd.xlane.f32.xlu0 %v1519_v16 }
 0x5d2   : > { %1517 = vadd.xlane.f32.xlu1 %v1516_v17 }
 0x5f3   : > { %v1577_v19 = vpop.xlane.xlu0 %1576 }
 0x5f4   : > { %v1610_v21 = vrot.slane %v1577_v19, %v3004_v13 }
 0x5f7   : > { %v1500_v22 = vpop.xlane.xlu0 %1499 }
 0x5f8   : > { %v1695_v23 = vadd.f32 %v1610_v21, %v1500_v22 }
 0x5fa   : > { %v1711_v25 = vmul.f32 0.2, %v1695_v23  ;;  %vm1703_vm7 = vcmp.gt.f32.partialorder %v1695_v23, 0.0 }
 0x5fc   : > { %v1719_v26 = vsel %vm1703_vm7, %v1695_v23, %v1711_v25 }
 0x5fd   : > { %v3306_v28 = vsel %vm838_vm4, %v1719_v26, -1e+09 }
 0x5fe   : > { %v1735_v30 = vsel %vm599_vm3, %v3306_v28, -inf }
 0x5ff   : > { %1736 = vmax.xlane.f32.xlu1 %v1735_v30 }
 0x642   : > { %v1503_v31 = vpop.xlane.xlu0 %1502 }
 0x643   : > { %v1580_v32 = vpop.xlane.xlu1 %1579 }
 0x644   : > { %v1614_v34 = vrot.slane %v1580_v32, %v3004_v13 }
 0x646   : > { %v1696_v35 = vadd.f32 %v1614_v34, %v1503_v31  ;;  %v1586_v36 = vpop.xlane.xlu0 %1585 }
 0x647   : > { %v1583_v37 = vpop.xlane.xlu1 %1582  ;;  %v1622_v38 = vrot.slane %v1586_v36, %v3004_v13 }
 0x648   : > { %vm1704_vm8 = vcmp.gt.f32.partialorder %v1696_v35, 0.0  ;;  %v1712_v45 = vmul.f32 0.2, %v1696_v35  ;;  %v1618_v39 = vrot.slane %v1583_v37, %v3004_v13 }
 0x64a   : > { %v1509_v40 = vpop.xlane.xlu0 %1508  ;;  %v1720_v41 = vsel %vm1704_vm8, %v1696_v35, %v1712_v45 }
 0x64b   : > { %v1698_v42 = vadd.f32 %v1622_v38, %v1509_v40  ;;  %v1506_v43 = vpop.xlane.xlu1 %1505  ;;  %v3315_v44 = vsel %vm838_vm4, %v1720_v41, -1e+09 }
 0x64c   : > { %v1697_v46 = vadd.f32 %v1618_v39, %v1506_v43  ;;  %v1738_v53 = vsel %vm599_vm3, %v3315_v44, -inf }
 0x64d   : > { %v1714_v49 = vmul.f32 0.2, %v1698_v42  ;;  %1739 = vmax.xlane.f32.xlu0 %v1738_v53  ;;  %vm1706_vm10 = vcmp.gt.f32.partialorder %v1698_v42, 0.0 }
 0x64e   : > { %v1713_v50 = vmul.f32 0.2, %v1697_v46  ;;  %v1592_v51 = vpop.xlane.xlu0 %1591  ;;  %vm1705_vm11 = vcmp.gt.f32.partialorder %v1697_v46, 0.0 }
 0x64f   : > { %v1589_v18 = vpop.xlane.xlu1 %1588  ;;  %v1722_v52 = vsel %vm1706_vm10, %v1698_v42, %v1714_v49  ;;  %v1630_v56 = vrot.slane %v1592_v51, %v3004_v13 }
 0x650   : > { %v1730_v54 = vsel %vm838_vm4, %v1722_v52, -1e+09  ;;  %v1721_v29 = vsel %vm1705_vm11, %v1697_v46, %v1713_v50  ;;  %v1626_v58 = vrot.slane %v1589_v18, %v3004_v13 }
 0x651   : > { %v1744_v3 = vsel %vm599_vm3, %v1730_v54, -inf  ;;  %v1729_v33 = vsel %vm838_vm4, %v1721_v29, -1e+09 }
 0x652   : > { %v1515_v59 = vpop.xlane.xlu0 %1514  ;;  %1745 = vmax.xlane.f32.xlu0 %v1744_v3  ;;  %v1741_v62 = vsel %vm599_vm3, %v1729_v33, -inf }
 0x653   : > { %v1700_v63 = vadd.f32 %v1630_v56, %v1515_v59  ;;  %1742 = vmax.xlane.f32.xlu1 %v1741_v62  ;;  %v1512_v8 = vpop.xlane.xlu1 %1511 }
 0x654   : > { %v1699_v20 = vadd.f32 %v1626_v58, %v1512_v8 }
 0x655   : > { %v1716_v1 = vmul.f32 0.2, %v1700_v63  ;;  %vm1708_vm12 = vcmp.gt.f32.partialorder %v1700_v63, 0.0 }
 0x656   : > { %v1715_v47 = vmul.f32 0.2, %v1699_v20  ;;  %v1598_v11 = vpop.xlane.xlu0 %1597  ;;  %vm1707_vm13 = vcmp.gt.f32.partialorder %v1699_v20, 0.0 }
 0x657   : > { %v1595_v57 = vpop.xlane.xlu1 %1594  ;;  %v1724_v6 = vsel %vm1708_vm12, %v1700_v63, %v1716_v1  ;;  %v1638_v7 = vrot.slane %v1598_v11, %v3004_v13 }
 0x658   : > { %v1732_v27 = vsel %vm839_vm9, %v1724_v6, -1e+09  ;;  %v1723_v2 = vsel %vm1707_vm13, %v1699_v20, %v1715_v47  ;;  %v1634_v12 = vrot.slane %v1595_v57, %v3004_v13 }
 0x659   : > { %v1750_v9 = vsel %vm599_vm3, %v1732_v27, -inf  ;;  %v1731_v10 = vsel %vm839_vm9, %v1723_v2, -1e+09 }
 0x65a   : > { %v1521_v14 = vpop.xlane.xlu0 %1520  ;;  %1751 = vmax.xlane.f32.xlu0 %v1750_v9  ;;  %v1747_v15 = vsel %vm599_vm3, %v1731_v10, -inf }
 0x65b   : > { %v1702_v16 = vadd.f32 %v1638_v7, %v1521_v14  ;;  %1748 = vmax.xlane.f32.xlu1 %v1747_v15  ;;  %v1518_v17 = vpop.xlane.xlu1 %1517 }
 0x65c   : > { %v1701_v19 = vadd.f32 %v1634_v12, %v1518_v17 }
 0x65d   : > { %v1718_v21 = vmul.f32 0.2, %v1702_v16  ;;  %vm1710_vm4 = vcmp.gt.f32.partialorder %v1702_v16, 0.0 }
 0x65e   : > { %v1717_v22 = vmul.f32 0.2, %v1701_v19  ;;  %vm1709_vm5 = vcmp.gt.f32.partialorder %v1701_v19, 0.0 }
 0x65f   : > { %v1726_v23 = vsel %vm1710_vm4, %v1702_v16, %v1718_v21 }
 0x660   : > { %v1734_v25 = vsel %vm839_vm9, %v1726_v23, -1e+09  ;;  %v1725_v26 = vsel %vm1709_vm5, %v1701_v19, %v1717_v22  ;;  %v1834_v23 = vpack.c.bf16 %v3271_v55, %v3271_v55 }
 0x661   : > { %v1756_v30 = vsel %vm599_vm3, %v1734_v25, -inf  ;;  %v1733_v13 = vsel %vm839_vm9, %v1725_v26, -1e+09 }
 0x662   : > { %1757 = vmax.xlane.f32.xlu0 %v1756_v30  ;;  %v1753_v31 = vsel %vm599_vm3, %v1733_v13, -inf }
 0x663   : > { %1754 = vmax.xlane.f32.xlu1 %v1753_v31 }
 0x688   : > { %v1737_v32 = vpop.xlane.xlu1 %1736 }
 0x689   : > { %v1759_v34 = vsub.f32 %v3306_v28, %v1737_v32 }
 0x68b   : > { %v1767_v35 = vmul.f32 1.442695, %v1759_v34 }
 0x68d   : > { %2849 = vpow2.f32 %v1767_v35  ;;  %v1835_v35 = vpack.c.bf16 %v3245_v24, %v3245_v24 }
 0x69a   : > { %v2850_v36 = vpop.eup %2849 }
 0x69b   : > { %v1783_v37 = vsel %vm599_vm3, %v2850_v36, 0.0 }
 0x69c   : > { %1784 = vadd.xlane.f32.xlu1 %v1783_v37  ;;  %v1836_v37 = vpack.c.bf16 %v3279_v60, %v3279_v60  ;;  %v1837_v60 = vpack.c.bf16 %v3291_v5, %v3291_v5 }
 0x6d6   : > { %v1740_v45 = vpop.xlane.xlu0 %1739 }
 0x6d7   : > { %v1760_v38 = vsub.f32 %v3315_v44, %v1740_v45 }
 0x6d9   : > { %v1769_v39 = vmul.f32 1.442695, %v1760_v38  ;;  %v2027_v38 = vsel %vm959_vm2, %v1835_v35, 0 }
 0x6db   : > { %2851 = vpow2.f32 %v1769_v39  ;;  %v1746_v61 = vpop.xlane.xlu0 %1745 }
 0x6dc   : > { %v1762_v40 = vsub.f32 %v1730_v54, %v1746_v61  ;;  %v1743_v41 = vpop.xlane.xlu1 %1742  ;;  %v2073_v61 = vsel %vm959_vm2, %v1836_v37, 0 }
 0x6dd   : > { %v1761_v42 = vsub.f32 %v1729_v33, %v1743_v41 }
 0x6de   : > { %v1773_v43 = vmul.f32 1.442695, %v1762_v40 }
 0x6df   : > { %v1771_v46 = vmul.f32 1.442695, %v1761_v42 }
 0x6e0   : > { %2853 = vpow2.f32 %v1773_v43  ;;  %v1838_v43 = vpack.c.bf16 %v3288_v4, %v3288_v4 }
 0x6e1   : > { %2855 = vpow2.f32 %v1771_v46 }
 0x6e3   : > { %v1752_v28 = vpop.xlane.xlu0 %1751 }
 0x6e4   : > { %v1764_v53 = vsub.f32 %v1732_v27, %v1752_v28  ;;  %v1749_v49 = vpop.xlane.xlu1 %1748  ;;  %v2119_v28 = vsel %vm959_vm2, %v1837_v60, 0 }
 0x6e5   : > { %v1763_v50 = vsub.f32 %v1731_v10, %v1749_v49  ;;  %v1833_v10 = vpack.c.bf16 %v3264_v48, %v3264_v48  ;;  %v2165_v49 = vsel %vm959_vm2, %v1838_v43, 0  ;;  %v2894_v43 = vld [vmem:[%s2994_s18 + $0x8] sm:$0xff] }
 0x6e6   : > { %v1777_v51 = vmul.f32 1.442695, %v1764_v53 }
 0x6e7   : > { %v1775_v18 = vmul.f32 1.442695, %v1763_v50  ;;  %v1935_v15 = vsel %vm959_vm2, %v1833_v10, 0 }
 0x6e8   : > { %v2852_v52 = vpop.eup %2851  ;;  %2857 = vpow2.f32 %v1777_v51 }
 0x6e9   : > { %2859 = vpow2.f32 %v1775_v18  ;;  %v1786_v44 = vsel %vm599_vm3, %v2852_v52, 0.0 }
 0x6ea   : > { %1787 = vadd.xlane.f32.xlu0 %v1786_v44 }
 0x6eb   : > { %v1758_v29 = vpop.xlane.xlu0 %1757 }
 0x6ec   : > { %v1766_v54 = vsub.f32 %v1734_v25, %v1758_v29  ;;  %v1755_v56 = vpop.xlane.xlu1 %1754 }
 0x6ed   : > { %v2854_v3 = vpop.eup %2853  ;;  %v1765_v33 = vsub.f32 %v1733_v13, %v1755_v56  ;;  %v1981_v13 = vsel %vm959_vm2, %v1834_v23, 0  ;;  %vm743_vm2 = vcmask 1041409  }
 0x6ee   : > { %v2856_v58 = vpop.eup %2855  ;;  %v1781_v59 = vmul.f32 1.442695, %v1766_v54  ;;  %v1792_v62 = vsel %vm599_vm3, %v2854_v3, 0.0 }
 0x6ef   : > { %v1779_v63 = vmul.f32 1.442695, %v1765_v33  ;;  %1793 = vadd.xlane.f32.xlu0 %v1792_v62  ;;  %v1789_v8 = vsel %vm599_vm3, %v2856_v58, 0.0 }
 0x6f0   : > { %2861 = vpow2.f32 %v1781_v59  ;;  %1790 = vadd.xlane.f32.xlu1 %v1789_v8 }
 0x6f1   : > { %2863 = vpow2.f32 %v1779_v63 }
 0x6f5   : > { %v3347_v20 = vpop.eup %2857 }
 0x6f6   : > { %v3349_v1 = vpop.eup %2859  ;;  %v1798_v47 = vsel %vm599_vm3, %v3347_v20, 0.0 }
 0x6f7   : > { %1799 = vadd.xlane.f32.xlu0 %v1798_v47  ;;  %v1795_v11 = vsel %vm599_vm3, %v3349_v1, 0.0 }
 0x6f8   : > { %1796 = vadd.xlane.f32.xlu1 %v1795_v11 }
 0x6fd   : > { %v3355_v57 = vpop.eup %2861 }
 0x6fe   : > { %v3357_v6 = vpop.eup %2863  ;;  %v1804_v27 = vsel %vm599_vm3, %v3355_v57, 0.0 }
 0x6ff   : > { %1805 = vadd.xlane.f32.xlu0 %v1804_v27  ;;  %v1801_v2 = vsel %vm599_vm3, %v3357_v6, 0.0 }
 0x700   : > { %1802 = vadd.xlane.f32.xlu1 %v1801_v2 }
 0x725   : > { %v1785_v7 = vpop.xlane.xlu1 %1784 }
 0x726   : > { %2865 = vrcp.f32 %v1785_v7 }
 0x733   : > { %v2866_v9 = vpop.eup %2865 }
 0x734   : > { %v1815_v12 = vmul.f32 %v2866_v9, %v2850_v36 }
 0x736   : > { %v1823_v14 = vpack.c.bf16 %v1815_v12, %v1815_v12  ;;  %v2241_v12 = vld [vmem:[%s452_s20] sm:$0xff] }
 0x738   : > { %2732 = vmatmul.mubr.msk.bf16.vlgmr.msra.gmra.mxu1 %vm599_vm3, %v1823_v14  ;;  %v2242_v14 = vld [vmem:[%s452_s20 + $0x8] sm:$0xff] }
 0x739   : > { %2742 = vmatpush3.bf16.msra.mxu1 %v1935_v15  ;;  %2743 = vmatprep.mubr.msk.bf16.mxu1 %vm2904_vm0, %v2903_v0  ;;  %v2245_v15 = vpack.c.bf16 %v2242_v14, %v2241_v12 }
 0x73a   : > { %2753 = vmatprep.subr.bf16.mxu1 %v2903_v0 }
 0x773   : > { %v1788_v16 = vpop.xlane.xlu0 %1787 }
 0x774   : > { %2867 = vrcp.f32 %v1788_v16 }
 0x778   : > { %v1794_v17 = vpop.xlane.xlu0 %1793 }
 0x779   : > { %2869 = vrcp.f32 %v1794_v17  ;;  %v1791_v19 = vpop.xlane.xlu1 %1790 }
 0x77a   : > { %2871 = vrcp.f32 %v1791_v19 }
 0x780   : > { %v1800_v21 = vpop.xlane.xlu0 %1799 }
 0x781   : > { %v2868_v48 = vpop.eup %2867  ;;  %2873 = vrcp.f32 %v1800_v21  ;;  %v1797_v22 = vpop.xlane.xlu1 %1796 }
 0x782   : > { %2875 = vrcp.f32 %v1797_v22  ;;  %v1816_v25 = vmul.f32 %v2868_v48, %v2852_v52 }
 0x784   : > { %v1824_v26 = vpack.c.bf16 %v1816_v25, %v1816_v25 }
 0x786   : > { %v2870_v30 = vpop.eup %2869  ;;  %2738 = vmatmul.mubr.msk.bf16.vlgmr.msra.gmra.mxu0 %vm599_vm3, %v1824_v26 }
 0x787   : > { %v2872_v31 = vpop.eup %2871  ;;  %2748 = vmatpush3.bf16.msra.mxu0 %v1981_v13  ;;  %2749 = vmatprep.mubr.msk.bf16.mxu0 %vm2904_vm0, %v2903_v0  ;;  %v1818_v55 = vmul.f32 %v2870_v30, %v2854_v3 }
 0x788   : > { %v1806_v32 = vpop.xlane.xlu0 %1805  ;;  %v1817_v34 = vmul.f32 %v2872_v31, %v2856_v58  ;;  %2759 = vmatprep.subr.bf16.mxu0 %v2903_v0 }
 0x789   : > { %2877 = vrcp.f32 %v1806_v32  ;;  %v1803_v36 = vpop.xlane.xlu1 %1802  ;;  %v1826_v39 = vpack.c.bf16 %v1818_v55, %v1818_v55 }
 0x78a   : > { %2879 = vrcp.f32 %v1803_v36  ;;  %v1825_v45 = vpack.c.bf16 %v1817_v34, %v1817_v34 }
 0x78c   : > { %2744 = vmatmul.mubr.msk.bf16.vlgmr.msra.gmra.mxu1 %vm599_vm3, %v1825_v45 }
 0x78d   : > { %2754 = vmatpush3.bf16.msra.mxu1 %v2027_v38  ;;  %2755 = vmatprep.mubr.msk.bf16.mxu1 %vm2904_vm0, %v2903_v0 }
 0x78e   : > { %v2874_v24 = vpop.eup %2873  ;;  %2750 = vmatmul.mubr.msk.bf16.vlgmr.msra.gmra.mxu0 %vm599_vm3, %v1826_v39  ;;  %2765 = vmatprep.subr.bf16.mxu1 %v2903_v0 }
 0x78f   : > { %v2876_v40 = vpop.eup %2875  ;;  %2760 = vmatpush3.bf16.msra.mxu0 %v2073_v61  ;;  %2761 = vmatprep.mubr.msk.bf16.mxu0 %vm2904_vm0, %v2903_v0  ;;  %v1820_v42 = vmul.f32 %v2874_v24, %v3347_v20  ;;  %v2893_v61 = vld [vmem:[%s2994_s18] sm:$0xff] }
 0x790   : > { %v1819_v41 = vmul.f32 %v2876_v40, %v3349_v1  ;;  %2771 = vmatprep.subr.bf16.mxu0 %v2903_v0 }
 0x791   : > { %v1828_v53 = vpack.c.bf16 %v1820_v42, %v1820_v42 }
 0x792   : > { %v1827_v46 = vpack.c.bf16 %v1819_v41, %v1819_v41 }
 0x794   : > { %2756 = vmatmul.mubr.msk.bf16.vlgmr.msra.gmra.mxu1 %vm599_vm3, %v1827_v46 }
 0x795   : > { %2766 = vmatpush3.bf16.msra.mxu1 %v2119_v28  ;;  %2767 = vmatprep.mubr.msk.bf16.mxu1 %vm2904_vm0, %v2903_v0 }
 0x796   : > { %v2878_v5 = vpop.eup %2877  ;;  %2762 = vmatmul.mubr.msk.bf16.vlgmr.msra.gmra.mxu0 %vm599_vm3, %v1828_v53  ;;  %2777 = vmatprep.subr.bf16.mxu1 %v2903_v0 }
 0x797   : > { %v2880_v50 = vpop.eup %2879  ;;  %2772 = vmatpush3.bf16.msra.mxu0 %v2165_v49  ;;  %2773 = vmatprep.mubr.msk.bf16.mxu0 %vm2904_vm0, %v2903_v0  ;;  %v1822_v51 = vmul.f32 %v2878_v5, %v3355_v57  ;;  %v2243_v57 = vld [vmem:[%s452_s20 + $0x10] sm:$0xff] }
 0x798   : > { %v1821_v4 = vmul.f32 %v2880_v50, %v3357_v6  ;;  %2785 = vmatprep.subr.bf16.mxu0 %v2903_v0  ;;  %v2244_v6 = vld [vmem:[%s452_s20 + $0x18] sm:$0xff]  ;;  %v2250_v49 = vld [vmem:[%s460_s23 + $0x10] sm:$0xff] }
 0x799   : > { %v1830_v52 = vpack.c.bf16 %v1822_v51, %v1822_v51  ;;  %v2246_v27 = vpack.c.bf16 %v2244_v6, %v2243_v57  ;;  %v2251_v50 = vld [vmem:[%s460_s23 + $0x18] sm:$0xff] }
 0x79a   : > { %v1829_v18 = vpack.c.bf16 %v1821_v4, %v1821_v4  ;;  %v2248_v4 = vld [vmem:[%s460_s23] sm:$0xff]  ;;  %v2253_v51 = vpack.c.bf16 %v2251_v50, %v2250_v49 }
 0x79c   : > { %2768 = vmatmul.mubr.msk.bf16.vlgmr.msra.gmra.mxu1 %vm599_vm3, %v1829_v18  ;;  %v2249_v18 = vld [vmem:[%s460_s23 + $0x8] sm:$0xff] }
 0x79d   : > { %2781 = vmatprep.mubr.msk.bf16.mxu1 %vm2904_vm0, %v2903_v0  ;;  %2778 = vmatpush3.bf16.msra.mxu1 %v2246_v27 }
 0x79e   : > { %2774 = vmatmul.mubr.msk.bf16.vlgmr.msra.gmra.mxu0 %vm599_vm3, %v1830_v52  ;;  %2779 = vmatprep.subr.bf16.mxu1 %v2903_v0  ;;  %v2252_v52 = vpack.c.bf16 %v2249_v18, %v2248_v4 }
 0x79f   : > { %2789 = vmatprep.mubr.msk.bf16.mxu0 %vm2904_vm0, %v2903_v0  ;;  %2786 = vmatpush3.bf16.msra.mxu0 %v2253_v51  ;;  %vm2354_vm0 = vcmask 7168  }
 0x7a0   : > { %2787 = vmatprep.subr.bf16.mxu0 %v2903_v0  ;;  %v2912_v0 = vmov 0  }
 0x7a1   : > { %2780 = vmatpush3.bf16.msra.mxu1 %v2245_v15  ;;  %2811 = vset.pattern.permute.xlu0 %v2912_v0 }
 0x7a2   : > { %2812 = vset.pattern.permute.xlu1 %v2912_v0 }
 0x7a3   : > { %2788 = vmatpush3.bf16.msra.mxu0 %v2252_v52 }
 0x7f8   : > { %v1879_v44 = vpop.f32.mrf.mxu1 }
 0x7fa   : > { %v2733_v29 = vpop.f32.mrf.mxu1 }
 0x7fc   : > { %v1882_v54 = vpop.f32.mrf.mxu1 }
 0x7fe   : > { %v2734_v56 = vpop.f32.mrf.mxu1 }
 0x846   : > { %v1925_v3 = vpop.f32.mrf.mxu0 }
 0x847   : > { %2209 = vrot.lane.b32.xlu1 %v1925_v3, %s2909_s12 }
 0x848   : > { %v2739_v33 = vpop.f32.mrf.mxu0 }
 0x84a   : > { %v1928_v58 = vpop.f32.mrf.mxu0 }
 0x84c   : > { %v2740_v59 = vpop.f32.mrf.mxu0  ;;  %v1971_v62 = vpop.f32.mrf.mxu1 }
 0x84d   : > { %2217 = vrot.lane.b32.xlu1 %v1971_v62, %s2910_s14 }
 0x84e   : > { %v2745_v63 = vpop.f32.mrf.mxu1  ;;  %v2017_v8 = vpop.f32.mrf.mxu0 }
 0x850   : > { %v1974_v20 = vpop.f32.mrf.mxu1  ;;  %v2751_v1 = vpop.f32.mrf.mxu0 }
 0x852   : > { %v2746_v47 = vpop.f32.mrf.mxu1  ;;  %v2020_v11 = vpop.f32.mrf.mxu0 }
 0x853   : > { %v471_v11 = vld [vmem:[%s3489_s8 + $0x8] sm:$0xff] }
 0x854   : > { %v2752_v2 = vpop.f32.mrf.mxu0  ;;  %v2063_v7 = vpop.f32.mrf.mxu1 }
 0x856   : > { %v2757_v9 = vpop.f32.mrf.mxu1  ;;  %v2109_v10 = vpop.f32.mrf.mxu0 }
 0x857   : > { %2211 = vrot.lane.b32.xlu0 %v2109_v10, %s2909_s12 }
 0x858   : > { %v2066_v16 = vpop.f32.mrf.mxu1  ;;  %v2763_v17 = vpop.f32.mrf.mxu0 }
 0x85a   : > { %v2758_v19 = vpop.f32.mrf.mxu1  ;;  %v2112_v21 = vpop.f32.mrf.mxu0 }
 0x85b   : > { %2225 = vrot.lane.b32.xlu0 %v2017_v8, %s2911_s16  ;;  %v470_v8 = vld [vmem:[%s3489_s8] sm:$0xff] }
 0x85c   : > { %v2764_v48 = vpop.f32.mrf.mxu0  ;;  %v2155_v22 = vpop.f32.mrf.mxu1 }
 0x85d   : > { %2219 = vrot.lane.b32.xlu1 %v2155_v22, %s2910_s14  ;;  %s464_s14 = scalar_lea.vmem %s3490_s9, %s2578_s11 }
 0x85e   : > { %v2769_v23 = vpop.f32.mrf.mxu1  ;;  %v2201_v25 = vpop.f32.mrf.mxu0 }
 0x860   : > { %v2158_v26 = vpop.f32.mrf.mxu1  ;;  %v2775_v30 = vpop.f32.mrf.mxu0 }
 0x861   : > { %2227 = vrot.lane.b32.xlu1 %v2201_v25, %s2911_s16 }
 0x862   : > { %v2770_v13 = vpop.f32.mrf.mxu1  ;;  %v2204_v31 = vpop.f32.mrf.mxu0 }
 0x864   : > { %v2776_v32 = vpop.f32.mrf.mxu0 }
 0x8b9   : > { %v2210_v34 = vpop.permute.xlu1 %2209 }
 0x8ba   : > { %v2231_v37 = vsel %vm599_vm3, %v1879_v44, %v2210_v34  ;;  %v2609_v44 = vld [vmem:[%s455_s25] ss:$0 sm:$0xff] }
 0x8bf   : > { %v2218_v55 = vpop.permute.xlu1 %2217 }
 0x8c0   : > { %v2233_v45 = vsel %vm1351_vm14, %v2231_v37, %v2218_v55 }
 0x8c9   : > { %v2212_v35 = vpop.permute.xlu0 %2211 }
 0x8ca   : > { %v2232_v24 = vsel %vm599_vm3, %v2063_v7, %v2212_v35  ;;  %vm2423_vm3 = vcmask 254976  }
 0x8cd   : > { %v2226_v36 = vpop.permute.xlu0 %2225 }
 0x8ce   : > { %v2235_v39 = vsel %vm1354_vm15, %v2233_v45, %v2226_v36 }
 0x8cf   : > { %v2220_v38 = vpop.permute.xlu1 %2219  ;;  %v3433_v40 = vadd.f32 %v2893_v61, %v2235_v39 }
 0x8d0   : > { %v2234_v60 = vsel %vm1351_vm14, %v2232_v24, %v2220_v38 }
 0x8d1   : > { %v2239_v28 = vmax.f32 %v3433_v40, 0.0 }
 0x8d3   : > { %v2228_v41 = vpop.permute.xlu1 %2227 }
 0x8d4   : > { %v2236_v42 = vsel %vm1354_vm15, %v2234_v60, %v2228_v41 }
 0x8d5   : > { %v3438_v46 = vadd.f32 %v2894_v43, %v2236_v42 }
 0x8d7   : > { %v2240_v53 = vmax.f32 %v3438_v46, 0.0 }
 0x8d9   : > { %v2254_v5 = vpack.c.bf16 %v2240_v53, %v2239_v28 }
 0x8db   : > { %2782 = vmatmul.mubr.msk.bf16.vlgmr.msra.gmra.mxu1 %vm481_vm1, %v2254_v5 }
 0x99b   : > { %v2298_v29 = vpop.f32.mrf.mxu1 }
 0x99c   : > { %v2299_v54 = vadd.f32 %v2609_v44, %v2298_v29 }
 0x99d   : > { %v2783_v56 = vpop.f32.mrf.mxu1 }
 0x99e   : > { %2881 = vtanh.f32 %v2299_v54 }
 0x99f   : > { %v2301_v3 = vpop.f32.mrf.mxu1 }
 0x9a0   : > { %v2302_v33 = vadd.f32 %v2609_v44, %v2301_v3 }
 0x9a1   : > { %v2784_v58 = vpop.f32.mrf.mxu1 }
 0x9a2   : > { %2883 = vtanh.f32 %v2302_v33 }
 0x9ab   : > { %v2882_v59 = vpop.eup %2881 }
 0x9af   : > { %v2884_v62 = vpop.eup %2883 }
 0x9b0   : > { %v2307_v63 = vpack.c.bf16 %v2884_v62, %v2882_v59 }
 0x9b2   : > { %2790 = vmatmul.mubr.msk.bf16.vlgmr.msra.gmra.mxu0 %vm481_vm1, %v2307_v63 }
 0xa72   : > { %v2345_v20 = vpop.f32.mrf.mxu0 }
 0xa73   : > { %v2352_v1 = vadd.f32 %v2345_v20, %v470_v8 }
 0xa74   : > { %v2791_v47 = vpop.f32.mrf.mxu0 }
 0xa75   : > { %v2355_v57 = vsel %vm2354_vm0, %v2352_v1, -inf }
 0xa76   : > { %v2356_v6 = vrot.slane %v2355_v57, 4  ;;  %v2348_v27 = vpop.f32.mrf.mxu0 }
 0xa77   : > { %v2353_v2 = vadd.f32 %v2348_v27, %v471_v11 }
 0xa78   : > { %v2357_v7 = vmax.f32 %v2355_v57, %v2356_v6  ;;  %v2792_v9 = vpop.f32.mrf.mxu0 }
 0xa79   : > { %v2362_v10 = vsel %vm2354_vm0, %v2353_v2, -inf }
 0xa7a   : > { %v2358_v12 = vrot.slane %v2357_v7, 2  ;;  %v2363_v14 = vrot.slane %v2362_v10, 4 }
 0xa7c   : > { %v2359_v15 = vmax.f32 %v2357_v7, %v2358_v12  ;;  %v2364_v16 = vmax.f32 %v2362_v10, %v2363_v14 }
 0xa7e   : > { %v2360_v17 = vrot.slane %v2359_v15, 1  ;;  %v2365_v19 = vrot.slane %v2364_v16, 2 }
 0xa80   : > { %v2361_v21 = vmax.f32 %v2359_v15, %v2360_v17  ;;  %v2366_v48 = vmax.f32 %v2364_v16, %v2365_v19 }
 0xa82   : > { %v2369_v22 = vsub.f32 %v2352_v1, %v2361_v21  ;;  %v2367_v23 = vrot.slane %v2366_v48, 1 }
 0xa84   : > { %v2371_v25 = vmul.f32 1.442695, %v2369_v22  ;;  %v2368_v26 = vmax.f32 %v2366_v48, %v2367_v23 }
 0xa86   : > { %2885 = vpow2.f32 %v2371_v25  ;;  %v2370_v30 = vsub.f32 %v2353_v2, %v2368_v26 }
 0xa88   : > { %v2373_v13 = vmul.f32 1.442695, %v2370_v30 }
 0xa8a   : > { %2887 = vpow2.f32 %v2373_v13 }
 0xa93   : > { %v2886_v31 = vpop.eup %2885 }
 0xa94   : > { %v2375_v32 = vsel %vm2354_vm0, %v2886_v31, 0.0 }
 0xa95   : > { %v2376_v34 = vrot.slane %v2375_v32, 4 }
 0xa97   : > { %v2888_v35 = vpop.eup %2887  ;;  %v2377_v55 = vadd.f32 %v2376_v34, %v2375_v32 }
 0xa98   : > { %v2382_v36 = vsel %vm2354_vm0, %v2888_v35, 0.0 }
 0xa99   : > { %v2378_v37 = vrot.slane %v2377_v55, 2  ;;  %v2383_v45 = vrot.slane %v2382_v36, 4 }
 0xa9b   : > { %v2379_v38 = vadd.f32 %v2378_v37, %v2377_v55  ;;  %v2384_v39 = vadd.f32 %v2383_v45, %v2382_v36 }
 0xa9d   : > { %v2380_v24 = vrot.slane %v2379_v38, 1  ;;  %v2385_v61 = vrot.slane %v2384_v39, 2 }
 0xa9f   : > { %v2381_v60 = vadd.f32 %v2380_v24, %v2379_v38  ;;  %v2386_v41 = vadd.f32 %v2385_v61, %v2384_v39 }
 0xaa1   : > { %2889 = vrcp.f32 %v2381_v60  ;;  %v2387_v42 = vrot.slane %v2386_v41, 1 }
 0xaa3   : > { %v2388_v43 = vadd.f32 %v2387_v42, %v2386_v41 }
 0xaa5   : > { %2891 = vrcp.f32 %v2388_v43 }
 0xaae   : > { %v2890_v5 = vpop.eup %2889 }
 0xaaf   : > { %v2391_v49 = vmul.f32 %v2890_v5, %v2886_v31 }
 0xab1   : > { %2395 = vperm.xlu0 %2811, %v2391_v49  }
 0xab2   : > { %v2892_v50 = vpop.eup %2891 }
 0xab3   : > { %v2392_v4 = vmul.f32 %v2892_v50, %v2888_v35 }
 0xab5   : > { %2400 = vperm.xlu1 %2812, %v2392_v4  }
 0xb2c   : > { %v2396_v51 = vpop.permute.xlu0 %2395 }
 0xb2d   : > { %v2403_v18 = vmul.f32 %v2396_v51, %v2239_v28 }
 0xb2f   : > { %v2405_v52 = vsel %vm481_vm1, %v2403_v18, 0.0 }
 0xb30   : > { %v2406_v44 = vrot.slane %v2405_v52, 4  ;;  %v2401_v29 = vpop.permute.xlu1 %2400 }
 0xb31   : > { %v2404_v54 = vmul.f32 %v2401_v29, %v2240_v53 }
 0xb32   : > { %v2407_v56 = vadd.f32 %v2406_v44, %v2405_v52 }
 0xb33   : > { %v2412_v3 = vsel %vm481_vm1, %v2404_v54, 0.0 }
 0xb34   : > { %v2408_v33 = vrot.slane %v2407_v56, 2  ;;  %v2413_v58 = vrot.slane %v2412_v3, 4 }
 0xb36   : > { %v2409_v59 = vadd.f32 %v2408_v33, %v2407_v56  ;;  %v2414_v62 = vadd.f32 %v2413_v58, %v2412_v3 }
 0xb38   : > { %v2415_v63 = vrot.slane %v2414_v62, 2  ;;  %v2410_v0 = vrot.slane %v2409_v59, 1 }
 0xb3a   : > { %v2416_v8 = vadd.f32 %v2415_v63, %v2414_v62  ;;  %v2411_v28 = vadd.f32 %v2410_v0, %v2409_v59 }
 0xb3c   : > { %v2417_v40 = vrot.slane %v2416_v8, 1 }
 0xb3e   : > { %v2418_v46 = vadd.f32 %v2417_v40, %v2416_v8 }
 0xb40   : > { %v2421_v53 = vsel %vm743_vm2, %v2418_v46, %v2411_v28 }
 0xb41   : > { %2424 = vst.msk [vmem:[%s464_s14] sm:$0x3] %vm2423_vm3, %v2421_v53 }
 0xb42 PF: > { %s19_s30 = sadd.s32 1, %s2901_s30  }
 0xb43   : > { %p16_p4 = scmp.ge.s32.totalorder %s19_s30, 8  }
 0xb45   :  { %18 = sbr.rel (!%p16_p4) target bundleno = 1 (0x1), region = 110 }

</bundles_post_ra>
